<compile_context>
chip_gen: v7x
topology: tpu7x:2x2x1
jax: 0.10.0
libtpu: 0.0.40
codegen_flags: <defaults>
</compile_context>

<pallas_src>
import jax
import jax.numpy as jnp
from jax import lax
from jax.experimental import pallas as pl
from jax.experimental.pallas import tpu as pltpu


# ----------------------------------------------------------------------------
# Pallas kernel: 1-layer bidirectional GRU with length masking + 'sum'
# aggregation of the two directions (outputs and last state).
# ----------------------------------------------------------------------------
def _bigru_kernel(
    x_ref,       # (S, Bb, D)   f32
    len_ref,     # (Bb, 1)      i32
    w_in_ref,    # (D, 6H)      bf16  [wih_f | wih_b], gate order r|z|n
    b_in_ref,    # (1, 6H)      f32   bih + bhh(r,z only), both directions
    w_hh_ref,    # (2H, 6H)     bf16  blockdiag(whh_f, whh_b)
    b_hhn_ref,   # (1, 6H)      f32   bhh(n only), both directions
    out_ref,     # (S, Bb, H)   f32
    last_ref,    # (1, Bb, H)   f32
    gx_ref,      # scratch (S, Bb, 6H)   hoisted input projection
    bbuf_ref,    # scratch (S, Bb, H)    backward-direction outputs
    mask_ref,    # scratch (S, Bb, 1)    1.0 where t < length else 0.0
):
    S, Bb, D = x_ref.shape
    H = out_ref.shape[2]
    H2, H3 = 2 * H, 3 * H

    # ---- pre-loop ----------------------------------------------------------
    # Length masks, computed once (off the serial chain).
    lengths = len_ref[...]                                        # (Bb, 1) i32
    t_iota = lax.broadcasted_iota(jnp.int32, (S, Bb, 1), 0)
    mask_ref[...] = (t_iota < lengths[None, :, :]).astype(jnp.float32)

    # Hoisted input projection: one big bf16 MXU matmul (f32 accumulation)
    # instead of 2*S tiny ones.
    x2d = x_ref[...].reshape(S * Bb, D).astype(jnp.bfloat16)
    gx = jnp.dot(x2d, w_in_ref[...], preferred_element_type=jnp.float32)
    gx_ref[...] = (gx + b_in_ref[...]).reshape(S, Bb, 2 * H3)

    # Loop invariants hoisted out of the unrolled body (no per-step re-load /
    # re-broadcast: Mosaic does not CSE these inside the unrolled loop).
    w_hh = w_hh_ref[...]                                          # (2H, 6H) bf16
    b_hhn = jnp.broadcast_to(b_hhn_ref[...], (Bb, 2 * H3))        # (Bb, 6H)

    # ---- recurrence (fully unrolled, state lives in the loop carry) --------
    def step(s, carry):
        hf, hb = carry           # (Bb, H) f32 each, register-resident
        t_f = s                  # forward direction walks 0 .. S-1
        t_b = S - 1 - s          # backward direction walks S-1 .. 0

        # One block-diagonal recurrent matmul covering both directions (bf16
        # operands, f32 accumulation).
        h_cat = jnp.concatenate([hf, hb], axis=1).astype(jnp.bfloat16)
        gh = jnp.dot(h_cat, w_hh, preferred_element_type=jnp.float32) + b_hhn

        g_f = gx_ref[t_f]                                         # (Bb, 6H)
        g_b = gx_ref[t_b]

        # Forward GRU cell (r and z share one sigmoid over a 2H-wide block).
        rz_f = jax.nn.sigmoid(g_f[:, 0:H2] + gh[:, 0:H2])
        n_f = jnp.tanh(g_f[:, H2:H3] + rz_f[:, 0:H] * gh[:, H2:H3])
        hf_new = n_f + rz_f[:, H:H2] * (hf - n_f)                 # (1-z)n + zh

        # Backward GRU cell.
        rz_b = jax.nn.sigmoid(g_b[:, H3:H3 + H2] + gh[:, H3:H3 + H2])
        n_b = jnp.tanh(g_b[:, H3 + H2:] + rz_b[:, 0:H] * gh[:, H3 + H2:])
        hb_new = n_b + rz_b[:, H:H2] * (hb - n_b)

        m_f = mask_ref[t_f]                                       # (Bb, 1)
        m_b = mask_ref[t_b]

        out_ref[t_f] = m_f * hf_new        # forward outputs go straight out
        bbuf_ref[t_b] = m_b * hb_new

        # Freeze state past length: h + m*(h_new - h) == where(m, h_new, h)
        # (exact for m in {0,1}); stays in the f32 register carry.
        hf = hf + m_f * (hf_new - hf)
        hb = hb + m_b * (hb_new - hb)
        return (hf, hb)

    h0 = jnp.zeros((Bb, H), jnp.float32)
    hf, hb = lax.fori_loop(0, S, step, (h0, h0), unroll=True)

    # ---- epilogue: BidirectionalRNNAggregator(method='sum') ----------------
    out_ref[...] = out_ref[...] + bbuf_ref[...]
    last_ref[0] = hf + hb


# ----------------------------------------------------------------------------
# Wrapper (SequentialEncoder.forward)
# ----------------------------------------------------------------------------
def sequential_encoder_forward(embed_seq, lengths, params, *, batch_block=None):
    """embed_seq: [S,B,D] f32, lengths: [B] i32 -> (outputs [S,B,H], last [1,B,H]).

    batch_block defaults to B (grid=(1,)): on single-TC v5e/v6e a batch split
    only serializes the latency-bound recurrence.  Pass batch_block < B only
    when explicitly targeting v7x's two TensorCores (and verify with a trace).
    """
    S, B, D = embed_seq.shape
    H = params["hidden_size"]
    H3 = 3 * H
    if batch_block is None:
        batch_block = B
    assert B % batch_block == 0
    nb = B // batch_block

    lengths_col = lengths.reshape(B, 1).astype(jnp.int32)

    def rz_only(b):
        return jnp.concatenate([b[:, :2 * H], jnp.zeros_like(b[:, 2 * H:])], axis=1)

    def n_only(b):
        return jnp.concatenate([jnp.zeros_like(b[:, :2 * H]), b[:, 2 * H:]], axis=1)

    # Fused parameter layout (built once, outside the kernel):
    #   w_in:   (D, 6H)  = [wih_f | wih_b]                       (bf16)
    #   b_in:   (1, 6H)  = bih + r/z part of bhh (the n-gate bhh must stay on
    #                      the recurrent side because of the r * (.) term)
    #   w_hh:   (2H, 6H) = blockdiag(whh_f, whh_b)               (bf16)
    #                      -> [hf|hb] @ w_hh = [gh_f|gh_b]
    #   b_hh_n: (1, 6H)  = n-gate part of bhh only
    w_in = jnp.concatenate([params["wih_f"], params["wih_b"]],
                           axis=1).astype(jnp.bfloat16)
    b_in = jnp.concatenate([params["bih_f"] + rz_only(params["bhh_f"]),
                            params["bih_b"] + rz_only(params["bhh_b"])], axis=1)
    zero_h = jnp.zeros((H, H3), jnp.float32)
    w_hh = jnp.concatenate(
        [jnp.concatenate([params["whh_f"], zero_h], axis=1),
         jnp.concatenate([zero_h, params["whh_b"]], axis=1)],
        axis=0).astype(jnp.bfloat16)
    b_hh_n = jnp.concatenate([n_only(params["bhh_f"]), n_only(params["bhh_b"])],
                             axis=1)

    wfull = lambda shape: pl.BlockSpec(shape, lambda b: (0,) * len(shape))

    kernel = pl.pallas_call(
        _bigru_kernel,
        grid=(nb,),
        in_specs=[
            pl.BlockSpec((S, batch_block, D), lambda b: (0, b, 0)),
            pl.BlockSpec((batch_block, 1), lambda b: (b, 0)),
            wfull((D, 2 * H3)),
            wfull((1, 2 * H3)),
            wfull((2 * H, 2 * H3)),
            wfull((1, 2 * H3)),
        ],
        out_specs=[
            pl.BlockSpec((S, batch_block, H), lambda b: (0, b, 0)),
            pl.BlockSpec((1, batch_block, H), lambda b: (0, b, 0)),
        ],
        out_shape=[
            jax.ShapeDtypeStruct((S, B, H), jnp.float32),
            jax.ShapeDtypeStruct((1, B, H), jnp.float32),
        ],
        scratch_shapes=[
            pltpu.VMEM((S, batch_block, 2 * H3), jnp.float32),  # gx
            pltpu.VMEM((S, batch_block, H), jnp.float32),       # backward outs
            pltpu.VMEM((S, batch_block, 1), jnp.float32),       # masks
        ],
        compiler_params=pltpu.CompilerParams(
            dimension_semantics=("parallel",)),
    )
    outputs, last_state = kernel(embed_seq, lengths_col, w_in, b_in, w_hh, b_hh_n)
    return outputs, last_state


# ----------------------------------------------------------------------------
# Pure-JAX reference (packed bidirectional GRU + 'sum' aggregation), f32
# ----------------------------------------------------------------------------
def _reference_forward(embed_seq, lengths, params):
    S, B, D = embed_seq.shape
    H = params["hidden_size"]
    lengths = lengths.reshape(B, 1)

    def gru_cell(x_t, h, wih, whh, bih, bhh):
        gx = x_t @ wih + bih
        gh = h @ whh + bhh
        r = jax.nn.sigmoid(gx[:, :H] + gh[:, :H])
        z = jax.nn.sigmoid(gx[:, H:2 * H] + gh[:, H:2 * H])
        n = jnp.tanh(gx[:, 2 * H:] + r * gh[:, 2 * H:])
        return (1.0 - z) * n + z * h

    def run_dir(order, wih, whh, bih, bhh):
        def scan_fn(h, t):
            h_new = gru_cell(embed_seq[t], h, wih, whh, bih, bhh)
            m = t < lengths
            h_upd = jnp.where(m, h_new, h)
            return h_upd, jnp.where(m, h_new, 0.0)
        h_last, outs = lax.scan(scan_fn, jnp.zeros((B, H), jnp.float32), order)
        return outs, h_last

    f_out, f_last = run_dir(jnp.arange(S),
                            params["wih_f"], params["whh_f"],
                            params["bih_f"], params["bhh_f"])
    b_out_rev, b_last = run_dir(jnp.arange(S - 1, -1, -1),
                                params["wih_b"], params["whh_b"],
                                params["bih_b"], params["bhh_b"])
    b_out = b_out_rev[::-1]
    return f_out + b_out, (f_last + b_last)[None]


# ----------------------------------------------------------------------------
# Main
# ----------------------------------------------------------------------------
if __name__ == "__main__":
    S, B, D, H = 16, 16, 32, 32

    key = jax.random.PRNGKey(0)
    ks = jax.random.split(key, 10)
    scale = 1.0 / jnp.sqrt(jnp.float32(H))

    def u(k, shape):
        return jax.random.uniform(k, shape, jnp.float32, -scale, scale)

    params = {
        "hidden_size": H,
        # forward direction (weights stored pre-transposed: x @ W, gate order r|z|n)
        "wih_f": u(ks[0], (D, 3 * H)),
        "whh_f": u(ks[1], (H, 3 * H)),
        "bih_f": u(ks[2], (1, 3 * H)),
        "bhh_f": u(ks[3], (1, 3 * H)),
        # backward direction
        "wih_b": u(ks[4], (D, 3 * H)),
        "whh_b": u(ks[5], (H, 3 * H)),
        "bih_b": u(ks[6], (1, 3 * H)),
        "bhh_b": u(ks[7], (1, 3 * H)),
    }

    embed_seq = jax.random.normal(ks[8], (S, B, D), jnp.float32)
    lengths = jnp.array([16, 13, 10, 8, 5, 3, 2, 1,
                         16, 12, 9, 7, 6, 4, 2, 1], dtype=jnp.int32)

    # Default batch_block=B -> grid=(1,): best on single-TC v5e/v6e (the
    # recurrence is latency-bound; splitting the batch only serializes it).
    outputs, last_state = sequential_encoder_forward(embed_seq, lengths, params)
    outputs = jax.block_until_ready(outputs)
    last_state = jax.block_until_ready(last_state)

    ref_out, ref_last = _reference_forward(embed_seq, lengths, params)
    assert outputs.shape == (S, B, H) and last_state.shape == (1, B, H)
    # Tolerance loosened: kernel matmuls use bf16 operands with f32 accumulation.
    assert jnp.allclose(outputs, ref_out, atol=5e-2, rtol=5e-2)
    assert jnp.allclose(last_state, ref_last, atol=5e-2, rtol=5e-2)

    print("KERNEL_OK")
</pallas_src>

<mosaic_0001>
module attributes {stable_mosaic.version = 11 : i64} {
  func.func @_bigru_kernel(%arg0: i32, %arg1: memref<16x16x32xf32, #tpu.memory_space<vmem>>, %arg2: memref<16x1xi32, #tpu.memory_space<vmem>>, %arg3: memref<32x192xbf16, #tpu.memory_space<vmem>>, %arg4: memref<1x192xf32, #tpu.memory_space<vmem>>, %arg5: memref<64x192xbf16, #tpu.memory_space<vmem>>, %arg6: memref<1x192xf32, #tpu.memory_space<vmem>>, %arg7: memref<16x16x32xf32, #tpu.memory_space<vmem>>, %arg8: memref<1x16x32xf32, #tpu.memory_space<vmem>>, %arg9: memref<16x16x192xf32, #tpu.memory_space<vmem>>, %arg10: memref<16x16x32xf32, #tpu.memory_space<vmem>>, %arg11: memref<16x16x1xf32, #tpu.memory_space<vmem>>) attributes {dimension_semantics = [#tpu.dimension_semantics<parallel>], iteration_bounds = array<i64: 1>, scalar_prefetch = 0 : i64, scratch_operands = 3 : i64, tpu.core_type = #tpu.core_type<tc>, window_params = [{transform_indices = @transform_0, window_bounds = array<i64: 16, 16, 32>}, {transform_indices = @transform_1, window_bounds = array<i64: 16, 1>}, {pipeline_mode = #tpu.pipeline_mode<synchronous>, transform_indices = @transform_2, window_bounds = array<i64: 32, 192>}, {pipeline_mode = #tpu.pipeline_mode<synchronous>, transform_indices = @transform_3, window_bounds = array<i64: 1, 192>}, {pipeline_mode = #tpu.pipeline_mode<synchronous>, transform_indices = @transform_4, window_bounds = array<i64: 64, 192>}, {pipeline_mode = #tpu.pipeline_mode<synchronous>, transform_indices = @transform_5, window_bounds = array<i64: 1, 192>}, {transform_indices = @transform_6, window_bounds = array<i64: 16, 16, 32>}, {transform_indices = @transform_7, window_bounds = array<i64: 1, 16, 32>}]} {
    %c0 = arith.constant 0 : index
    %c0_0 = arith.constant 0 : index
    %0 = vector.load %arg2[%c0, %c0_0] : memref<16x1xi32, #tpu.memory_space<vmem>>, vector<16x1xi32>
    %1 = tpu.iota {dimensions = array<i32: 0>} : vector<16x16x1xi32>
    %2 = vector.shape_cast %0 : vector<16x1xi32> to vector<1x16x1xi32>
    %3 = vector.broadcast %2 : vector<1x16x1xi32> to vector<16x16x1xi32>
    %4 = arith.cmpi slt, %1, %3 : vector<16x16x1xi32>
    %5 = arith.extui %4 : vector<16x16x1xi1> to vector<16x16x1xi32>
    %6 = arith.sitofp %5 : vector<16x16x1xi32> to vector<16x16x1xf32>
    %c0_1 = arith.constant 0 : index
    %c0_2 = arith.constant 0 : index
    %c0_3 = arith.constant 0 : index
    %7 = vector.load %arg11[%c0_1, %c0_2, %c0_3] : memref<16x16x1xf32, #tpu.memory_space<vmem>>, vector<16x16x1xf32>
    tpu.vector_store %arg11[%c0_1, %c0_2, %c0_3], %6 {strides = array<i32>} : memref<16x16x1xf32, #tpu.memory_space<vmem>>, vector<16x16x1xf32>,
    %c0_4 = arith.constant 0 : index
    %c0_5 = arith.constant 0 : index
    %c0_6 = arith.constant 0 : index
    %8 = vector.load %arg1[%c0_4, %c0_5, %c0_6] : memref<16x16x32xf32, #tpu.memory_space<vmem>>, vector<16x16x32xf32>
    %9 = vector.shape_cast %8 : vector<16x16x32xf32> to vector<256x32xf32>
    %10 = arith.truncf %9 : vector<256x32xf32> to vector<256x32xbf16>
    %c0_7 = arith.constant 0 : index
    %c0_8 = arith.constant 0 : index
    %11 = vector.load %arg3[%c0_7, %c0_8] : memref<32x192xbf16, #tpu.memory_space<vmem>>, vector<32x192xbf16>
    %cst = arith.constant dense<0.000000e+00> : vector<256x192xf32>
    %12 = tpu.matmul %10, %11, %cst {dimension_numbers = #tpu.dot_dimension_numbers<[1], [0], [0], [1], [0, 0, 1, 1], [], []>} : vector<256x32xbf16>, vector<32x192xbf16>, vector<256x192xf32> -> vector<256x192xf32>
    %c0_9 = arith.constant 0 : index
    %c0_10 = arith.constant 0 : index
    %13 = vector.load %arg4[%c0_9, %c0_10] : memref<1x192xf32, #tpu.memory_space<vmem>>, vector<1x192xf32>
    %14 = vector.broadcast %13 : vector<1x192xf32> to vector<256x192xf32>
    %15 = arith.addf %12, %14 : vector<256x192xf32>
    %16 = vector.shape_cast %15 : vector<256x192xf32> to vector<16x16x192xf32>
    %c0_11 = arith.constant 0 : index
    %c0_12 = arith.constant 0 : index
    %c0_13 = arith.constant 0 : index
    %17 = vector.load %arg9[%c0_11, %c0_12, %c0_13] : memref<16x16x192xf32, #tpu.memory_space<vmem>>, vector<16x16x192xf32>
    tpu.vector_store %arg9[%c0_11, %c0_12, %c0_13], %16 {strides = array<i32>} : memref<16x16x192xf32, #tpu.memory_space<vmem>>, vector<16x16x192xf32>,
    %c0_14 = arith.constant 0 : index
    %c0_15 = arith.constant 0 : index
    %18 = vector.load %arg5[%c0_14, %c0_15] : memref<64x192xbf16, #tpu.memory_space<vmem>>, vector<64x192xbf16>
    %c0_16 = arith.constant 0 : index
    %c0_17 = arith.constant 0 : index
    %19 = vector.load %arg6[%c0_16, %c0_17] : memref<1x192xf32, #tpu.memory_space<vmem>>, vector<1x192xf32>
    %20 = vector.shape_cast %19 : vector<1x192xf32> to vector<1x192xf32>
    %21 = vector.broadcast %20 : vector<1x192xf32> to vector<16x192xf32>
    %cst_18 = arith.constant 0.000000e+00 : f32
    %22 = vector.broadcast %cst_18 : f32 to vector<16x32xf32>
    %c0_i32 = arith.constant 0 : i32
    %c15_i32 = arith.constant 15 : i32
    %23 = arith.subi %c15_i32, %c0_i32 : i32
    %24 = tpu.concatenate %22, %22 in 1 : vector<16x32xf32>, vector<16x32xf32> -> vector<16x64xf32>
    %25 = arith.truncf %24 : vector<16x64xf32> to vector<16x64xbf16>
    %cst_19 = arith.constant dense<0.000000e+00> : vector<16x192xf32>
    %26 = tpu.matmul %25, %18, %cst_19 {dimension_numbers = #tpu.dot_dimension_numbers<[1], [0], [0], [1], [0, 0, 1, 1], [], []>} : vector<16x64xbf16>, vector<64x192xbf16>, vector<16x192xf32> -> vector<16x192xf32>
    %27 = arith.addf %26, %21 : vector<16x192xf32>
    %28 = arith.index_cast %c0_i32 : i32 to index
    %c0_20 = arith.constant 0 : index
    %c0_21 = arith.constant 0 : index
    %29 = vector.load %arg9[%28, %c0_20, %c0_21] : memref<16x16x192xf32, #tpu.memory_space<vmem>>, vector<1x16x192xf32>
    %30 = vector.shape_cast %29 : vector<1x16x192xf32> to vector<16x192xf32>
    %31 = arith.index_cast %23 : i32 to index
    %c0_22 = arith.constant 0 : index
    %c0_23 = arith.constant 0 : index
    %32 = vector.load %arg9[%31, %c0_22, %c0_23] : memref<16x16x192xf32, #tpu.memory_space<vmem>>, vector<1x16x192xf32>
    %33 = vector.shape_cast %32 : vector<1x16x192xf32> to vector<16x192xf32>
    %34 = vector.extract_strided_slice %30 {offsets = [0, 0], sizes = [16, 64], strides = [1, 1]} : vector<16x192xf32> to vector<16x64xf32>
    %35 = vector.extract_strided_slice %27 {offsets = [0, 0], sizes = [16, 64], strides = [1, 1]} : vector<16x192xf32> to vector<16x64xf32>
    %36 = arith.addf %34, %35 : vector<16x64xf32>
    %37 = arith.negf %36 : vector<16x64xf32>
    %38 = math.exp %37 : vector<16x64xf32>
    %cst_24 = arith.constant 1.000000e+00 : f32
    %39 = vector.broadcast %cst_24 : f32 to vector<16x64xf32>
    %40 = arith.addf %39, %38 : vector<16x64xf32>
    %41 = arith.divf %39, %40 : vector<16x64xf32>
    %42 = vector.extract_strided_slice %30 {offsets = [0, 64], sizes = [16, 32], strides = [1, 1]} : vector<16x192xf32> to vector<16x32xf32>
    %43 = vector.extract_strided_slice %41 {offsets = [0, 0], sizes = [16, 32], strides = [1, 1]} : vector<16x64xf32> to vector<16x32xf32>
    %44 = vector.extract_strided_slice %27 {offsets = [0, 64], sizes = [16, 32], strides = [1, 1]} : vector<16x192xf32> to vector<16x32xf32>
    %45 = arith.mulf %43, %44 : vector<16x32xf32>
    %46 = arith.addf %42, %45 : vector<16x32xf32>
    %47 = math.tanh %46 : vector<16x32xf32>
    %48 = vector.extract_strided_slice %41 {offsets = [0, 32], sizes = [16, 32], strides = [1, 1]} : vector<16x64xf32> to vector<16x32xf32>
    %49 = arith.subf %22, %47 : vector<16x32xf32>
    %50 = arith.mulf %48, %49 : vector<16x32xf32>
    %51 = arith.addf %47, %50 : vector<16x32xf32>
    %52 = vector.extract_strided_slice %33 {offsets = [0, 96], sizes = [16, 64], strides = [1, 1]} : vector<16x192xf32> to vector<16x64xf32>
    %53 = vector.extract_strided_slice %27 {offsets = [0, 96], sizes = [16, 64], strides = [1, 1]} : vector<16x192xf32> to vector<16x64xf32>
    %54 = arith.addf %52, %53 : vector<16x64xf32>
    %55 = arith.negf %54 : vector<16x64xf32>
    %56 = math.exp %55 : vector<16x64xf32>
    %cst_25 = arith.constant 1.000000e+00 : f32
    %57 = vector.broadcast %cst_25 : f32 to vector<16x64xf32>
    %58 = arith.addf %57, %56 : vector<16x64xf32>
    %59 = arith.divf %57, %58 : vector<16x64xf32>
    %60 = vector.extract_strided_slice %33 {offsets = [0, 160], sizes = [16, 32], strides = [1, 1]} : vector<16x192xf32> to vector<16x32xf32>
    %61 = vector.extract_strided_slice %59 {offsets = [0, 0], sizes = [16, 32], strides = [1, 1]} : vector<16x64xf32> to vector<16x32xf32>
    %62 = vector.extract_strided_slice %27 {offsets = [0, 160], sizes = [16, 32], strides = [1, 1]} : vector<16x192xf32> to vector<16x32xf32>
    %63 = arith.mulf %61, %62 : vector<16x32xf32>
    %64 = arith.addf %60, %63 : vector<16x32xf32>
    %65 = math.tanh %64 : vector<16x32xf32>
    %66 = vector.extract_strided_slice %59 {offsets = [0, 32], sizes = [16, 32], strides = [1, 1]} : vector<16x64xf32> to vector<16x32xf32>
    %67 = arith.subf %22, %65 : vector<16x32xf32>
    %68 = arith.mulf %66, %67 : vector<16x32xf32>
    %69 = arith.addf %65, %68 : vector<16x32xf32>
    %70 = arith.index_cast %c0_i32 : i32 to index
    %c0_26 = arith.constant 0 : index
    %c0_27 = arith.constant 0 : index
    %71 = vector.load %arg11[%70, %c0_26, %c0_27] : memref<16x16x1xf32, #tpu.memory_space<vmem>>, vector<1x16x1xf32>
    %72 = vector.shape_cast %71 : vector<1x16x1xf32> to vector<16x1xf32>
    %73 = arith.index_cast %23 : i32 to index
    %c0_28 = arith.constant 0 : index
    %c0_29 = arith.constant 0 : index
    %74 = vector.load %arg11[%73, %c0_28, %c0_29] : memref<16x16x1xf32, #tpu.memory_space<vmem>>, vector<1x16x1xf32>
    %75 = vector.shape_cast %74 : vector<1x16x1xf32> to vector<16x1xf32>
    %76 = vector.broadcast %72 : vector<16x1xf32> to vector<16x32xf32>
    %77 = arith.mulf %76, %51 : vector<16x32xf32>
    %78 = arith.index_cast %c0_i32 : i32 to index
    %c0_30 = arith.constant 0 : index
    %c0_31 = arith.constant 0 : index
    %79 = vector.load %arg7[%78, %c0_30, %c0_31] : memref<16x16x32xf32, #tpu.memory_space<vmem>>, vector<1x16x32xf32>
    %80 = vector.shape_cast %79 : vector<1x16x32xf32> to vector<16x32xf32>
    %81 = vector.shape_cast %77 : vector<16x32xf32> to vector<1x16x32xf32>
    tpu.vector_store %arg7[%78, %c0_30, %c0_31], %81 {strides = array<i32>} : memref<16x16x32xf32, #tpu.memory_space<vmem>>, vector<1x16x32xf32>,
    %82 = vector.broadcast %75 : vector<16x1xf32> to vector<16x32xf32>
    %83 = arith.mulf %82, %69 : vector<16x32xf32>
    %84 = arith.index_cast %23 : i32 to index
    %c0_32 = arith.constant 0 : index
    %c0_33 = arith.constant 0 : index
    %85 = vector.load %arg10[%84, %c0_32, %c0_33] : memref<16x16x32xf32, #tpu.memory_space<vmem>>, vector<1x16x32xf32>
    %86 = vector.shape_cast %85 : vector<1x16x32xf32> to vector<16x32xf32>
    %87 = vector.shape_cast %83 : vector<16x32xf32> to vector<1x16x32xf32>
    tpu.vector_store %arg10[%84, %c0_32, %c0_33], %87 {strides = array<i32>} : memref<16x16x32xf32, #tpu.memory_space<vmem>>, vector<1x16x32xf32>,
    %88 = arith.subf %51, %22 : vector<16x32xf32>
    %89 = vector.broadcast %72 : vector<16x1xf32> to vector<16x32xf32>
    %90 = arith.mulf %89, %88 : vector<16x32xf32>
    %91 = arith.addf %22, %90 : vector<16x32xf32>
    %92 = arith.subf %69, %22 : vector<16x32xf32>
    %93 = vector.broadcast %75 : vector<16x1xf32> to vector<16x32xf32>
    %94 = arith.mulf %93, %92 : vector<16x32xf32>
    %95 = arith.addf %22, %94 : vector<16x32xf32>
    %c1_i32 = arith.constant 1 : i32
    %c15_i32_34 = arith.constant 15 : i32
    %96 = arith.subi %c15_i32_34, %c1_i32 : i32
    %97 = tpu.concatenate %91, %95 in 1 : vector<16x32xf32>, vector<16x32xf32> -> vector<16x64xf32>
    %98 = arith.truncf %97 : vector<16x64xf32> to vector<16x64xbf16>
    %cst_35 = arith.constant dense<0.000000e+00> : vector<16x192xf32>
    %99 = tpu.matmul %98, %18, %cst_35 {dimension_numbers = #tpu.dot_dimension_numbers<[1], [0], [0], [1], [0, 0, 1, 1], [], []>} : vector<16x64xbf16>, vector<64x192xbf16>, vector<16x192xf32> -> vector<16x192xf32>
    %100 = arith.addf %99, %21 : vector<16x192xf32>
    %101 = arith.index_cast %c1_i32 : i32 to index
    %c0_36 = arith.constant 0 : index
    %c0_37 = arith.constant 0 : index
    %102 = vector.load %arg9[%101, %c0_36, %c0_37] : memref<16x16x192xf32, #tpu.memory_space<vmem>>, vector<1x16x192xf32>
    %103 = vector.shape_cast %102 : vector<1x16x192xf32> to vector<16x192xf32>
    %104 = arith.index_cast %96 : i32 to index
    %c0_38 = arith.constant 0 : index
    %c0_39 = arith.constant 0 : index
    %105 = vector.load %arg9[%104, %c0_38, %c0_39] : memref<16x16x192xf32, #tpu.memory_space<vmem>>, vector<1x16x192xf32>
    %106 = vector.shape_cast %105 : vector<1x16x192xf32> to vector<16x192xf32>
    %107 = vector.extract_strided_slice %103 {offsets = [0, 0], sizes = [16, 64], strides = [1, 1]} : vector<16x192xf32> to vector<16x64xf32>
    %108 = vector.extract_strided_slice %100 {offsets = [0, 0], sizes = [16, 64], strides = [1, 1]} : vector<16x192xf32> to vector<16x64xf32>
    %109 = arith.addf %107, %108 : vector<16x64xf32>
    %110 = arith.negf %109 : vector<16x64xf32>
    %111 = math.exp %110 : vector<16x64xf32>
    %cst_40 = arith.constant 1.000000e+00 : f32
    %112 = vector.broadcast %cst_40 : f32 to vector<16x64xf32>
    %113 = arith.addf %112, %111 : vector<16x64xf32>
    %114 = arith.divf %112, %113 : vector<16x64xf32>
    %115 = vector.extract_strided_slice %103 {offsets = [0, 64], sizes = [16, 32], strides = [1, 1]} : vector<16x192xf32> to vector<16x32xf32>
    %116 = vector.extract_strided_slice %114 {offsets = [0, 0], sizes = [16, 32], strides = [1, 1]} : vector<16x64xf32> to vector<16x32xf32>
    %117 = vector.extract_strided_slice %100 {offsets = [0, 64], sizes = [16, 32], strides = [1, 1]} : vector<16x192xf32> to vector<16x32xf32>
    %118 = arith.mulf %116, %117 : vector<16x32xf32>
    %119 = arith.addf %115, %118 : vector<16x32xf32>
    %120 = math.tanh %119 : vector<16x32xf32>
    %121 = vector.extract_strided_slice %114 {offsets = [0, 32], sizes = [16, 32], strides = [1, 1]} : vector<16x64xf32> to vector<16x32xf32>
    %122 = arith.subf %91, %120 : vector<16x32xf32>
    %123 = arith.mulf %121, %122 : vector<16x32xf32>
    %124 = arith.addf %120, %123 : vector<16x32xf32>
    %125 = vector.extract_strided_slice %106 {offsets = [0, 96], sizes = [16, 64], strides = [1, 1]} : vector<16x192xf32> to vector<16x64xf32>
    %126 = vector.extract_strided_slice %100 {offsets = [0, 96], sizes = [16, 64], strides = [1, 1]} : vector<16x192xf32> to vector<16x64xf32>
    %127 = arith.addf %125, %126 : vector<16x64xf32>
    %128 = arith.negf %127 : vector<16x64xf32>
    %129 = math.exp %128 : vector<16x64xf32>
    %cst_41 = arith.constant 1.000000e+00 : f32
    %130 = vector.broadcast %cst_41 : f32 to vector<16x64xf32>
    %131 = arith.addf %130, %129 : vector<16x64xf32>
    %132 = arith.divf %130, %131 : vector<16x64xf32>
    %133 = vector.extract_strided_slice %106 {offsets = [0, 160], sizes = [16, 32], strides = [1, 1]} : vector<16x192xf32> to vector<16x32xf32>
    %134 = vector.extract_strided_slice %132 {offsets = [0, 0], sizes = [16, 32], strides = [1, 1]} : vector<16x64xf32> to vector<16x32xf32>
    %135 = vector.extract_strided_slice %100 {offsets = [0, 160], sizes = [16, 32], strides = [1, 1]} : vector<16x192xf32> to vector<16x32xf32>
    %136 = arith.mulf %134, %135 : vector<16x32xf32>
    %137 = arith.addf %133, %136 : vector<16x32xf32>
    %138 = math.tanh %137 : vector<16x32xf32>
    %139 = vector.extract_strided_slice %132 {offsets = [0, 32], sizes = [16, 32], strides = [1, 1]} : vector<16x64xf32> to vector<16x32xf32>
    %140 = arith.subf %95, %138 : vector<16x32xf32>
    %141 = arith.mulf %139, %140 : vector<16x32xf32>
    %142 = arith.addf %138, %141 : vector<16x32xf32>
    %143 = arith.index_cast %c1_i32 : i32 to index
    %c0_42 = arith.constant 0 : index
    %c0_43 = arith.constant 0 : index
    %144 = vector.load %arg11[%143, %c0_42, %c0_43] : memref<16x16x1xf32, #tpu.memory_space<vmem>>, vector<1x16x1xf32>
    %145 = vector.shape_cast %144 : vector<1x16x1xf32> to vector<16x1xf32>
    %146 = arith.index_cast %96 : i32 to index
    %c0_44 = arith.constant 0 : index
    %c0_45 = arith.constant 0 : index
    %147 = vector.load %arg11[%146, %c0_44, %c0_45] : memref<16x16x1xf32, #tpu.memory_space<vmem>>, vector<1x16x1xf32>
    %148 = vector.shape_cast %147 : vector<1x16x1xf32> to vector<16x1xf32>
    %149 = vector.broadcast %145 : vector<16x1xf32> to vector<16x32xf32>
    %150 = arith.mulf %149, %124 : vector<16x32xf32>
    %151 = arith.index_cast %c1_i32 : i32 to index
    %c0_46 = arith.constant 0 : index
    %c0_47 = arith.constant 0 : index
    %152 = vector.load %arg7[%151, %c0_46, %c0_47] : memref<16x16x32xf32, #tpu.memory_space<vmem>>, vector<1x16x32xf32>
    %153 = vector.shape_cast %152 : vector<1x16x32xf32> to vector<16x32xf32>
    %154 = vector.shape_cast %150 : vector<16x32xf32> to vector<1x16x32xf32>
    tpu.vector_store %arg7[%151, %c0_46, %c0_47], %154 {strides = array<i32>} : memref<16x16x32xf32, #tpu.memory_space<vmem>>, vector<1x16x32xf32>,
    %155 = vector.broadcast %148 : vector<16x1xf32> to vector<16x32xf32>
    %156 = arith.mulf %155, %142 : vector<16x32xf32>
    %157 = arith.index_cast %96 : i32 to index
    %c0_48 = arith.constant 0 : index
    %c0_49 = arith.constant 0 : index
    %158 = vector.load %arg10[%157, %c0_48, %c0_49] : memref<16x16x32xf32, #tpu.memory_space<vmem>>, vector<1x16x32xf32>
    %159 = vector.shape_cast %158 : vector<1x16x32xf32> to vector<16x32xf32>
    %160 = vector.shape_cast %156 : vector<16x32xf32> to vector<1x16x32xf32>
    tpu.vector_store %arg10[%157, %c0_48, %c0_49], %160 {strides = array<i32>} : memref<16x16x32xf32, #tpu.memory_space<vmem>>, vector<1x16x32xf32>,
    %161 = arith.subf %124, %91 : vector<16x32xf32>
    %162 = vector.broadcast %145 : vector<16x1xf32> to vector<16x32xf32>
    %163 = arith.mulf %162, %161 : vector<16x32xf32>
    %164 = arith.addf %91, %163 : vector<16x32xf32>
    %165 = arith.subf %142, %95 : vector<16x32xf32>
    %166 = vector.broadcast %148 : vector<16x1xf32> to vector<16x32xf32>
    %167 = arith.mulf %166, %165 : vector<16x32xf32>
    %168 = arith.addf %95, %167 : vector<16x32xf32>
    %c2_i32 = arith.constant 2 : i32
    %c15_i32_50 = arith.constant 15 : i32
    %169 = arith.subi %c15_i32_50, %c2_i32 : i32
    %170 = tpu.concatenate %164, %168 in 1 : vector<16x32xf32>, vector<16x32xf32> -> vector<16x64xf32>
    %171 = arith.truncf %170 : vector<16x64xf32> to vector<16x64xbf16>
    %cst_51 = arith.constant dense<0.000000e+00> : vector<16x192xf32>
    %172 = tpu.matmul %171, %18, %cst_51 {dimension_numbers = #tpu.dot_dimension_numbers<[1], [0], [0], [1], [0, 0, 1, 1], [], []>} : vector<16x64xbf16>, vector<64x192xbf16>, vector<16x192xf32> -> vector<16x192xf32>
    %173 = arith.addf %172, %21 : vector<16x192xf32>
    %174 = arith.index_cast %c2_i32 : i32 to index
    %c0_52 = arith.constant 0 : index
    %c0_53 = arith.constant 0 : index
    %175 = vector.load %arg9[%174, %c0_52, %c0_53] : memref<16x16x192xf32, #tpu.memory_space<vmem>>, vector<1x16x192xf32>
    %176 = vector.shape_cast %175 : vector<1x16x192xf32> to vector<16x192xf32>
    %177 = arith.index_cast %169 : i32 to index
    %c0_54 = arith.constant 0 : index
    %c0_55 = arith.constant 0 : index
    %178 = vector.load %arg9[%177, %c0_54, %c0_55] : memref<16x16x192xf32, #tpu.memory_space<vmem>>, vector<1x16x192xf32>
    %179 = vector.shape_cast %178 : vector<1x16x192xf32> to vector<16x192xf32>
    %180 = vector.extract_strided_slice %176 {offsets = [0, 0], sizes = [16, 64], strides = [1, 1]} : vector<16x192xf32> to vector<16x64xf32>
    %181 = vector.extract_strided_slice %173 {offsets = [0, 0], sizes = [16, 64], strides = [1, 1]} : vector<16x192xf32> to vector<16x64xf32>
    %182 = arith.addf %180, %181 : vector<16x64xf32>
    %183 = arith.negf %182 : vector<16x64xf32>
    %184 = math.exp %183 : vector<16x64xf32>
    %cst_56 = arith.constant 1.000000e+00 : f32
    %185 = vector.broadcast %cst_56 : f32 to vector<16x64xf32>
    %186 = arith.addf %185, %184 : vector<16x64xf32>
    %187 = arith.divf %185, %186 : vector<16x64xf32>
    %188 = vector.extract_strided_slice %176 {offsets = [0, 64], sizes = [16, 32], strides = [1, 1]} : vector<16x192xf32> to vector<16x32xf32>
    %189 = vector.extract_strided_slice %187 {offsets = [0, 0], sizes = [16, 32], strides = [1, 1]} : vector<16x64xf32> to vector<16x32xf32>
    %190 = vector.extract_strided_slice %173 {offsets = [0, 64], sizes = [16, 32], strides = [1, 1]} : vector<16x192xf32> to vector<16x32xf32>
    %191 = arith.mulf %189, %190 : vector<16x32xf32>
    %192 = arith.addf %188, %191 : vector<16x32xf32>
    %193 = math.tanh %192 : vector<16x32xf32>
    %194 = vector.extract_strided_slice %187 {offsets = [0, 32], sizes = [16, 32], strides = [1, 1]} : vector<16x64xf32> to vector<16x32xf32>
    %195 = arith.subf %164, %193 : vector<16x32xf32>
    %196 = arith.mulf %194, %195 : vector<16x32xf32>
    %197 = arith.addf %193, %196 : vector<16x32xf32>
    %198 = vector.extract_strided_slice %179 {offsets = [0, 96], sizes = [16, 64], strides = [1, 1]} : vector<16x192xf32> to vector<16x64xf32>
    %199 = vector.extract_strided_slice %173 {offsets = [0, 96], sizes = [16, 64], strides = [1, 1]} : vector<16x192xf32> to vector<16x64xf32>
    %200 = arith.addf %198, %199 : vector<16x64xf32>
    %201 = arith.negf %200 : vector<16x64xf32>
    %202 = math.exp %201 : vector<16x64xf32>
    %cst_57 = arith.constant 1.000000e+00 : f32
    %203 = vector.broadcast %cst_57 : f32 to vector<16x64xf32>
    %204 = arith.addf %203, %202 : vector<16x64xf32>
    %205 = arith.divf %203, %204 : vector<16x64xf32>
    %206 = vector.extract_strided_slice %179 {offsets = [0, 160], sizes = [16, 32], strides = [1, 1]} : vector<16x192xf32> to vector<16x32xf32>
    %207 = vector.extract_strided_slice %205 {offsets = [0, 0], sizes = [16, 32], strides = [1, 1]} : vector<16x64xf32> to vector<16x32xf32>
    %208 = vector.extract_strided_slice %173 {offsets = [0, 160], sizes = [16, 32], strides = [1, 1]} : vector<16x192xf32> to vector<16x32xf32>
    %209 = arith.mulf %207, %208 : vector<16x32xf32>
    %210 = arith.addf %206, %209 : vector<16x32xf32>
    %211 = math.tanh %210 : vector<16x32xf32>
    %212 = vector.extract_strided_slice %205 {offsets = [0, 32], sizes = [16, 32], strides = [1, 1]} : vector<16x64xf32> to vector<16x32xf32>
    %213 = arith.subf %168, %211 : vector<16x32xf32>
    %214 = arith.mulf %212, %213 : vector<16x32xf32>
    %215 = arith.addf %211, %214 : vector<16x32xf32>
    %216 = arith.index_cast %c2_i32 : i32 to index
    %c0_58 = arith.constant 0 : index
    %c0_59 = arith.constant 0 : index
    %217 = vector.load %arg11[%216, %c0_58, %c0_59] : memref<16x16x1xf32, #tpu.memory_space<vmem>>, vector<1x16x1xf32>
    %218 = vector.shape_cast %217 : vector<1x16x1xf32> to vector<16x1xf32>
    %219 = arith.index_cast %169 : i32 to index
    %c0_60 = arith.constant 0 : index
    %c0_61 = arith.constant 0 : index
    %220 = vector.load %arg11[%219, %c0_60, %c0_61] : memref<16x16x1xf32, #tpu.memory_space<vmem>>, vector<1x16x1xf32>
    %221 = vector.shape_cast %220 : vector<1x16x1xf32> to vector<16x1xf32>
    %222 = vector.broadcast %218 : vector<16x1xf32> to vector<16x32xf32>
    %223 = arith.mulf %222, %197 : vector<16x32xf32>
    %224 = arith.index_cast %c2_i32 : i32 to index
    %c0_62 = arith.constant 0 : index
    %c0_63 = arith.constant 0 : index
    %225 = vector.load %arg7[%224, %c0_62, %c0_63] : memref<16x16x32xf32, #tpu.memory_space<vmem>>, vector<1x16x32xf32>
    %226 = vector.shape_cast %225 : vector<1x16x32xf32> to vector<16x32xf32>
    %227 = vector.shape_cast %223 : vector<16x32xf32> to vector<1x16x32xf32>
    tpu.vector_store %arg7[%224, %c0_62, %c0_63], %227 {strides = array<i32>} : memref<16x16x32xf32, #tpu.memory_space<vmem>>, vector<1x16x32xf32>,
    %228 = vector.broadcast %221 : vector<16x1xf32> to vector<16x32xf32>
    %229 = arith.mulf %228, %215 : vector<16x32xf32>
    %230 = arith.index_cast %169 : i32 to index
    %c0_64 = arith.constant 0 : index
    %c0_65 = arith.constant 0 : index
    %231 = vector.load %arg10[%230, %c0_64, %c0_65] : memref<16x16x32xf32, #tpu.memory_space<vmem>>, vector<1x16x32xf32>
    %232 = vector.shape_cast %231 : vector<1x16x32xf32> to vector<16x32xf32>
    %233 = vector.shape_cast %229 : vector<16x32xf32> to vector<1x16x32xf32>
    tpu.vector_store %arg10[%230, %c0_64, %c0_65], %233 {strides = array<i32>} : memref<16x16x32xf32, #tpu.memory_space<vmem>>, vector<1x16x32xf32>,
    %234 = arith.subf %197, %164 : vector<16x32xf32>
    %235 = vector.broadcast %218 : vector<16x1xf32> to vector<16x32xf32>
    %236 = arith.mulf %235, %234 : vector<16x32xf32>
    %237 = arith.addf %164, %236 : vector<16x32xf32>
    %238 = arith.subf %215, %168 : vector<16x32xf32>
    %239 = vector.broadcast %221 : vector<16x1xf32> to vector<16x32xf32>
    %240 = arith.mulf %239, %238 : vector<16x32xf32>
    %241 = arith.addf %168, %240 : vector<16x32xf32>
    %c3_i32 = arith.constant 3 : i32
    %c15_i32_66 = arith.constant 15 : i32
    %242 = arith.subi %c15_i32_66, %c3_i32 : i32
    %243 = tpu.concatenate %237, %241 in 1 : vector<16x32xf32>, vector<16x32xf32> -> vector<16x64xf32>
    %244 = arith.truncf %243 : vector<16x64xf32> to vector<16x64xbf16>
    %cst_67 = arith.constant dense<0.000000e+00> : vector<16x192xf32>
    %245 = tpu.matmul %244, %18, %cst_67 {dimension_numbers = #tpu.dot_dimension_numbers<[1], [0], [0], [1], [0, 0, 1, 1], [], []>} : vector<16x64xbf16>, vector<64x192xbf16>, vector<16x192xf32> -> vector<16x192xf32>
    %246 = arith.addf %245, %21 : vector<16x192xf32>
    %247 = arith.index_cast %c3_i32 : i32 to index
    %c0_68 = arith.constant 0 : index
    %c0_69 = arith.constant 0 : index
    %248 = vector.load %arg9[%247, %c0_68, %c0_69] : memref<16x16x192xf32, #tpu.memory_space<vmem>>, vector<1x16x192xf32>
    %249 = vector.shape_cast %248 : vector<1x16x192xf32> to vector<16x192xf32>
    %250 = arith.index_cast %242 : i32 to index
    %c0_70 = arith.constant 0 : index
    %c0_71 = arith.constant 0 : index
    %251 = vector.load %arg9[%250, %c0_70, %c0_71] : memref<16x16x192xf32, #tpu.memory_space<vmem>>, vector<1x16x192xf32>
    %252 = vector.shape_cast %251 : vector<1x16x192xf32> to vector<16x192xf32>
    %253 = vector.extract_strided_slice %249 {offsets = [0, 0], sizes = [16, 64], strides = [1, 1]} : vector<16x192xf32> to vector<16x64xf32>
    %254 = vector.extract_strided_slice %246 {offsets = [0, 0], sizes = [16, 64], strides = [1, 1]} : vector<16x192xf32> to vector<16x64xf32>
    %255 = arith.addf %253, %254 : vector<16x64xf32>
    %256 = arith.negf %255 : vector<16x64xf32>
    %257 = math.exp %256 : vector<16x64xf32>
    %cst_72 = arith.constant 1.000000e+00 : f32
    %258 = vector.broadcast %cst_72 : f32 to vector<16x64xf32>
    %259 = arith.addf %258, %257 : vector<16x64xf32>
    %260 = arith.divf %258, %259 : vector<16x64xf32>
    %261 = vector.extract_strided_slice %249 {offsets = [0, 64], sizes = [16, 32], strides = [1, 1]} : vector<16x192xf32> to vector<16x32xf32>
    %262 = vector.extract_strided_slice %260 {offsets = [0, 0], sizes = [16, 32], strides = [1, 1]} : vector<16x64xf32> to vector<16x32xf32>
    %263 = vector.extract_strided_slice %246 {offsets = [0, 64], sizes = [16, 32], strides = [1, 1]} : vector<16x192xf32> to vector<16x32xf32>
    %264 = arith.mulf %262, %263 : vector<16x32xf32>
    %265 = arith.addf %261, %264 : vector<16x32xf32>
    %266 = math.tanh %265 : vector<16x32xf32>
    %267 = vector.extract_strided_slice %260 {offsets = [0, 32], sizes = [16, 32], strides = [1, 1]} : vector<16x64xf32> to vector<16x32xf32>
    %268 = arith.subf %237, %266 : vector<16x32xf32>
    %269 = arith.mulf %267, %268 : vector<16x32xf32>
    %270 = arith.addf %266, %269 : vector<16x32xf32>
    %271 = vector.extract_strided_slice %252 {offsets = [0, 96], sizes = [16, 64], strides = [1, 1]} : vector<16x192xf32> to vector<16x64xf32>
    %272 = vector.extract_strided_slice %246 {offsets = [0, 96], sizes = [16, 64], strides = [1, 1]} : vector<16x192xf32> to vector<16x64xf32>
    %273 = arith.addf %271, %272 : vector<16x64xf32>
    %274 = arith.negf %273 : vector<16x64xf32>
    %275 = math.exp %274 : vector<16x64xf32>
    %cst_73 = arith.constant 1.000000e+00 : f32
    %276 = vector.broadcast %cst_73 : f32 to vector<16x64xf32>
    %277 = arith.addf %276, %275 : vector<16x64xf32>
    %278 = arith.divf %276, %277 : vector<16x64xf32>
    %279 = vector.extract_strided_slice %252 {offsets = [0, 160], sizes = [16, 32], strides = [1, 1]} : vector<16x192xf32> to vector<16x32xf32>
    %280 = vector.extract_strided_slice %278 {offsets = [0, 0], sizes = [16, 32], strides = [1, 1]} : vector<16x64xf32> to vector<16x32xf32>
    %281 = vector.extract_strided_slice %246 {offsets = [0, 160], sizes = [16, 32], strides = [1, 1]} : vector<16x192xf32> to vector<16x32xf32>
    %282 = arith.mulf %280, %281 : vector<16x32xf32>
    %283 = arith.addf %279, %282 : vector<16x32xf32>
    %284 = math.tanh %283 : vector<16x32xf32>
    %285 = vector.extract_strided_slice %278 {offsets = [0, 32], sizes = [16, 32], strides = [1, 1]} : vector<16x64xf32> to vector<16x32xf32>
    %286 = arith.subf %241, %284 : vector<16x32xf32>
    %287 = arith.mulf %285, %286 : vector<16x32xf32>
    %288 = arith.addf %284, %287 : vector<16x32xf32>
    %289 = arith.index_cast %c3_i32 : i32 to index
    %c0_74 = arith.constant 0 : index
    %c0_75 = arith.constant 0 : index
    %290 = vector.load %arg11[%289, %c0_74, %c0_75] : memref<16x16x1xf32, #tpu.memory_space<vmem>>, vector<1x16x1xf32>
    %291 = vector.shape_cast %290 : vector<1x16x1xf32> to vector<16x1xf32>
    %292 = arith.index_cast %242 : i32 to index
    %c0_76 = arith.constant 0 : index
    %c0_77 = arith.constant 0 : index
    %293 = vector.load %arg11[%292, %c0_76, %c0_77] : memref<16x16x1xf32, #tpu.memory_space<vmem>>, vector<1x16x1xf32>
    %294 = vector.shape_cast %293 : vector<1x16x1xf32> to vector<16x1xf32>
    %295 = vector.broadcast %291 : vector<16x1xf32> to vector<16x32xf32>
    %296 = arith.mulf %295, %270 : vector<16x32xf32>
    %297 = arith.index_cast %c3_i32 : i32 to index
    %c0_78 = arith.constant 0 : index
    %c0_79 = arith.constant 0 : index
    %298 = vector.load %arg7[%297, %c0_78, %c0_79] : memref<16x16x32xf32, #tpu.memory_space<vmem>>, vector<1x16x32xf32>
    %299 = vector.shape_cast %298 : vector<1x16x32xf32> to vector<16x32xf32>
    %300 = vector.shape_cast %296 : vector<16x32xf32> to vector<1x16x32xf32>
    tpu.vector_store %arg7[%297, %c0_78, %c0_79], %300 {strides = array<i32>} : memref<16x16x32xf32, #tpu.memory_space<vmem>>, vector<1x16x32xf32>,
    %301 = vector.broadcast %294 : vector<16x1xf32> to vector<16x32xf32>
    %302 = arith.mulf %301, %288 : vector<16x32xf32>
    %303 = arith.index_cast %242 : i32 to index
    %c0_80 = arith.constant 0 : index
    %c0_81 = arith.constant 0 : index
    %304 = vector.load %arg10[%303, %c0_80, %c0_81] : memref<16x16x32xf32, #tpu.memory_space<vmem>>, vector<1x16x32xf32>
    %305 = vector.shape_cast %304 : vector<1x16x32xf32> to vector<16x32xf32>
    %306 = vector.shape_cast %302 : vector<16x32xf32> to vector<1x16x32xf32>
    tpu.vector_store %arg10[%303, %c0_80, %c0_81], %306 {strides = array<i32>} : memref<16x16x32xf32, #tpu.memory_space<vmem>>, vector<1x16x32xf32>,
    %307 = arith.subf %270, %237 : vector<16x32xf32>
    %308 = vector.broadcast %291 : vector<16x1xf32> to vector<16x32xf32>
    %309 = arith.mulf %308, %307 : vector<16x32xf32>
    %310 = arith.addf %237, %309 : vector<16x32xf32>
    %311 = arith.subf %288, %241 : vector<16x32xf32>
    %312 = vector.broadcast %294 : vector<16x1xf32> to vector<16x32xf32>
    %313 = arith.mulf %312, %311 : vector<16x32xf32>
    %314 = arith.addf %241, %313 : vector<16x32xf32>
    %c4_i32 = arith.constant 4 : i32
    %c15_i32_82 = arith.constant 15 : i32
    %315 = arith.subi %c15_i32_82, %c4_i32 : i32
    %316 = tpu.concatenate %310, %314 in 1 : vector<16x32xf32>, vector<16x32xf32> -> vector<16x64xf32>
    %317 = arith.truncf %316 : vector<16x64xf32> to vector<16x64xbf16>
    %cst_83 = arith.constant dense<0.000000e+00> : vector<16x192xf32>
    %318 = tpu.matmul %317, %18, %cst_83 {dimension_numbers = #tpu.dot_dimension_numbers<[1], [0], [0], [1], [0, 0, 1, 1], [], []>} : vector<16x64xbf16>, vector<64x192xbf16>, vector<16x192xf32> -> vector<16x192xf32>
    %319 = arith.addf %318, %21 : vector<16x192xf32>
    %320 = arith.index_cast %c4_i32 : i32 to index
    %c0_84 = arith.constant 0 : index
    %c0_85 = arith.constant 0 : index
    %321 = vector.load %arg9[%320, %c0_84, %c0_85] : memref<16x16x192xf32, #tpu.memory_space<vmem>>, vector<1x16x192xf32>
    %322 = vector.shape_cast %321 : vector<1x16x192xf32> to vector<16x192xf32>
    %323 = arith.index_cast %315 : i32 to index
    %c0_86 = arith.constant 0 : index
    %c0_87 = arith.constant 0 : index
    %324 = vector.load %arg9[%323, %c0_86, %c0_87] : memref<16x16x192xf32, #tpu.memory_space<vmem>>, vector<1x16x192xf32>
    %325 = vector.shape_cast %324 : vector<1x16x192xf32> to vector<16x192xf32>
    %326 = vector.extract_strided_slice %322 {offsets = [0, 0], sizes = [16, 64], strides = [1, 1]} : vector<16x192xf32> to vector<16x64xf32>
    %327 = vector.extract_strided_slice %319 {offsets = [0, 0], sizes = [16, 64], strides = [1, 1]} : vector<16x192xf32> to vector<16x64xf32>
    %328 = arith.addf %326, %327 : vector<16x64xf32>
    %329 = arith.negf %328 : vector<16x64xf32>
    %330 = math.exp %329 : vector<16x64xf32>
    %cst_88 = arith.constant 1.000000e+00 : f32
    %331 = vector.broadcast %cst_88 : f32 to vector<16x64xf32>
    %332 = arith.addf %331, %330 : vector<16x64xf32>
    %333 = arith.divf %331, %332 : vector<16x64xf32>
    %334 = vector.extract_strided_slice %322 {offsets = [0, 64], sizes = [16, 32], strides = [1, 1]} : vector<16x192xf32> to vector<16x32xf32>
    %335 = vector.extract_strided_slice %333 {offsets = [0, 0], sizes = [16, 32], strides = [1, 1]} : vector<16x64xf32> to vector<16x32xf32>
    %336 = vector.extract_strided_slice %319 {offsets = [0, 64], sizes = [16, 32], strides = [1, 1]} : vector<16x192xf32> to vector<16x32xf32>
    %337 = arith.mulf %335, %336 : vector<16x32xf32>
    %338 = arith.addf %334, %337 : vector<16x32xf32>
    %339 = math.tanh %338 : vector<16x32xf32>
    %340 = vector.extract_strided_slice %333 {offsets = [0, 32], sizes = [16, 32], strides = [1, 1]} : vector<16x64xf32> to vector<16x32xf32>
    %341 = arith.subf %310, %339 : vector<16x32xf32>
    %342 = arith.mulf %340, %341 : vector<16x32xf32>
    %343 = arith.addf %339, %342 : vector<16x32xf32>
    %344 = vector.extract_strided_slice %325 {offsets = [0, 96], sizes = [16, 64], strides = [1, 1]} : vector<16x192xf32> to vector<16x64xf32>
    %345 = vector.extract_strided_slice %319 {offsets = [0, 96], sizes = [16, 64], strides = [1, 1]} : vector<16x192xf32> to vector<16x64xf32>
    %346 = arith.addf %344, %345 : vector<16x64xf32>
    %347 = arith.negf %346 : vector<16x64xf32>
    %348 = math.exp %347 : vector<16x64xf32>
    %cst_89 = arith.constant 1.000000e+00 : f32
    %349 = vector.broadcast %cst_89 : f32 to vector<16x64xf32>
    %350 = arith.addf %349, %348 : vector<16x64xf32>
    %351 = arith.divf %349, %350 : vector<16x64xf32>
    %352 = vector.extract_strided_slice %325 {offsets = [0, 160], sizes = [16, 32], strides = [1, 1]} : vector<16x192xf32> to vector<16x32xf32>
    %353 = vector.extract_strided_slice %351 {offsets = [0, 0], sizes = [16, 32], strides = [1, 1]} : vector<16x64xf32> to vector<16x32xf32>
    %354 = vector.extract_strided_slice %319 {offsets = [0, 160], sizes = [16, 32], strides = [1, 1]} : vector<16x192xf32> to vector<16x32xf32>
    %355 = arith.mulf %353, %354 : vector<16x32xf32>
    %356 = arith.addf %352, %355 : vector<16x32xf32>
    %357 = math.tanh %356 : vector<16x32xf32>
    %358 = vector.extract_strided_slice %351 {offsets = [0, 32], sizes = [16, 32], strides = [1, 1]} : vector<16x64xf32> to vector<16x32xf32>
    %359 = arith.subf %314, %357 : vector<16x32xf32>
    %360 = arith.mulf %358, %359 : vector<16x32xf32>
    %361 = arith.addf %357, %360 : vector<16x32xf32>
    %362 = arith.index_cast %c4_i32 : i32 to index
    %c0_90 = arith.constant 0 : index
    %c0_91 = arith.constant 0 : index
    %363 = vector.load %arg11[%362, %c0_90, %c0_91] : memref<16x16x1xf32, #tpu.memory_space<vmem>>, vector<1x16x1xf32>
    %364 = vector.shape_cast %363 : vector<1x16x1xf32> to vector<16x1xf32>
    %365 = arith.index_cast %315 : i32 to index
    %c0_92 = arith.constant 0 : index
    %c0_93 = arith.constant 0 : index
    %366 = vector.load %arg11[%365, %c0_92, %c0_93] : memref<16x16x1xf32, #tpu.memory_space<vmem>>, vector<1x16x1xf32>
    %367 = vector.shape_cast %366 : vector<1x16x1xf32> to vector<16x1xf32>
    %368 = vector.broadcast %364 : vector<16x1xf32> to vector<16x32xf32>
    %369 = arith.mulf %368, %343 : vector<16x32xf32>
    %370 = arith.index_cast %c4_i32 : i32 to index
    %c0_94 = arith.constant 0 : index
    %c0_95 = arith.constant 0 : index
    %371 = vector.load %arg7[%370, %c0_94, %c0_95] : memref<16x16x32xf32, #tpu.memory_space<vmem>>, vector<1x16x32xf32>
    %372 = vector.shape_cast %371 : vector<1x16x32xf32> to vector<16x32xf32>
    %373 = vector.shape_cast %369 : vector<16x32xf32> to vector<1x16x32xf32>
    tpu.vector_store %arg7[%370, %c0_94, %c0_95], %373 {strides = array<i32>} : memref<16x16x32xf32, #tpu.memory_space<vmem>>, vector<1x16x32xf32>,
    %374 = vector.broadcast %367 : vector<16x1xf32> to vector<16x32xf32>
    %375 = arith.mulf %374, %361 : vector<16x32xf32>
    %376 = arith.index_cast %315 : i32 to index
    %c0_96 = arith.constant 0 : index
    %c0_97 = arith.constant 0 : index
    %377 = vector.load %arg10[%376, %c0_96, %c0_97] : memref<16x16x32xf32, #tpu.memory_space<vmem>>, vector<1x16x32xf32>
    %378 = vector.shape_cast %377 : vector<1x16x32xf32> to vector<16x32xf32>
    %379 = vector.shape_cast %375 : vector<16x32xf32> to vector<1x16x32xf32>
    tpu.vector_store %arg10[%376, %c0_96, %c0_97], %379 {strides = array<i32>} : memref<16x16x32xf32, #tpu.memory_space<vmem>>, vector<1x16x32xf32>,
    %380 = arith.subf %343, %310 : vector<16x32xf32>
    %381 = vector.broadcast %364 : vector<16x1xf32> to vector<16x32xf32>
    %382 = arith.mulf %381, %380 : vector<16x32xf32>
    %383 = arith.addf %310, %382 : vector<16x32xf32>
    %384 = arith.subf %361, %314 : vector<16x32xf32>
    %385 = vector.broadcast %367 : vector<16x1xf32> to vector<16x32xf32>
    %386 = arith.mulf %385, %384 : vector<16x32xf32>
    %387 = arith.addf %314, %386 : vector<16x32xf32>
    %c5_i32 = arith.constant 5 : i32
    %c15_i32_98 = arith.constant 15 : i32
    %388 = arith.subi %c15_i32_98, %c5_i32 : i32
    %389 = tpu.concatenate %383, %387 in 1 : vector<16x32xf32>, vector<16x32xf32> -> vector<16x64xf32>
    %390 = arith.truncf %389 : vector<16x64xf32> to vector<16x64xbf16>
    %cst_99 = arith.constant dense<0.000000e+00> : vector<16x192xf32>
    %391 = tpu.matmul %390, %18, %cst_99 {dimension_numbers = #tpu.dot_dimension_numbers<[1], [0], [0], [1], [0, 0, 1, 1], [], []>} : vector<16x64xbf16>, vector<64x192xbf16>, vector<16x192xf32> -> vector<16x192xf32>
    %392 = arith.addf %391, %21 : vector<16x192xf32>
    %393 = arith.index_cast %c5_i32 : i32 to index
    %c0_100 = arith.constant 0 : index
    %c0_101 = arith.constant 0 : index
    %394 = vector.load %arg9[%393, %c0_100, %c0_101] : memref<16x16x192xf32, #tpu.memory_space<vmem>>, vector<1x16x192xf32>
    %395 = vector.shape_cast %394 : vector<1x16x192xf32> to vector<16x192xf32>
    %396 = arith.index_cast %388 : i32 to index
    %c0_102 = arith.constant 0 : index
    %c0_103 = arith.constant 0 : index
    %397 = vector.load %arg9[%396, %c0_102, %c0_103] : memref<16x16x192xf32, #tpu.memory_space<vmem>>, vector<1x16x192xf32>
    %398 = vector.shape_cast %397 : vector<1x16x192xf32> to vector<16x192xf32>
    %399 = vector.extract_strided_slice %395 {offsets = [0, 0], sizes = [16, 64], strides = [1, 1]} : vector<16x192xf32> to vector<16x64xf32>
    %400 = vector.extract_strided_slice %392 {offsets = [0, 0], sizes = [16, 64], strides = [1, 1]} : vector<16x192xf32> to vector<16x64xf32>
    %401 = arith.addf %399, %400 : vector<16x64xf32>
    %402 = arith.negf %401 : vector<16x64xf32>
    %403 = math.exp %402 : vector<16x64xf32>
    %cst_104 = arith.constant 1.000000e+00 : f32
    %404 = vector.broadcast %cst_104 : f32 to vector<16x64xf32>
    %405 = arith.addf %404, %403 : vector<16x64xf32>
    %406 = arith.divf %404, %405 : vector<16x64xf32>
    %407 = vector.extract_strided_slice %395 {offsets = [0, 64], sizes = [16, 32], strides = [1, 1]} : vector<16x192xf32> to vector<16x32xf32>
    %408 = vector.extract_strided_slice %406 {offsets = [0, 0], sizes = [16, 32], strides = [1, 1]} : vector<16x64xf32> to vector<16x32xf32>
    %409 = vector.extract_strided_slice %392 {offsets = [0, 64], sizes = [16, 32], strides = [1, 1]} : vector<16x192xf32> to vector<16x32xf32>
    %410 = arith.mulf %408, %409 : vector<16x32xf32>
    %411 = arith.addf %407, %410 : vector<16x32xf32>
    %412 = math.tanh %411 : vector<16x32xf32>
    %413 = vector.extract_strided_slice %406 {offsets = [0, 32], sizes = [16, 32], strides = [1, 1]} : vector<16x64xf32> to vector<16x32xf32>
    %414 = arith.subf %383, %412 : vector<16x32xf32>
    %415 = arith.mulf %413, %414 : vector<16x32xf32>
    %416 = arith.addf %412, %415 : vector<16x32xf32>
    %417 = vector.extract_strided_slice %398 {offsets = [0, 96], sizes = [16, 64], strides = [1, 1]} : vector<16x192xf32> to vector<16x64xf32>
    %418 = vector.extract_strided_slice %392 {offsets = [0, 96], sizes = [16, 64], strides = [1, 1]} : vector<16x192xf32> to vector<16x64xf32>
    %419 = arith.addf %417, %418 : vector<16x64xf32>
    %420 = arith.negf %419 : vector<16x64xf32>
    %421 = math.exp %420 : vector<16x64xf32>
    %cst_105 = arith.constant 1.000000e+00 : f32
    %422 = vector.broadcast %cst_105 : f32 to vector<16x64xf32>
    %423 = arith.addf %422, %421 : vector<16x64xf32>
    %424 = arith.divf %422, %423 : vector<16x64xf32>
    %425 = vector.extract_strided_slice %398 {offsets = [0, 160], sizes = [16, 32], strides = [1, 1]} : vector<16x192xf32> to vector<16x32xf32>
    %426 = vector.extract_strided_slice %424 {offsets = [0, 0], sizes = [16, 32], strides = [1, 1]} : vector<16x64xf32> to vector<16x32xf32>
    %427 = vector.extract_strided_slice %392 {offsets = [0, 160], sizes = [16, 32], strides = [1, 1]} : vector<16x192xf32> to vector<16x32xf32>
    %428 = arith.mulf %426, %427 : vector<16x32xf32>
    %429 = arith.addf %425, %428 : vector<16x32xf32>
    %430 = math.tanh %429 : vector<16x32xf32>
    %431 = vector.extract_strided_slice %424 {offsets = [0, 32], sizes = [16, 32], strides = [1, 1]} : vector<16x64xf32> to vector<16x32xf32>
    %432 = arith.subf %387, %430 : vector<16x32xf32>
    %433 = arith.mulf %431, %432 : vector<16x32xf32>
    %434 = arith.addf %430, %433 : vector<16x32xf32>
    %435 = arith.index_cast %c5_i32 : i32 to index
    %c0_106 = arith.constant 0 : index
    %c0_107 = arith.constant 0 : index
    %436 = vector.load %arg11[%435, %c0_106, %c0_107] : memref<16x16x1xf32, #tpu.memory_space<vmem>>, vector<1x16x1xf32>
    %437 = vector.shape_cast %436 : vector<1x16x1xf32> to vector<16x1xf32>
    %438 = arith.index_cast %388 : i32 to index
    %c0_108 = arith.constant 0 : index
    %c0_109 = arith.constant 0 : index
    %439 = vector.load %arg11[%438, %c0_108, %c0_109] : memref<16x16x1xf32, #tpu.memory_space<vmem>>, vector<1x16x1xf32>
    %440 = vector.shape_cast %439 : vector<1x16x1xf32> to vector<16x1xf32>
    %441 = vector.broadcast %437 : vector<16x1xf32> to vector<16x32xf32>
    %442 = arith.mulf %441, %416 : vector<16x32xf32>
    %443 = arith.index_cast %c5_i32 : i32 to index
    %c0_110 = arith.constant 0 : index
    %c0_111 = arith.constant 0 : index
    %444 = vector.load %arg7[%443, %c0_110, %c0_111] : memref<16x16x32xf32, #tpu.memory_space<vmem>>, vector<1x16x32xf32>
    %445 = vector.shape_cast %444 : vector<1x16x32xf32> to vector<16x32xf32>
    %446 = vector.shape_cast %442 : vector<16x32xf32> to vector<1x16x32xf32>
    tpu.vector_store %arg7[%443, %c0_110, %c0_111], %446 {strides = array<i32>} : memref<16x16x32xf32, #tpu.memory_space<vmem>>, vector<1x16x32xf32>,
    %447 = vector.broadcast %440 : vector<16x1xf32> to vector<16x32xf32>
    %448 = arith.mulf %447, %434 : vector<16x32xf32>
    %449 = arith.index_cast %388 : i32 to index
    %c0_112 = arith.constant 0 : index
    %c0_113 = arith.constant 0 : index
    %450 = vector.load %arg10[%449, %c0_112, %c0_113] : memref<16x16x32xf32, #tpu.memory_space<vmem>>, vector<1x16x32xf32>
    %451 = vector.shape_cast %450 : vector<1x16x32xf32> to vector<16x32xf32>
    %452 = vector.shape_cast %448 : vector<16x32xf32> to vector<1x16x32xf32>
    tpu.vector_store %arg10[%449, %c0_112, %c0_113], %452 {strides = array<i32>} : memref<16x16x32xf32, #tpu.memory_space<vmem>>, vector<1x16x32xf32>,
    %453 = arith.subf %416, %383 : vector<16x32xf32>
    %454 = vector.broadcast %437 : vector<16x1xf32> to vector<16x32xf32>
    %455 = arith.mulf %454, %453 : vector<16x32xf32>
    %456 = arith.addf %383, %455 : vector<16x32xf32>
    %457 = arith.subf %434, %387 : vector<16x32xf32>
    %458 = vector.broadcast %440 : vector<16x1xf32> to vector<16x32xf32>
    %459 = arith.mulf %458, %457 : vector<16x32xf32>
    %460 = arith.addf %387, %459 : vector<16x32xf32>
    %c6_i32 = arith.constant 6 : i32
    %c15_i32_114 = arith.constant 15 : i32
    %461 = arith.subi %c15_i32_114, %c6_i32 : i32
    %462 = tpu.concatenate %456, %460 in 1 : vector<16x32xf32>, vector<16x32xf32> -> vector<16x64xf32>
    %463 = arith.truncf %462 : vector<16x64xf32> to vector<16x64xbf16>
    %cst_115 = arith.constant dense<0.000000e+00> : vector<16x192xf32>
    %464 = tpu.matmul %463, %18, %cst_115 {dimension_numbers = #tpu.dot_dimension_numbers<[1], [0], [0], [1], [0, 0, 1, 1], [], []>} : vector<16x64xbf16>, vector<64x192xbf16>, vector<16x192xf32> -> vector<16x192xf32>
    %465 = arith.addf %464, %21 : vector<16x192xf32>
    %466 = arith.index_cast %c6_i32 : i32 to index
    %c0_116 = arith.constant 0 : index
    %c0_117 = arith.constant 0 : index
    %467 = vector.load %arg9[%466, %c0_116, %c0_117] : memref<16x16x192xf32, #tpu.memory_space<vmem>>, vector<1x16x192xf32>
    %468 = vector.shape_cast %467 : vector<1x16x192xf32> to vector<16x192xf32>
    %469 = arith.index_cast %461 : i32 to index
    %c0_118 = arith.constant 0 : index
    %c0_119 = arith.constant 0 : index
    %470 = vector.load %arg9[%469, %c0_118, %c0_119] : memref<16x16x192xf32, #tpu.memory_space<vmem>>, vector<1x16x192xf32>
    %471 = vector.shape_cast %470 : vector<1x16x192xf32> to vector<16x192xf32>
    %472 = vector.extract_strided_slice %468 {offsets = [0, 0], sizes = [16, 64], strides = [1, 1]} : vector<16x192xf32> to vector<16x64xf32>
    %473 = vector.extract_strided_slice %465 {offsets = [0, 0], sizes = [16, 64], strides = [1, 1]} : vector<16x192xf32> to vector<16x64xf32>
    %474 = arith.addf %472, %473 : vector<16x64xf32>
    %475 = arith.negf %474 : vector<16x64xf32>
    %476 = math.exp %475 : vector<16x64xf32>
    %cst_120 = arith.constant 1.000000e+00 : f32
    %477 = vector.broadcast %cst_120 : f32 to vector<16x64xf32>
    %478 = arith.addf %477, %476 : vector<16x64xf32>
    %479 = arith.divf %477, %478 : vector<16x64xf32>
    %480 = vector.extract_strided_slice %468 {offsets = [0, 64], sizes = [16, 32], strides = [1, 1]} : vector<16x192xf32> to vector<16x32xf32>
    %481 = vector.extract_strided_slice %479 {offsets = [0, 0], sizes = [16, 32], strides = [1, 1]} : vector<16x64xf32> to vector<16x32xf32>
    %482 = vector.extract_strided_slice %465 {offsets = [0, 64], sizes = [16, 32], strides = [1, 1]} : vector<16x192xf32> to vector<16x32xf32>
    %483 = arith.mulf %481, %482 : vector<16x32xf32>
    %484 = arith.addf %480, %483 : vector<16x32xf32>
    %485 = math.tanh %484 : vector<16x32xf32>
    %486 = vector.extract_strided_slice %479 {offsets = [0, 32], sizes = [16, 32], strides = [1, 1]} : vector<16x64xf32> to vector<16x32xf32>
    %487 = arith.subf %456, %485 : vector<16x32xf32>
    %488 = arith.mulf %486, %487 : vector<16x32xf32>
    %489 = arith.addf %485, %488 : vector<16x32xf32>
    %490 = vector.extract_strided_slice %471 {offsets = [0, 96], sizes = [16, 64], strides = [1, 1]} : vector<16x192xf32> to vector<16x64xf32>
    %491 = vector.extract_strided_slice %465 {offsets = [0, 96], sizes = [16, 64], strides = [1, 1]} : vector<16x192xf32> to vector<16x64xf32>
    %492 = arith.addf %490, %491 : vector<16x64xf32>
    %493 = arith.negf %492 : vector<16x64xf32>
    %494 = math.exp %493 : vector<16x64xf32>
    %cst_121 = arith.constant 1.000000e+00 : f32
    %495 = vector.broadcast %cst_121 : f32 to vector<16x64xf32>
    %496 = arith.addf %495, %494 : vector<16x64xf32>
    %497 = arith.divf %495, %496 : vector<16x64xf32>
    %498 = vector.extract_strided_slice %471 {offsets = [0, 160], sizes = [16, 32], strides = [1, 1]} : vector<16x192xf32> to vector<16x32xf32>
    %499 = vector.extract_strided_slice %497 {offsets = [0, 0], sizes = [16, 32], strides = [1, 1]} : vector<16x64xf32> to vector<16x32xf32>
    %500 = vector.extract_strided_slice %465 {offsets = [0, 160], sizes = [16, 32], strides = [1, 1]} : vector<16x192xf32> to vector<16x32xf32>
    %501 = arith.mulf %499, %500 : vector<16x32xf32>
    %502 = arith.addf %498, %501 : vector<16x32xf32>
    %503 = math.tanh %502 : vector<16x32xf32>
    %504 = vector.extract_strided_slice %497 {offsets = [0, 32], sizes = [16, 32], strides = [1, 1]} : vector<16x64xf32> to vector<16x32xf32>
    %505 = arith.subf %460, %503 : vector<16x32xf32>
    %506 = arith.mulf %504, %505 : vector<16x32xf32>
    %507 = arith.addf %503, %506 : vector<16x32xf32>
    %508 = arith.index_cast %c6_i32 : i32 to index
    %c0_122 = arith.constant 0 : index
    %c0_123 = arith.constant 0 : index
    %509 = vector.load %arg11[%508, %c0_122, %c0_123] : memref<16x16x1xf32, #tpu.memory_space<vmem>>, vector<1x16x1xf32>
    %510 = vector.shape_cast %509 : vector<1x16x1xf32> to vector<16x1xf32>
    %511 = arith.index_cast %461 : i32 to index
    %c0_124 = arith.constant 0 : index
    %c0_125 = arith.constant 0 : index
    %512 = vector.load %arg11[%511, %c0_124, %c0_125] : memref<16x16x1xf32, #tpu.memory_space<vmem>>, vector<1x16x1xf32>
    %513 = vector.shape_cast %512 : vector<1x16x1xf32> to vector<16x1xf32>
    %514 = vector.broadcast %510 : vector<16x1xf32> to vector<16x32xf32>
    %515 = arith.mulf %514, %489 : vector<16x32xf32>
    %516 = arith.index_cast %c6_i32 : i32 to index
    %c0_126 = arith.constant 0 : index
    %c0_127 = arith.constant 0 : index
    %517 = vector.load %arg7[%516, %c0_126, %c0_127] : memref<16x16x32xf32, #tpu.memory_space<vmem>>, vector<1x16x32xf32>
    %518 = vector.shape_cast %517 : vector<1x16x32xf32> to vector<16x32xf32>
    %519 = vector.shape_cast %515 : vector<16x32xf32> to vector<1x16x32xf32>
    tpu.vector_store %arg7[%516, %c0_126, %c0_127], %519 {strides = array<i32>} : memref<16x16x32xf32, #tpu.memory_space<vmem>>, vector<1x16x32xf32>,
    %520 = vector.broadcast %513 : vector<16x1xf32> to vector<16x32xf32>
    %521 = arith.mulf %520, %507 : vector<16x32xf32>
    %522 = arith.index_cast %461 : i32 to index
    %c0_128 = arith.constant 0 : index
    %c0_129 = arith.constant 0 : index
    %523 = vector.load %arg10[%522, %c0_128, %c0_129] : memref<16x16x32xf32, #tpu.memory_space<vmem>>, vector<1x16x32xf32>
    %524 = vector.shape_cast %523 : vector<1x16x32xf32> to vector<16x32xf32>
    %525 = vector.shape_cast %521 : vector<16x32xf32> to vector<1x16x32xf32>
    tpu.vector_store %arg10[%522, %c0_128, %c0_129], %525 {strides = array<i32>} : memref<16x16x32xf32, #tpu.memory_space<vmem>>, vector<1x16x32xf32>,
    %526 = arith.subf %489, %456 : vector<16x32xf32>
    %527 = vector.broadcast %510 : vector<16x1xf32> to vector<16x32xf32>
    %528 = arith.mulf %527, %526 : vector<16x32xf32>
    %529 = arith.addf %456, %528 : vector<16x32xf32>
    %530 = arith.subf %507, %460 : vector<16x32xf32>
    %531 = vector.broadcast %513 : vector<16x1xf32> to vector<16x32xf32>
    %532 = arith.mulf %531, %530 : vector<16x32xf32>
    %533 = arith.addf %460, %532 : vector<16x32xf32>
    %c7_i32 = arith.constant 7 : i32
    %c15_i32_130 = arith.constant 15 : i32
    %534 = arith.subi %c15_i32_130, %c7_i32 : i32
    %535 = tpu.concatenate %529, %533 in 1 : vector<16x32xf32>, vector<16x32xf32> -> vector<16x64xf32>
    %536 = arith.truncf %535 : vector<16x64xf32> to vector<16x64xbf16>
    %cst_131 = arith.constant dense<0.000000e+00> : vector<16x192xf32>
    %537 = tpu.matmul %536, %18, %cst_131 {dimension_numbers = #tpu.dot_dimension_numbers<[1], [0], [0], [1], [0, 0, 1, 1], [], []>} : vector<16x64xbf16>, vector<64x192xbf16>, vector<16x192xf32> -> vector<16x192xf32>
    %538 = arith.addf %537, %21 : vector<16x192xf32>
    %539 = arith.index_cast %c7_i32 : i32 to index
    %c0_132 = arith.constant 0 : index
    %c0_133 = arith.constant 0 : index
    %540 = vector.load %arg9[%539, %c0_132, %c0_133] : memref<16x16x192xf32, #tpu.memory_space<vmem>>, vector<1x16x192xf32>
    %541 = vector.shape_cast %540 : vector<1x16x192xf32> to vector<16x192xf32>
    %542 = arith.index_cast %534 : i32 to index
    %c0_134 = arith.constant 0 : index
    %c0_135 = arith.constant 0 : index
    %543 = vector.load %arg9[%542, %c0_134, %c0_135] : memref<16x16x192xf32, #tpu.memory_space<vmem>>, vector<1x16x192xf32>
    %544 = vector.shape_cast %543 : vector<1x16x192xf32> to vector<16x192xf32>
    %545 = vector.extract_strided_slice %541 {offsets = [0, 0], sizes = [16, 64], strides = [1, 1]} : vector<16x192xf32> to vector<16x64xf32>
    %546 = vector.extract_strided_slice %538 {offsets = [0, 0], sizes = [16, 64], strides = [1, 1]} : vector<16x192xf32> to vector<16x64xf32>
    %547 = arith.addf %545, %546 : vector<16x64xf32>
    %548 = arith.negf %547 : vector<16x64xf32>
    %549 = math.exp %548 : vector<16x64xf32>
    %cst_136 = arith.constant 1.000000e+00 : f32
    %550 = vector.broadcast %cst_136 : f32 to vector<16x64xf32>
    %551 = arith.addf %550, %549 : vector<16x64xf32>
    %552 = arith.divf %550, %551 : vector<16x64xf32>
    %553 = vector.extract_strided_slice %541 {offsets = [0, 64], sizes = [16, 32], strides = [1, 1]} : vector<16x192xf32> to vector<16x32xf32>
    %554 = vector.extract_strided_slice %552 {offsets = [0, 0], sizes = [16, 32], strides = [1, 1]} : vector<16x64xf32> to vector<16x32xf32>
    %555 = vector.extract_strided_slice %538 {offsets = [0, 64], sizes = [16, 32], strides = [1, 1]} : vector<16x192xf32> to vector<16x32xf32>
    %556 = arith.mulf %554, %555 : vector<16x32xf32>
    %557 = arith.addf %553, %556 : vector<16x32xf32>
    %558 = math.tanh %557 : vector<16x32xf32>
    %559 = vector.extract_strided_slice %552 {offsets = [0, 32], sizes = [16, 32], strides = [1, 1]} : vector<16x64xf32> to vector<16x32xf32>
    %560 = arith.subf %529, %558 : vector<16x32xf32>
    %561 = arith.mulf %559, %560 : vector<16x32xf32>
    %562 = arith.addf %558, %561 : vector<16x32xf32>
    %563 = vector.extract_strided_slice %544 {offsets = [0, 96], sizes = [16, 64], strides = [1, 1]} : vector<16x192xf32> to vector<16x64xf32>
    %564 = vector.extract_strided_slice %538 {offsets = [0, 96], sizes = [16, 64], strides = [1, 1]} : vector<16x192xf32> to vector<16x64xf32>
    %565 = arith.addf %563, %564 : vector<16x64xf32>
    %566 = arith.negf %565 : vector<16x64xf32>
    %567 = math.exp %566 : vector<16x64xf32>
    %cst_137 = arith.constant 1.000000e+00 : f32
    %568 = vector.broadcast %cst_137 : f32 to vector<16x64xf32>
    %569 = arith.addf %568, %567 : vector<16x64xf32>
    %570 = arith.divf %568, %569 : vector<16x64xf32>
    %571 = vector.extract_strided_slice %544 {offsets = [0, 160], sizes = [16, 32], strides = [1, 1]} : vector<16x192xf32> to vector<16x32xf32>
    %572 = vector.extract_strided_slice %570 {offsets = [0, 0], sizes = [16, 32], strides = [1, 1]} : vector<16x64xf32> to vector<16x32xf32>
    %573 = vector.extract_strided_slice %538 {offsets = [0, 160], sizes = [16, 32], strides = [1, 1]} : vector<16x192xf32> to vector<16x32xf32>
    %574 = arith.mulf %572, %573 : vector<16x32xf32>
    %575 = arith.addf %571, %574 : vector<16x32xf32>
    %576 = math.tanh %575 : vector<16x32xf32>
    %577 = vector.extract_strided_slice %570 {offsets = [0, 32], sizes = [16, 32], strides = [1, 1]} : vector<16x64xf32> to vector<16x32xf32>
    %578 = arith.subf %533, %576 : vector<16x32xf32>
    %579 = arith.mulf %577, %578 : vector<16x32xf32>
    %580 = arith.addf %576, %579 : vector<16x32xf32>
    %581 = arith.index_cast %c7_i32 : i32 to index
    %c0_138 = arith.constant 0 : index
    %c0_139 = arith.constant 0 : index
    %582 = vector.load %arg11[%581, %c0_138, %c0_139] : memref<16x16x1xf32, #tpu.memory_space<vmem>>, vector<1x16x1xf32>
    %583 = vector.shape_cast %582 : vector<1x16x1xf32> to vector<16x1xf32>
    %584 = arith.index_cast %534 : i32 to index
    %c0_140 = arith.constant 0 : index
    %c0_141 = arith.constant 0 : index
    %585 = vector.load %arg11[%584, %c0_140, %c0_141] : memref<16x16x1xf32, #tpu.memory_space<vmem>>, vector<1x16x1xf32>
    %586 = vector.shape_cast %585 : vector<1x16x1xf32> to vector<16x1xf32>
    %587 = vector.broadcast %583 : vector<16x1xf32> to vector<16x32xf32>
    %588 = arith.mulf %587, %562 : vector<16x32xf32>
    %589 = arith.index_cast %c7_i32 : i32 to index
    %c0_142 = arith.constant 0 : index
    %c0_143 = arith.constant 0 : index
    %590 = vector.load %arg7[%589, %c0_142, %c0_143] : memref<16x16x32xf32, #tpu.memory_space<vmem>>, vector<1x16x32xf32>
    %591 = vector.shape_cast %590 : vector<1x16x32xf32> to vector<16x32xf32>
    %592 = vector.shape_cast %588 : vector<16x32xf32> to vector<1x16x32xf32>
    tpu.vector_store %arg7[%589, %c0_142, %c0_143], %592 {strides = array<i32>} : memref<16x16x32xf32, #tpu.memory_space<vmem>>, vector<1x16x32xf32>,
    %593 = vector.broadcast %586 : vector<16x1xf32> to vector<16x32xf32>
    %594 = arith.mulf %593, %580 : vector<16x32xf32>
    %595 = arith.index_cast %534 : i32 to index
    %c0_144 = arith.constant 0 : index
    %c0_145 = arith.constant 0 : index
    %596 = vector.load %arg10[%595, %c0_144, %c0_145] : memref<16x16x32xf32, #tpu.memory_space<vmem>>, vector<1x16x32xf32>
    %597 = vector.shape_cast %596 : vector<1x16x32xf32> to vector<16x32xf32>
    %598 = vector.shape_cast %594 : vector<16x32xf32> to vector<1x16x32xf32>
    tpu.vector_store %arg10[%595, %c0_144, %c0_145], %598 {strides = array<i32>} : memref<16x16x32xf32, #tpu.memory_space<vmem>>, vector<1x16x32xf32>,
    %599 = arith.subf %562, %529 : vector<16x32xf32>
    %600 = vector.broadcast %583 : vector<16x1xf32> to vector<16x32xf32>
    %601 = arith.mulf %600, %599 : vector<16x32xf32>
    %602 = arith.addf %529, %601 : vector<16x32xf32>
    %603 = arith.subf %580, %533 : vector<16x32xf32>
    %604 = vector.broadcast %586 : vector<16x1xf32> to vector<16x32xf32>
    %605 = arith.mulf %604, %603 : vector<16x32xf32>
    %606 = arith.addf %533, %605 : vector<16x32xf32>
    %c8_i32 = arith.constant 8 : i32
    %c15_i32_146 = arith.constant 15 : i32
    %607 = arith.subi %c15_i32_146, %c8_i32 : i32
    %608 = tpu.concatenate %602, %606 in 1 : vector<16x32xf32>, vector<16x32xf32> -> vector<16x64xf32>
    %609 = arith.truncf %608 : vector<16x64xf32> to vector<16x64xbf16>
    %cst_147 = arith.constant dense<0.000000e+00> : vector<16x192xf32>
    %610 = tpu.matmul %609, %18, %cst_147 {dimension_numbers = #tpu.dot_dimension_numbers<[1], [0], [0], [1], [0, 0, 1, 1], [], []>} : vector<16x64xbf16>, vector<64x192xbf16>, vector<16x192xf32> -> vector<16x192xf32>
    %611 = arith.addf %610, %21 : vector<16x192xf32>
    %612 = arith.index_cast %c8_i32 : i32 to index
    %c0_148 = arith.constant 0 : index
    %c0_149 = arith.constant 0 : index
    %613 = vector.load %arg9[%612, %c0_148, %c0_149] : memref<16x16x192xf32, #tpu.memory_space<vmem>>, vector<1x16x192xf32>
    %614 = vector.shape_cast %613 : vector<1x16x192xf32> to vector<16x192xf32>
    %615 = arith.index_cast %607 : i32 to index
    %c0_150 = arith.constant 0 : index
    %c0_151 = arith.constant 0 : index
    %616 = vector.load %arg9[%615, %c0_150, %c0_151] : memref<16x16x192xf32, #tpu.memory_space<vmem>>, vector<1x16x192xf32>
    %617 = vector.shape_cast %616 : vector<1x16x192xf32> to vector<16x192xf32>
    %618 = vector.extract_strided_slice %614 {offsets = [0, 0], sizes = [16, 64], strides = [1, 1]} : vector<16x192xf32> to vector<16x64xf32>
    %619 = vector.extract_strided_slice %611 {offsets = [0, 0], sizes = [16, 64], strides = [1, 1]} : vector<16x192xf32> to vector<16x64xf32>
    %620 = arith.addf %618, %619 : vector<16x64xf32>
    %621 = arith.negf %620 : vector<16x64xf32>
    %622 = math.exp %621 : vector<16x64xf32>
    %cst_152 = arith.constant 1.000000e+00 : f32
    %623 = vector.broadcast %cst_152 : f32 to vector<16x64xf32>
    %624 = arith.addf %623, %622 : vector<16x64xf32>
    %625 = arith.divf %623, %624 : vector<16x64xf32>
    %626 = vector.extract_strided_slice %614 {offsets = [0, 64], sizes = [16, 32], strides = [1, 1]} : vector<16x192xf32> to vector<16x32xf32>
    %627 = vector.extract_strided_slice %625 {offsets = [0, 0], sizes = [16, 32], strides = [1, 1]} : vector<16x64xf32> to vector<16x32xf32>
    %628 = vector.extract_strided_slice %611 {offsets = [0, 64], sizes = [16, 32], strides = [1, 1]} : vector<16x192xf32> to vector<16x32xf32>
    %629 = arith.mulf %627, %628 : vector<16x32xf32>
    %630 = arith.addf %626, %629 : vector<16x32xf32>
    %631 = math.tanh %630 : vector<16x32xf32>
    %632 = vector.extract_strided_slice %625 {offsets = [0, 32], sizes = [16, 32], strides = [1, 1]} : vector<16x64xf32> to vector<16x32xf32>
    %633 = arith.subf %602, %631 : vector<16x32xf32>
    %634 = arith.mulf %632, %633 : vector<16x32xf32>
    %635 = arith.addf %631, %634 : vector<16x32xf32>
    %636 = vector.extract_strided_slice %617 {offsets = [0, 96], sizes = [16, 64], strides = [1, 1]} : vector<16x192xf32> to vector<16x64xf32>
    %637 = vector.extract_strided_slice %611 {offsets = [0, 96], sizes = [16, 64], strides = [1, 1]} : vector<16x192xf32> to vector<16x64xf32>
    %638 = arith.addf %636, %637 : vector<16x64xf32>
    %639 = arith.negf %638 : vector<16x64xf32>
    %640 = math.exp %639 : vector<16x64xf32>
    %cst_153 = arith.constant 1.000000e+00 : f32
    %641 = vector.broadcast %cst_153 : f32 to vector<16x64xf32>
    %642 = arith.addf %641, %640 : vector<16x64xf32>
    %643 = arith.divf %641, %642 : vector<16x64xf32>
    %644 = vector.extract_strided_slice %617 {offsets = [0, 160], sizes = [16, 32], strides = [1, 1]} : vector<16x192xf32> to vector<16x32xf32>
    %645 = vector.extract_strided_slice %643 {offsets = [0, 0], sizes = [16, 32], strides = [1, 1]} : vector<16x64xf32> to vector<16x32xf32>
    %646 = vector.extract_strided_slice %611 {offsets = [0, 160], sizes = [16, 32], strides = [1, 1]} : vector<16x192xf32> to vector<16x32xf32>
    %647 = arith.mulf %645, %646 : vector<16x32xf32>
    %648 = arith.addf %644, %647 : vector<16x32xf32>
    %649 = math.tanh %648 : vector<16x32xf32>
    %650 = vector.extract_strided_slice %643 {offsets = [0, 32], sizes = [16, 32], strides = [1, 1]} : vector<16x64xf32> to vector<16x32xf32>
    %651 = arith.subf %606, %649 : vector<16x32xf32>
    %652 = arith.mulf %650, %651 : vector<16x32xf32>
    %653 = arith.addf %649, %652 : vector<16x32xf32>
    %654 = arith.index_cast %c8_i32 : i32 to index
    %c0_154 = arith.constant 0 : index
    %c0_155 = arith.constant 0 : index
    %655 = vector.load %arg11[%654, %c0_154, %c0_155] : memref<16x16x1xf32, #tpu.memory_space<vmem>>, vector<1x16x1xf32>
    %656 = vector.shape_cast %655 : vector<1x16x1xf32> to vector<16x1xf32>
    %657 = arith.index_cast %607 : i32 to index
    %c0_156 = arith.constant 0 : index
    %c0_157 = arith.constant 0 : index
    %658 = vector.load %arg11[%657, %c0_156, %c0_157] : memref<16x16x1xf32, #tpu.memory_space<vmem>>, vector<1x16x1xf32>
    %659 = vector.shape_cast %658 : vector<1x16x1xf32> to vector<16x1xf32>
    %660 = vector.broadcast %656 : vector<16x1xf32> to vector<16x32xf32>
    %661 = arith.mulf %660, %635 : vector<16x32xf32>
    %662 = arith.index_cast %c8_i32 : i32 to index
    %c0_158 = arith.constant 0 : index
    %c0_159 = arith.constant 0 : index
    %663 = vector.load %arg7[%662, %c0_158, %c0_159] : memref<16x16x32xf32, #tpu.memory_space<vmem>>, vector<1x16x32xf32>
    %664 = vector.shape_cast %663 : vector<1x16x32xf32> to vector<16x32xf32>
    %665 = vector.shape_cast %661 : vector<16x32xf32> to vector<1x16x32xf32>
    tpu.vector_store %arg7[%662, %c0_158, %c0_159], %665 {strides = array<i32>} : memref<16x16x32xf32, #tpu.memory_space<vmem>>, vector<1x16x32xf32>,
    %666 = vector.broadcast %659 : vector<16x1xf32> to vector<16x32xf32>
    %667 = arith.mulf %666, %653 : vector<16x32xf32>
    %668 = arith.index_cast %607 : i32 to index
    %c0_160 = arith.constant 0 : index
    %c0_161 = arith.constant 0 : index
    %669 = vector.load %arg10[%668, %c0_160, %c0_161] : memref<16x16x32xf32, #tpu.memory_space<vmem>>, vector<1x16x32xf32>
    %670 = vector.shape_cast %669 : vector<1x16x32xf32> to vector<16x32xf32>
    %671 = vector.shape_cast %667 : vector<16x32xf32> to vector<1x16x32xf32>
    tpu.vector_store %arg10[%668, %c0_160, %c0_161], %671 {strides = array<i32>} : memref<16x16x32xf32, #tpu.memory_space<vmem>>, vector<1x16x32xf32>,
    %672 = arith.subf %635, %602 : vector<16x32xf32>
    %673 = vector.broadcast %656 : vector<16x1xf32> to vector<16x32xf32>
    %674 = arith.mulf %673, %672 : vector<16x32xf32>
    %675 = arith.addf %602, %674 : vector<16x32xf32>
    %676 = arith.subf %653, %606 : vector<16x32xf32>
    %677 = vector.broadcast %659 : vector<16x1xf32> to vector<16x32xf32>
    %678 = arith.mulf %677, %676 : vector<16x32xf32>
    %679 = arith.addf %606, %678 : vector<16x32xf32>
    %c9_i32 = arith.constant 9 : i32
    %c15_i32_162 = arith.constant 15 : i32
    %680 = arith.subi %c15_i32_162, %c9_i32 : i32
    %681 = tpu.concatenate %675, %679 in 1 : vector<16x32xf32>, vector<16x32xf32> -> vector<16x64xf32>
    %682 = arith.truncf %681 : vector<16x64xf32> to vector<16x64xbf16>
    %cst_163 = arith.constant dense<0.000000e+00> : vector<16x192xf32>
    %683 = tpu.matmul %682, %18, %cst_163 {dimension_numbers = #tpu.dot_dimension_numbers<[1], [0], [0], [1], [0, 0, 1, 1], [], []>} : vector<16x64xbf16>, vector<64x192xbf16>, vector<16x192xf32> -> vector<16x192xf32>
    %684 = arith.addf %683, %21 : vector<16x192xf32>
    %685 = arith.index_cast %c9_i32 : i32 to index
    %c0_164 = arith.constant 0 : index
    %c0_165 = arith.constant 0 : index
    %686 = vector.load %arg9[%685, %c0_164, %c0_165] : memref<16x16x192xf32, #tpu.memory_space<vmem>>, vector<1x16x192xf32>
    %687 = vector.shape_cast %686 : vector<1x16x192xf32> to vector<16x192xf32>
    %688 = arith.index_cast %680 : i32 to index
    %c0_166 = arith.constant 0 : index
    %c0_167 = arith.constant 0 : index
    %689 = vector.load %arg9[%688, %c0_166, %c0_167] : memref<16x16x192xf32, #tpu.memory_space<vmem>>, vector<1x16x192xf32>
    %690 = vector.shape_cast %689 : vector<1x16x192xf32> to vector<16x192xf32>
    %691 = vector.extract_strided_slice %687 {offsets = [0, 0], sizes = [16, 64], strides = [1, 1]} : vector<16x192xf32> to vector<16x64xf32>
    %692 = vector.extract_strided_slice %684 {offsets = [0, 0], sizes = [16, 64], strides = [1, 1]} : vector<16x192xf32> to vector<16x64xf32>
    %693 = arith.addf %691, %692 : vector<16x64xf32>
    %694 = arith.negf %693 : vector<16x64xf32>
    %695 = math.exp %694 : vector<16x64xf32>
    %cst_168 = arith.constant 1.000000e+00 : f32
    %696 = vector.broadcast %cst_168 : f32 to vector<16x64xf32>
    %697 = arith.addf %696, %695 : vector<16x64xf32>
    %698 = arith.divf %696, %697 : vector<16x64xf32>
    %699 = vector.extract_strided_slice %687 {offsets = [0, 64], sizes = [16, 32], strides = [1, 1]} : vector<16x192xf32> to vector<16x32xf32>
    %700 = vector.extract_strided_slice %698 {offsets = [0, 0], sizes = [16, 32], strides = [1, 1]} : vector<16x64xf32> to vector<16x32xf32>
    %701 = vector.extract_strided_slice %684 {offsets = [0, 64], sizes = [16, 32], strides = [1, 1]} : vector<16x192xf32> to vector<16x32xf32>
    %702 = arith.mulf %700, %701 : vector<16x32xf32>
    %703 = arith.addf %699, %702 : vector<16x32xf32>
    %704 = math.tanh %703 : vector<16x32xf32>
    %705 = vector.extract_strided_slice %698 {offsets = [0, 32], sizes = [16, 32], strides = [1, 1]} : vector<16x64xf32> to vector<16x32xf32>
    %706 = arith.subf %675, %704 : vector<16x32xf32>
    %707 = arith.mulf %705, %706 : vector<16x32xf32>
    %708 = arith.addf %704, %707 : vector<16x32xf32>
    %709 = vector.extract_strided_slice %690 {offsets = [0, 96], sizes = [16, 64], strides = [1, 1]} : vector<16x192xf32> to vector<16x64xf32>
    %710 = vector.extract_strided_slice %684 {offsets = [0, 96], sizes = [16, 64], strides = [1, 1]} : vector<16x192xf32> to vector<16x64xf32>
    %711 = arith.addf %709, %710 : vector<16x64xf32>
    %712 = arith.negf %711 : vector<16x64xf32>
    %713 = math.exp %712 : vector<16x64xf32>
    %cst_169 = arith.constant 1.000000e+00 : f32
    %714 = vector.broadcast %cst_169 : f32 to vector<16x64xf32>
    %715 = arith.addf %714, %713 : vector<16x64xf32>
    %716 = arith.divf %714, %715 : vector<16x64xf32>
    %717 = vector.extract_strided_slice %690 {offsets = [0, 160], sizes = [16, 32], strides = [1, 1]} : vector<16x192xf32> to vector<16x32xf32>
    %718 = vector.extract_strided_slice %716 {offsets = [0, 0], sizes = [16, 32], strides = [1, 1]} : vector<16x64xf32> to vector<16x32xf32>
    %719 = vector.extract_strided_slice %684 {offsets = [0, 160], sizes = [16, 32], strides = [1, 1]} : vector<16x192xf32> to vector<16x32xf32>
    %720 = arith.mulf %718, %719 : vector<16x32xf32>
    %721 = arith.addf %717, %720 : vector<16x32xf32>
    %722 = math.tanh %721 : vector<16x32xf32>
    %723 = vector.extract_strided_slice %716 {offsets = [0, 32], sizes = [16, 32], strides = [1, 1]} : vector<16x64xf32> to vector<16x32xf32>
    %724 = arith.subf %679, %722 : vector<16x32xf32>
    %725 = arith.mulf %723, %724 : vector<16x32xf32>
    %726 = arith.addf %722, %725 : vector<16x32xf32>
    %727 = arith.index_cast %c9_i32 : i32 to index
    %c0_170 = arith.constant 0 : index
    %c0_171 = arith.constant 0 : index
    %728 = vector.load %arg11[%727, %c0_170, %c0_171] : memref<16x16x1xf32, #tpu.memory_space<vmem>>, vector<1x16x1xf32>
    %729 = vector.shape_cast %728 : vector<1x16x1xf32> to vector<16x1xf32>
    %730 = arith.index_cast %680 : i32 to index
    %c0_172 = arith.constant 0 : index
    %c0_173 = arith.constant 0 : index
    %731 = vector.load %arg11[%730, %c0_172, %c0_173] : memref<16x16x1xf32, #tpu.memory_space<vmem>>, vector<1x16x1xf32>
    %732 = vector.shape_cast %731 : vector<1x16x1xf32> to vector<16x1xf32>
    %733 = vector.broadcast %729 : vector<16x1xf32> to vector<16x32xf32>
    %734 = arith.mulf %733, %708 : vector<16x32xf32>
    %735 = arith.index_cast %c9_i32 : i32 to index
    %c0_174 = arith.constant 0 : index
    %c0_175 = arith.constant 0 : index
    %736 = vector.load %arg7[%735, %c0_174, %c0_175] : memref<16x16x32xf32, #tpu.memory_space<vmem>>, vector<1x16x32xf32>
    %737 = vector.shape_cast %736 : vector<1x16x32xf32> to vector<16x32xf32>
    %738 = vector.shape_cast %734 : vector<16x32xf32> to vector<1x16x32xf32>
    tpu.vector_store %arg7[%735, %c0_174, %c0_175], %738 {strides = array<i32>} : memref<16x16x32xf32, #tpu.memory_space<vmem>>, vector<1x16x32xf32>,
    %739 = vector.broadcast %732 : vector<16x1xf32> to vector<16x32xf32>
    %740 = arith.mulf %739, %726 : vector<16x32xf32>
    %741 = arith.index_cast %680 : i32 to index
    %c0_176 = arith.constant 0 : index
    %c0_177 = arith.constant 0 : index
    %742 = vector.load %arg10[%741, %c0_176, %c0_177] : memref<16x16x32xf32, #tpu.memory_space<vmem>>, vector<1x16x32xf32>
    %743 = vector.shape_cast %742 : vector<1x16x32xf32> to vector<16x32xf32>
    %744 = vector.shape_cast %740 : vector<16x32xf32> to vector<1x16x32xf32>
    tpu.vector_store %arg10[%741, %c0_176, %c0_177], %744 {strides = array<i32>} : memref<16x16x32xf32, #tpu.memory_space<vmem>>, vector<1x16x32xf32>,
    %745 = arith.subf %708, %675 : vector<16x32xf32>
    %746 = vector.broadcast %729 : vector<16x1xf32> to vector<16x32xf32>
    %747 = arith.mulf %746, %745 : vector<16x32xf32>
    %748 = arith.addf %675, %747 : vector<16x32xf32>
    %749 = arith.subf %726, %679 : vector<16x32xf32>
    %750 = vector.broadcast %732 : vector<16x1xf32> to vector<16x32xf32>
    %751 = arith.mulf %750, %749 : vector<16x32xf32>
    %752 = arith.addf %679, %751 : vector<16x32xf32>
    %c10_i32 = arith.constant 10 : i32
    %c15_i32_178 = arith.constant 15 : i32
    %753 = arith.subi %c15_i32_178, %c10_i32 : i32
    %754 = tpu.concatenate %748, %752 in 1 : vector<16x32xf32>, vector<16x32xf32> -> vector<16x64xf32>
    %755 = arith.truncf %754 : vector<16x64xf32> to vector<16x64xbf16>
    %cst_179 = arith.constant dense<0.000000e+00> : vector<16x192xf32>
    %756 = tpu.matmul %755, %18, %cst_179 {dimension_numbers = #tpu.dot_dimension_numbers<[1], [0], [0], [1], [0, 0, 1, 1], [], []>} : vector<16x64xbf16>, vector<64x192xbf16>, vector<16x192xf32> -> vector<16x192xf32>
    %757 = arith.addf %756, %21 : vector<16x192xf32>
    %758 = arith.index_cast %c10_i32 : i32 to index
    %c0_180 = arith.constant 0 : index
    %c0_181 = arith.constant 0 : index
    %759 = vector.load %arg9[%758, %c0_180, %c0_181] : memref<16x16x192xf32, #tpu.memory_space<vmem>>, vector<1x16x192xf32>
    %760 = vector.shape_cast %759 : vector<1x16x192xf32> to vector<16x192xf32>
    %761 = arith.index_cast %753 : i32 to index
    %c0_182 = arith.constant 0 : index
    %c0_183 = arith.constant 0 : index
    %762 = vector.load %arg9[%761, %c0_182, %c0_183] : memref<16x16x192xf32, #tpu.memory_space<vmem>>, vector<1x16x192xf32>
    %763 = vector.shape_cast %762 : vector<1x16x192xf32> to vector<16x192xf32>
    %764 = vector.extract_strided_slice %760 {offsets = [0, 0], sizes = [16, 64], strides = [1, 1]} : vector<16x192xf32> to vector<16x64xf32>
    %765 = vector.extract_strided_slice %757 {offsets = [0, 0], sizes = [16, 64], strides = [1, 1]} : vector<16x192xf32> to vector<16x64xf32>
    %766 = arith.addf %764, %765 : vector<16x64xf32>
    %767 = arith.negf %766 : vector<16x64xf32>
    %768 = math.exp %767 : vector<16x64xf32>
    %cst_184 = arith.constant 1.000000e+00 : f32
    %769 = vector.broadcast %cst_184 : f32 to vector<16x64xf32>
    %770 = arith.addf %769, %768 : vector<16x64xf32>
    %771 = arith.divf %769, %770 : vector<16x64xf32>
    %772 = vector.extract_strided_slice %760 {offsets = [0, 64], sizes = [16, 32], strides = [1, 1]} : vector<16x192xf32> to vector<16x32xf32>
    %773 = vector.extract_strided_slice %771 {offsets = [0, 0], sizes = [16, 32], strides = [1, 1]} : vector<16x64xf32> to vector<16x32xf32>
    %774 = vector.extract_strided_slice %757 {offsets = [0, 64], sizes = [16, 32], strides = [1, 1]} : vector<16x192xf32> to vector<16x32xf32>
    %775 = arith.mulf %773, %774 : vector<16x32xf32>
    %776 = arith.addf %772, %775 : vector<16x32xf32>
    %777 = math.tanh %776 : vector<16x32xf32>
    %778 = vector.extract_strided_slice %771 {offsets = [0, 32], sizes = [16, 32], strides = [1, 1]} : vector<16x64xf32> to vector<16x32xf32>
    %779 = arith.subf %748, %777 : vector<16x32xf32>
    %780 = arith.mulf %778, %779 : vector<16x32xf32>
    %781 = arith.addf %777, %780 : vector<16x32xf32>
    %782 = vector.extract_strided_slice %763 {offsets = [0, 96], sizes = [16, 64], strides = [1, 1]} : vector<16x192xf32> to vector<16x64xf32>
    %783 = vector.extract_strided_slice %757 {offsets = [0, 96], sizes = [16, 64], strides = [1, 1]} : vector<16x192xf32> to vector<16x64xf32>
    %784 = arith.addf %782, %783 : vector<16x64xf32>
    %785 = arith.negf %784 : vector<16x64xf32>
    %786 = math.exp %785 : vector<16x64xf32>
    %cst_185 = arith.constant 1.000000e+00 : f32
    %787 = vector.broadcast %cst_185 : f32 to vector<16x64xf32>
    %788 = arith.addf %787, %786 : vector<16x64xf32>
    %789 = arith.divf %787, %788 : vector<16x64xf32>
    %790 = vector.extract_strided_slice %763 {offsets = [0, 160], sizes = [16, 32], strides = [1, 1]} : vector<16x192xf32> to vector<16x32xf32>
    %791 = vector.extract_strided_slice %789 {offsets = [0, 0], sizes = [16, 32], strides = [1, 1]} : vector<16x64xf32> to vector<16x32xf32>
    %792 = vector.extract_strided_slice %757 {offsets = [0, 160], sizes = [16, 32], strides = [1, 1]} : vector<16x192xf32> to vector<16x32xf32>
    %793 = arith.mulf %791, %792 : vector<16x32xf32>
    %794 = arith.addf %790, %793 : vector<16x32xf32>
    %795 = math.tanh %794 : vector<16x32xf32>
    %796 = vector.extract_strided_slice %789 {offsets = [0, 32], sizes = [16, 32], strides = [1, 1]} : vector<16x64xf32> to vector<16x32xf32>
    %797 = arith.subf %752, %795 : vector<16x32xf32>
    %798 = arith.mulf %796, %797 : vector<16x32xf32>
    %799 = arith.addf %795, %798 : vector<16x32xf32>
    %800 = arith.index_cast %c10_i32 : i32 to index
    %c0_186 = arith.constant 0 : index
    %c0_187 = arith.constant 0 : index
    %801 = vector.load %arg11[%800, %c0_186, %c0_187] : memref<16x16x1xf32, #tpu.memory_space<vmem>>, vector<1x16x1xf32>
    %802 = vector.shape_cast %801 : vector<1x16x1xf32> to vector<16x1xf32>
    %803 = arith.index_cast %753 : i32 to index
    %c0_188 = arith.constant 0 : index
    %c0_189 = arith.constant 0 : index
    %804 = vector.load %arg11[%803, %c0_188, %c0_189] : memref<16x16x1xf32, #tpu.memory_space<vmem>>, vector<1x16x1xf32>
    %805 = vector.shape_cast %804 : vector<1x16x1xf32> to vector<16x1xf32>
    %806 = vector.broadcast %802 : vector<16x1xf32> to vector<16x32xf32>
    %807 = arith.mulf %806, %781 : vector<16x32xf32>
    %808 = arith.index_cast %c10_i32 : i32 to index
    %c0_190 = arith.constant 0 : index
    %c0_191 = arith.constant 0 : index
    %809 = vector.load %arg7[%808, %c0_190, %c0_191] : memref<16x16x32xf32, #tpu.memory_space<vmem>>, vector<1x16x32xf32>
    %810 = vector.shape_cast %809 : vector<1x16x32xf32> to vector<16x32xf32>
    %811 = vector.shape_cast %807 : vector<16x32xf32> to vector<1x16x32xf32>
    tpu.vector_store %arg7[%808, %c0_190, %c0_191], %811 {strides = array<i32>} : memref<16x16x32xf32, #tpu.memory_space<vmem>>, vector<1x16x32xf32>,
    %812 = vector.broadcast %805 : vector<16x1xf32> to vector<16x32xf32>
    %813 = arith.mulf %812, %799 : vector<16x32xf32>
    %814 = arith.index_cast %753 : i32 to index
    %c0_192 = arith.constant 0 : index
    %c0_193 = arith.constant 0 : index
    %815 = vector.load %arg10[%814, %c0_192, %c0_193] : memref<16x16x32xf32, #tpu.memory_space<vmem>>, vector<1x16x32xf32>
    %816 = vector.shape_cast %815 : vector<1x16x32xf32> to vector<16x32xf32>
    %817 = vector.shape_cast %813 : vector<16x32xf32> to vector<1x16x32xf32>
    tpu.vector_store %arg10[%814, %c0_192, %c0_193], %817 {strides = array<i32>} : memref<16x16x32xf32, #tpu.memory_space<vmem>>, vector<1x16x32xf32>,
    %818 = arith.subf %781, %748 : vector<16x32xf32>
    %819 = vector.broadcast %802 : vector<16x1xf32> to vector<16x32xf32>
    %820 = arith.mulf %819, %818 : vector<16x32xf32>
    %821 = arith.addf %748, %820 : vector<16x32xf32>
    %822 = arith.subf %799, %752 : vector<16x32xf32>
    %823 = vector.broadcast %805 : vector<16x1xf32> to vector<16x32xf32>
    %824 = arith.mulf %823, %822 : vector<16x32xf32>
    %825 = arith.addf %752, %824 : vector<16x32xf32>
    %c11_i32 = arith.constant 11 : i32
    %c15_i32_194 = arith.constant 15 : i32
    %826 = arith.subi %c15_i32_194, %c11_i32 : i32
    %827 = tpu.concatenate %821, %825 in 1 : vector<16x32xf32>, vector<16x32xf32> -> vector<16x64xf32>
    %828 = arith.truncf %827 : vector<16x64xf32> to vector<16x64xbf16>
    %cst_195 = arith.constant dense<0.000000e+00> : vector<16x192xf32>
    %829 = tpu.matmul %828, %18, %cst_195 {dimension_numbers = #tpu.dot_dimension_numbers<[1], [0], [0], [1], [0, 0, 1, 1], [], []>} : vector<16x64xbf16>, vector<64x192xbf16>, vector<16x192xf32> -> vector<16x192xf32>
    %830 = arith.addf %829, %21 : vector<16x192xf32>
    %831 = arith.index_cast %c11_i32 : i32 to index
    %c0_196 = arith.constant 0 : index
    %c0_197 = arith.constant 0 : index
    %832 = vector.load %arg9[%831, %c0_196, %c0_197] : memref<16x16x192xf32, #tpu.memory_space<vmem>>, vector<1x16x192xf32>
    %833 = vector.shape_cast %832 : vector<1x16x192xf32> to vector<16x192xf32>
    %834 = arith.index_cast %826 : i32 to index
    %c0_198 = arith.constant 0 : index
    %c0_199 = arith.constant 0 : index
    %835 = vector.load %arg9[%834, %c0_198, %c0_199] : memref<16x16x192xf32, #tpu.memory_space<vmem>>, vector<1x16x192xf32>
    %836 = vector.shape_cast %835 : vector<1x16x192xf32> to vector<16x192xf32>
    %837 = vector.extract_strided_slice %833 {offsets = [0, 0], sizes = [16, 64], strides = [1, 1]} : vector<16x192xf32> to vector<16x64xf32>
    %838 = vector.extract_strided_slice %830 {offsets = [0, 0], sizes = [16, 64], strides = [1, 1]} : vector<16x192xf32> to vector<16x64xf32>
    %839 = arith.addf %837, %838 : vector<16x64xf32>
    %840 = arith.negf %839 : vector<16x64xf32>
    %841 = math.exp %840 : vector<16x64xf32>
    %cst_200 = arith.constant 1.000000e+00 : f32
    %842 = vector.broadcast %cst_200 : f32 to vector<16x64xf32>
    %843 = arith.addf %842, %841 : vector<16x64xf32>
    %844 = arith.divf %842, %843 : vector<16x64xf32>
    %845 = vector.extract_strided_slice %833 {offsets = [0, 64], sizes = [16, 32], strides = [1, 1]} : vector<16x192xf32> to vector<16x32xf32>
    %846 = vector.extract_strided_slice %844 {offsets = [0, 0], sizes = [16, 32], strides = [1, 1]} : vector<16x64xf32> to vector<16x32xf32>
    %847 = vector.extract_strided_slice %830 {offsets = [0, 64], sizes = [16, 32], strides = [1, 1]} : vector<16x192xf32> to vector<16x32xf32>
    %848 = arith.mulf %846, %847 : vector<16x32xf32>
    %849 = arith.addf %845, %848 : vector<16x32xf32>
    %850 = math.tanh %849 : vector<16x32xf32>
    %851 = vector.extract_strided_slice %844 {offsets = [0, 32], sizes = [16, 32], strides = [1, 1]} : vector<16x64xf32> to vector<16x32xf32>
    %852 = arith.subf %821, %850 : vector<16x32xf32>
    %853 = arith.mulf %851, %852 : vector<16x32xf32>
    %854 = arith.addf %850, %853 : vector<16x32xf32>
    %855 = vector.extract_strided_slice %836 {offsets = [0, 96], sizes = [16, 64], strides = [1, 1]} : vector<16x192xf32> to vector<16x64xf32>
    %856 = vector.extract_strided_slice %830 {offsets = [0, 96], sizes = [16, 64], strides = [1, 1]} : vector<16x192xf32> to vector<16x64xf32>
    %857 = arith.addf %855, %856 : vector<16x64xf32>
    %858 = arith.negf %857 : vector<16x64xf32>
    %859 = math.exp %858 : vector<16x64xf32>
    %cst_201 = arith.constant 1.000000e+00 : f32
    %860 = vector.broadcast %cst_201 : f32 to vector<16x64xf32>
    %861 = arith.addf %860, %859 : vector<16x64xf32>
    %862 = arith.divf %860, %861 : vector<16x64xf32>
    %863 = vector.extract_strided_slice %836 {offsets = [0, 160], sizes = [16, 32], strides = [1, 1]} : vector<16x192xf32> to vector<16x32xf32>
    %864 = vector.extract_strided_slice %862 {offsets = [0, 0], sizes = [16, 32], strides = [1, 1]} : vector<16x64xf32> to vector<16x32xf32>
    %865 = vector.extract_strided_slice %830 {offsets = [0, 160], sizes = [16, 32], strides = [1, 1]} : vector<16x192xf32> to vector<16x32xf32>
    %866 = arith.mulf %864, %865 : vector<16x32xf32>
    %867 = arith.addf %863, %866 : vector<16x32xf32>
    %868 = math.tanh %867 : vector<16x32xf32>
    %869 = vector.extract_strided_slice %862 {offsets = [0, 32], sizes = [16, 32], strides = [1, 1]} : vector<16x64xf32> to vector<16x32xf32>
    %870 = arith.subf %825, %868 : vector<16x32xf32>
    %871 = arith.mulf %869, %870 : vector<16x32xf32>
    %872 = arith.addf %868, %871 : vector<16x32xf32>
    %873 = arith.index_cast %c11_i32 : i32 to index
    %c0_202 = arith.constant 0 : index
    %c0_203 = arith.constant 0 : index
    %874 = vector.load %arg11[%873, %c0_202, %c0_203] : memref<16x16x1xf32, #tpu.memory_space<vmem>>, vector<1x16x1xf32>
    %875 = vector.shape_cast %874 : vector<1x16x1xf32> to vector<16x1xf32>
    %876 = arith.index_cast %826 : i32 to index
    %c0_204 = arith.constant 0 : index
    %c0_205 = arith.constant 0 : index
    %877 = vector.load %arg11[%876, %c0_204, %c0_205] : memref<16x16x1xf32, #tpu.memory_space<vmem>>, vector<1x16x1xf32>
    %878 = vector.shape_cast %877 : vector<1x16x1xf32> to vector<16x1xf32>
    %879 = vector.broadcast %875 : vector<16x1xf32> to vector<16x32xf32>
    %880 = arith.mulf %879, %854 : vector<16x32xf32>
    %881 = arith.index_cast %c11_i32 : i32 to index
    %c0_206 = arith.constant 0 : index
    %c0_207 = arith.constant 0 : index
    %882 = vector.load %arg7[%881, %c0_206, %c0_207] : memref<16x16x32xf32, #tpu.memory_space<vmem>>, vector<1x16x32xf32>
    %883 = vector.shape_cast %882 : vector<1x16x32xf32> to vector<16x32xf32>
    %884 = vector.shape_cast %880 : vector<16x32xf32> to vector<1x16x32xf32>
    tpu.vector_store %arg7[%881, %c0_206, %c0_207], %884 {strides = array<i32>} : memref<16x16x32xf32, #tpu.memory_space<vmem>>, vector<1x16x32xf32>,
    %885 = vector.broadcast %878 : vector<16x1xf32> to vector<16x32xf32>
    %886 = arith.mulf %885, %872 : vector<16x32xf32>
    %887 = arith.index_cast %826 : i32 to index
    %c0_208 = arith.constant 0 : index
    %c0_209 = arith.constant 0 : index
    %888 = vector.load %arg10[%887, %c0_208, %c0_209] : memref<16x16x32xf32, #tpu.memory_space<vmem>>, vector<1x16x32xf32>
    %889 = vector.shape_cast %888 : vector<1x16x32xf32> to vector<16x32xf32>
    %890 = vector.shape_cast %886 : vector<16x32xf32> to vector<1x16x32xf32>
    tpu.vector_store %arg10[%887, %c0_208, %c0_209], %890 {strides = array<i32>} : memref<16x16x32xf32, #tpu.memory_space<vmem>>, vector<1x16x32xf32>,
    %891 = arith.subf %854, %821 : vector<16x32xf32>
    %892 = vector.broadcast %875 : vector<16x1xf32> to vector<16x32xf32>
    %893 = arith.mulf %892, %891 : vector<16x32xf32>
    %894 = arith.addf %821, %893 : vector<16x32xf32>
    %895 = arith.subf %872, %825 : vector<16x32xf32>
    %896 = vector.broadcast %878 : vector<16x1xf32> to vector<16x32xf32>
    %897 = arith.mulf %896, %895 : vector<16x32xf32>
    %898 = arith.addf %825, %897 : vector<16x32xf32>
    %c12_i32 = arith.constant 12 : i32
    %c15_i32_210 = arith.constant 15 : i32
    %899 = arith.subi %c15_i32_210, %c12_i32 : i32
    %900 = tpu.concatenate %894, %898 in 1 : vector<16x32xf32>, vector<16x32xf32> -> vector<16x64xf32>
    %901 = arith.truncf %900 : vector<16x64xf32> to vector<16x64xbf16>
    %cst_211 = arith.constant dense<0.000000e+00> : vector<16x192xf32>
    %902 = tpu.matmul %901, %18, %cst_211 {dimension_numbers = #tpu.dot_dimension_numbers<[1], [0], [0], [1], [0, 0, 1, 1], [], []>} : vector<16x64xbf16>, vector<64x192xbf16>, vector<16x192xf32> -> vector<16x192xf32>
    %903 = arith.addf %902, %21 : vector<16x192xf32>
    %904 = arith.index_cast %c12_i32 : i32 to index
    %c0_212 = arith.constant 0 : index
    %c0_213 = arith.constant 0 : index
    %905 = vector.load %arg9[%904, %c0_212, %c0_213] : memref<16x16x192xf32, #tpu.memory_space<vmem>>, vector<1x16x192xf32>
    %906 = vector.shape_cast %905 : vector<1x16x192xf32> to vector<16x192xf32>
    %907 = arith.index_cast %899 : i32 to index
    %c0_214 = arith.constant 0 : index
    %c0_215 = arith.constant 0 : index
    %908 = vector.load %arg9[%907, %c0_214, %c0_215] : memref<16x16x192xf32, #tpu.memory_space<vmem>>, vector<1x16x192xf32>
    %909 = vector.shape_cast %908 : vector<1x16x192xf32> to vector<16x192xf32>
    %910 = vector.extract_strided_slice %906 {offsets = [0, 0], sizes = [16, 64], strides = [1, 1]} : vector<16x192xf32> to vector<16x64xf32>
    %911 = vector.extract_strided_slice %903 {offsets = [0, 0], sizes = [16, 64], strides = [1, 1]} : vector<16x192xf32> to vector<16x64xf32>
    %912 = arith.addf %910, %911 : vector<16x64xf32>
    %913 = arith.negf %912 : vector<16x64xf32>
    %914 = math.exp %913 : vector<16x64xf32>
    %cst_216 = arith.constant 1.000000e+00 : f32
    %915 = vector.broadcast %cst_216 : f32 to vector<16x64xf32>
    %916 = arith.addf %915, %914 : vector<16x64xf32>
    %917 = arith.divf %915, %916 : vector<16x64xf32>
    %918 = vector.extract_strided_slice %906 {offsets = [0, 64], sizes = [16, 32], strides = [1, 1]} : vector<16x192xf32> to vector<16x32xf32>
    %919 = vector.extract_strided_slice %917 {offsets = [0, 0], sizes = [16, 32], strides = [1, 1]} : vector<16x64xf32> to vector<16x32xf32>
    %920 = vector.extract_strided_slice %903 {offsets = [0, 64], sizes = [16, 32], strides = [1, 1]} : vector<16x192xf32> to vector<16x32xf32>
    %921 = arith.mulf %919, %920 : vector<16x32xf32>
    %922 = arith.addf %918, %921 : vector<16x32xf32>
    %923 = math.tanh %922 : vector<16x32xf32>
    %924 = vector.extract_strided_slice %917 {offsets = [0, 32], sizes = [16, 32], strides = [1, 1]} : vector<16x64xf32> to vector<16x32xf32>
    %925 = arith.subf %894, %923 : vector<16x32xf32>
    %926 = arith.mulf %924, %925 : vector<16x32xf32>
    %927 = arith.addf %923, %926 : vector<16x32xf32>
    %928 = vector.extract_strided_slice %909 {offsets = [0, 96], sizes = [16, 64], strides = [1, 1]} : vector<16x192xf32> to vector<16x64xf32>
    %929 = vector.extract_strided_slice %903 {offsets = [0, 96], sizes = [16, 64], strides = [1, 1]} : vector<16x192xf32> to vector<16x64xf32>
    %930 = arith.addf %928, %929 : vector<16x64xf32>
    %931 = arith.negf %930 : vector<16x64xf32>
    %932 = math.exp %931 : vector<16x64xf32>
    %cst_217 = arith.constant 1.000000e+00 : f32
    %933 = vector.broadcast %cst_217 : f32 to vector<16x64xf32>
    %934 = arith.addf %933, %932 : vector<16x64xf32>
    %935 = arith.divf %933, %934 : vector<16x64xf32>
    %936 = vector.extract_strided_slice %909 {offsets = [0, 160], sizes = [16, 32], strides = [1, 1]} : vector<16x192xf32> to vector<16x32xf32>
    %937 = vector.extract_strided_slice %935 {offsets = [0, 0], sizes = [16, 32], strides = [1, 1]} : vector<16x64xf32> to vector<16x32xf32>
    %938 = vector.extract_strided_slice %903 {offsets = [0, 160], sizes = [16, 32], strides = [1, 1]} : vector<16x192xf32> to vector<16x32xf32>
    %939 = arith.mulf %937, %938 : vector<16x32xf32>
    %940 = arith.addf %936, %939 : vector<16x32xf32>
    %941 = math.tanh %940 : vector<16x32xf32>
    %942 = vector.extract_strided_slice %935 {offsets = [0, 32], sizes = [16, 32], strides = [1, 1]} : vector<16x64xf32> to vector<16x32xf32>
    %943 = arith.subf %898, %941 : vector<16x32xf32>
    %944 = arith.mulf %942, %943 : vector<16x32xf32>
    %945 = arith.addf %941, %944 : vector<16x32xf32>
    %946 = arith.index_cast %c12_i32 : i32 to index
    %c0_218 = arith.constant 0 : index
    %c0_219 = arith.constant 0 : index
    %947 = vector.load %arg11[%946, %c0_218, %c0_219] : memref<16x16x1xf32, #tpu.memory_space<vmem>>, vector<1x16x1xf32>
    %948 = vector.shape_cast %947 : vector<1x16x1xf32> to vector<16x1xf32>
    %949 = arith.index_cast %899 : i32 to index
    %c0_220 = arith.constant 0 : index
    %c0_221 = arith.constant 0 : index
    %950 = vector.load %arg11[%949, %c0_220, %c0_221] : memref<16x16x1xf32, #tpu.memory_space<vmem>>, vector<1x16x1xf32>
    %951 = vector.shape_cast %950 : vector<1x16x1xf32> to vector<16x1xf32>
    %952 = vector.broadcast %948 : vector<16x1xf32> to vector<16x32xf32>
    %953 = arith.mulf %952, %927 : vector<16x32xf32>
    %954 = arith.index_cast %c12_i32 : i32 to index
    %c0_222 = arith.constant 0 : index
    %c0_223 = arith.constant 0 : index
    %955 = vector.load %arg7[%954, %c0_222, %c0_223] : memref<16x16x32xf32, #tpu.memory_space<vmem>>, vector<1x16x32xf32>
    %956 = vector.shape_cast %955 : vector<1x16x32xf32> to vector<16x32xf32>
    %957 = vector.shape_cast %953 : vector<16x32xf32> to vector<1x16x32xf32>
    tpu.vector_store %arg7[%954, %c0_222, %c0_223], %957 {strides = array<i32>} : memref<16x16x32xf32, #tpu.memory_space<vmem>>, vector<1x16x32xf32>,
    %958 = vector.broadcast %951 : vector<16x1xf32> to vector<16x32xf32>
    %959 = arith.mulf %958, %945 : vector<16x32xf32>
    %960 = arith.index_cast %899 : i32 to index
    %c0_224 = arith.constant 0 : index
    %c0_225 = arith.constant 0 : index
    %961 = vector.load %arg10[%960, %c0_224, %c0_225] : memref<16x16x32xf32, #tpu.memory_space<vmem>>, vector<1x16x32xf32>
    %962 = vector.shape_cast %961 : vector<1x16x32xf32> to vector<16x32xf32>
    %963 = vector.shape_cast %959 : vector<16x32xf32> to vector<1x16x32xf32>
    tpu.vector_store %arg10[%960, %c0_224, %c0_225], %963 {strides = array<i32>} : memref<16x16x32xf32, #tpu.memory_space<vmem>>, vector<1x16x32xf32>,
    %964 = arith.subf %927, %894 : vector<16x32xf32>
    %965 = vector.broadcast %948 : vector<16x1xf32> to vector<16x32xf32>
    %966 = arith.mulf %965, %964 : vector<16x32xf32>
    %967 = arith.addf %894, %966 : vector<16x32xf32>
    %968 = arith.subf %945, %898 : vector<16x32xf32>
    %969 = vector.broadcast %951 : vector<16x1xf32> to vector<16x32xf32>
    %970 = arith.mulf %969, %968 : vector<16x32xf32>
    %971 = arith.addf %898, %970 : vector<16x32xf32>
    %c13_i32 = arith.constant 13 : i32
    %c15_i32_226 = arith.constant 15 : i32
    %972 = arith.subi %c15_i32_226, %c13_i32 : i32
    %973 = tpu.concatenate %967, %971 in 1 : vector<16x32xf32>, vector<16x32xf32> -> vector<16x64xf32>
    %974 = arith.truncf %973 : vector<16x64xf32> to vector<16x64xbf16>
    %cst_227 = arith.constant dense<0.000000e+00> : vector<16x192xf32>
    %975 = tpu.matmul %974, %18, %cst_227 {dimension_numbers = #tpu.dot_dimension_numbers<[1], [0], [0], [1], [0, 0, 1, 1], [], []>} : vector<16x64xbf16>, vector<64x192xbf16>, vector<16x192xf32> -> vector<16x192xf32>
    %976 = arith.addf %975, %21 : vector<16x192xf32>
    %977 = arith.index_cast %c13_i32 : i32 to index
    %c0_228 = arith.constant 0 : index
    %c0_229 = arith.constant 0 : index
    %978 = vector.load %arg9[%977, %c0_228, %c0_229] : memref<16x16x192xf32, #tpu.memory_space<vmem>>, vector<1x16x192xf32>
    %979 = vector.shape_cast %978 : vector<1x16x192xf32> to vector<16x192xf32>
    %980 = arith.index_cast %972 : i32 to index
    %c0_230 = arith.constant 0 : index
    %c0_231 = arith.constant 0 : index
    %981 = vector.load %arg9[%980, %c0_230, %c0_231] : memref<16x16x192xf32, #tpu.memory_space<vmem>>, vector<1x16x192xf32>
    %982 = vector.shape_cast %981 : vector<1x16x192xf32> to vector<16x192xf32>
    %983 = vector.extract_strided_slice %979 {offsets = [0, 0], sizes = [16, 64], strides = [1, 1]} : vector<16x192xf32> to vector<16x64xf32>
    %984 = vector.extract_strided_slice %976 {offsets = [0, 0], sizes = [16, 64], strides = [1, 1]} : vector<16x192xf32> to vector<16x64xf32>
    %985 = arith.addf %983, %984 : vector<16x64xf32>
    %986 = arith.negf %985 : vector<16x64xf32>
    %987 = math.exp %986 : vector<16x64xf32>
    %cst_232 = arith.constant 1.000000e+00 : f32
    %988 = vector.broadcast %cst_232 : f32 to vector<16x64xf32>
    %989 = arith.addf %988, %987 : vector<16x64xf32>
    %990 = arith.divf %988, %989 : vector<16x64xf32>
    %991 = vector.extract_strided_slice %979 {offsets = [0, 64], sizes = [16, 32], strides = [1, 1]} : vector<16x192xf32> to vector<16x32xf32>
    %992 = vector.extract_strided_slice %990 {offsets = [0, 0], sizes = [16, 32], strides = [1, 1]} : vector<16x64xf32> to vector<16x32xf32>
    %993 = vector.extract_strided_slice %976 {offsets = [0, 64], sizes = [16, 32], strides = [1, 1]} : vector<16x192xf32> to vector<16x32xf32>
    %994 = arith.mulf %992, %993 : vector<16x32xf32>
    %995 = arith.addf %991, %994 : vector<16x32xf32>
    %996 = math.tanh %995 : vector<16x32xf32>
    %997 = vector.extract_strided_slice %990 {offsets = [0, 32], sizes = [16, 32], strides = [1, 1]} : vector<16x64xf32> to vector<16x32xf32>
    %998 = arith.subf %967, %996 : vector<16x32xf32>
    %999 = arith.mulf %997, %998 : vector<16x32xf32>
    %1000 = arith.addf %996, %999 : vector<16x32xf32>
    %1001 = vector.extract_strided_slice %982 {offsets = [0, 96], sizes = [16, 64], strides = [1, 1]} : vector<16x192xf32> to vector<16x64xf32>
    %1002 = vector.extract_strided_slice %976 {offsets = [0, 96], sizes = [16, 64], strides = [1, 1]} : vector<16x192xf32> to vector<16x64xf32>
    %1003 = arith.addf %1001, %1002 : vector<16x64xf32>
    %1004 = arith.negf %1003 : vector<16x64xf32>
    %1005 = math.exp %1004 : vector<16x64xf32>
    %cst_233 = arith.constant 1.000000e+00 : f32
    %1006 = vector.broadcast %cst_233 : f32 to vector<16x64xf32>
    %1007 = arith.addf %1006, %1005 : vector<16x64xf32>
    %1008 = arith.divf %1006, %1007 : vector<16x64xf32>
    %1009 = vector.extract_strided_slice %982 {offsets = [0, 160], sizes = [16, 32], strides = [1, 1]} : vector<16x192xf32> to vector<16x32xf32>
    %1010 = vector.extract_strided_slice %1008 {offsets = [0, 0], sizes = [16, 32], strides = [1, 1]} : vector<16x64xf32> to vector<16x32xf32>
    %1011 = vector.extract_strided_slice %976 {offsets = [0, 160], sizes = [16, 32], strides = [1, 1]} : vector<16x192xf32> to vector<16x32xf32>
    %1012 = arith.mulf %1010, %1011 : vector<16x32xf32>
    %1013 = arith.addf %1009, %1012 : vector<16x32xf32>
    %1014 = math.tanh %1013 : vector<16x32xf32>
    %1015 = vector.extract_strided_slice %1008 {offsets = [0, 32], sizes = [16, 32], strides = [1, 1]} : vector<16x64xf32> to vector<16x32xf32>
    %1016 = arith.subf %971, %1014 : vector<16x32xf32>
    %1017 = arith.mulf %1015, %1016 : vector<16x32xf32>
    %1018 = arith.addf %1014, %1017 : vector<16x32xf32>
    %1019 = arith.index_cast %c13_i32 : i32 to index
    %c0_234 = arith.constant 0 : index
    %c0_235 = arith.constant 0 : index
    %1020 = vector.load %arg11[%1019, %c0_234, %c0_235] : memref<16x16x1xf32, #tpu.memory_space<vmem>>, vector<1x16x1xf32>
    %1021 = vector.shape_cast %1020 : vector<1x16x1xf32> to vector<16x1xf32>
    %1022 = arith.index_cast %972 : i32 to index
    %c0_236 = arith.constant 0 : index
    %c0_237 = arith.constant 0 : index
    %1023 = vector.load %arg11[%1022, %c0_236, %c0_237] : memref<16x16x1xf32, #tpu.memory_space<vmem>>, vector<1x16x1xf32>
    %1024 = vector.shape_cast %1023 : vector<1x16x1xf32> to vector<16x1xf32>
    %1025 = vector.broadcast %1021 : vector<16x1xf32> to vector<16x32xf32>
    %1026 = arith.mulf %1025, %1000 : vector<16x32xf32>
    %1027 = arith.index_cast %c13_i32 : i32 to index
    %c0_238 = arith.constant 0 : index
    %c0_239 = arith.constant 0 : index
    %1028 = vector.load %arg7[%1027, %c0_238, %c0_239] : memref<16x16x32xf32, #tpu.memory_space<vmem>>, vector<1x16x32xf32>
    %1029 = vector.shape_cast %1028 : vector<1x16x32xf32> to vector<16x32xf32>
    %1030 = vector.shape_cast %1026 : vector<16x32xf32> to vector<1x16x32xf32>
    tpu.vector_store %arg7[%1027, %c0_238, %c0_239], %1030 {strides = array<i32>} : memref<16x16x32xf32, #tpu.memory_space<vmem>>, vector<1x16x32xf32>,
    %1031 = vector.broadcast %1024 : vector<16x1xf32> to vector<16x32xf32>
    %1032 = arith.mulf %1031, %1018 : vector<16x32xf32>
    %1033 = arith.index_cast %972 : i32 to index
    %c0_240 = arith.constant 0 : index
    %c0_241 = arith.constant 0 : index
    %1034 = vector.load %arg10[%1033, %c0_240, %c0_241] : memref<16x16x32xf32, #tpu.memory_space<vmem>>, vector<1x16x32xf32>
    %1035 = vector.shape_cast %1034 : vector<1x16x32xf32> to vector<16x32xf32>
    %1036 = vector.shape_cast %1032 : vector<16x32xf32> to vector<1x16x32xf32>
    tpu.vector_store %arg10[%1033, %c0_240, %c0_241], %1036 {strides = array<i32>} : memref<16x16x32xf32, #tpu.memory_space<vmem>>, vector<1x16x32xf32>,
    %1037 = arith.subf %1000, %967 : vector<16x32xf32>
    %1038 = vector.broadcast %1021 : vector<16x1xf32> to vector<16x32xf32>
    %1039 = arith.mulf %1038, %1037 : vector<16x32xf32>
    %1040 = arith.addf %967, %1039 : vector<16x32xf32>
    %1041 = arith.subf %1018, %971 : vector<16x32xf32>
    %1042 = vector.broadcast %1024 : vector<16x1xf32> to vector<16x32xf32>
    %1043 = arith.mulf %1042, %1041 : vector<16x32xf32>
    %1044 = arith.addf %971, %1043 : vector<16x32xf32>
    %c14_i32 = arith.constant 14 : i32
    %c15_i32_242 = arith.constant 15 : i32
    %1045 = arith.subi %c15_i32_242, %c14_i32 : i32
    %1046 = tpu.concatenate %1040, %1044 in 1 : vector<16x32xf32>, vector<16x32xf32> -> vector<16x64xf32>
    %1047 = arith.truncf %1046 : vector<16x64xf32> to vector<16x64xbf16>
    %cst_243 = arith.constant dense<0.000000e+00> : vector<16x192xf32>
    %1048 = tpu.matmul %1047, %18, %cst_243 {dimension_numbers = #tpu.dot_dimension_numbers<[1], [0], [0], [1], [0, 0, 1, 1], [], []>} : vector<16x64xbf16>, vector<64x192xbf16>, vector<16x192xf32> -> vector<16x192xf32>
    %1049 = arith.addf %1048, %21 : vector<16x192xf32>
    %1050 = arith.index_cast %c14_i32 : i32 to index
    %c0_244 = arith.constant 0 : index
    %c0_245 = arith.constant 0 : index
    %1051 = vector.load %arg9[%1050, %c0_244, %c0_245] : memref<16x16x192xf32, #tpu.memory_space<vmem>>, vector<1x16x192xf32>
    %1052 = vector.shape_cast %1051 : vector<1x16x192xf32> to vector<16x192xf32>
    %1053 = arith.index_cast %1045 : i32 to index
    %c0_246 = arith.constant 0 : index
    %c0_247 = arith.constant 0 : index
    %1054 = vector.load %arg9[%1053, %c0_246, %c0_247] : memref<16x16x192xf32, #tpu.memory_space<vmem>>, vector<1x16x192xf32>
    %1055 = vector.shape_cast %1054 : vector<1x16x192xf32> to vector<16x192xf32>
    %1056 = vector.extract_strided_slice %1052 {offsets = [0, 0], sizes = [16, 64], strides = [1, 1]} : vector<16x192xf32> to vector<16x64xf32>
    %1057 = vector.extract_strided_slice %1049 {offsets = [0, 0], sizes = [16, 64], strides = [1, 1]} : vector<16x192xf32> to vector<16x64xf32>
    %1058 = arith.addf %1056, %1057 : vector<16x64xf32>
    %1059 = arith.negf %1058 : vector<16x64xf32>
    %1060 = math.exp %1059 : vector<16x64xf32>
    %cst_248 = arith.constant 1.000000e+00 : f32
    %1061 = vector.broadcast %cst_248 : f32 to vector<16x64xf32>
    %1062 = arith.addf %1061, %1060 : vector<16x64xf32>
    %1063 = arith.divf %1061, %1062 : vector<16x64xf32>
    %1064 = vector.extract_strided_slice %1052 {offsets = [0, 64], sizes = [16, 32], strides = [1, 1]} : vector<16x192xf32> to vector<16x32xf32>
    %1065 = vector.extract_strided_slice %1063 {offsets = [0, 0], sizes = [16, 32], strides = [1, 1]} : vector<16x64xf32> to vector<16x32xf32>
    %1066 = vector.extract_strided_slice %1049 {offsets = [0, 64], sizes = [16, 32], strides = [1, 1]} : vector<16x192xf32> to vector<16x32xf32>
    %1067 = arith.mulf %1065, %1066 : vector<16x32xf32>
    %1068 = arith.addf %1064, %1067 : vector<16x32xf32>
    %1069 = math.tanh %1068 : vector<16x32xf32>
    %1070 = vector.extract_strided_slice %1063 {offsets = [0, 32], sizes = [16, 32], strides = [1, 1]} : vector<16x64xf32> to vector<16x32xf32>
    %1071 = arith.subf %1040, %1069 : vector<16x32xf32>
    %1072 = arith.mulf %1070, %1071 : vector<16x32xf32>
    %1073 = arith.addf %1069, %1072 : vector<16x32xf32>
    %1074 = vector.extract_strided_slice %1055 {offsets = [0, 96], sizes = [16, 64], strides = [1, 1]} : vector<16x192xf32> to vector<16x64xf32>
    %1075 = vector.extract_strided_slice %1049 {offsets = [0, 96], sizes = [16, 64], strides = [1, 1]} : vector<16x192xf32> to vector<16x64xf32>
    %1076 = arith.addf %1074, %1075 : vector<16x64xf32>
    %1077 = arith.negf %1076 : vector<16x64xf32>
    %1078 = math.exp %1077 : vector<16x64xf32>
    %cst_249 = arith.constant 1.000000e+00 : f32
    %1079 = vector.broadcast %cst_249 : f32 to vector<16x64xf32>
    %1080 = arith.addf %1079, %1078 : vector<16x64xf32>
    %1081 = arith.divf %1079, %1080 : vector<16x64xf32>
    %1082 = vector.extract_strided_slice %1055 {offsets = [0, 160], sizes = [16, 32], strides = [1, 1]} : vector<16x192xf32> to vector<16x32xf32>
    %1083 = vector.extract_strided_slice %1081 {offsets = [0, 0], sizes = [16, 32], strides = [1, 1]} : vector<16x64xf32> to vector<16x32xf32>
    %1084 = vector.extract_strided_slice %1049 {offsets = [0, 160], sizes = [16, 32], strides = [1, 1]} : vector<16x192xf32> to vector<16x32xf32>
    %1085 = arith.mulf %1083, %1084 : vector<16x32xf32>
    %1086 = arith.addf %1082, %1085 : vector<16x32xf32>
    %1087 = math.tanh %1086 : vector<16x32xf32>
    %1088 = vector.extract_strided_slice %1081 {offsets = [0, 32], sizes = [16, 32], strides = [1, 1]} : vector<16x64xf32> to vector<16x32xf32>
    %1089 = arith.subf %1044, %1087 : vector<16x32xf32>
    %1090 = arith.mulf %1088, %1089 : vector<16x32xf32>
    %1091 = arith.addf %1087, %1090 : vector<16x32xf32>
    %1092 = arith.index_cast %c14_i32 : i32 to index
    %c0_250 = arith.constant 0 : index
    %c0_251 = arith.constant 0 : index
    %1093 = vector.load %arg11[%1092, %c0_250, %c0_251] : memref<16x16x1xf32, #tpu.memory_space<vmem>>, vector<1x16x1xf32>
    %1094 = vector.shape_cast %1093 : vector<1x16x1xf32> to vector<16x1xf32>
    %1095 = arith.index_cast %1045 : i32 to index
    %c0_252 = arith.constant 0 : index
    %c0_253 = arith.constant 0 : index
    %1096 = vector.load %arg11[%1095, %c0_252, %c0_253] : memref<16x16x1xf32, #tpu.memory_space<vmem>>, vector<1x16x1xf32>
    %1097 = vector.shape_cast %1096 : vector<1x16x1xf32> to vector<16x1xf32>
    %1098 = vector.broadcast %1094 : vector<16x1xf32> to vector<16x32xf32>
    %1099 = arith.mulf %1098, %1073 : vector<16x32xf32>
    %1100 = arith.index_cast %c14_i32 : i32 to index
    %c0_254 = arith.constant 0 : index
    %c0_255 = arith.constant 0 : index
    %1101 = vector.load %arg7[%1100, %c0_254, %c0_255] : memref<16x16x32xf32, #tpu.memory_space<vmem>>, vector<1x16x32xf32>
    %1102 = vector.shape_cast %1101 : vector<1x16x32xf32> to vector<16x32xf32>
    %1103 = vector.shape_cast %1099 : vector<16x32xf32> to vector<1x16x32xf32>
    tpu.vector_store %arg7[%1100, %c0_254, %c0_255], %1103 {strides = array<i32>} : memref<16x16x32xf32, #tpu.memory_space<vmem>>, vector<1x16x32xf32>,
    %1104 = vector.broadcast %1097 : vector<16x1xf32> to vector<16x32xf32>
    %1105 = arith.mulf %1104, %1091 : vector<16x32xf32>
    %1106 = arith.index_cast %1045 : i32 to index
    %c0_256 = arith.constant 0 : index
    %c0_257 = arith.constant 0 : index
    %1107 = vector.load %arg10[%1106, %c0_256, %c0_257] : memref<16x16x32xf32, #tpu.memory_space<vmem>>, vector<1x16x32xf32>
    %1108 = vector.shape_cast %1107 : vector<1x16x32xf32> to vector<16x32xf32>
    %1109 = vector.shape_cast %1105 : vector<16x32xf32> to vector<1x16x32xf32>
    tpu.vector_store %arg10[%1106, %c0_256, %c0_257], %1109 {strides = array<i32>} : memref<16x16x32xf32, #tpu.memory_space<vmem>>, vector<1x16x32xf32>,
    %1110 = arith.subf %1073, %1040 : vector<16x32xf32>
    %1111 = vector.broadcast %1094 : vector<16x1xf32> to vector<16x32xf32>
    %1112 = arith.mulf %1111, %1110 : vector<16x32xf32>
    %1113 = arith.addf %1040, %1112 : vector<16x32xf32>
    %1114 = arith.subf %1091, %1044 : vector<16x32xf32>
    %1115 = vector.broadcast %1097 : vector<16x1xf32> to vector<16x32xf32>
    %1116 = arith.mulf %1115, %1114 : vector<16x32xf32>
    %1117 = arith.addf %1044, %1116 : vector<16x32xf32>
    %c15_i32_258 = arith.constant 15 : i32
    %c15_i32_259 = arith.constant 15 : i32
    %1118 = arith.subi %c15_i32_259, %c15_i32_258 : i32
    %1119 = tpu.concatenate %1113, %1117 in 1 : vector<16x32xf32>, vector<16x32xf32> -> vector<16x64xf32>
    %1120 = arith.truncf %1119 : vector<16x64xf32> to vector<16x64xbf16>
    %cst_260 = arith.constant dense<0.000000e+00> : vector<16x192xf32>
    %1121 = tpu.matmul %1120, %18, %cst_260 {dimension_numbers = #tpu.dot_dimension_numbers<[1], [0], [0], [1], [0, 0, 1, 1], [], []>} : vector<16x64xbf16>, vector<64x192xbf16>, vector<16x192xf32> -> vector<16x192xf32>
    %1122 = arith.addf %1121, %21 : vector<16x192xf32>
    %1123 = arith.index_cast %c15_i32_258 : i32 to index
    %c0_261 = arith.constant 0 : index
    %c0_262 = arith.constant 0 : index
    %1124 = vector.load %arg9[%1123, %c0_261, %c0_262] : memref<16x16x192xf32, #tpu.memory_space<vmem>>, vector<1x16x192xf32>
    %1125 = vector.shape_cast %1124 : vector<1x16x192xf32> to vector<16x192xf32>
    %1126 = arith.index_cast %1118 : i32 to index
    %c0_263 = arith.constant 0 : index
    %c0_264 = arith.constant 0 : index
    %1127 = vector.load %arg9[%1126, %c0_263, %c0_264] : memref<16x16x192xf32, #tpu.memory_space<vmem>>, vector<1x16x192xf32>
    %1128 = vector.shape_cast %1127 : vector<1x16x192xf32> to vector<16x192xf32>
    %1129 = vector.extract_strided_slice %1125 {offsets = [0, 0], sizes = [16, 64], strides = [1, 1]} : vector<16x192xf32> to vector<16x64xf32>
    %1130 = vector.extract_strided_slice %1122 {offsets = [0, 0], sizes = [16, 64], strides = [1, 1]} : vector<16x192xf32> to vector<16x64xf32>
    %1131 = arith.addf %1129, %1130 : vector<16x64xf32>
    %1132 = arith.negf %1131 : vector<16x64xf32>
    %1133 = math.exp %1132 : vector<16x64xf32>
    %cst_265 = arith.constant 1.000000e+00 : f32
    %1134 = vector.broadcast %cst_265 : f32 to vector<16x64xf32>
    %1135 = arith.addf %1134, %1133 : vector<16x64xf32>
    %1136 = arith.divf %1134, %1135 : vector<16x64xf32>
    %1137 = vector.extract_strided_slice %1125 {offsets = [0, 64], sizes = [16, 32], strides = [1, 1]} : vector<16x192xf32> to vector<16x32xf32>
    %1138 = vector.extract_strided_slice %1136 {offsets = [0, 0], sizes = [16, 32], strides = [1, 1]} : vector<16x64xf32> to vector<16x32xf32>
    %1139 = vector.extract_strided_slice %1122 {offsets = [0, 64], sizes = [16, 32], strides = [1, 1]} : vector<16x192xf32> to vector<16x32xf32>
    %1140 = arith.mulf %1138, %1139 : vector<16x32xf32>
    %1141 = arith.addf %1137, %1140 : vector<16x32xf32>
    %1142 = math.tanh %1141 : vector<16x32xf32>
    %1143 = vector.extract_strided_slice %1136 {offsets = [0, 32], sizes = [16, 32], strides = [1, 1]} : vector<16x64xf32> to vector<16x32xf32>
    %1144 = arith.subf %1113, %1142 : vector<16x32xf32>
    %1145 = arith.mulf %1143, %1144 : vector<16x32xf32>
    %1146 = arith.addf %1142, %1145 : vector<16x32xf32>
    %1147 = vector.extract_strided_slice %1128 {offsets = [0, 96], sizes = [16, 64], strides = [1, 1]} : vector<16x192xf32> to vector<16x64xf32>
    %1148 = vector.extract_strided_slice %1122 {offsets = [0, 96], sizes = [16, 64], strides = [1, 1]} : vector<16x192xf32> to vector<16x64xf32>
    %1149 = arith.addf %1147, %1148 : vector<16x64xf32>
    %1150 = arith.negf %1149 : vector<16x64xf32>
    %1151 = math.exp %1150 : vector<16x64xf32>
    %cst_266 = arith.constant 1.000000e+00 : f32
    %1152 = vector.broadcast %cst_266 : f32 to vector<16x64xf32>
    %1153 = arith.addf %1152, %1151 : vector<16x64xf32>
    %1154 = arith.divf %1152, %1153 : vector<16x64xf32>
    %1155 = vector.extract_strided_slice %1128 {offsets = [0, 160], sizes = [16, 32], strides = [1, 1]} : vector<16x192xf32> to vector<16x32xf32>
    %1156 = vector.extract_strided_slice %1154 {offsets = [0, 0], sizes = [16, 32], strides = [1, 1]} : vector<16x64xf32> to vector<16x32xf32>
    %1157 = vector.extract_strided_slice %1122 {offsets = [0, 160], sizes = [16, 32], strides = [1, 1]} : vector<16x192xf32> to vector<16x32xf32>
    %1158 = arith.mulf %1156, %1157 : vector<16x32xf32>
    %1159 = arith.addf %1155, %1158 : vector<16x32xf32>
    %1160 = math.tanh %1159 : vector<16x32xf32>
    %1161 = vector.extract_strided_slice %1154 {offsets = [0, 32], sizes = [16, 32], strides = [1, 1]} : vector<16x64xf32> to vector<16x32xf32>
    %1162 = arith.subf %1117, %1160 : vector<16x32xf32>
    %1163 = arith.mulf %1161, %1162 : vector<16x32xf32>
    %1164 = arith.addf %1160, %1163 : vector<16x32xf32>
    %1165 = arith.index_cast %c15_i32_258 : i32 to index
    %c0_267 = arith.constant 0 : index
    %c0_268 = arith.constant 0 : index
    %1166 = vector.load %arg11[%1165, %c0_267, %c0_268] : memref<16x16x1xf32, #tpu.memory_space<vmem>>, vector<1x16x1xf32>
    %1167 = vector.shape_cast %1166 : vector<1x16x1xf32> to vector<16x1xf32>
    %1168 = arith.index_cast %1118 : i32 to index
    %c0_269 = arith.constant 0 : index
    %c0_270 = arith.constant 0 : index
    %1169 = vector.load %arg11[%1168, %c0_269, %c0_270] : memref<16x16x1xf32, #tpu.memory_space<vmem>>, vector<1x16x1xf32>
    %1170 = vector.shape_cast %1169 : vector<1x16x1xf32> to vector<16x1xf32>
    %1171 = vector.broadcast %1167 : vector<16x1xf32> to vector<16x32xf32>
    %1172 = arith.mulf %1171, %1146 : vector<16x32xf32>
    %1173 = arith.index_cast %c15_i32_258 : i32 to index
    %c0_271 = arith.constant 0 : index
    %c0_272 = arith.constant 0 : index
    %1174 = vector.load %arg7[%1173, %c0_271, %c0_272] : memref<16x16x32xf32, #tpu.memory_space<vmem>>, vector<1x16x32xf32>
    %1175 = vector.shape_cast %1174 : vector<1x16x32xf32> to vector<16x32xf32>
    %1176 = vector.shape_cast %1172 : vector<16x32xf32> to vector<1x16x32xf32>
    tpu.vector_store %arg7[%1173, %c0_271, %c0_272], %1176 {strides = array<i32>} : memref<16x16x32xf32, #tpu.memory_space<vmem>>, vector<1x16x32xf32>,
    %1177 = vector.broadcast %1170 : vector<16x1xf32> to vector<16x32xf32>
    %1178 = arith.mulf %1177, %1164 : vector<16x32xf32>
    %1179 = arith.index_cast %1118 : i32 to index
    %c0_273 = arith.constant 0 : index
    %c0_274 = arith.constant 0 : index
    %1180 = vector.load %arg10[%1179, %c0_273, %c0_274] : memref<16x16x32xf32, #tpu.memory_space<vmem>>, vector<1x16x32xf32>
    %1181 = vector.shape_cast %1180 : vector<1x16x32xf32> to vector<16x32xf32>
    %1182 = vector.shape_cast %1178 : vector<16x32xf32> to vector<1x16x32xf32>
    tpu.vector_store %arg10[%1179, %c0_273, %c0_274], %1182 {strides = array<i32>} : memref<16x16x32xf32, #tpu.memory_space<vmem>>, vector<1x16x32xf32>,
    %1183 = arith.subf %1146, %1113 : vector<16x32xf32>
    %1184 = vector.broadcast %1167 : vector<16x1xf32> to vector<16x32xf32>
    %1185 = arith.mulf %1184, %1183 : vector<16x32xf32>
    %1186 = arith.addf %1113, %1185 : vector<16x32xf32>
    %1187 = arith.subf %1164, %1117 : vector<16x32xf32>
    %1188 = vector.broadcast %1170 : vector<16x1xf32> to vector<16x32xf32>
    %1189 = arith.mulf %1188, %1187 : vector<16x32xf32>
    %1190 = arith.addf %1117, %1189 : vector<16x32xf32>
    %c16_i32 = arith.constant 16 : i32
    %c0_275 = arith.constant 0 : index
    %c0_276 = arith.constant 0 : index
    %c0_277 = arith.constant 0 : index
    %1191 = vector.load %arg7[%c0_275, %c0_276, %c0_277] : memref<16x16x32xf32, #tpu.memory_space<vmem>>, vector<16x16x32xf32>
    %c0_278 = arith.constant 0 : index
    %c0_279 = arith.constant 0 : index
    %c0_280 = arith.constant 0 : index
    %1192 = vector.load %arg10[%c0_278, %c0_279, %c0_280] : memref<16x16x32xf32, #tpu.memory_space<vmem>>, vector<16x16x32xf32>
    %1193 = arith.addf %1191, %1192 : vector<16x16x32xf32>
    %c0_281 = arith.constant 0 : index
    %c0_282 = arith.constant 0 : index
    %c0_283 = arith.constant 0 : index
    %1194 = vector.load %arg7[%c0_281, %c0_282, %c0_283] : memref<16x16x32xf32, #tpu.memory_space<vmem>>, vector<16x16x32xf32>
    tpu.vector_store %arg7[%c0_281, %c0_282, %c0_283], %1193 {strides = array<i32>} : memref<16x16x32xf32, #tpu.memory_space<vmem>>, vector<16x16x32xf32>,
    %1195 = arith.addf %1186, %1190 : vector<16x32xf32>
    %c0_284 = arith.constant 0 : index
    %c0_285 = arith.constant 0 : index
    %c0_286 = arith.constant 0 : index
    %1196 = vector.load %arg8[%c0_284, %c0_285, %c0_286] : memref<1x16x32xf32, #tpu.memory_space<vmem>>, vector<1x16x32xf32>
    %1197 = vector.shape_cast %1196 : vector<1x16x32xf32> to vector<16x32xf32>
    %1198 = vector.shape_cast %1195 : vector<16x32xf32> to vector<1x16x32xf32>
    tpu.vector_store %arg8[%c0_284, %c0_285, %c0_286], %1198 {strides = array<i32>} : memref<1x16x32xf32, #tpu.memory_space<vmem>>, vector<1x16x32xf32>,
    return
  }
  func.func @transform_0(%arg0: i32) -> (i32, i32, i32) {
    %c0_i32 = arith.constant 0 : i32
    %c0_i32_0 = arith.constant 0 : i32
    %c0_i32_1 = arith.constant 0 : i32
    return %c0_i32, %arg0, %c0_i32_0 : i32, i32, i32
  }
  func.func @transform_1(%arg0: i32) -> (i32, i32) {
    %c0_i32 = arith.constant 0 : i32
    %c0_i32_0 = arith.constant 0 : i32
    return %arg0, %c0_i32 : i32, i32
  }
  func.func @transform_2(%arg0: i32) -> (i32, i32) {
    %c0_i32 = arith.constant 0 : i32
    %c0_i32_0 = arith.constant 0 : i32
    %c0_i32_1 = arith.constant 0 : i32
    return %c0_i32, %c0_i32_0 : i32, i32
  }
  func.func @transform_3(%arg0: i32) -> (i32, i32) {
    %c0_i32 = arith.constant 0 : i32
    %c0_i32_0 = arith.constant 0 : i32
    %c0_i32_1 = arith.constant 0 : i32
    return %c0_i32, %c0_i32_0 : i32, i32
  }
  func.func @transform_4(%arg0: i32) -> (i32, i32) {
    %c0_i32 = arith.constant 0 : i32
    %c0_i32_0 = arith.constant 0 : i32
    %c0_i32_1 = arith.constant 0 : i32
    return %c0_i32, %c0_i32_0 : i32, i32
  }
  func.func @transform_5(%arg0: i32) -> (i32, i32) {
    %c0_i32 = arith.constant 0 : i32
    %c0_i32_0 = arith.constant 0 : i32
    %c0_i32_1 = arith.constant 0 : i32
    return %c0_i32, %c0_i32_0 : i32, i32
  }
  func.func @transform_6(%arg0: i32) -> (i32, i32, i32) {
    %c0_i32 = arith.constant 0 : i32
    %c0_i32_0 = arith.constant 0 : i32
    %c0_i32_1 = arith.constant 0 : i32
    return %c0_i32, %arg0, %c0_i32_0 : i32, i32, i32
  }
  func.func @transform_7(%arg0: i32) -> (i32, i32, i32) {
    %c0_i32 = arith.constant 0 : i32
    %c0_i32_0 = arith.constant 0 : i32
    %c0_i32_1 = arith.constant 0 : i32
    return %c0_i32, %arg0, %c0_i32_0 : i32, i32, i32
  }
}

</mosaic_0001>

<bundles_post_ra>
// kernel: tpu_custom_call.1
= control target key start
LH: loop header
LB: loop body
LE: loop exit
PB: predicated region body
PF: predicated region fallthrough
CT: control target
= control target key end

     0   :  { %13 = vsyncpa [#allocation6], 0  ;;  %s8193_s0 = inlined_call_operand.hbm [shape: f32[16,16,32], index: 0, kind: input, shape index: {}]   ;;  %s8194_s1 = inlined_call_operand.vmem [shape: s32[16,1], index: 1, kind: input, shape index: {}]   ;;  %s8195_s2 = inlined_call_operand.hbm [shape: bf16[32,192], index: 2, kind: input, shape index: {}]   ;;  %s8196_s3 = inlined_call_operand.vmem [shape: f32[1,192], index: 3, kind: input, shape index: {}]   ;;  %s8197_s4 = inlined_call_operand.hbm [shape: bf16[64,192], index: 4, kind: input, shape index: {}]   ;;  %s8198_s5 = inlined_call_operand.vmem [shape: f32[1,192], index: 5, kind: input, shape index: {}]   ;;  %s8199_s6 = inlined_call_operand.hbm [shape: f32[16,16,32], index: 6, kind: output, shape index: {0}]   ;;  %s8200_s7 = inlined_call_operand.hbm [shape: f32[1,16,32], index: 7, kind: output, shape index: {1}]  }
   0x1   :  { %14 = vsyncpa [#allocation9], 0 }
   0x2   :  { %15 = vsyncpa [#allocation7], 0 }
   0x3   :  { %16 = vsyncpa [#allocation13], 0  ;;  %s5866_s24 = smov [#allocation8]   ;;  %s5867_s26 = smov [#allocation5]  }
   0x4   :  { %s36_s25 = sshll.u32 %s5866_s24, 4  ;;  %s22_s27 = sshll.u32 %s5867_s26, 4  ;;  %s37_s25 = int_to_ptr.vmem [resolvable:$true] %s36_s25  ;;  %s5919_s27 = int_to_ptr.vmem [resolvable:$true] %s22_s27 }
   0x5   :  { %s5748_s30 = scalar_lea.hbm %s8195_s2, 512 }
   0x6   :  { %p5749_p0 = scmp.ne.s32.totalorder %s8195_s2, %s5748_s30  ;;  %p5752_p1 = scmp.lt.u32.totalorder %s5748_s30, %s8195_s2 }
   0x8   :  { %p5754_p2 = pnand %p5752_p1, %p5749_p0 }
   0xa   :  { %5757 = shalt.err (!%p5754_p2)
}
   0xb   :  { %s5758_s12 = scalar_lea.vmem %s37_s25, 512  ;;  %p5763_p4 = scmp.lt.s32.totalorder %s37_s25, %s37_s25 }
   0xc   :  { %p5759_p3 = scmp.ne.s32.totalorder %s37_s25, %s5758_s12  ;;  %p5764_p5 = scmp.lt.s32.totalorder %s5758_s12, %s5758_s12 }
   0xe   :  { %p5765_p6 = por %p5764_p5, %p5763_p4 }
  0x10   :  { %p5766_p7 = pnand %p5765_p6, %p5759_p3 }
  0x12   :  { %5769 = shalt.err (!%p5766_p7)
}
  0x13   :  { %s5868_s13 = smov 128   ;;  %s5869_s14 = smov 8  }
  0x14   :  { %42 = dma.hbm_to_vmem [thread:$0]  %s8195_s2, 512, %s37_s25, [#allocation9], %s5868_s13, %s5868_s13, %s5869_s14  }
  0x15   :  { %s5770_s19 = scalar_lea.hbm %s8193_s0, 4096 }
  0x16   :  { %p5771_p8 = scmp.ne.s32.totalorder %s8193_s0, %s5770_s19  ;;  %p5774_p9 = scmp.lt.u32.totalorder %s5770_s19, %s8193_s0 }
  0x18   :  { %p5776_p10 = pnand %p5774_p9, %p5771_p8 }
  0x1a   :  { %5779 = shalt.err (!%p5776_p10)
}
  0x1b   :  { %s5780_s24 = scalar_lea.vmem %s5919_s27, 4096  ;;  %p5785_p12 = scmp.lt.s32.totalorder %s5919_s27, %s5919_s27 }
  0x1c   :  { %p5781_p11 = scmp.ne.s32.totalorder %s5919_s27, %s5780_s24  ;;  %p5786_p13 = scmp.lt.s32.totalorder %s5780_s24, %s5780_s24 }
  0x1e   :  { %p5787_p0 = por %p5786_p13, %p5785_p12 }
  0x20   :  { %p5788_p1 = pnand %p5787_p0, %p5781_p11 }
  0x22   :  { %5791 = shalt.err (!%p5788_p1)
}
  0x23   :  { %28 = dma.hbm_to_vmem [thread:$0]  %s8193_s0, 4096, %s5919_s27, [#allocation6], %s5868_s13, %s5868_s13, %s5869_s14  }
  0x24   :  { %s5870_s26 = smov [#allocation10]   ;;  %s5792_s8 = scalar_lea.hbm %s8197_s4, 1024 }
  0x25   :  { %s50_s28 = sshll.u32 %s5870_s26, 4  ;;  %p5793_p2 = scmp.ne.s32.totalorder %s8197_s4, %s5792_s8  ;;  %s51_s28 = int_to_ptr.vmem [resolvable:$true] %s50_s28 }
  0x26   :  { %p5796_p3 = scmp.lt.u32.totalorder %s5792_s8, %s8197_s4 }
  0x28   :  { %p5798_p4 = pnand %p5796_p3, %p5793_p2 }
  0x2a   :  { %5801 = shalt.err (!%p5798_p4)
}
  0x2b   :  { %s5802_s15 = scalar_lea.vmem %s51_s28, 1024  ;;  %p5807_p6 = scmp.lt.s32.totalorder %s51_s28, %s51_s28 }
  0x2c   :  { %p5803_p5 = scmp.ne.s32.totalorder %s51_s28, %s5802_s15  ;;  %p5808_p7 = scmp.lt.s32.totalorder %s5802_s15, %s5802_s15 }
  0x2e   :  { %p5809_p8 = por %p5808_p7, %p5807_p6 }
  0x30   :  { %p5810_p9 = pnand %p5809_p8, %p5803_p5 }
  0x32   :  { %5813 = shalt.err (!%p5810_p9)
}
  0x33   :  { %56 = dma.hbm_to_vmem [thread:$0]  %s8197_s4, 1024, %s51_s28, [#allocation9], %s5868_s13, %s5868_s13, %s5869_s14  }
  0x34   :  { %5858 = dma.done.wait [#allocation6], 4096  }
  0x35   :  { %5859 = vsyncadd [#allocation6], 4294963200 }
  0x36   :  { %5860 = dma.done.wait [#allocation9], 1536  }
  0x37   :  { %5861 = vsyncadd [#allocation9], 4294965760  ;;  %v8201_v0 = vmov 0   ;;  %v5184_v1 = vld [vmem:[#allocation8 + $0x4] ss:$8 sps:$4 sm:$0xff]   ;;  %vm284_vm0 = vcmask 261120   ;;  %v254_v62 = vlaneseq }
  0x38   :  { %365 = vmatprep.mubr.bf16.mxu0 %v8201_v0  ;;  %687 = vmatprep.mubr.bf16.mxu1 %v8201_v0  ;;  %v5975_v2 = vld [vmem:[#allocation10 + $0x4] ss:$8 sps:$4 sm:$0xff]   ;;  %v5188_v3 = vld [vmem:[#allocation8] ss:$8 sps:$4 sm:$0xff]   ;;  %v5190_v5 = vld [vmem:[#allocation8 + $0x14] ss:$8 sps:$4 sm:$0xff]  }
  0x39   :  { %5108 = vset.pattern.permute.xlu1 %v8201_v0  ;;  %5107 = vset.pattern.permute.xlu0 %v8201_v0  ;;  %v5977_v4 = vld [vmem:[#allocation10] ss:$8 sps:$4 sm:$0xff]   ;;  %v5981_v6 = vld [vmem:[#allocation10 + $0x14] ss:$8 sps:$4 sm:$0xff]   ;;  %v5194_v7 = vld [vmem:[#allocation8 + $0x10] ss:$8 sps:$4 sm:$0xff]  }
  0x3a   :  { %333 = vmatprep.subr.bf16.mxu0 %v5184_v1  ;;  %655 = vmatprep.subr.bf16.mxu1 %v5975_v2  ;;  %v5983_v8 = vld [vmem:[#allocation10 + $0x10] ss:$8 sps:$4 sm:$0xff]   ;;  %v200_v9 = vld [vmem:[#allocation5] sm:$0xff]  ;;  %v201_v10 = vld [vmem:[#allocation5 + $0x8] sm:$0xff]  ;;  %v5872_v19 = vmov 0.0|0.0   ;;  %v255_v63 = vshrl.u32 %v254_v62, 7 }
  0x3b   :  { %334 = vmatpush1.bf16.msra.mxu0 %v5188_v3  ;;  %656 = vmatpush1.bf16.msra.mxu1 %v5977_v4  ;;  %v5986_v11 = vld [vmem:[#allocation10 + $0x24] ss:$8 sps:$4 sm:$0xff]   ;;  %v232_v12 = vpack.c.bf16 %v201_v10, %v200_v9  ;;  %v5989_v13 = vld [vmem:[#allocation10 + $0x20] ss:$8 sps:$4 sm:$0xff]   ;;  %v5992_v14 = vld [vmem:[#allocation10 + $0x34] ss:$8 sps:$4 sm:$0xff]  }
  0x3c   :  { %335 = vmatprep.subr.bf16.mxu0 %v5190_v5  ;;  %657 = vmatprep.subr.bf16.mxu1 %v5981_v6  ;;  %v5997_v15 = vld [vmem:[#allocation10 + $0x30] ss:$8 sps:$4 sm:$0xff]   ;;  %v204_v20 = vld [vmem:[#allocation5 + $0x20] sm:$0xff]  ;;  %v205_v21 = vld [vmem:[#allocation5 + $0x28] sm:$0xff]  ;;  %v256_v1 = vsub.s32 0, %v255_v63  ;;  %v260_v5 = vsub.s32 1, %v255_v63 }
  0x3d   :  { %v202_v16 = vld [vmem:[#allocation5 + $0x10] sm:$0xff]  ;;  %v203_v17 = vld [vmem:[#allocation5 + $0x18] sm:$0xff]  ;;  %v234_v22 = vpack.c.bf16 %v205_v21, %v204_v20  ;;  %v208_v26 = vld [vmem:[#allocation5 + $0x40] sm:$0xff]  ;;  %vm527_vm1 = vcmask 523264   ;;  %vm167_vm3 = vcmask 7168   ;;  %s5875_s22 = smov 96  }
  0x3e   :  { %v233_v18 = vpack.c.bf16 %v203_v17, %v202_v16  ;;  %v206_v23 = vld [vmem:[#allocation5 + $0x30] sm:$0xff]  ;;  %v207_v24 = vld [vmem:[#allocation5 + $0x38] sm:$0xff]  ;;  %v209_v27 = vld [vmem:[#allocation5 + $0x48] sm:$0xff]  ;;  %s5876_s23 = smov 32  }
  0x3f   :  { %336 = vmatpush1.bf16.msra.mxu0 %v5194_v7  ;;  %658 = vmatpush1.bf16.msra.mxu1 %v5983_v8  ;;  %v235_v25 = vpack.c.bf16 %v207_v24, %v206_v23  ;;  %v236_v28 = vpack.c.bf16 %v209_v27, %v208_v26  ;;  %v210_v29 = vld [vmem:[#allocation5 + $0x50] sm:$0xff]  ;;  %v211_v30 = vld [vmem:[#allocation5 + $0x58] sm:$0xff]  ;;  %v212_v32 = vld [vmem:[#allocation5 + $0x60] sm:$0xff] }
  0x40   :  { %659 = vmatprep.subr.bf16.mxu1 %v5986_v11  ;;  %2716 = vmatprep.subr.bf16.mxu0 %v5975_v2  ;;  %v237_v31 = vpack.c.bf16 %v211_v30, %v210_v29  ;;  %v213_v33 = vld [vmem:[#allocation5 + $0x68] sm:$0xff]  ;;  %v214_v35 = vld [vmem:[#allocation5 + $0x70] sm:$0xff]  ;;  %v215_v36 = vld [vmem:[#allocation5 + $0x78] sm:$0xff] }
  0x41   :  { %v238_v34 = vpack.c.bf16 %v213_v33, %v212_v32  ;;  %v239_v37 = vpack.c.bf16 %v215_v36, %v214_v35  ;;  %v216_v38 = vld [vmem:[#allocation5 + $0x80] sm:$0xff]  ;;  %v217_v39 = vld [vmem:[#allocation5 + $0x88] sm:$0xff]  ;;  %v218_v41 = vld [vmem:[#allocation5 + $0x90] sm:$0xff] }
  0x42   :  { %4959 = vmatmul.mubr.msk.bf16.vlgmr.msra.gmra.mrb[0].mxu0 %vm284_vm0, %v232_v12  ;;  %v240_v40 = vpack.c.bf16 %v217_v39, %v216_v38  ;;  %v219_v42 = vld [vmem:[#allocation5 + $0x98] sm:$0xff]  ;;  %v220_v44 = vld [vmem:[#allocation5 + $0xa0] sm:$0xff]  ;;  %v221_v45 = vld [vmem:[#allocation5 + $0xa8] sm:$0xff] }
  0x43   :  { %660 = vmatpush1.bf16.msra.mxu1 %v5989_v13  ;;  %375 = vmatprep.mubr.bf16.mxu0 %v8201_v0  ;;  %v241_v43 = vpack.c.bf16 %v219_v42, %v218_v41  ;;  %v242_v46 = vpack.c.bf16 %v221_v45, %v220_v44  ;;  %v222_v47 = vld [vmem:[#allocation5 + $0xb0] sm:$0xff]  ;;  %v223_v48 = vld [vmem:[#allocation5 + $0xb8] sm:$0xff]  ;;  %v224_v50 = vld [vmem:[#allocation5 + $0xc0] sm:$0xff] }
  0x44   :  { %661 = vmatprep.subr.bf16.mxu1 %v5992_v14  ;;  %2717 = vmatpush1.bf16.msra.mxu0 %v5977_v4  ;;  %v243_v49 = vpack.c.bf16 %v223_v48, %v222_v47  ;;  %v225_v51 = vld [vmem:[#allocation5 + $0xc8] sm:$0xff]  ;;  %v226_v53 = vld [vmem:[#allocation5 + $0xd0] sm:$0xff]  ;;  %v227_v54 = vld [vmem:[#allocation5 + $0xd8] sm:$0xff] }
  0x45   :  { %2718 = vmatprep.subr.bf16.mxu0 %v5981_v6  ;;  %v244_v52 = vpack.c.bf16 %v225_v51, %v224_v50  ;;  %v245_v55 = vpack.c.bf16 %v227_v54, %v226_v53  ;;  %v228_v56 = vld [vmem:[#allocation5 + $0xe0] sm:$0xff]  ;;  %v229_v57 = vld [vmem:[#allocation5 + $0xe8] sm:$0xff]  ;;  %v230_v59 = vld [vmem:[#allocation5 + $0xf0] sm:$0xff] }
  0x46   :  { %v246_v58 = vpack.c.bf16 %v229_v57, %v228_v56  ;;  %v231_v60 = vld [vmem:[#allocation5 + $0xf8] sm:$0xff]  ;;  %v252_v3 = vld [vmem:[%s8196_s3] sm:$0x3]  ;;  %s5873_s3 = smov 64  }
  0x47   :  { %662 = vmatpush1.bf16.msra.mxu1 %v5997_v15  ;;  %v247_v61 = vpack.c.bf16 %v231_v60, %v230_v59  ;;  %v6053_v7 = vrot.slane %v252_v3, %v256_v1  ;;  %v6055_v9 = vrot.slane %v252_v3, %v260_v5 }
  0x48   :  { %903 = vmatprep.subr.bf16.mxu1 %v5975_v2  ;;  %2719 = vmatpush1.bf16.msra.mxu0 %v5983_v8 }
  0x49   :  { %2720 = vmatprep.subr.bf16.mxu0 %v5986_v11 }
  0x4a   :  { %4960 = vmatmul.mubr.msk.bf16.gmra.mrb[4].mxu0 %vm284_vm0, %v233_v18  ;;  %688 = vmatmul.mubr.bf16.vlgmr.msra.gmra.mrb[0].mxu1 %v5872_v19  ;;  %v599_v19 = vld [vmem:[%s8198_s5] sm:$0x3] }
  0x4b   :  { %385 = vmatprep.mubr.bf16.mxu0 %v8201_v0  ;;  %904 = vmatpush1.bf16.msra.mxu1 %v5977_v4  ;;  %v6071_v23 = vrot.slane %v599_v19, %v256_v1  ;;  %v6073_v24 = vrot.slane %v599_v19, %v260_v5 }
  0x4c   :  { %905 = vmatprep.subr.bf16.mxu1 %v5981_v6  ;;  %935 = vmatprep.mubr.bf16.mxu1 %v8201_v0 }
  0x4d   :  { %2721 = vmatpush1.bf16.msra.mxu0 %v5989_v13 }
  0x4e   :  { %2722 = vmatprep.subr.bf16.mxu0 %v5992_v14 }
  0x4f   :  { %906 = vmatpush1.bf16.msra.mxu1 %v5983_v8 }
  0x50   :  { %907 = vmatprep.subr.bf16.mxu1 %v5986_v11 }
  0x51   :  { %2723 = vmatpush1.bf16.msra.mxu0 %v5997_v15 }
  0x52   :  { %4961 = vmatmul.mubr.msk.bf16.gmra.mrb[8].mxu0 %vm284_vm0, %v234_v22  ;;  %3226 = vmatprep.subr.bf16.mxu0 %v5975_v2 }
  0x53   :  { %395 = vmatprep.mubr.bf16.mxu0 %v8201_v0  ;;  %908 = vmatpush1.bf16.msra.mxu1 %v5989_v13 }
  0x54   :  { %909 = vmatprep.subr.bf16.mxu1 %v5992_v14 }
  0x57   :  { %910 = vmatpush1.bf16.msra.mxu1 %v5997_v15 }
  0x58   :  { %1162 = vmatprep.subr.bf16.mxu1 %v5975_v2 }
  0x5a   :  { %4962 = vmatmul.mubr.msk.bf16.gmra.mrb[12].mxu0 %vm284_vm0, %v235_v25 }
  0x5b   :  { %405 = vmatprep.mubr.bf16.mxu0 %v8201_v0 }
  0x62   :  { %4963 = vmatmul.mubr.msk.bf16.gmra.mrb[16].mxu0 %vm284_vm0, %v236_v28 }
  0x63   :  { %415 = vmatprep.mubr.bf16.mxu0 %v8201_v0 }
  0x6a   :  { %4964 = vmatmul.mubr.msk.bf16.gmra.mrb[20].mxu0 %vm284_vm0, %v237_v31 }
  0x6b   :  { %425 = vmatprep.mubr.bf16.mxu0 %v8201_v0 }
  0x72   :  { %4965 = vmatmul.mubr.msk.bf16.gmra.mrb[24].mxu0 %vm284_vm0, %v238_v34 }
  0x73   :  { %435 = vmatprep.mubr.bf16.mxu0 %v8201_v0 }
  0x7a   :  { %4966 = vmatmul.mubr.msk.bf16.gmra.mrb[28].mxu0 %vm284_vm0, %v239_v37 }
  0x7b   :  { %445 = vmatprep.mubr.bf16.mxu0 %v8201_v0 }
  0x82   :  { %4967 = vmatmul.mubr.msk.bf16.gmra.mrb[32].mxu0 %vm284_vm0, %v240_v40 }
  0x83   :  { %455 = vmatprep.mubr.bf16.mxu0 %v8201_v0 }
  0x8a   :  { %4968 = vmatmul.mubr.msk.bf16.gmra.mrb[36].mxu0 %vm284_vm0, %v241_v43 }
  0x8b   :  { %465 = vmatprep.mubr.bf16.mxu0 %v8201_v0 }
  0x92   :  { %4969 = vmatmul.mubr.msk.bf16.gmra.mrb[40].mxu0 %vm284_vm0, %v242_v46 }
  0x93   :  { %475 = vmatprep.mubr.bf16.mxu0 %v8201_v0 }
  0x9a   :  { %4970 = vmatmul.mubr.msk.bf16.gmra.mrb[44].mxu0 %vm284_vm0, %v243_v49 }
  0x9b   :  { %485 = vmatprep.mubr.bf16.mxu0 %v8201_v0 }
  0xa2   :  { %4971 = vmatmul.mubr.msk.bf16.gmra.mrb[48].mxu0 %vm284_vm0, %v244_v52 }
  0xa3   :  { %495 = vmatprep.mubr.bf16.mxu0 %v8201_v0 }
  0xaa   :  { %4972 = vmatmul.mubr.msk.bf16.gmra.mrb[52].mxu0 %vm284_vm0, %v245_v55 }
  0xab   :  { %505 = vmatprep.mubr.bf16.mxu0 %v8201_v0 }
  0xb2   :  { %4973 = vmatmul.mubr.msk.bf16.gmra.mrb[56].mxu0 %vm284_vm0, %v246_v58 }
  0xb3   :  { %515 = vmatprep.mubr.bf16.mxu0 %v8201_v0 }
  0xba   :  { %4974 = vmatmul.mubr.msk.bf16.gmra.mrb[60].mxu0 %vm284_vm0, %v247_v61 }
  0xbb   :  { %2748 = vmatprep.mubr.bf16.mxu0 %v8201_v0 }
 0x115   :  { %v367_v10 = vpop.f32.mrb[0].mxu0 }
 0x116   :  { %v6058_v12 = vadd.f32 %v367_v10, %v6053_v7  ;;  %v369_v16 = vpop.f32.mrb[1].mxu0 }
 0x117   :  { %v370_v17 = vadd.f32 %v369_v16, %v6055_v9  ;;  %v371_v18 = vpop.f32.mrb[2].mxu0 }
 0x118   :  { %526 = vst [vmem:[#allocation2] sm:$0xff] %v6058_v12  ;;  %v6066_v20 = vadd.f32 %v371_v18, %v6053_v7  ;;  %v373_v21 = vpop.f32.mrb[3].mxu0 }
 0x119   :  { %528 = vst.msk [vmem:[#allocation2 + $0x8] sm:$0xff] %vm527_vm1, %v370_v17  ;;  %v374_v22 = vadd.f32 %v373_v21, %v6055_v9 }
 0x11a   :  { %529 = vst [vmem:[#allocation2 + $0x10] sm:$0xff] %v6066_v20 }
 0x11b   :  { %530 = vst.msk [vmem:[#allocation2 + $0x18] sm:$0xff] %vm527_vm1, %v374_v22 }
 0x11d   :  { %v689_v25 = vpop.f32.mrb[0].mxu1  ;;  %v377_v26 = vpop.f32.mrb[4].mxu0 }
 0x11e   :  { %v6077_v27 = vadd.f32 %v689_v25, %v6071_v23  ;;  %v691_v28 = vpop.f32.mrb[1].mxu1  ;;  %v6080_v29 = vadd.f32 %v377_v26, %v6053_v7  ;;  %v379_v30 = vpop.f32.mrb[5].mxu0 }
 0x11f   :  { %v6083_v31 = vadd.f32 %v691_v28, %v6073_v24  ;;  %v693_v32 = vpop.f32.mrb[2].mxu1  ;;  %v380_v33 = vadd.f32 %v379_v30, %v6055_v9  ;;  %v381_v34 = vpop.f32.mrb[6].mxu0 }
 0x120   :  { %v695_v35 = vpop.f32.mrb[3].mxu1  ;;  %721 = vrot.lane.b32.xlu0 %v6077_v27, %s5873_s3  ;;  %531 = vst [vmem:[#allocation2 + $0x20] sm:$0xff] %v6080_v29  ;;  %v6090_v36 = vadd.f32 %v381_v34, %v6053_v7  ;;  %v383_v37 = vpop.f32.mrb[7].mxu0  ;;  %v6097_v39 = vadd.f32 %v693_v32, %v6071_v23 }
 0x121   :  { %793 = vrot.lane.b32.xlu1 %v6083_v31, %s5873_s3  ;;  %532 = vst.msk [vmem:[#allocation2 + $0x28] sm:$0xff] %vm527_vm1, %v380_v33  ;;  %v384_v38 = vadd.f32 %v383_v37, %v6055_v9  ;;  %v6101_v40 = vadd.f32 %v695_v35, %v6073_v24 }
 0x122   :  { %533 = vst [vmem:[#allocation2 + $0x30] sm:$0xff] %v6090_v36 }
 0x123   :  { %534 = vst.msk [vmem:[#allocation2 + $0x38] sm:$0xff] %vm527_vm1, %v384_v38 }
 0x124   :  { %723 = vrot.lane.b32.xlu0 %v6097_v39, %s5873_s3 }
 0x125   :  { %795 = vrot.lane.b32.xlu1 %v6101_v40, %s5873_s3  ;;  %v387_v41 = vpop.f32.mrb[8].mxu0 }
 0x126   :  { %v6109_v42 = vadd.f32 %v387_v41, %v6053_v7  ;;  %v389_v43 = vpop.f32.mrb[9].mxu0 }
 0x127   :  { %v390_v44 = vadd.f32 %v389_v43, %v6055_v9  ;;  %v391_v45 = vpop.f32.mrb[10].mxu0 }
 0x128   :  { %535 = vst [vmem:[#allocation2 + $0x40] sm:$0xff] %v6109_v42  ;;  %v6114_v46 = vadd.f32 %v391_v45, %v6053_v7  ;;  %v393_v47 = vpop.f32.mrb[11].mxu0 }
 0x129   :  { %536 = vst.msk [vmem:[#allocation2 + $0x48] sm:$0xff] %vm527_vm1, %v390_v44  ;;  %v394_v48 = vadd.f32 %v393_v47, %v6055_v9 }
 0x12a   :  { %537 = vst [vmem:[#allocation2 + $0x50] sm:$0xff] %v6114_v46 }
 0x12b   :  { %538 = vst.msk [vmem:[#allocation2 + $0x58] sm:$0xff] %vm527_vm1, %v394_v48 }
 0x12d   :  { %v397_v49 = vpop.f32.mrb[12].mxu0 }
 0x12e   :  { %v398_v50 = vadd.f32 %v397_v49, %v6053_v7  ;;  %v399_v51 = vpop.f32.mrb[13].mxu0 }
 0x12f   :  { %v400_v52 = vadd.f32 %v399_v51, %v6055_v9  ;;  %v401_v53 = vpop.f32.mrb[14].mxu0 }
 0x130   :  { %539 = vst [vmem:[#allocation2 + $0x60] sm:$0xff] %v398_v50  ;;  %v402_v54 = vadd.f32 %v401_v53, %v6053_v7  ;;  %v403_v55 = vpop.f32.mrb[15].mxu0 }
 0x131   :  { %540 = vst.msk [vmem:[#allocation2 + $0x68] sm:$0xff] %vm527_vm1, %v400_v52  ;;  %v404_v56 = vadd.f32 %v403_v55, %v6055_v9 }
 0x132   :  { %541 = vst [vmem:[#allocation2 + $0x70] sm:$0xff] %v402_v54 }
 0x133   :  { %542 = vst.msk [vmem:[#allocation2 + $0x78] sm:$0xff] %vm527_vm1, %v404_v56 }
 0x135   :  { %v407_v57 = vpop.f32.mrb[16].mxu0 }
 0x136   :  { %v408_v58 = vadd.f32 %v407_v57, %v6053_v7  ;;  %v409_v59 = vpop.f32.mrb[17].mxu0 }
 0x137   :  { %v410_v60 = vadd.f32 %v409_v59, %v6055_v9  ;;  %v411_v61 = vpop.f32.mrb[18].mxu0 }
 0x138   :  { %543 = vst [vmem:[#allocation2 + $0x80] sm:$0xff] %v408_v58  ;;  %v412_v62 = vadd.f32 %v411_v61, %v6053_v7  ;;  %v413_v63 = vpop.f32.mrb[19].mxu0 }
 0x139   :  { %544 = vst.msk [vmem:[#allocation2 + $0x88] sm:$0xff] %vm527_vm1, %v410_v60  ;;  %v414_v1 = vadd.f32 %v413_v63, %v6055_v9 }
 0x13a   :  { %545 = vst [vmem:[#allocation2 + $0x90] sm:$0xff] %v412_v62 }
 0x13b   :  { %546 = vst.msk [vmem:[#allocation2 + $0x98] sm:$0xff] %vm527_vm1, %v414_v1 }
 0x13d   :  { %v417_v3 = vpop.f32.mrb[20].mxu0 }
 0x13e   :  { %v418_v5 = vadd.f32 %v417_v3, %v6053_v7  ;;  %v419_v10 = vpop.f32.mrb[21].mxu0 }
 0x13f   :  { %v420_v16 = vadd.f32 %v419_v10, %v6055_v9  ;;  %v421_v17 = vpop.f32.mrb[22].mxu0 }
 0x140   :  { %547 = vst [vmem:[#allocation2 + $0xa0] sm:$0xff] %v418_v5  ;;  %v422_v18 = vadd.f32 %v421_v17, %v6053_v7  ;;  %v423_v19 = vpop.f32.mrb[23].mxu0 }
 0x141   :  { %548 = vst.msk [vmem:[#allocation2 + $0xa8] sm:$0xff] %vm527_vm1, %v420_v16  ;;  %v424_v21 = vadd.f32 %v423_v19, %v6055_v9 }
 0x142   :  { %549 = vst [vmem:[#allocation2 + $0xb0] sm:$0xff] %v422_v18 }
 0x143   :  { %550 = vst.msk [vmem:[#allocation2 + $0xb8] sm:$0xff] %vm527_vm1, %v424_v21 }
 0x145   :  { %v427_v22 = vpop.f32.mrb[24].mxu0 }
 0x146   :  { %v428_v25 = vadd.f32 %v427_v22, %v6053_v7  ;;  %v429_v26 = vpop.f32.mrb[25].mxu0 }
 0x147   :  { %v430_v28 = vadd.f32 %v429_v26, %v6055_v9  ;;  %v431_v30 = vpop.f32.mrb[26].mxu0  ;;  %v705_v26 = vadd.f32 %v6077_v27, %v6058_v12 }
 0x148   :  { %551 = vst [vmem:[#allocation2 + $0xc0] sm:$0xff] %v428_v25  ;;  %v432_v32 = vadd.f32 %v431_v30, %v6053_v7  ;;  %v433_v33 = vpop.f32.mrb[27].mxu0 }
 0x149   :  { %552 = vst.msk [vmem:[#allocation2 + $0xc8] sm:$0xff] %vm527_vm1, %v430_v28  ;;  %v434_v34 = vadd.f32 %v433_v33, %v6055_v9 }
 0x14a   :  { %553 = vst [vmem:[#allocation2 + $0xd0] sm:$0xff] %v432_v32 }
 0x14b   :  { %554 = vst.msk [vmem:[#allocation2 + $0xd8] sm:$0xff] %vm527_vm1, %v434_v34 }
 0x14d   :  { %v437_v35 = vpop.f32.mrb[28].mxu0 }
 0x14e   :  { %v438_v37 = vadd.f32 %v437_v35, %v6053_v7  ;;  %v439_v38 = vpop.f32.mrb[29].mxu0  ;;  %v4983_v35 = vmul.f32 -1.442695, %v705_v26 }
 0x14f   :  { %v440_v41 = vadd.f32 %v439_v38, %v6055_v9  ;;  %v441_v43 = vpop.f32.mrb[30].mxu0 }
 0x150   :  { %555 = vst [vmem:[#allocation2 + $0xe0] sm:$0xff] %v438_v37  ;;  %v442_v44 = vadd.f32 %v441_v43, %v6053_v7  ;;  %v443_v45 = vpop.f32.mrb[31].mxu0  ;;  %v706_v37 = vadd.f32 %v6097_v39, %v6066_v20  ;;  %5202 = vpow2.f32 %v4983_v35 }
 0x151   :  { %556 = vst.msk [vmem:[#allocation2 + $0xe8] sm:$0xff] %vm527_vm1, %v440_v41  ;;  %v444_v47 = vadd.f32 %v443_v45, %v6055_v9 }
 0x152   :  { %557 = vst [vmem:[#allocation2 + $0xf0] sm:$0xff] %v442_v44  ;;  %v4984_v44 = vmul.f32 -1.442695, %v706_v37 }
 0x153   :  { %558 = vst.msk [vmem:[#allocation2 + $0xf8] sm:$0xff] %vm527_vm1, %v444_v47 }
 0x154   :  { %5204 = vpow2.f32 %v4984_v44 }
 0x155   :  { %v447_v48 = vpop.f32.mrb[32].mxu0 }
 0x156   :  { %v448_v49 = vadd.f32 %v447_v48, %v6053_v7  ;;  %v449_v50 = vpop.f32.mrb[33].mxu0 }
 0x157   :  { %v450_v51 = vadd.f32 %v449_v50, %v6055_v9  ;;  %v451_v52 = vpop.f32.mrb[34].mxu0 }
 0x158   :  { %559 = vst [vmem:[#allocation2 + $0x100] sm:$0xff] %v448_v49  ;;  %v452_v53 = vadd.f32 %v451_v52, %v6053_v7  ;;  %v453_v54 = vpop.f32.mrb[35].mxu0 }
 0x159   :  { %560 = vst.msk [vmem:[#allocation2 + $0x108] sm:$0xff] %vm527_vm1, %v450_v51  ;;  %v454_v55 = vadd.f32 %v453_v54, %v6055_v9 }
 0x15a   :  { %561 = vst [vmem:[#allocation2 + $0x110] sm:$0xff] %v452_v53 }
 0x15b   :  { %562 = vst.msk [vmem:[#allocation2 + $0x118] sm:$0xff] %vm527_vm1, %v454_v55 }
 0x15d   :  { %v457_v56 = vpop.f32.mrb[36].mxu0 }
 0x15e   :  { %v458_v57 = vadd.f32 %v457_v56, %v6053_v7  ;;  %v459_v58 = vpop.f32.mrb[37].mxu0 }
 0x15f   :  { %v460_v59 = vadd.f32 %v459_v58, %v6055_v9  ;;  %v461_v60 = vpop.f32.mrb[38].mxu0  ;;  %v5203_v58 = vpop.eup %5202 }
 0x160   :  { %563 = vst [vmem:[#allocation2 + $0x120] sm:$0xff] %v458_v57  ;;  %v462_v61 = vadd.f32 %v461_v60, %v6053_v7  ;;  %v463_v62 = vpop.f32.mrb[39].mxu0  ;;  %v713_v60 = vadd.f32 1.0, %v5203_v58 }
 0x161   :  { %564 = vst.msk [vmem:[#allocation2 + $0x128] sm:$0xff] %vm527_vm1, %v460_v59  ;;  %v464_v63 = vadd.f32 %v463_v62, %v6055_v9 }
 0x162   :  { %565 = vst [vmem:[#allocation2 + $0x130] sm:$0xff] %v462_v61  ;;  %v5205_v61 = vpop.eup %5204  ;;  %5206 = vrcp.f32 %v713_v60 }
 0x163   :  { %566 = vst.msk [vmem:[#allocation2 + $0x138] sm:$0xff] %vm527_vm1, %v464_v63 }
 0x165   :  { %v467_v1 = vpop.f32.mrb[40].mxu0 }
 0x166   :  { %v468_v3 = vadd.f32 %v467_v1, %v6053_v7  ;;  %v469_v5 = vpop.f32.mrb[41].mxu0 }
 0x167   :  { %v470_v10 = vadd.f32 %v469_v5, %v6055_v9  ;;  %v471_v16 = vpop.f32.mrb[42].mxu0 }
 0x168   :  { %567 = vst [vmem:[#allocation2 + $0x140] sm:$0xff] %v468_v3  ;;  %v472_v17 = vadd.f32 %v471_v16, %v6053_v7  ;;  %v473_v18 = vpop.f32.mrb[43].mxu0 }
 0x169   :  { %568 = vst.msk [vmem:[#allocation2 + $0x148] sm:$0xff] %vm527_vm1, %v470_v10  ;;  %v474_v19 = vadd.f32 %v473_v18, %v6055_v9  ;;  %v714_v10 = vadd.f32 1.0, %v5205_v61 }
 0x16a   :  { %569 = vst [vmem:[#allocation2 + $0x150] sm:$0xff] %v472_v17 }
 0x16b   :  { %570 = vst.msk [vmem:[#allocation2 + $0x158] sm:$0xff] %vm527_vm1, %v474_v19  ;;  %5208 = vrcp.f32 %v714_v10 }
 0x16d   :  { %v477_v21 = vpop.f32.mrb[44].mxu0 }
 0x16e   :  { %v478_v22 = vadd.f32 %v477_v21, %v6053_v7  ;;  %v479_v25 = vpop.f32.mrb[45].mxu0 }
 0x16f   :  { %v480_v28 = vadd.f32 %v479_v25, %v6055_v9  ;;  %v481_v30 = vpop.f32.mrb[46].mxu0 }
 0x170   :  { %571 = vst [vmem:[#allocation2 + $0x160] sm:$0xff] %v478_v22  ;;  %v482_v32 = vadd.f32 %v481_v30, %v6053_v7  ;;  %v483_v33 = vpop.f32.mrb[47].mxu0 }
 0x171   :  { %572 = vst.msk [vmem:[#allocation2 + $0x168] sm:$0xff] %vm527_vm1, %v480_v28  ;;  %v484_v34 = vadd.f32 %v483_v33, %v6055_v9 }
 0x172   :  { %573 = vst [vmem:[#allocation2 + $0x170] sm:$0xff] %v482_v32 }
 0x173   :  { %574 = vst.msk [vmem:[#allocation2 + $0x178] sm:$0xff] %vm527_vm1, %v484_v34  ;;  %v6214_v34 = vpop.eup %5206 }
 0x175   :  { %v487_v38 = vpop.f32.mrb[48].mxu0 }
 0x176   :  { %v488_v41 = vadd.f32 %v487_v38, %v6053_v7  ;;  %v489_v43 = vpop.f32.mrb[49].mxu0 }
 0x177   :  { %v490_v45 = vadd.f32 %v489_v43, %v6055_v9  ;;  %v491_v47 = vpop.f32.mrb[50].mxu0 }
 0x178   :  { %575 = vst [vmem:[#allocation2 + $0x180] sm:$0xff] %v488_v41  ;;  %v492_v48 = vadd.f32 %v491_v47, %v6053_v7  ;;  %v493_v49 = vpop.f32.mrb[51].mxu0 }
 0x179   :  { %576 = vst.msk [vmem:[#allocation2 + $0x188] sm:$0xff] %vm527_vm1, %v490_v45  ;;  %v494_v50 = vadd.f32 %v493_v49, %v6055_v9  ;;  %v6232_v45 = vld [vmem:[%s8194_s1] sm:$0xff] }
 0x17a   :  { %577 = vst [vmem:[#allocation2 + $0x190] sm:$0xff] %v492_v48  ;;  %vm71_vm4 = vcmp.gt.s32.totalorder %v6232_v45, 0  ;;  %vm101_vm5 = vcmp.gt.s32.totalorder %v6232_v45, 15  ;;  %vm73_vm7 = vcmp.gt.s32.totalorder %v6232_v45, 1  ;;  %vm99_vm9 = vcmp.gt.s32.totalorder %v6232_v45, 14 }
 0x17b   :  { %578 = vst.msk [vmem:[#allocation2 + $0x198] sm:$0xff] %vm527_vm1, %v494_v50  ;;  %vm75_vm11 = vcmp.gt.s32.totalorder %v6232_v45, 2  ;;  %vm97_vm13 = vcmp.gt.s32.totalorder %v6232_v45, 13  ;;  %vm77_vm15 = vcmp.gt.s32.totalorder %v6232_v45, 3 }
 0x17d   :  { %v497_v51 = vpop.f32.mrb[52].mxu0 }
 0x17e   :  { %v6185_v52 = vadd.f32 %v497_v51, %v6053_v7  ;;  %v499_v53 = vpop.f32.mrb[53].mxu0 }
 0x17f   :  { %v500_v54 = vadd.f32 %v499_v53, %v6055_v9  ;;  %v501_v55 = vpop.f32.mrb[54].mxu0 }
 0x180   :  { %579 = vst [vmem:[#allocation2 + $0x1a0] sm:$0xff] %v6185_v52  ;;  %v6190_v56 = vadd.f32 %v501_v55, %v6053_v7  ;;  %v503_v57 = vpop.f32.mrb[55].mxu0 }
 0x181   :  { %580 = vst.msk [vmem:[#allocation2 + $0x1a8] sm:$0xff] %vm527_vm1, %v500_v54  ;;  %v504_v59 = vadd.f32 %v503_v57, %v6055_v9 }
 0x182   :  { %581 = vst [vmem:[#allocation2 + $0x1b0] sm:$0xff] %v6190_v56 }
 0x183   :  { %582 = vst.msk [vmem:[#allocation2 + $0x1b8] sm:$0xff] %vm527_vm1, %v504_v59 }
 0x185   :  { %v507_v62 = vpop.f32.mrb[56].mxu0 }
 0x186   :  { %v6197_v63 = vadd.f32 %v507_v62, %v6053_v7  ;;  %v509_v1 = vpop.f32.mrb[57].mxu0 }
 0x187   :  { %v510_v3 = vadd.f32 %v509_v1, %v6055_v9  ;;  %v511_v5 = vpop.f32.mrb[58].mxu0 }
 0x188   :  { %583 = vst [vmem:[#allocation2 + $0x1c0] sm:$0xff] %v6197_v63  ;;  %v6202_v16 = vadd.f32 %v511_v5, %v6053_v7  ;;  %v513_v17 = vpop.f32.mrb[59].mxu0 }
 0x189   :  { %584 = vst.msk [vmem:[#allocation2 + $0x1c8] sm:$0xff] %vm527_vm1, %v510_v3  ;;  %v514_v18 = vadd.f32 %v513_v17, %v6055_v9 }
 0x18a   :  { %585 = vst [vmem:[#allocation2 + $0x1d0] sm:$0xff] %v6202_v16 }
 0x18b   :  { %586 = vst.msk [vmem:[#allocation2 + $0x1d8] sm:$0xff] %vm527_vm1, %v514_v18 }
 0x18d   :  { %v517_v19 = vpop.f32.mrb[60].mxu0 }
 0x18e   :  { %v518_v21 = vadd.f32 %v517_v19, %v6053_v7  ;;  %v519_v22 = vpop.f32.mrb[61].mxu0 }
 0x18f   :  { %v520_v25 = vadd.f32 %v519_v22, %v6055_v9  ;;  %v521_v26 = vpop.f32.mrb[62].mxu0 }
 0x190   :  { %587 = vst [vmem:[#allocation2 + $0x1e0] sm:$0xff] %v518_v21  ;;  %v522_v28 = vadd.f32 %v521_v26, %v6053_v7  ;;  %v523_v30 = vpop.f32.mrb[63].mxu0  ;;  %v763_v32 = vadd.f32 %v6077_v27, %v518_v21  ;;  %v6222_v27 = vld [vmem:[%s8194_s1 + $0x8] sm:$0xff] }
 0x191   :  { %588 = vst.msk [vmem:[#allocation2 + $0x1e8] sm:$0xff] %vm527_vm1, %v520_v25  ;;  %v524_v33 = vadd.f32 %v523_v30, %v6055_v9  ;;  %vm72_vm2 = vcmp.gt.s32.totalorder %v6222_v27, 0  ;;  %v6226_v9 = vpop.eup %5208  ;;  %vm102_vm6 = vcmp.gt.s32.totalorder %v6222_v27, 15  ;;  %vm74_vm8 = vcmp.gt.s32.totalorder %v6222_v27, 1 }
 0x192   :  { %589 = vst [vmem:[#allocation2 + $0x1f0] sm:$0xff] %v522_v28  ;;  %v722_v35 = vpop.permute.xlu0 %721  ;;  %v4985_v37 = vmul.f32 -1.442695, %v763_v32  ;;  %v765_v38 = vadd.f32 %v6097_v39, %v522_v28  ;;  %v8203_v39 = vmov 0.0   ;;  %vm100_vm10 = vcmp.gt.s32.totalorder %v6222_v27, 14 }
 0x193   :  { %590 = vst.msk [vmem:[#allocation2 + $0x1f8] sm:$0xff] %vm527_vm1, %v524_v33  ;;  %v727_v41 = vmul.f32 %v6214_v34, %v722_v35  ;;  %v4924_v44 = vsel %vm72_vm2, 1.0, %v8203_v39  ;;  %v4923_v48 = vsel %vm71_vm4, 1.0, %v8203_v39  ;;  %v794_v54 = vpop.permute.xlu1 %793  ;;  %v4953_v62 = vsel %vm101_vm5, 1.0, %v8203_v39 }
 0x194   :  { %5210 = vpow2.f32 %v4985_v37  ;;  %v4987_v7 = vmul.f32 -1.442695, %v765_v38  ;;  %169 = vst.msk [vmem:[#allocation4 + $0x8] sm:$0xff] %vm167_vm3, %v4924_v44  ;;  %168 = vst.msk [vmem:[#allocation4] sm:$0xff] %vm167_vm3, %v4923_v48  ;;  %v4954_v5 = vsel %vm102_vm6, 1.0, %v8203_v39  ;;  %vm76_vm12 = vcmp.gt.s32.totalorder %v6222_v27, 2 }
 0x195   :  { %731 = vrot.lane.b32.xlu0 %v727_v41, %s5873_s3  ;;  %198 = vst.msk [vmem:[#allocation4 + $0xf0] sm:$0xff] %vm167_vm3, %v4953_v62  ;;  %199 = vst.msk [vmem:[#allocation4 + $0xf8] sm:$0xff] %vm167_vm3, %v4954_v5  ;;  %vm98_vm14 = vcmp.gt.s32.totalorder %v6222_v27, 13 }
 0x196   :  { %v724_v43 = vpop.permute.xlu0 %723  ;;  %5212 = vpow2.f32 %v4987_v7 }
 0x197   :  { %v728_v47 = vmul.f32 %v6226_v9, %v724_v43  ;;  %v796_v59 = vpop.permute.xlu1 %795 }
 0x198   :  { %v702_v25 = vld [vmem:[#allocation2 + $0x1e8] sm:$0xff] }
 0x199   :  { %733 = vrot.lane.b32.xlu1 %v728_v47, %s5873_s3  ;;  %v764_v41 = vadd.f32 %v702_v25, %v6083_v31 }
 0x19b   :  { %v836_v22 = vld [vmem:[#allocation4 + $0x8] sm:$0xff]  ;;  %v4986_v43 = vmul.f32 -1.442695, %v764_v41 }
 0x19e   :  { %v5211_v49 = vpop.eup %5210 }
 0x19f   :  { %v779_v50 = vadd.f32 1.0, %v5211_v49 }
 0x1a0   :  { %v5213_v51 = vpop.eup %5212 }
 0x1a1   :  { %5214 = vrcp.f32 %v779_v50  ;;  %v781_v53 = vadd.f32 1.0, %v5213_v51  ;;  %v838_v50 = vld [vmem:[#allocation4 + $0xf0] sm:$0xff] }
 0x1a3   :  { %5216 = vrcp.f32 %v781_v53  ;;  %v839_v53 = vld [vmem:[#allocation4 + $0xf8] sm:$0xff] }
 0x1ab   :  { %v5215_v55 = vpop.eup %5214 }
 0x1ac   :  { %v799_v57 = vmul.f32 %v5215_v55, %v794_v54 }
 0x1ad   :  { %v5217_v58 = vpop.eup %5216 }
 0x1ae   :  { %v800_v60 = vmul.f32 %v5217_v58, %v796_v59  ;;  %803 = vrot.lane.b32.xlu0 %v799_v57, %s5873_s3 }
 0x1b0   :  { %805 = vrot.lane.b32.xlu1 %v800_v60, %s5873_s3 }
 0x207   :  { %v732_v61 = vpop.permute.xlu0 %731 }
 0x208   :  { %v737_v1 = vadd.f32 %v732_v61, %v6058_v12  ;;  %v835_v12 = vld [vmem:[#allocation4] sm:$0xff] }
 0x20a   :  { %5218 = vtanh.f32 %v737_v1 }
 0x20b   :  { %v734_v3 = vpop.permute.xlu1 %733 }
 0x20c   :  { %v738_v10 = vadd.f32 %v734_v3, %v6066_v20  ;;  %v704_v20 = vld [vmem:[#allocation2 + $0x1f8] sm:$0xff] }
 0x20d   :  { %v766_v7 = vadd.f32 %v704_v20, %v6101_v40 }
 0x20e   :  { %5220 = vtanh.f32 %v738_v10 }
 0x20f   :  { %v4988_v44 = vmul.f32 -1.442695, %v766_v7 }
 0x214   :  { %v5219_v17 = vpop.eup %5218 }
 0x215   :  { %v741_v18 = vsub.f32 0.0, %v5219_v17 }
 0x217   :  { %745 = vrot.lane.b32.xlu0 %v741_v18, %s5875_s22 }
 0x218   :  { %v5221_v19 = vpop.eup %5220 }
 0x219   :  { %v742_v21 = vsub.f32 0.0, %v5221_v19 }
 0x21b   :  { %747 = vrot.lane.b32.xlu1 %v742_v21, %s5875_s22  ;;  %842 = vperm.xlu0 %5107, %v835_v12  }
 0x21f   :  { %847 = vperm.xlu1 %5108, %v836_v22  }
 0x220   :  { %v804_v26 = vpop.permute.xlu0 %803 }
 0x221   :  { %v809_v28 = vadd.f32 %v804_v26, %v702_v25 }
 0x222   :  { %v806_v30 = vpop.permute.xlu1 %805 }
 0x223   :  { %5222 = vtanh.f32 %v809_v28  ;;  %v810_v32 = vadd.f32 %v806_v30, %v704_v20 }
 0x225   :  { %5224 = vtanh.f32 %v810_v32 }
 0x226   :  { %5226 = vpow2.f32 %v4986_v43 }
 0x227   :  { %5228 = vpow2.f32 %v4988_v44 }
 0x22d   :  { %v5223_v33 = vpop.eup %5222 }
 0x22e   :  { %v813_v35 = vsub.f32 0.0, %v5223_v33 }
 0x22f   :  { %v5225_v37 = vpop.eup %5224 }
 0x230   :  { %817 = vrot.lane.b32.xlu1 %v813_v35, %s5875_s22  ;;  %v814_v38 = vsub.f32 0.0, %v5225_v37  ;;  %v5227_v31 = vpop.eup %5226 }
 0x231   :  { %v5229_v40 = vpop.eup %5228  ;;  %v780_v54 = vadd.f32 1.0, %v5227_v31 }
 0x232   :  { %819 = vrot.lane.b32.xlu0 %v814_v38, %s5875_s22  ;;  %v782_v55 = vadd.f32 1.0, %v5229_v40 }
 0x233   :  { %5230 = vrcp.f32 %v780_v54 }
 0x234   :  { %5232 = vrcp.f32 %v782_v55 }
 0x23d   :  { %v5231_v58 = vpop.eup %5230 }
 0x23e   :  { %v5233_v61 = vpop.eup %5232 }
 0x289   :  { %v746_v47 = vpop.permute.xlu0 %745 }
 0x28a   :  { %v751_v48 = vmul.f32 %v6214_v34, %v746_v47 }
 0x28c   :  { %755 = vrot.lane.b32.xlu1 %v751_v48, %s5876_s23 }
 0x28d   :  { %v748_v49 = vpop.permute.xlu1 %747 }
 0x28e   :  { %v752_v51 = vmul.f32 %v6226_v9, %v748_v49 }
 0x290   :  { %864 = vperm.xlu1 %5108, %v838_v50   ;;  %757 = vrot.lane.b32.xlu0 %v752_v51, %s5876_s23 }
 0x294   :  { %869 = vperm.xlu0 %5107, %v839_v53  }
 0x29a   :  { %v843_v34 = vpop.permute.xlu0 %842 }
 0x29e   :  { %v848_v57 = vpop.permute.xlu1 %847 }
 0x2a2   :  { %v818_v59 = vpop.permute.xlu1 %817 }
 0x2a3   :  { %v823_v60 = vmul.f32 %v5231_v58, %v818_v59 }
 0x2a4   :  { %v820_v62 = vpop.permute.xlu0 %819 }
 0x2a5   :  { %v824_v1 = vmul.f32 %v5233_v61, %v820_v62  ;;  %827 = vrot.lane.b32.xlu1 %v823_v60, %s5876_s23  ;;  %v4925_v62 = vsel %vm73_vm7, 1.0, %v8203_v39 }
 0x2a6   :  { %170 = vst.msk [vmem:[#allocation4 + $0x10] sm:$0xff] %vm167_vm3, %v4925_v62 }
 0x2a7   :  { %829 = vrot.lane.b32.xlu0 %v824_v1, %s5876_s23 }
 0x2fe   :  { %v756_v9 = vpop.permute.xlu1 %755 }
 0x2ff   :  { %v761_v3 = vadd.f32 %v5219_v17, %v756_v9 }
 0x301   :  { %v6262_v18 = vmul.f32 %v843_v34, %v761_v3 }
 0x302   :  { %v758_v5 = vpop.permute.xlu0 %757 }
 0x303   :  { %v762_v10 = vadd.f32 %v5221_v19, %v758_v5  ;;  %v4926_v5 = vsel %vm74_vm8, 1.0, %v8203_v39 }
 0x304   :  { %171 = vst.msk [vmem:[#allocation4 + $0x18] sm:$0xff] %vm167_vm3, %v4926_v5 }
 0x305   :  { %v6264_v12 = vmul.f32 %v848_v57, %v762_v10 }
 0x307   :  { %v5109_v21 = vpack.i.bf16 %v6264_v12, %v6262_v18 }
 0x309   :  { %5110 = vrot.lane.b32.xlu1 %v5109_v21, %s5873_s3 }
 0x30f   :  { %v865_v22 = vpop.permute.xlu1 %864 }
 0x313   :  { %v870_v25 = vpop.permute.xlu0 %869 }
 0x317   :  { %v828_v26 = vpop.permute.xlu1 %827 }
 0x318   :  { %v833_v20 = vadd.f32 %v5223_v33, %v828_v26 }
 0x319   :  { %v830_v28 = vpop.permute.xlu0 %829 }
 0x31a   :  { %v834_v30 = vadd.f32 %v5225_v37, %v830_v28  ;;  %v6269_v35 = vmul.f32 %v865_v22, %v833_v20 }
 0x31c   :  { %v6271_v17 = vmul.f32 %v870_v25, %v834_v30  ;;  %v4951_v30 = vsel %vm99_vm9, 1.0, %v8203_v39 }
 0x31d   :  { %196 = vst.msk [vmem:[#allocation4 + $0xe0] sm:$0xff] %vm167_vm3, %v4951_v30 }
 0x37b   :  { %v5111_v32 = vpop.permute.xlu1 %5110 }
 0x37c   :  { %v5113_v19 = vunpack.i.h.bf16 %v5111_v32  ;;  %v5112_v38 = vunpack.i.l.bf16 %v5111_v32 }
 0x37e   :  { %v897_v41 = vsel %vm284_vm0, %v5112_v38, %v6269_v35  ;;  %v898_v7 = vsel %vm284_vm0, %v5113_v19, %v6271_v17  ;;  %v951_v19 = vld [vmem:[#allocation2 + $0x1c8] sm:$0xff] }
 0x37f   :  { %v899_v43 = vpack.c.bf16 %v898_v7, %v897_v41  ;;  %v4952_v41 = vsel %vm100_vm10, 1.0, %v8203_v39 }
 0x380   :  { %197 = vst.msk [vmem:[#allocation4 + $0xe8] sm:$0xff] %vm167_vm3, %v4952_v41 }
 0x381   :  { %4989 = vmatmul.mubr.msk.bf16.vlgmr.msra.gmra.mrb[4].mxu1 %vm527_vm1, %v899_v43 }
 0x382   :  { %1163 = vmatpush1.bf16.msra.mxu1 %v5977_v4  ;;  %1194 = vmatprep.mubr.bf16.mxu1 %v8201_v0 }
 0x383   :  { %1164 = vmatprep.subr.bf16.mxu1 %v5981_v6 }
 0x386   :  { %1165 = vmatpush1.bf16.msra.mxu1 %v5983_v8 }
 0x387   :  { %1166 = vmatprep.subr.bf16.mxu1 %v5986_v11 }
 0x38a   :  { %1167 = vmatpush1.bf16.msra.mxu1 %v5989_v13 }
 0x38b   :  { %1168 = vmatprep.subr.bf16.mxu1 %v5992_v14 }
 0x38e   :  { %1169 = vmatpush1.bf16.msra.mxu1 %v5997_v15 }
 0x38f   :  { %1421 = vmatprep.subr.bf16.mxu1 %v5975_v2 }
 0x454   :  { %v937_v33 = vpop.f32.mrb[4].mxu1 }
 0x455   :  { %v938_v37 = vadd.f32 %v937_v33, %v6071_v23  ;;  %v939_v4 = vpop.f32.mrb[5].mxu1 }
 0x456   :  { %v941_v44 = vpop.f32.mrb[6].mxu1  ;;  %v6291_v8 = vadd.f32 %v939_v4, %v6073_v24 }
 0x457   :  { %v942_v47 = vadd.f32 %v941_v44, %v6071_v23  ;;  %v943_v6 = vpop.f32.mrb[7].mxu1  ;;  %970 = vrot.lane.b32.xlu0 %v938_v37, %s5873_s3  ;;  %v954_v2 = vadd.f32 %v938_v37, %v6080_v29  ;;  %v1012_v15 = vadd.f32 %v938_v37, %v6197_v63 }
 0x458   :  { %v6295_v11 = vadd.f32 %v943_v6, %v6073_v24 }
 0x459   :  { %972 = vrot.lane.b32.xlu1 %v942_v47, %s5873_s3  ;;  %v955_v13 = vadd.f32 %v942_v47, %v6090_v36  ;;  %v4990_v14 = vmul.f32 -1.442695, %v954_v2  ;;  %v1014_v49 = vadd.f32 %v942_v47, %v6202_v16  ;;  %v4992_v50 = vmul.f32 -1.442695, %v1012_v15  ;;  %v1085_v47 = vld [vmem:[#allocation4 + $0x10] sm:$0xff]  ;;  %v1086_v2 = vld [vmem:[#allocation4 + $0x18] sm:$0xff] }
 0x45b   :  { %1042 = vrot.lane.b32.xlu0 %v6291_v8, %s5873_s3  ;;  %v4991_v48 = vmul.f32 -1.442695, %v955_v13  ;;  %5234 = vpow2.f32 %v4990_v14  ;;  %v4994_v51 = vmul.f32 -1.442695, %v1014_v49 }
 0x45d   :  { %1044 = vrot.lane.b32.xlu1 %v6295_v11, %s5873_s3  ;;  %5236 = vpow2.f32 %v4991_v48  ;;  %v1013_v48 = vadd.f32 %v951_v19, %v6291_v8  ;;  %v1089_v8 = vld [vmem:[#allocation4 + $0xe8] sm:$0xff] }
 0x45e   :  { %5238 = vpow2.f32 %v4992_v50 }
 0x45f   :  { %5240 = vpow2.f32 %v4994_v51  ;;  %v4993_v50 = vmul.f32 -1.442695, %v1013_v48 }
 0x465   :  { %v5235_v31 = vpop.eup %5234 }
 0x466   :  { %v962_v40 = vadd.f32 1.0, %v5235_v31 }
 0x467   :  { %v5237_v53 = vpop.eup %5236 }
 0x468   :  { %v5239_v54 = vpop.eup %5238  ;;  %v963_v55 = vadd.f32 1.0, %v5237_v53  ;;  %5242 = vrcp.f32 %v962_v40 }
 0x469   :  { %v5241_v57 = vpop.eup %5240  ;;  %v1028_v34 = vadd.f32 1.0, %v5239_v54 }
 0x46a   :  { %5244 = vrcp.f32 %v963_v55  ;;  %v1030_v58 = vadd.f32 1.0, %v5241_v57  ;;  %v1088_v57 = vld [vmem:[#allocation4 + $0xe0] sm:$0xff] }
 0x46b   :  { %5246 = vrcp.f32 %v1028_v34 }
 0x46c   :  { %5248 = vrcp.f32 %v1030_v58 }
 0x472   :  { %v6305_v63 = vpop.eup %5242 }
 0x474   :  { %v6309_v60 = vpop.eup %5244 }
 0x475   :  { %v5247_v9 = vpop.eup %5246 }
 0x476   :  { %v5249_v21 = vpop.eup %5248 }
 0x4c9   :  { %v971_v16 = vpop.permute.xlu0 %970 }
 0x4ca   :  { %v976_v59 = vmul.f32 %v6305_v63, %v971_v16 }
 0x4cb   :  { %v973_v61 = vpop.permute.xlu1 %972 }
 0x4cc   :  { %v977_v1 = vmul.f32 %v6309_v60, %v973_v61  ;;  %980 = vrot.lane.b32.xlu0 %v976_v59, %s5873_s3 }
 0x4cd   :  { %v1043_v3 = vpop.permute.xlu0 %1042 }
 0x4ce   :  { %v1048_v10 = vmul.f32 %v5247_v9, %v1043_v3  ;;  %982 = vrot.lane.b32.xlu1 %v977_v1, %s5873_s3 }
 0x4cf   :  { %v1045_v22 = vpop.permute.xlu1 %1044 }
 0x4d0   :  { %v1049_v25 = vmul.f32 %v5249_v21, %v1045_v22  ;;  %1052 = vrot.lane.b32.xlu0 %v1048_v10, %s5873_s3 }
 0x4d2   :  { %1054 = vrot.lane.b32.xlu1 %v1049_v25, %s5873_s3 }
 0x53e   :  { %v981_v26 = vpop.permute.xlu0 %980 }
 0x53f   :  { %v986_v28 = vadd.f32 %v981_v26, %v6080_v29  ;;  %v953_v29 = vld [vmem:[#allocation2 + $0x1d8] sm:$0xff] }
 0x540   :  { %v983_v20 = vpop.permute.xlu1 %982  ;;  %v1015_v49 = vadd.f32 %v953_v29, %v6295_v11 }
 0x541   :  { %5250 = vtanh.f32 %v986_v28  ;;  %v987_v32 = vadd.f32 %v983_v20, %v6090_v36 }
 0x542   :  { %v1053_v38 = vpop.permute.xlu0 %1052  ;;  %v4995_v51 = vmul.f32 -1.442695, %v1015_v49  ;;  %v6393_v49 = vld [vmem:[#allocation10] ss:$8 sps:$4 sm:$0xff]  }
 0x543   :  { %5252 = vtanh.f32 %v987_v32  ;;  %v1058_v7 = vadd.f32 %v1053_v38, %v951_v19 }
 0x544   :  { %v1055_v43 = vpop.permute.xlu1 %1054 }
 0x545   :  { %v1059_v33 = vadd.f32 %v1055_v43, %v953_v29  ;;  %5254 = vtanh.f32 %v1058_v7 }
 0x547   :  { %5256 = vtanh.f32 %v1059_v33 }
 0x548   :  { %5258 = vpow2.f32 %v4993_v50  ;;  %v6397_v50 = vld [vmem:[#allocation10 + $0x14] ss:$8 sps:$4 sm:$0xff]  }
 0x549   :  { %5260 = vpow2.f32 %v4995_v51  ;;  %v6400_v51 = vld [vmem:[#allocation10 + $0x10] ss:$8 sps:$4 sm:$0xff]  }
 0x54b   :  { %v5251_v37 = vpop.eup %5250 }
 0x54c   :  { %v990_v36 = vsub.f32 %v6262_v18, %v5251_v37 }
 0x54d   :  { %v5253_v4 = vpop.eup %5252 }
 0x54e   :  { %994 = vrot.lane.b32.xlu0 %v990_v36, %s5875_s22  ;;  %v991_v44 = vsub.f32 %v6264_v12, %v5253_v4 }
 0x54f   :  { %v5255_v6 = vpop.eup %5254 }
 0x550   :  { %996 = vrot.lane.b32.xlu1 %v991_v44, %s5875_s22  ;;  %v1062_v14 = vsub.f32 %v6269_v35, %v5255_v6 }
 0x551   :  { %v5257_v13 = vpop.eup %5256 }
 0x552   :  { %1092 = vperm.xlu0 %5107, %v1085_v47   ;;  %v1063_v15 = vsub.f32 %v6271_v17, %v5257_v13  ;;  %v5259_v55 = vpop.eup %5258 }
 0x553   :  { %v5261_v34 = vpop.eup %5260  ;;  %v1029_v58 = vadd.f32 1.0, %v5259_v55  ;;  %v6415_v55 = vld [vmem:[#allocation10 + $0x4] ss:$8 sps:$4 sm:$0xff]  }
 0x554   :  { %1097 = vperm.xlu1 %5108, %v1086_v2   ;;  %v1031_v11 = vadd.f32 1.0, %v5261_v34 }
 0x555   :  { %5262 = vrcp.f32 %v1029_v58 }
 0x556   :  { %1066 = vrot.lane.b32.xlu0 %v1062_v14, %s5875_s22  ;;  %5264 = vrcp.f32 %v1031_v11 }
 0x558   :  { %1068 = vrot.lane.b32.xlu1 %v1063_v15, %s5875_s22 }
 0x55f   :  { %v5263_v59 = vpop.eup %5262 }
 0x560   :  { %v5265_v62 = vpop.eup %5264 }
 0x5c0   :  { %v995_v31 = vpop.permute.xlu0 %994 }
 0x5c1   :  { %v1000_v53 = vmul.f32 %v6305_v63, %v995_v31  ;;  %v6403_v31 = vld [vmem:[#allocation10 + $0x24] ss:$8 sps:$4 sm:$0xff]  }
 0x5c2   :  { %v997_v40 = vpop.permute.xlu1 %996 }
 0x5c3   :  { %v1001_v54 = vmul.f32 %v6309_v60, %v997_v40  ;;  %1004 = vrot.lane.b32.xlu0 %v1000_v53, %s5876_s23  ;;  %v6406_v53 = vld [vmem:[#allocation10 + $0x20] ss:$8 sps:$4 sm:$0xff]   ;;  %v6409_v40 = vld [vmem:[#allocation10 + $0x34] ss:$8 sps:$4 sm:$0xff]  }
 0x5c5   :  { %1006 = vrot.lane.b32.xlu1 %v1001_v54, %s5876_s23  ;;  %v6412_v54 = vld [vmem:[#allocation10 + $0x30] ss:$8 sps:$4 sm:$0xff]  }
 0x5c7   :  { %1115 = vperm.xlu0 %5107, %v1088_v57  }
 0x5c9   :  { %1120 = vperm.xlu1 %5108, %v1089_v8  }
 0x5d1   :  { %v6343_v16 = vpop.permute.xlu0 %1092 }
 0x5d3   :  { %v6345_v63 = vpop.permute.xlu1 %1097 }
 0x5d5   :  { %v1067_v60 = vpop.permute.xlu0 %1066 }
 0x5d6   :  { %v1072_v61 = vmul.f32 %v5263_v59, %v1067_v60 }
 0x5d7   :  { %v1069_v1 = vpop.permute.xlu1 %1068 }
 0x5d8   :  { %v1073_v9 = vmul.f32 %v5265_v62, %v1069_v1  ;;  %1076 = vrot.lane.b32.xlu0 %v1072_v61, %s5876_s23 }
 0x5da   :  { %1078 = vrot.lane.b32.xlu1 %v1073_v9, %s5876_s23 }
 0x635   :  { %v1005_v3 = vpop.permute.xlu0 %1004 }
 0x636   :  { %v6349_v5 = vadd.f32 %v5251_v37, %v1005_v3 }
 0x637   :  { %v1007_v10 = vpop.permute.xlu1 %1006 }
 0x638   :  { %v1136_v21 = vsub.f32 %v6349_v5, %v6262_v18  ;;  %v6353_v22 = vadd.f32 %v5253_v4, %v1007_v10 }
 0x63a   :  { %v1138_v25 = vmul.f32 %v1136_v21, %v6343_v16  ;;  %v1137_v26 = vsub.f32 %v6353_v22, %v6264_v12 }
 0x63c   :  { %v1139_v28 = vmul.f32 %v1137_v26, %v6345_v63  ;;  %v6360_v20 = vadd.f32 %v1138_v25, %v6262_v18 }
 0x63e   :  { %v6363_v30 = vadd.f32 %v1139_v28, %v6264_v12 }
 0x640   :  { %v5114_v32 = vpack.i.bf16 %v6363_v30, %v6360_v20 }
 0x642   :  { %5115 = vrot.lane.b32.xlu0 %v5114_v32, %s5873_s3 }
 0x646   :  { %v6368_v19 = vpop.permute.xlu0 %1115 }
 0x648   :  { %v6370_v38 = vpop.permute.xlu1 %1120 }
 0x64a   :  { %v1077_v41 = vpop.permute.xlu0 %1076 }
 0x64b   :  { %v6372_v29 = vadd.f32 %v5255_v6, %v1077_v41 }
 0x64c   :  { %v1079_v7 = vpop.permute.xlu1 %1078 }
 0x64d   :  { %v6374_v43 = vadd.f32 %v5257_v13, %v1079_v7  ;;  %v1142_v33 = vsub.f32 %v6372_v29, %v6269_v35 }
 0x64f   :  { %v1143_v37 = vsub.f32 %v6374_v43, %v6271_v17  ;;  %v1144_v36 = vmul.f32 %v1142_v33, %v6368_v19 }
 0x651   :  { %v1145_v4 = vmul.f32 %v1143_v37, %v6370_v38  ;;  %v6383_v47 = vadd.f32 %v1144_v36, %v6269_v35 }
 0x653   :  { %v6386_v2 = vadd.f32 %v1145_v4, %v6271_v17 }
 0x6b4   :  { %v5116_v44 = vpop.permute.xlu0 %5115 }
 0x6b5   :  { %v5118_v6 = vunpack.i.h.bf16 %v5116_v44  ;;  %v5117_v13 = vunpack.i.l.bf16 %v5116_v44 }
 0x6b7   :  { %v1157_v14 = vsel %vm284_vm0, %v5118_v6, %v6386_v2  ;;  %v1156_v15 = vsel %vm284_vm0, %v5117_v13, %v6383_v47  ;;  %v4927_v6 = vsel %vm75_vm11, 1.0, %v8203_v39 }
 0x6b8   :  { %v1158_v48 = vpack.c.bf16 %v1157_v14, %v1156_v15  ;;  %172 = vst.msk [vmem:[#allocation4 + $0x20] sm:$0xff] %vm167_vm3, %v4927_v6 }
 0x6ba   :  { %4996 = vmatmul.mubr.msk.bf16.vlgmr.msra.gmra.mrb[8].mxu1 %vm527_vm1, %v1158_v48  ;;  %v4928_v48 = vsel %vm76_vm12, 1.0, %v8203_v39 }
 0x6bb   :  { %1422 = vmatpush1.bf16.msra.mxu1 %v6393_v49  ;;  %1453 = vmatprep.mubr.bf16.mxu1 %v8201_v0  ;;  %173 = vst.msk [vmem:[#allocation4 + $0x28] sm:$0xff] %vm167_vm3, %v4928_v48 }
 0x6bc   :  { %1423 = vmatprep.subr.bf16.mxu1 %v6397_v50 }
 0x6bf   :  { %1424 = vmatpush1.bf16.msra.mxu1 %v6400_v51 }
 0x6c0   :  { %1425 = vmatprep.subr.bf16.mxu1 %v6403_v31 }
 0x6c3   :  { %1426 = vmatpush1.bf16.msra.mxu1 %v6406_v53 }
 0x6c4   :  { %1427 = vmatprep.subr.bf16.mxu1 %v6409_v40 }
 0x6c7   :  { %1428 = vmatpush1.bf16.msra.mxu1 %v6412_v54 }
 0x6c8   :  { %1680 = vmatprep.subr.bf16.mxu1 %v6415_v55 }
 0x78d   :  { %v1196_v57 = vpop.f32.mrb[8].mxu1 }
 0x78e   :  { %v1197_v34 = vadd.f32 %v1196_v57, %v6071_v23  ;;  %v1198_v8 = vpop.f32.mrb[9].mxu1 }
 0x78f   :  { %v1200_v58 = vpop.f32.mrb[10].mxu1  ;;  %v6422_v60 = vadd.f32 %v1198_v8, %v6073_v24 }
 0x790   :  { %v1201_v11 = vadd.f32 %v1200_v58, %v6071_v23  ;;  %v1202_v59 = vpop.f32.mrb[11].mxu1  ;;  %1229 = vrot.lane.b32.xlu1 %v1197_v34, %s5873_s3  ;;  %v1213_v62 = vadd.f32 %v1197_v34, %v6109_v42  ;;  %v1271_v3 = vadd.f32 %v1197_v34, %v6185_v52 }
 0x791   :  { %v6426_v61 = vadd.f32 %v1202_v59, %v6073_v24  ;;  %v5722_v59 = vld [vmem:[#allocation2 + $0x40] sm:$0xff] }
 0x792   :  { %1231 = vrot.lane.b32.xlu0 %v1201_v11, %s5873_s3  ;;  %v1214_v1 = vadd.f32 %v1201_v11, %v6114_v46  ;;  %v4997_v9 = vmul.f32 -1.442695, %v1213_v62  ;;  %v1273_v21 = vadd.f32 %v1201_v11, %v6190_v56  ;;  %v4999_v25 = vmul.f32 -1.442695, %v1271_v3  ;;  %v5723_v3 = vld [vmem:[#allocation2 + $0x50] sm:$0xff] }
 0x794   :  { %1301 = vrot.lane.b32.xlu1 %v6422_v60, %s5873_s3  ;;  %v4998_v10 = vmul.f32 -1.442695, %v1214_v1  ;;  %5266 = vpow2.f32 %v4997_v9  ;;  %v5001_v26 = vmul.f32 -1.442695, %v1273_v21  ;;  %v4949_v9 = vsel %vm97_vm13, 1.0, %v8203_v39  ;;  %v1210_v21 = vld [vmem:[#allocation2 + $0x1a8] sm:$0xff] }
 0x795   :  { %194 = vst.msk [vmem:[#allocation4 + $0xd0] sm:$0xff] %vm167_vm3, %v4949_v9 }
 0x796   :  { %1303 = vrot.lane.b32.xlu0 %v6426_v61, %s5873_s3  ;;  %5268 = vpow2.f32 %v4998_v10 }
 0x797   :  { %5270 = vpow2.f32 %v4999_v25 }
 0x798   :  { %5272 = vpow2.f32 %v5001_v26  ;;  %v4950_v26 = vsel %vm98_vm14, 1.0, %v8203_v39 }
 0x799   :  { %195 = vst.msk [vmem:[#allocation4 + $0xd8] sm:$0xff] %vm167_vm3, %v4950_v26 }
 0x79e   :  { %v5267_v28 = vpop.eup %5266 }
 0x79f   :  { %v1221_v41 = vadd.f32 1.0, %v5267_v28 }
 0x7a0   :  { %v5269_v32 = vpop.eup %5268 }
 0x7a1   :  { %v5271_v7 = vpop.eup %5270  ;;  %v1222_v33 = vadd.f32 1.0, %v5269_v32  ;;  %5274 = vrcp.f32 %v1221_v41  ;;  %v1212_v32 = vld [vmem:[#allocation2 + $0x1b8] sm:$0xff] }
 0x7a2   :  { %v5273_v42 = vpop.eup %5272  ;;  %v1287_v46 = vadd.f32 1.0, %v5271_v7 }
 0x7a3   :  { %5276 = vrcp.f32 %v1222_v33  ;;  %v1289_v37 = vadd.f32 1.0, %v5273_v42 }
 0x7a4   :  { %5278 = vrcp.f32 %v1287_v46 }
 0x7a5   :  { %5280 = vrcp.f32 %v1289_v37  ;;  %v1344_v37 = vld [vmem:[#allocation4 + $0x20] sm:$0xff] }
 0x7ab   :  { %v6436_v52 = vpop.eup %5274 }
 0x7ad   :  { %v6440_v4 = vpop.eup %5276 }
 0x7ae   :  { %v5279_v14 = vpop.eup %5278 }
 0x7af   :  { %v5281_v34 = vpop.eup %5280 }
 0x802   :  { %v1230_v56 = vpop.permute.xlu1 %1229 }
 0x803   :  { %v1235_v36 = vmul.f32 %v6436_v52, %v1230_v56 }
 0x804   :  { %v1232_v44 = vpop.permute.xlu0 %1231 }
 0x805   :  { %v1236_v13 = vmul.f32 %v6440_v4, %v1232_v44  ;;  %1239 = vrot.lane.b32.xlu1 %v1235_v36, %s5873_s3  ;;  %v1345_v36 = vld [vmem:[#allocation4 + $0x28] sm:$0xff] }
 0x806   :  { %v1302_v15 = vpop.permute.xlu1 %1301 }
 0x807   :  { %v1307_v57 = vmul.f32 %v5279_v14, %v1302_v15  ;;  %1241 = vrot.lane.b32.xlu0 %v1236_v13, %s5873_s3  ;;  %v1272_v14 = vadd.f32 %v1210_v21, %v6422_v60  ;;  %v1274_v15 = vadd.f32 %v1212_v32, %v6426_v61  ;;  %v1348_v60 = vld [vmem:[#allocation4 + $0xd8] sm:$0xff] }
 0x808   :  { %v1304_v8 = vpop.permute.xlu0 %1303 }
 0x809   :  { %v1308_v58 = vmul.f32 %v5281_v34, %v1304_v8  ;;  %1311 = vrot.lane.b32.xlu1 %v1307_v57, %s5873_s3  ;;  %v5000_v48 = vmul.f32 -1.442695, %v1272_v14  ;;  %v5002_v57 = vmul.f32 -1.442695, %v1274_v15 }
 0x80b   :  { %1313 = vrot.lane.b32.xlu0 %v1308_v58, %s5873_s3 }
 0x877   :  { %v1240_v11 = vpop.permute.xlu1 %1239 }
 0x878   :  { %v1245_v62 = vadd.f32 %v5722_v59, %v1240_v11 }
 0x879   :  { %v1242_v1 = vpop.permute.xlu0 %1241 }
 0x87a   :  { %5282 = vtanh.f32 %v1245_v62  ;;  %v1246_v10 = vadd.f32 %v5723_v3, %v1242_v1  ;;  %v1347_v62 = vld [vmem:[#allocation4 + $0xd0] sm:$0xff] }
 0x87b   :  { %v1312_v25 = vpop.permute.xlu1 %1311 }
 0x87c   :  { %5284 = vtanh.f32 %v1246_v10  ;;  %v1317_v28 = vadd.f32 %v1312_v25, %v1210_v21 }
 0x87d   :  { %v1314_v41 = vpop.permute.xlu0 %1313 }
 0x87e   :  { %v1318_v7 = vadd.f32 %v1314_v41, %v1212_v32  ;;  %5286 = vtanh.f32 %v1317_v28 }
 0x880   :  { %5288 = vtanh.f32 %v1318_v7 }
 0x881   :  { %5290 = vpow2.f32 %v5000_v48 }
 0x882   :  { %5292 = vpow2.f32 %v5002_v57 }
 0x884   :  { %v5283_v33 = vpop.eup %5282 }
 0x885   :  { %v1249_v42 = vsub.f32 %v6360_v20, %v5283_v33 }
 0x886   :  { %v5285_v46 = vpop.eup %5284 }
 0x887   :  { %1253 = vrot.lane.b32.xlu1 %v1249_v42, %s5875_s22  ;;  %v1250_v27 = vsub.f32 %v6363_v30, %v5285_v46 }
 0x888   :  { %v5287_v56 = vpop.eup %5286 }
 0x889   :  { %1255 = vrot.lane.b32.xlu0 %v1250_v27, %s5875_s22  ;;  %v1321_v6 = vsub.f32 %v6383_v47, %v5287_v56 }
 0x88a   :  { %v5289_v44 = vpop.eup %5288 }
 0x88b   :  { %1351 = vperm.xlu1 %5108, %v1344_v37   ;;  %v1322_v13 = vsub.f32 %v6386_v2, %v5289_v44  ;;  %v5291_v59 = vpop.eup %5290 }
 0x88c   :  { %v5293_v1 = vpop.eup %5292  ;;  %v1288_v9 = vadd.f32 1.0, %v5291_v59 }
 0x88d   :  { %1356 = vperm.xlu0 %5107, %v1345_v36   ;;  %v1290_v61 = vadd.f32 1.0, %v5293_v1 }
 0x88e   :  { %5294 = vrcp.f32 %v1288_v9 }
 0x88f   :  { %1325 = vrot.lane.b32.xlu1 %v1321_v6, %s5875_s22  ;;  %5296 = vrcp.f32 %v1290_v61 }
 0x891   :  { %1327 = vrot.lane.b32.xlu0 %v1322_v13, %s5875_s22 }
 0x898   :  { %v5295_v10 = vpop.eup %5294 }
 0x899   :  { %v5297_v25 = vpop.eup %5296 }
 0x8f9   :  { %v1254_v34 = vpop.permute.xlu1 %1253 }
 0x8fa   :  { %v1259_v8 = vmul.f32 %v6436_v52, %v1254_v34 }
 0x8fb   :  { %v1256_v58 = vpop.permute.xlu0 %1255 }
 0x8fc   :  { %v1260_v11 = vmul.f32 %v6440_v4, %v1256_v58  ;;  %1263 = vrot.lane.b32.xlu1 %v1259_v8, %s5876_s23 }
 0x8fe   :  { %1265 = vrot.lane.b32.xlu0 %v1260_v11, %s5876_s23 }
 0x900   :  { %1374 = vperm.xlu1 %5108, %v1347_v62  }
 0x902   :  { %1379 = vperm.xlu0 %5107, %v1348_v60  }
 0x90a   :  { %v6472_v3 = vpop.permute.xlu1 %1351 }
 0x90c   :  { %v6474_v52 = vpop.permute.xlu0 %1356 }
 0x90d   :  { %8279 = vst [vmem:[#allocation18_spill] sm:$0xff] %v6474_v52 }
 0x90e   :  { %v1326_v4 = vpop.permute.xlu1 %1325 }
 0x90f   :  { %v1331_v21 = vmul.f32 %v5295_v10, %v1326_v4 }
 0x910   :  { %v1328_v26 = vpop.permute.xlu0 %1327 }
 0x911   :  { %v1332_v28 = vmul.f32 %v5297_v25, %v1328_v26  ;;  %1335 = vrot.lane.b32.xlu1 %v1331_v21, %s5876_s23 }
 0x913   :  { %1337 = vrot.lane.b32.xlu0 %v1332_v28, %s5876_s23 }
 0x96e   :  { %v1264_v32 = vpop.permute.xlu1 %1263 }
 0x96f   :  { %v6478_v41 = vadd.f32 %v5283_v33, %v1264_v32  ;;  %v1465_v32 = vld [vmem:[#allocation2 + $0x60] sm:$0xff] }
 0x970   :  { %v1266_v7 = vpop.permute.xlu0 %1265 }
 0x971   :  { %v1395_v42 = vsub.f32 %v6478_v41, %v6360_v20  ;;  %v6482_v27 = vadd.f32 %v5285_v46, %v1266_v7 }
 0x973   :  { %8280 = vst [vmem:[#allocation19_spill] sm:$0xff] %v6482_v27  ;;  %v1397_v37 = vmul.f32 %v1395_v42, %v6472_v3  ;;  %v1396_v36 = vsub.f32 %v6482_v27, %v6363_v30  ;;  %v1466_v42 = vld [vmem:[#allocation2 + $0x70] sm:$0xff] }
 0x975   :  { %v1398_v6 = vmul.f32 %v1396_v36, %v6474_v52  ;;  %v6489_v13 = vadd.f32 %v1397_v37, %v6360_v20 }
 0x977   :  { %v6492_v14 = vadd.f32 %v1398_v6, %v6363_v30  ;;  %v5724_v6 = vld [vmem:[#allocation2 + $0x180] sm:$0xff] }
 0x979   :  { %v5119_v33 = vpack.i.bf16 %v6492_v14, %v6489_v13 }
 0x97b   :  { %5120 = vrot.lane.b32.xlu1 %v5119_v33, %s5873_s3 }
 0x97f   :  { %v6497_v46 = vpop.permute.xlu1 %1374 }
 0x980   :  { %8281 = vst [vmem:[#allocation20_spill] sm:$0xff] %v6497_v46 }
 0x981   :  { %v6499_v15 = vpop.permute.xlu0 %1379 }
 0x982   :  { %8282 = vst [vmem:[#allocation21_spill] sm:$0xff] %v6499_v15 }
 0x983   :  { %v1336_v48 = vpop.permute.xlu1 %1335 }
 0x984   :  { %v6501_v34 = vadd.f32 %v5287_v56, %v1336_v48 }
 0x985   :  { %v1338_v57 = vpop.permute.xlu0 %1337 }
 0x986   :  { %8283 = vst [vmem:[#allocation22_spill] sm:$0xff] %v6501_v34  ;;  %v6503_v8 = vadd.f32 %v5289_v44, %v1338_v57  ;;  %v1401_v20 = vsub.f32 %v6501_v34, %v6383_v47  ;;  %v5725_v57 = vld [vmem:[#allocation2 + $0x190] sm:$0xff] }
 0x988   :  { %8284 = vst [vmem:[#allocation23_spill] sm:$0xff] %v6503_v8  ;;  %v1402_v30 = vsub.f32 %v6503_v8, %v6386_v2  ;;  %v1403_v58 = vmul.f32 %v1401_v20, %v6497_v46 }
 0x98a   :  { %v1404_v11 = vmul.f32 %v1402_v30, %v6499_v15  ;;  %v6512_v62 = vadd.f32 %v1403_v58, %v6383_v47 }
 0x98c   :  { %v6515_v1 = vadd.f32 %v1404_v11, %v6386_v2 }
 0x9ed   :  { %v5121_v59 = vpop.permute.xlu1 %5120 }
 0x9ee   :  { %v5123_v56 = vunpack.i.h.bf16 %v5121_v59  ;;  %v5122_v44 = vunpack.i.l.bf16 %v5121_v59 }
 0x9f0   :  { %v1416_v60 = vsel %vm284_vm0, %v5123_v56, %v6515_v1  ;;  %v1415_v9 = vsel %vm284_vm0, %v5122_v44, %v6512_v62 }
 0x9f1   :  { %v1417_v61 = vpack.c.bf16 %v1416_v60, %v1415_v9 }
 0x9f3   :  { %5003 = vmatmul.mubr.msk.bf16.vlgmr.msra.gmra.mrb[12].mxu1 %vm527_vm1, %v1417_v61 }
 0x9f4   :  { %1681 = vmatpush1.bf16.msra.mxu1 %v6393_v49  ;;  %1712 = vmatprep.mubr.bf16.mxu1 %v8201_v0 }
 0x9f5   :  { %1682 = vmatprep.subr.bf16.mxu1 %v6397_v50 }
 0x9f8   :  { %1683 = vmatpush1.bf16.msra.mxu1 %v6400_v51 }
 0x9f9   :  { %1684 = vmatprep.subr.bf16.mxu1 %v6403_v31 }
 0x9fc   :  { %1685 = vmatpush1.bf16.msra.mxu1 %v6406_v53 }
 0x9fd   :  { %1686 = vmatprep.subr.bf16.mxu1 %v6409_v40 }
 0xa00   :  { %1687 = vmatpush1.bf16.msra.mxu1 %v6412_v54 }
 0xa01   :  { %1939 = vmatprep.subr.bf16.mxu1 %v6415_v55 }
 0xac6   :  { %v1455_v47 = vpop.f32.mrb[12].mxu1 }
 0xac7   :  { %v1456_v2 = vadd.f32 %v1455_v47, %v6071_v23  ;;  %v1457_v10 = vpop.f32.mrb[13].mxu1 }
 0xac8   :  { %v1459_v4 = vpop.f32.mrb[14].mxu1  ;;  %v6535_v26 = vadd.f32 %v1457_v10, %v6073_v24 }
 0xac9   :  { %v1460_v21 = vadd.f32 %v1459_v4, %v6071_v23  ;;  %v1461_v25 = vpop.f32.mrb[15].mxu1  ;;  %1488 = vrot.lane.b32.xlu0 %v1456_v2, %s5873_s3  ;;  %v1472_v7 = vadd.f32 %v1465_v32, %v1456_v2  ;;  %v1530_v33 = vadd.f32 %v5724_v6, %v1456_v2 }
 0xaca   :  { %v6539_v28 = vadd.f32 %v1461_v25, %v6073_v24 }
 0xacb   :  { %1490 = vrot.lane.b32.xlu1 %v1460_v21, %s5873_s3  ;;  %v1473_v37 = vadd.f32 %v1466_v42, %v1460_v21  ;;  %v5004_v36 = vmul.f32 -1.442695, %v1472_v7  ;;  %v1532_v20 = vadd.f32 %v5725_v57, %v1460_v21  ;;  %v5006_v30 = vmul.f32 -1.442695, %v1530_v33 }
 0xacc   :  { %v4929_v7 = vsel %vm77_vm15, 1.0, %v8203_v39 }
 0xacd   :  { %1560 = vrot.lane.b32.xlu0 %v6535_v26, %s5873_s3  ;;  %v5005_v48 = vmul.f32 -1.442695, %v1473_v37  ;;  %5298 = vpow2.f32 %v5004_v36  ;;  %v5008_v58 = vmul.f32 -1.442695, %v1532_v20  ;;  %174 = vst.msk [vmem:[#allocation4 + $0x30] sm:$0xff] %vm167_vm3, %v4929_v7  ;;  %v6558_v36 = vld [vmem:[%s8194_s1 + $0x8] sm:$0xff] }
 0xace   :  { %vm78_vm2 = vcmp.gt.s32.totalorder %v6558_v36, 3  ;;  %vm96_vm5 = vcmp.gt.s32.totalorder %v6558_v36, 12  ;;  %vm80_vm7 = vcmp.gt.s32.totalorder %v6558_v36, 4  ;;  %vm94_vm9 = vcmp.gt.s32.totalorder %v6558_v36, 11 }
 0xacf   :  { %1562 = vrot.lane.b32.xlu1 %v6539_v28, %s5873_s3  ;;  %5300 = vpow2.f32 %v5005_v48  ;;  %v4930_v33 = vsel %vm78_vm2, 1.0, %v8203_v39  ;;  %vm82_vm11 = vcmp.gt.s32.totalorder %v6558_v36, 5  ;;  %vm92_vm13 = vcmp.gt.s32.totalorder %v6558_v36, 10 }
 0xad0   :  { %5302 = vpow2.f32 %v5006_v30  ;;  %175 = vst.msk [vmem:[#allocation4 + $0x38] sm:$0xff] %vm167_vm3, %v4930_v33  ;;  %vm84_vm15 = vcmp.gt.s32.totalorder %v6558_v36, 6 }
 0xad1   :  { %5304 = vpow2.f32 %v5008_v58 }
 0xad7   :  { %v5299_v11 = vpop.eup %5298 }
 0xad8   :  { %v1480_v56 = vadd.f32 1.0, %v5299_v11 }
 0xad9   :  { %v5301_v59 = vpop.eup %5300 }
 0xada   :  { %v5303_v44 = vpop.eup %5302  ;;  %v1481_v60 = vadd.f32 1.0, %v5301_v59  ;;  %5306 = vrcp.f32 %v1480_v56  ;;  %v6569_v59 = vld [vmem:[%s8194_s1] sm:$0xff] }
 0xadb   :  { %v5305_v9 = vpop.eup %5304  ;;  %v1546_v61 = vadd.f32 1.0, %v5303_v44  ;;  %vm95_vm4 = vcmp.gt.s32.totalorder %v6569_v59, 12  ;;  %vm79_vm6 = vcmp.gt.s32.totalorder %v6569_v59, 4  ;;  %vm93_vm8 = vcmp.gt.s32.totalorder %v6569_v59, 11 }
 0xadc   :  { %5308 = vrcp.f32 %v1481_v60  ;;  %v1548_v47 = vadd.f32 1.0, %v5305_v9  ;;  %v4947_v44 = vsel %vm95_vm4, 1.0, %v8203_v39  ;;  %v1469_v9 = vld [vmem:[#allocation2 + $0x188] sm:$0xff]  ;;  %vm81_vm10 = vcmp.gt.s32.totalorder %v6569_v59, 5 }
 0xadd   :  { %5310 = vrcp.f32 %v1546_v61  ;;  %192 = vst.msk [vmem:[#allocation4 + $0xc0] sm:$0xff] %vm167_vm3, %v4947_v44  ;;  %vm91_vm12 = vcmp.gt.s32.totalorder %v6569_v59, 10  ;;  %vm83_vm14 = vcmp.gt.s32.totalorder %v6569_v59, 6  ;;  %vm89_vm2 = vcmp.gt.s32.totalorder %v6569_v59, 9 }
 0xade   :  { %5312 = vrcp.f32 %v1548_v47 }
 0xae4   :  { %v6545_v2 = vpop.eup %5306 }
 0xae6   :  { %v6549_v21 = vpop.eup %5308 }
 0xae7   :  { %v5311_v6 = vpop.eup %5310 }
 0xae8   :  { %v5313_v57 = vpop.eup %5312 }
 0xb3b   :  { %v1489_v10 = vpop.permute.xlu0 %1488 }
 0xb3c   :  { %v1494_v4 = vmul.f32 %v6545_v2, %v1489_v10  ;;  %v1471_v10 = vld [vmem:[#allocation2 + $0x198] sm:$0xff] }
 0xb3d   :  { %v1491_v25 = vpop.permute.xlu1 %1490 }
 0xb3e   :  { %v1495_v37 = vmul.f32 %v6549_v21, %v1491_v25  ;;  %1498 = vrot.lane.b32.xlu0 %v1494_v4, %s5873_s3 }
 0xb3f   :  { %v1561_v45 = vpop.permute.xlu0 %1560 }
 0xb40   :  { %v1566_v48 = vmul.f32 %v5311_v6, %v1561_v45  ;;  %1500 = vrot.lane.b32.xlu1 %v1495_v37, %s5873_s3  ;;  %v1603_v45 = vld [vmem:[#allocation4 + $0x30] sm:$0xff] }
 0xb41   :  { %v1563_v20 = vpop.permute.xlu1 %1562 }
 0xb42   :  { %v1567_v30 = vmul.f32 %v5313_v57, %v1563_v20  ;;  %1570 = vrot.lane.b32.xlu0 %v1566_v48, %s5873_s3  ;;  %v1604_v48 = vld [vmem:[#allocation4 + $0x38] sm:$0xff] }
 0xb44   :  { %1572 = vrot.lane.b32.xlu1 %v1567_v30, %s5873_s3 }
 0xbb0   :  { %v1499_v58 = vpop.permute.xlu0 %1498 }
 0xbb1   :  { %v1504_v11 = vadd.f32 %v1499_v58, %v1465_v32  ;;  %v4948_v32 = vsel %vm96_vm5, 1.0, %v8203_v39  ;;  %v1531_v58 = vadd.f32 %v1469_v9, %v6535_v26 }
 0xbb2   :  { %v1501_v56 = vpop.permute.xlu1 %1500  ;;  %193 = vst.msk [vmem:[#allocation4 + $0xc8] sm:$0xff] %vm167_vm3, %v4948_v32 }
 0xbb3   :  { %5314 = vtanh.f32 %v1504_v11  ;;  %v1505_v60 = vadd.f32 %v1501_v56, %v1466_v42  ;;  %v1533_v11 = vadd.f32 %v1471_v10, %v6539_v28  ;;  %v5007_v56 = vmul.f32 -1.442695, %v1531_v58 }
 0xbb4   :  { %v1571_v61 = vpop.permute.xlu0 %1570 }
 0xbb5   :  { %5316 = vtanh.f32 %v1505_v60  ;;  %v1576_v47 = vadd.f32 %v1571_v61, %v1469_v9  ;;  %v5009_v44 = vmul.f32 -1.442695, %v1533_v11 }
 0xbb6   :  { %v1573_v4 = vpop.permute.xlu1 %1572 }
 0xbb7   :  { %v1577_v25 = vadd.f32 %v1573_v4, %v1471_v10  ;;  %5318 = vtanh.f32 %v1576_v47 }
 0xbb9   :  { %5320 = vtanh.f32 %v1577_v25  ;;  %v1606_v25 = vld [vmem:[#allocation4 + $0xc0] sm:$0xff]  ;;  %v1607_v26 = vld [vmem:[#allocation4 + $0xc8] sm:$0xff] }
 0xbba   :  { %5322 = vpow2.f32 %v5007_v56 }
 0xbbb   :  { %5324 = vpow2.f32 %v5009_v44 }
 0xbbd   :  { %v5315_v7 = vpop.eup %5314 }
 0xbbe   :  { %v1508_v42 = vsub.f32 %v6489_v13, %v5315_v7 }
 0xbbf   :  { %v5317_v37 = vpop.eup %5316 }
 0xbc0   :  { %1512 = vrot.lane.b32.xlu0 %v1508_v42, %s5875_s22  ;;  %v1509_v6 = vsub.f32 %v6492_v14, %v5317_v37 }
 0xbc1   :  { %v5319_v33 = vpop.eup %5318 }
 0xbc2   :  { %1514 = vrot.lane.b32.xlu1 %v1509_v6, %s5875_s22  ;;  %v1580_v20 = vsub.f32 %v6512_v62, %v5319_v33 }
 0xbc3   :  { %v5321_v57 = vpop.eup %5320 }
 0xbc4   :  { %1610 = vperm.xlu0 %5107, %v1603_v45   ;;  %v1581_v30 = vsub.f32 %v6515_v1, %v5321_v57  ;;  %v5323_v4 = vpop.eup %5322 }
 0xbc5   :  { %v5325_v42 = vpop.eup %5324  ;;  %v1547_v9 = vadd.f32 1.0, %v5323_v4 }
 0xbc6   :  { %1615 = vperm.xlu1 %5108, %v1604_v48   ;;  %v1549_v28 = vadd.f32 1.0, %v5325_v42 }
 0xbc7   :  { %5326 = vrcp.f32 %v1547_v9 }
 0xbc8   :  { %1584 = vrot.lane.b32.xlu0 %v1580_v20, %s5875_s22  ;;  %5328 = vrcp.f32 %v1549_v28 }
 0xbca   :  { %1586 = vrot.lane.b32.xlu1 %v1581_v30, %s5875_s22 }
 0xbd1   :  { %v5327_v6 = vpop.eup %5326 }
 0xbd2   :  { %v5329_v48 = vpop.eup %5328 }
 0xc32   :  { %v1513_v60 = vpop.permute.xlu0 %1512 }
 0xc33   :  { %v1518_v61 = vmul.f32 %v6545_v2, %v1513_v60 }
 0xc34   :  { %v1515_v32 = vpop.permute.xlu1 %1514 }
 0xc35   :  { %v1519_v47 = vmul.f32 %v6549_v21, %v1515_v32  ;;  %1522 = vrot.lane.b32.xlu0 %v1518_v61, %s5876_s23 }
 0xc37   :  { %1524 = vrot.lane.b32.xlu1 %v1519_v47, %s5876_s23 }
 0xc39   :  { %1633 = vperm.xlu0 %5107, %v1606_v25  }
 0xc3b   :  { %1638 = vperm.xlu1 %5108, %v1607_v26  }
 0xc43   :  { %v6591_v10 = vpop.permute.xlu0 %1610 }
 0xc44   :  { %8285 = vst [vmem:[#allocation24_spill] sm:$0xff] %v6591_v10 }
 0xc45   :  { %v6593_v2 = vpop.permute.xlu1 %1615 }
 0xc46   :  { %8286 = vst [vmem:[#allocation25_spill] sm:$0xff] %v6593_v2 }
 0xc47   :  { %v1585_v21 = vpop.permute.xlu0 %1584 }
 0xc48   :  { %v1590_v45 = vmul.f32 %v5327_v6, %v1585_v21 }
 0xc49   :  { %v1587_v20 = vpop.permute.xlu1 %1586 }
 0xc4a   :  { %v1591_v30 = vmul.f32 %v5329_v48, %v1587_v20  ;;  %1594 = vrot.lane.b32.xlu0 %v1590_v45, %s5876_s23 }
 0xc4c   :  { %1596 = vrot.lane.b32.xlu1 %v1591_v30, %s5876_s23 }
 0xca7   :  { %v1523_v58 = vpop.permute.xlu0 %1522 }
 0xca8   :  { %v6597_v11 = vadd.f32 %v5315_v7, %v1523_v58 }
 0xca9   :  { %v1525_v56 = vpop.permute.xlu1 %1524 }
 0xcaa   :  { %8287 = vst [vmem:[#allocation26_spill] sm:$0xff] %v6597_v11  ;;  %v1654_v44 = vsub.f32 %v6597_v11, %v6489_v13  ;;  %v6601_v60 = vadd.f32 %v5317_v37, %v1525_v56 }
 0xcac   :  { %8288 = vst [vmem:[#allocation27_spill] sm:$0xff] %v6601_v60  ;;  %v1656_v61 = vmul.f32 %v1654_v44, %v6591_v10  ;;  %v1655_v32 = vsub.f32 %v6601_v60, %v6492_v14 }
 0xcae   :  { %v1657_v47 = vmul.f32 %v1655_v32, %v6593_v2  ;;  %v6608_v4 = vadd.f32 %v1656_v61, %v6489_v13 }
 0xcb0   :  { %v6611_v25 = vadd.f32 %v1657_v47, %v6492_v14 }
 0xcb2   :  { %v5124_v7 = vpack.i.bf16 %v6611_v25, %v6608_v4 }
 0xcb4   :  { %5125 = vrot.lane.b32.xlu0 %v5124_v7, %s5873_s3 }
 0xcb8   :  { %v6616_v37 = vpop.permute.xlu0 %1633 }
 0xcb9   :  { %8289 = vst [vmem:[#allocation28_spill] sm:$0xff] %v6616_v37 }
 0xcba   :  { %v6618_v42 = vpop.permute.xlu1 %1638 }
 0xcbb   :  { %8290 = vst [vmem:[#allocation29_spill] sm:$0xff] %v6618_v42 }
 0xcbc   :  { %v1595_v26 = vpop.permute.xlu0 %1594 }
 0xcbd   :  { %v6620_v28 = vadd.f32 %v5319_v33, %v1595_v26 }
 0xcbe   :  { %v1597_v9 = vpop.permute.xlu1 %1596 }
 0xcbf   :  { %8291 = vst [vmem:[#allocation30_spill] sm:$0xff] %v6620_v28  ;;  %v6622_v6 = vadd.f32 %v5321_v57, %v1597_v9  ;;  %v1660_v13 = vsub.f32 %v6620_v28, %v6512_v62 }
 0xcc1   :  { %8292 = vst [vmem:[#allocation31_spill] sm:$0xff] %v6622_v6  ;;  %v1661_v14 = vsub.f32 %v6622_v6, %v6515_v1  ;;  %v1662_v21 = vmul.f32 %v1660_v13, %v6616_v37  ;;  %v1724_v13 = vld [vmem:[#allocation2 + $0x80] sm:$0xff] }
 0xcc3   :  { %v1663_v45 = vmul.f32 %v1661_v14, %v6618_v42  ;;  %v6631_v20 = vadd.f32 %v1662_v21, %v6512_v62  ;;  %v1725_v21 = vld [vmem:[#allocation2 + $0x90] sm:$0xff] }
 0xcc5   :  { %v6634_v30 = vadd.f32 %v1663_v45, %v6515_v1 }
 0xd26   :  { %v5126_v48 = vpop.permute.xlu0 %5125 }
 0xd27   :  { %v5128_v33 = vunpack.i.h.bf16 %v5126_v48  ;;  %v5127_v57 = vunpack.i.l.bf16 %v5126_v48  ;;  %v1727_v48 = vld [vmem:[#allocation2 + $0x160] sm:$0xff] }
 0xd29   :  { %v1675_v58 = vsel %vm284_vm0, %v5128_v33, %v6634_v30  ;;  %v1674_v56 = vsel %vm284_vm0, %v5127_v57, %v6631_v20 }
 0xd2a   :  { %v1676_v44 = vpack.c.bf16 %v1675_v58, %v1674_v56  ;;  %v1729_v58 = vld [vmem:[#allocation2 + $0x170] sm:$0xff] }
 0xd2c   :  { %5010 = vmatmul.mubr.msk.bf16.vlgmr.msra.gmra.mrb[16].mxu1 %vm527_vm1, %v1676_v44 }
 0xd2d   :  { %1940 = vmatpush1.bf16.msra.mxu1 %v6393_v49  ;;  %1971 = vmatprep.mubr.bf16.mxu1 %v8201_v0 }
 0xd2e   :  { %1941 = vmatprep.subr.bf16.mxu1 %v6397_v50 }
 0xd31   :  { %1942 = vmatpush1.bf16.msra.mxu1 %v6400_v51 }
 0xd32   :  { %1943 = vmatprep.subr.bf16.mxu1 %v6403_v31 }
 0xd35   :  { %1944 = vmatpush1.bf16.msra.mxu1 %v6406_v53 }
 0xd36   :  { %1945 = vmatprep.subr.bf16.mxu1 %v6409_v40 }
 0xd39   :  { %1946 = vmatpush1.bf16.msra.mxu1 %v6412_v54 }
 0xd3a   :  { %2198 = vmatprep.subr.bf16.mxu1 %v6415_v55 }
 0xdff   :  { %v1714_v62 = vpop.f32.mrb[16].mxu1 }
 0xe00   :  { %v1715_v1 = vadd.f32 %v1714_v62, %v6071_v23  ;;  %v1716_v61 = vpop.f32.mrb[17].mxu1 }
 0xe01   :  { %v1718_v32 = vpop.f32.mrb[18].mxu1  ;;  %v6654_v26 = vadd.f32 %v1716_v61, %v6073_v24 }
 0xe02   :  { %v1719_v47 = vadd.f32 %v1718_v32, %v6071_v23  ;;  %v1720_v7 = vpop.f32.mrb[19].mxu1  ;;  %1747 = vrot.lane.b32.xlu1 %v1715_v1, %s5873_s3  ;;  %v1731_v14 = vadd.f32 %v1724_v13, %v1715_v1  ;;  %v1789_v57 = vadd.f32 %v1727_v48, %v1715_v1 }
 0xe03   :  { %v6658_v9 = vadd.f32 %v1720_v7, %v6073_v24 }
 0xe04   :  { %1749 = vrot.lane.b32.xlu0 %v1719_v47, %s5873_s3  ;;  %v1732_v45 = vadd.f32 %v1725_v21, %v1719_v47  ;;  %v5011_v33 = vmul.f32 -1.442695, %v1731_v14  ;;  %v1791_v44 = vadd.f32 %v1729_v58, %v1719_v47  ;;  %v5013_v62 = vmul.f32 -1.442695, %v1789_v57 }
 0xe05   :  { %v8293_v57 = vmov 0.0  }
 0xe06   :  { %1819 = vrot.lane.b32.xlu1 %v6654_v26, %s5873_s3  ;;  %v5012_v56 = vmul.f32 -1.442695, %v1732_v45  ;;  %5330 = vpow2.f32 %v5011_v33  ;;  %v5015_v61 = vmul.f32 -1.442695, %v1791_v44  ;;  %v4931_v58 = vsel %vm79_vm6, 1.0, %v8293_v57 }
 0xe07   :  { %176 = vst.msk [vmem:[#allocation4 + $0x40] sm:$0xff] %vm167_vm3, %v4931_v58  ;;  %v4946_v58 = vsel %vm94_vm9, 1.0, %v8293_v57 }
 0xe08   :  { %1821 = vrot.lane.b32.xlu0 %v6658_v9, %s5873_s3  ;;  %5332 = vpow2.f32 %v5012_v56  ;;  %191 = vst.msk [vmem:[#allocation4 + $0xb8] sm:$0xff] %vm167_vm3, %v4946_v58 }
 0xe09   :  { %5334 = vpow2.f32 %v5013_v62 }
 0xe0a   :  { %5336 = vpow2.f32 %v5015_v61 }
 0xe10   :  { %v5331_v32 = vpop.eup %5330 }
 0xe11   :  { %v1739_v0 = vadd.f32 1.0, %v5331_v32 }
 0xe12   :  { %v5333_v7 = vpop.eup %5332 }
 0xe13   :  { %v5335_v39 = vpop.eup %5334  ;;  %v1740_v42 = vadd.f32 1.0, %v5333_v7  ;;  %5338 = vrcp.f32 %v1739_v0 }
 0xe14   :  { %v5337_v6 = vpop.eup %5336  ;;  %v1805_v37 = vadd.f32 1.0, %v5335_v39 }
 0xe15   :  { %5340 = vrcp.f32 %v1740_v42  ;;  %v1807_v14 = vadd.f32 1.0, %v5337_v6 }
 0xe16   :  { %5342 = vrcp.f32 %v1805_v37  ;;  %v4932_v37 = vsel %vm80_vm7, 1.0, %v8293_v57 }
 0xe17   :  { %5344 = vrcp.f32 %v1807_v14  ;;  %177 = vst.msk [vmem:[#allocation4 + $0x48] sm:$0xff] %vm167_vm3, %v4932_v37  ;;  %v4945_v14 = vsel %vm93_vm8, 1.0, %v8293_v57 }
 0xe18   :  { %190 = vst.msk [vmem:[#allocation4 + $0xb0] sm:$0xff] %vm167_vm3, %v4945_v14 }
 0xe1d   :  { %v6664_v1 = vpop.eup %5338 }
 0xe1f   :  { %v6668_v48 = vpop.eup %5340 }
 0xe20   :  { %v5343_v0 = vpop.eup %5342 }
 0xe21   :  { %v5345_v6 = vpop.eup %5344 }
 0xe74   :  { %v1748_v47 = vpop.permute.xlu1 %1747 }
 0xe75   :  { %v1753_v45 = vmul.f32 %v6664_v1, %v1748_v47 }
 0xe76   :  { %v1750_v33 = vpop.permute.xlu0 %1749 }
 0xe77   :  { %v1754_v56 = vmul.f32 %v6668_v48, %v1750_v33  ;;  %1757 = vrot.lane.b32.xlu1 %v1753_v45, %s5873_s3  ;;  %v1728_v45 = vld [vmem:[#allocation2 + $0x168] sm:$0xff] }
 0xe78   :  { %v1820_v39 = vpop.permute.xlu1 %1819 }
 0xe79   :  { %v1825_v42 = vmul.f32 %v5343_v0, %v1820_v39  ;;  %1759 = vrot.lane.b32.xlu0 %v1754_v56, %s5873_s3 }
 0xe7a   :  { %v1822_v44 = vpop.permute.xlu0 %1821 }
 0xe7b   :  { %v1826_v62 = vmul.f32 %v5345_v6, %v1822_v44  ;;  %1829 = vrot.lane.b32.xlu1 %v1825_v42, %s5873_s3  ;;  %v1862_v44 = vld [vmem:[#allocation4 + $0x40] sm:$0xff] }
 0xe7d   :  { %1831 = vrot.lane.b32.xlu0 %v1826_v62, %s5873_s3 }
 0xee9   :  { %v1758_v61 = vpop.permute.xlu1 %1757 }
 0xeea   :  { %v1763_v32 = vadd.f32 %v1758_v61, %v1724_v13  ;;  %v1730_v13 = vld [vmem:[#allocation2 + $0x178] sm:$0xff]  ;;  %v1863_v61 = vld [vmem:[#allocation4 + $0x48] sm:$0xff] }
 0xeeb   :  { %v1760_v7 = vpop.permute.xlu0 %1759 }
 0xeec   :  { %5346 = vtanh.f32 %v1763_v32  ;;  %v1764_v47 = vadd.f32 %v1760_v7, %v1725_v21 }
 0xeed   :  { %v1830_v33 = vpop.permute.xlu1 %1829 }
 0xeee   :  { %5348 = vtanh.f32 %v1764_v47  ;;  %v1835_v56 = vadd.f32 %v1830_v33, %v1728_v45  ;;  %v1790_v47 = vadd.f32 %v1728_v45, %v6654_v26  ;;  %v1792_v33 = vadd.f32 %v1730_v13, %v6658_v9  ;;  %v1866_v26 = vld [vmem:[#allocation4 + $0xb8] sm:$0xff] }
 0xeef   :  { %v1832_v0 = vpop.permute.xlu0 %1831 }
 0xef0   :  { %v1836_v39 = vadd.f32 %v1832_v0, %v1730_v13  ;;  %5350 = vtanh.f32 %v1835_v56  ;;  %v5014_v58 = vmul.f32 -1.442695, %v1790_v47  ;;  %v5016_v56 = vmul.f32 -1.442695, %v1792_v33 }
 0xef2   :  { %5352 = vtanh.f32 %v1836_v39 }
 0xef3   :  { %5354 = vpow2.f32 %v5014_v58 }
 0xef4   :  { %5356 = vpow2.f32 %v5016_v56 }
 0xef6   :  { %v5347_v37 = vpop.eup %5346 }
 0xef7   :  { %v1767_v21 = vsub.f32 %v6608_v4, %v5347_v37 }
 0xef8   :  { %v5349_v42 = vpop.eup %5348 }
 0xef9   :  { %1771 = vrot.lane.b32.xlu1 %v1767_v21, %s5875_s22  ;;  %v1768_v6 = vsub.f32 %v6611_v25, %v5349_v42 }
 0xefa   :  { %v5351_v62 = vpop.eup %5350 }
 0xefb   :  { %1773 = vrot.lane.b32.xlu0 %v1768_v6, %s5875_s22  ;;  %v1839_v7 = vsub.f32 %v6631_v20, %v5351_v62 }
 0xefc   :  { %v5353_v32 = vpop.eup %5352 }
 0xefd   :  { %1869 = vperm.xlu1 %5108, %v1862_v44   ;;  %v1840_v14 = vsub.f32 %v6634_v30, %v5353_v32  ;;  %v5355_v44 = vpop.eup %5354 }
 0xefe   :  { %v1806_v45 = vadd.f32 1.0, %v5355_v44 }
 0xeff   :  { %1874 = vperm.xlu0 %5107, %v1863_v61   ;;  %v1865_v61 = vld [vmem:[#allocation4 + $0xb0] sm:$0xff] }
 0xf00   :  { %5358 = vrcp.f32 %v1806_v45 }
 0xf01   :  { %1843 = vrot.lane.b32.xlu1 %v1839_v7, %s5875_s22  ;;  %v5357_v7 = vpop.eup %5356 }
 0xf02   :  { %v1808_v9 = vadd.f32 1.0, %v5357_v7 }
 0xf03   :  { %1845 = vrot.lane.b32.xlu0 %v1840_v14, %s5875_s22 }
 0xf04   :  { %5360 = vrcp.f32 %v1808_v9 }
 0xf0a   :  { %v5359_v14 = vpop.eup %5358 }
 0xf0e   :  { %v5361_v33 = vpop.eup %5360 }
 0xf6b   :  { %v1772_v0 = vpop.permute.xlu1 %1771 }
 0xf6c   :  { %v1777_v39 = vmul.f32 %v6664_v1, %v1772_v0 }
 0xf6d   :  { %v1774_v21 = vpop.permute.xlu0 %1773 }
 0xf6e   :  { %v1778_v6 = vmul.f32 %v6668_v48, %v1774_v21  ;;  %1781 = vrot.lane.b32.xlu1 %v1777_v39, %s5876_s23 }
 0xf70   :  { %1783 = vrot.lane.b32.xlu0 %v1778_v6, %s5876_s23 }
 0xf72   :  { %1892 = vperm.xlu1 %5108, %v1865_v61  }
 0xf74   :  { %1897 = vperm.xlu0 %5107, %v1866_v26  }
 0xf7c   :  { %v6700_v13 = vpop.permute.xlu1 %1869 }
 0xf7d   :  { %8294 = vst [vmem:[#allocation32_spill] sm:$0xff] %v6700_v13 }
 0xf7e   :  { %v6702_v1 = vpop.permute.xlu0 %1874 }
 0xf7f   :  { %8295 = vst [vmem:[#allocation33_spill] sm:$0xff] %v6702_v1 }
 0xf80   :  { %v1844_v48 = vpop.permute.xlu1 %1843 }
 0xf81   :  { %v1849_v47 = vmul.f32 %v5359_v14, %v1844_v48 }
 0xf82   :  { %v1846_v58 = vpop.permute.xlu0 %1845 }
 0xf83   :  { %v1850_v56 = vmul.f32 %v5361_v33, %v1846_v58  ;;  %1853 = vrot.lane.b32.xlu1 %v1849_v47, %s5876_s23 }
 0xf85   :  { %1855 = vrot.lane.b32.xlu0 %v1850_v56, %s5876_s23 }
 0xfe0   :  { %v1782_v0 = vpop.permute.xlu1 %1781 }
 0xfe1   :  { %v6706_v39 = vadd.f32 %v5347_v37, %v1782_v0 }
 0xfe2   :  { %v1784_v21 = vpop.permute.xlu0 %1783 }
 0xfe3   :  { %8296 = vst [vmem:[#allocation34_spill] sm:$0xff] %v6706_v39  ;;  %v1913_v6 = vsub.f32 %v6706_v39, %v6608_v4  ;;  %v6710_v44 = vadd.f32 %v5349_v42, %v1784_v21 }
 0xfe5   :  { %8297 = vst [vmem:[#allocation35_spill] sm:$0xff] %v6710_v44  ;;  %v1915_v61 = vmul.f32 %v1913_v6, %v6700_v13  ;;  %v1914_v7 = vsub.f32 %v6710_v44, %v6611_v25 }
 0xfe7   :  { %v1916_v26 = vmul.f32 %v1914_v7, %v6702_v1  ;;  %v6717_v45 = vadd.f32 %v1915_v61, %v6608_v4 }
 0xfe9   :  { %v6720_v9 = vadd.f32 %v1916_v26, %v6611_v25 }
 0xfeb   :  { %v5129_v37 = vpack.i.bf16 %v6720_v9, %v6717_v45 }
 0xfed   :  { %5130 = vrot.lane.b32.xlu1 %v5129_v37, %s5873_s3 }
 0xff1   :  { %v6725_v42 = vpop.permute.xlu1 %1892 }
 0xff2   :  { %8298 = vst [vmem:[#allocation36_spill] sm:$0xff] %v6725_v42 }
 0xff3   :  { %v6727_v14 = vpop.permute.xlu0 %1897 }
 0xff4   :  { %8299 = vst [vmem:[#allocation37_spill] sm:$0xff] %v6727_v14 }
 0xff5   :  { %v1854_v48 = vpop.permute.xlu1 %1853 }
 0xff6   :  { %v6729_v33 = vadd.f32 %v5351_v62, %v1854_v48  ;;  %v8302_v48 = vmov 0  }
 0xff7   :  { %v1856_v47 = vpop.permute.xlu0 %1855 }
 0xff8   :  { %8300 = vst [vmem:[#allocation38_spill] sm:$0xff] %v6729_v33  ;;  %v6731_v58 = vadd.f32 %v5353_v32, %v1856_v47  ;;  %v1919_v4 = vsub.f32 %v6729_v33, %v6631_v20 }
 0xffa   :  { %8301 = vst [vmem:[#allocation39_spill] sm:$0xff] %v6731_v58  ;;  %v1920_v25 = vsub.f32 %v6731_v58, %v6634_v30  ;;  %v1921_v56 = vmul.f32 %v1919_v4, %v6725_v42 }
 0xffc   :  { %v1922_v0 = vmul.f32 %v1920_v25, %v6727_v14  ;;  %v6740_v6 = vadd.f32 %v1921_v56, %v6631_v20  ;;  %v1986_v25 = vld [vmem:[#allocation2 + $0x140] sm:$0xff] }
 0xffe   :  { %v6743_v61 = vadd.f32 %v1922_v0, %v6634_v30 }
0x105f   :  { %v5131_v21 = vpop.permute.xlu1 %5130 }
0x1060   :  { %v5133_v62 = vunpack.i.h.bf16 %v5131_v21  ;;  %v5132_v32 = vunpack.i.l.bf16 %v5131_v21  ;;  %v1988_v21 = vld [vmem:[#allocation2 + $0x150] sm:$0xff] }
0x1062   :  { %v1934_v7 = vsel %vm284_vm0, %v5133_v62, %v6743_v61  ;;  %v1933_v26 = vsel %vm284_vm0, %v5132_v32, %v6740_v6 }
0x1063   :  { %v1935_v37 = vpack.c.bf16 %v1934_v7, %v1933_v26 }
0x1065   :  { %5017 = vmatmul.mubr.msk.bf16.vlgmr.msra.gmra.mrb[20].mxu1 %vm527_vm1, %v1935_v37 }
0x1066   :  { %2199 = vmatpush1.bf16.msra.mxu1 %v6393_v49  ;;  %2230 = vmatprep.mubr.bf16.mxu1 %v8302_v48 }
0x1067   :  { %2200 = vmatprep.subr.bf16.mxu1 %v6397_v50 }
0x106a   :  { %2201 = vmatpush1.bf16.msra.mxu1 %v6400_v51 }
0x106b   :  { %2202 = vmatprep.subr.bf16.mxu1 %v6403_v31 }
0x106e   :  { %2203 = vmatpush1.bf16.msra.mxu1 %v6406_v53  ;;  %v1983_v53 = vld [vmem:[#allocation2 + $0xa0] sm:$0xff] }
0x106f   :  { %2204 = vmatprep.subr.bf16.mxu1 %v6409_v40 }
0x1072   :  { %2205 = vmatpush1.bf16.msra.mxu1 %v6412_v54  ;;  %v1984_v54 = vld [vmem:[#allocation2 + $0xb0] sm:$0xff] }
0x1073   :  { %2457 = vmatprep.subr.bf16.mxu1 %v6415_v55 }
0x1138   :  { %v1973_v20 = vpop.f32.mrb[20].mxu1 }
0x1139   :  { %v1974_v30 = vadd.f32 %v1973_v20, %v6071_v23  ;;  %v1975_v49 = vpop.f32.mrb[21].mxu1 }
0x113a   :  { %v1977_v47 = vpop.f32.mrb[22].mxu1  ;;  %v6763_v51 = vadd.f32 %v1975_v49, %v6073_v24 }
0x113b   :  { %v1978_v4 = vadd.f32 %v1977_v47, %v6071_v23  ;;  %v1979_v50 = vpop.f32.mrb[23].mxu1  ;;  %2006 = vrot.lane.b32.xlu0 %v1974_v30, %s5873_s3  ;;  %v1990_v40 = vadd.f32 %v1983_v53, %v1974_v30  ;;  %v2048_v0 = vadd.f32 %v1986_v25, %v1974_v30 }
0x113c   :  { %v6767_v31 = vadd.f32 %v1979_v50, %v6073_v24 }
0x113d   :  { %2008 = vrot.lane.b32.xlu1 %v1978_v4, %s5873_s3  ;;  %v1991_v55 = vadd.f32 %v1984_v54, %v1978_v4  ;;  %v5018_v56 = vmul.f32 -1.442695, %v1990_v40  ;;  %v2050_v32 = vadd.f32 %v1988_v21, %v1978_v4  ;;  %v5020_v7 = vmul.f32 -1.442695, %v2048_v0 }
0x113e   :  { %v4933_v0 = vsel %vm81_vm10, 1.0, %v8293_v57 }
0x113f   :  { %2078 = vrot.lane.b32.xlu0 %v6763_v51, %s5873_s3  ;;  %v5019_v62 = vmul.f32 -1.442695, %v1991_v55  ;;  %5362 = vpow2.f32 %v5018_v56  ;;  %v5022_v26 = vmul.f32 -1.442695, %v2050_v32  ;;  %178 = vst.msk [vmem:[#allocation4 + $0x50] sm:$0xff] %vm167_vm3, %v4933_v0 }
0x1141   :  { %2080 = vrot.lane.b32.xlu1 %v6767_v31, %s5873_s3  ;;  %5364 = vpow2.f32 %v5019_v62  ;;  %v4934_v62 = vsel %vm82_vm11, 1.0, %v8293_v57 }
0x1142   :  { %5366 = vpow2.f32 %v5020_v7  ;;  %179 = vst.msk [vmem:[#allocation4 + $0x58] sm:$0xff] %vm167_vm3, %v4934_v62 }
0x1143   :  { %5368 = vpow2.f32 %v5022_v26 }
0x1149   :  { %v5363_v37 = vpop.eup %5362 }
0x114a   :  { %v1998_v49 = vadd.f32 1.0, %v5363_v37 }
0x114b   :  { %v5365_v20 = vpop.eup %5364 }
0x114c   :  { %v5367_v47 = vpop.eup %5366  ;;  %v1999_v50 = vadd.f32 1.0, %v5365_v20  ;;  %5370 = vrcp.f32 %v1998_v49 }
0x114d   :  { %v5369_v14 = vpop.eup %5368  ;;  %v2064_v58 = vadd.f32 1.0, %v5367_v47 }
0x114e   :  { %5372 = vrcp.f32 %v1999_v50  ;;  %v2066_v40 = vadd.f32 1.0, %v5369_v14  ;;  %v4943_v50 = vsel %vm91_vm12, 1.0, %v8293_v57 }
0x114f   :  { %5374 = vrcp.f32 %v2064_v58  ;;  %188 = vst.msk [vmem:[#allocation4 + $0xa0] sm:$0xff] %vm167_vm3, %v4943_v50 }
0x1150   :  { %5376 = vrcp.f32 %v2066_v40 }
0x1156   :  { %v6773_v30 = vpop.eup %5370 }
0x1158   :  { %v6777_v25 = vpop.eup %5372 }
0x1159   :  { %v5375_v14 = vpop.eup %5374 }
0x115a   :  { %v5377_v7 = vpop.eup %5376 }
0x11ad   :  { %v2007_v4 = vpop.permute.xlu0 %2006 }
0x11ae   :  { %v2012_v55 = vmul.f32 %v6773_v30, %v2007_v4  ;;  %v1987_v4 = vld [vmem:[#allocation2 + $0x148] sm:$0xff] }
0x11af   :  { %v2009_v56 = vpop.permute.xlu1 %2008  ;;  %v2049_v50 = vadd.f32 %v1987_v4, %v6763_v51 }
0x11b0   :  { %v2013_v21 = vmul.f32 %v6777_v25, %v2009_v56  ;;  %2016 = vrot.lane.b32.xlu0 %v2012_v55, %s5873_s3  ;;  %v4944_v56 = vsel %vm92_vm13, 1.0, %v8293_v57 }
0x11b1   :  { %v2079_v58 = vpop.permute.xlu0 %2078  ;;  %189 = vst.msk [vmem:[#allocation4 + $0xa8] sm:$0xff] %vm167_vm3, %v4944_v56 }
0x11b2   :  { %v2084_v32 = vmul.f32 %v5375_v14, %v2079_v58  ;;  %2018 = vrot.lane.b32.xlu1 %v2013_v21, %s5873_s3 }
0x11b3   :  { %v2081_v26 = vpop.permute.xlu1 %2080 }
0x11b4   :  { %v2085_v37 = vmul.f32 %v5377_v7, %v2081_v26  ;;  %2088 = vrot.lane.b32.xlu0 %v2084_v32, %s5873_s3  ;;  %v2121_v7 = vld [vmem:[#allocation4 + $0x50] sm:$0xff] }
0x11b6   :  { %2090 = vrot.lane.b32.xlu1 %v2085_v37, %s5873_s3  ;;  %v2122_v37 = vld [vmem:[#allocation4 + $0x58] sm:$0xff] }
0x11b8   :  { %v2125_v51 = vld [vmem:[#allocation4 + $0xa8] sm:$0xff] }
0x1222   :  { %v2017_v20 = vpop.permute.xlu0 %2016 }
0x1223   :  { %v2022_v49 = vadd.f32 %v2017_v20, %v1983_v53  ;;  %v1989_v53 = vld [vmem:[#allocation2 + $0x158] sm:$0xff] }
0x1224   :  { %v2019_v47 = vpop.permute.xlu1 %2018 }
0x1225   :  { %5378 = vtanh.f32 %v2022_v49  ;;  %v2023_v40 = vadd.f32 %v2019_v47, %v1984_v54 }
0x1226   :  { %v2089_v55 = vpop.permute.xlu0 %2088 }
0x1227   :  { %5380 = vtanh.f32 %v2023_v40  ;;  %v2094_v0 = vadd.f32 %v2089_v55, %v1987_v4  ;;  %v2051_v40 = vadd.f32 %v1989_v53, %v6767_v31  ;;  %v5021_v55 = vmul.f32 -1.442695, %v2049_v50 }
0x1228   :  { %v2091_v21 = vpop.permute.xlu1 %2090 }
0x1229   :  { %v2095_v14 = vadd.f32 %v2091_v21, %v1989_v53  ;;  %5382 = vtanh.f32 %v2094_v0  ;;  %v5023_v56 = vmul.f32 -1.442695, %v2051_v40 }
0x122b   :  { %5384 = vtanh.f32 %v2095_v14 }
0x122c   :  { %5386 = vpow2.f32 %v5021_v55 }
0x122d   :  { %5388 = vpow2.f32 %v5023_v56 }
0x122f   :  { %v5379_v58 = vpop.eup %5378 }
0x1230   :  { %v2026_v54 = vsub.f32 %v6717_v45, %v5379_v58 }
0x1231   :  { %v5381_v62 = vpop.eup %5380 }
0x1232   :  { %2030 = vrot.lane.b32.xlu0 %v2026_v54, %s5875_s22  ;;  %v2027_v32 = vsub.f32 %v6720_v9, %v5381_v62 }
0x1233   :  { %v5383_v26 = vpop.eup %5382 }
0x1234   :  { %2032 = vrot.lane.b32.xlu1 %v2027_v32, %s5875_s22  ;;  %v2098_v49 = vsub.f32 %v6740_v6, %v5383_v26 }
0x1235   :  { %v5385_v20 = vpop.eup %5384 }
0x1236   :  { %2128 = vperm.xlu0 %5107, %v2121_v7   ;;  %v2099_v47 = vsub.f32 %v6743_v61, %v5385_v20  ;;  %v5387_v32 = vpop.eup %5386  ;;  %v2124_v7 = vld [vmem:[#allocation4 + $0xa0] sm:$0xff] }
0x1237   :  { %v2065_v4 = vadd.f32 1.0, %v5387_v32 }
0x1238   :  { %2133 = vperm.xlu1 %5108, %v2122_v37   ;;  %v5389_v37 = vpop.eup %5388 }
0x1239   :  { %v2067_v31 = vadd.f32 1.0, %v5389_v37  ;;  %5390 = vrcp.f32 %v2065_v4 }
0x123a   :  { %2102 = vrot.lane.b32.xlu0 %v2098_v49, %s5875_s22 }
0x123b   :  { %5392 = vrcp.f32 %v2067_v31 }
0x123c   :  { %2104 = vrot.lane.b32.xlu1 %v2099_v47, %s5875_s22 }
0x1243   :  { %v5391_v49 = vpop.eup %5390 }
0x1245   :  { %v5393_v50 = vpop.eup %5392 }
0x12a4   :  { %v2031_v0 = vpop.permute.xlu0 %2030 }
0x12a5   :  { %v2036_v21 = vmul.f32 %v6773_v30, %v2031_v0 }
0x12a6   :  { %v2033_v14 = vpop.permute.xlu1 %2032 }
0x12a7   :  { %v2037_v54 = vmul.f32 %v6777_v25, %v2033_v14  ;;  %2040 = vrot.lane.b32.xlu0 %v2036_v21, %s5876_s23 }
0x12a9   :  { %2042 = vrot.lane.b32.xlu1 %v2037_v54, %s5876_s23 }
0x12ab   :  { %2151 = vperm.xlu0 %5107, %v2124_v7  }
0x12ad   :  { %2156 = vperm.xlu1 %5108, %v2125_v51  }
0x12b5   :  { %v6809_v53 = vpop.permute.xlu0 %2128 }
0x12b6   :  { %8303 = vst [vmem:[#allocation40_spill] sm:$0xff] %v6809_v53 }
0x12b7   :  { %v6811_v30 = vpop.permute.xlu1 %2133 }
0x12b8   :  { %8304 = vst [vmem:[#allocation41_spill] sm:$0xff] %v6811_v30 }
0x12b9   :  { %v2103_v25 = vpop.permute.xlu0 %2102 }
0x12ba   :  { %v2108_v47 = vmul.f32 %v5391_v49, %v2103_v25 }
0x12bb   :  { %v2105_v40 = vpop.permute.xlu1 %2104 }
0x12bc   :  { %v2109_v55 = vmul.f32 %v5393_v50, %v2105_v40  ;;  %2112 = vrot.lane.b32.xlu0 %v2108_v47, %s5876_s23 }
0x12be   :  { %2114 = vrot.lane.b32.xlu1 %v2109_v55, %s5876_s23 }
0x1319   :  { %v2041_v56 = vpop.permute.xlu0 %2040 }
0x131a   :  { %v6815_v0 = vadd.f32 %v5379_v58, %v2041_v56 }
0x131b   :  { %v2043_v21 = vpop.permute.xlu1 %2042 }
0x131c   :  { %8305 = vst [vmem:[#allocation42_spill] sm:$0xff] %v6815_v0  ;;  %v2172_v14 = vsub.f32 %v6815_v0, %v6717_v45  ;;  %v6819_v54 = vadd.f32 %v5381_v62, %v2043_v21 }
0x131e   :  { %8306 = vst [vmem:[#allocation43_spill] sm:$0xff] %v6819_v54  ;;  %v2174_v32 = vmul.f32 %v2172_v14, %v6809_v53  ;;  %v2173_v7 = vsub.f32 %v6819_v54, %v6720_v9 }
0x1320   :  { %v2175_v37 = vmul.f32 %v2173_v7, %v6811_v30  ;;  %v6826_v51 = vadd.f32 %v2174_v32, %v6717_v45  ;;  %v6907_v30 = vld [vmem:[#allocation2 + $0x130] sm:$0xff] }
0x1322   :  { %v6829_v4 = vadd.f32 %v2175_v37, %v6720_v9 }
0x1324   :  { %v5134_v58 = vpack.i.bf16 %v6829_v4, %v6826_v51 }
0x1326   :  { %5135 = vrot.lane.b32.xlu0 %v5134_v58, %s5873_s3  ;;  %v6859_v58 = vld [vmem:[#allocation10] ss:$8 sps:$4 sm:$0xff]  }
0x132a   :  { %v6834_v62 = vpop.permute.xlu0 %2151 }
0x132b   :  { %8307 = vst [vmem:[#allocation44_spill] sm:$0xff] %v6834_v62 }
0x132c   :  { %v6836_v31 = vpop.permute.xlu1 %2156 }
0x132d   :  { %8308 = vst [vmem:[#allocation45_spill] sm:$0xff] %v6836_v31 }
0x132e   :  { %v2113_v49 = vpop.permute.xlu0 %2112 }
0x132f   :  { %v6838_v47 = vadd.f32 %v5383_v26, %v2113_v49  ;;  %v6869_v49 = vld [vmem:[#allocation10 + $0x24] ss:$8 sps:$4 sm:$0xff]  }
0x1330   :  { %v2115_v25 = vpop.permute.xlu1 %2114 }
0x1331   :  { %8309 = vst [vmem:[#allocation46_spill] sm:$0xff] %v6838_v47  ;;  %v6840_v50 = vadd.f32 %v5385_v20, %v2115_v25  ;;  %v2178_v45 = vsub.f32 %v6838_v47, %v6740_v6  ;;  %v6872_v25 = vld [vmem:[#allocation10 + $0x20] ss:$8 sps:$4 sm:$0xff]  }
0x1333   :  { %8310 = vst [vmem:[#allocation47_spill] sm:$0xff] %v6840_v50  ;;  %v2179_v9 = vsub.f32 %v6840_v50, %v6743_v61  ;;  %v2180_v40 = vmul.f32 %v2178_v45, %v6834_v62  ;;  %v6875_v45 = vld [vmem:[#allocation10 + $0x34] ss:$8 sps:$4 sm:$0xff]   ;;  %v6904_v62 = vld [vmem:[#allocation2 + $0x120] sm:$0xff] }
0x1334   :  { %v6901_v50 = vld [vmem:[#allocation2 + $0xd0] sm:$0xff] }
0x1335   :  { %v2181_v55 = vmul.f32 %v2179_v9, %v6836_v31  ;;  %v6849_v21 = vadd.f32 %v2180_v40, %v6740_v6  ;;  %v6863_v6 = vld [vmem:[#allocation10 + $0x14] ss:$8 sps:$4 sm:$0xff]   ;;  %v6878_v9 = vld [vmem:[#allocation10 + $0x30] ss:$8 sps:$4 sm:$0xff]   ;;  %v6881_v40 = vld [vmem:[#allocation10 + $0x4] ss:$8 sps:$4 sm:$0xff]  }
0x1337   :  { %v6852_v14 = vadd.f32 %v2181_v55, %v6743_v61  ;;  %v6866_v61 = vld [vmem:[#allocation10 + $0x10] ss:$8 sps:$4 sm:$0xff]  }
0x1398   :  { %v5136_v56 = vpop.permute.xlu0 %5135 }
0x1399   :  { %v5138_v26 = vunpack.i.h.bf16 %v5136_v56  ;;  %v5137_v20 = vunpack.i.l.bf16 %v5136_v56 }
0x139b   :  { %v2193_v32 = vsel %vm284_vm0, %v5138_v26, %v6852_v14  ;;  %v2192_v7 = vsel %vm284_vm0, %v5137_v20, %v6849_v21 }
0x139c   :  { %v2194_v37 = vpack.c.bf16 %v2193_v32, %v2192_v7 }
0x139e   :  { %5024 = vmatmul.mubr.msk.bf16.vlgmr.msra.gmra.mrb[24].mxu1 %vm527_vm1, %v2194_v37 }
0x139f   :  { %2458 = vmatpush1.bf16.msra.mxu1 %v6859_v58  ;;  %2489 = vmatprep.mubr.bf16.mxu1 %v8302_v48 }
0x13a0   :  { %2459 = vmatprep.subr.bf16.mxu1 %v6863_v6 }
0x13a3   :  { %2460 = vmatpush1.bf16.msra.mxu1 %v6866_v61 }
0x13a4   :  { %2461 = vmatprep.subr.bf16.mxu1 %v6869_v49 }
0x13a7   :  { %2462 = vmatpush1.bf16.msra.mxu1 %v6872_v25 }
0x13a8   :  { %2463 = vmatprep.subr.bf16.mxu1 %v6875_v45 }
0x13ab   :  { %2464 = vmatpush1.bf16.msra.mxu1 %v6878_v9 }
0x13ac   :  { %2971 = vmatprep.subr.bf16.mxu1 %v6881_v40 }
0x1471   :  { %v2232_v55 = vpop.f32.mrb[24].mxu1 }
0x1472   :  { %v2233_v56 = vadd.f32 %v2232_v55, %v6071_v23  ;;  %v2234_v26 = vpop.f32.mrb[25].mxu1  ;;  %v6898_v55 = vld [vmem:[#allocation2 + $0xc0] sm:$0xff] }
0x1473   :  { %v2236_v20 = vpop.f32.mrb[26].mxu1  ;;  %v6888_v37 = vadd.f32 %v2234_v26, %v6073_v24 }
0x1474   :  { %v2237_v32 = vadd.f32 %v2236_v20, %v6071_v23  ;;  %v2238_v7 = vpop.f32.mrb[27].mxu1  ;;  %2265 = vrot.lane.b32.xlu1 %v2233_v56, %s5873_s3  ;;  %v2249_v20 = vadd.f32 %v6898_v55, %v2233_v56 }
0x1475   :  { %v6892_v31 = vadd.f32 %v2238_v7, %v6073_v24  ;;  %v2307_v7 = vadd.f32 %v6904_v62, %v2233_v56 }
0x1476   :  { %2267 = vrot.lane.b32.xlu0 %v2237_v32, %s5873_s3  ;;  %v2250_v26 = vadd.f32 %v6901_v50, %v2237_v32  ;;  %v5025_v47 = vmul.f32 -1.442695, %v2249_v20  ;;  %v2309_v53 = vadd.f32 %v6907_v30, %v2237_v32 }
0x1477   :  { %v5027_v0 = vmul.f32 -1.442695, %v2307_v7 }
0x1478   :  { %2337 = vrot.lane.b32.xlu1 %v6888_v37, %s5873_s3  ;;  %v5026_v54 = vmul.f32 -1.442695, %v2250_v26  ;;  %5394 = vpow2.f32 %v5025_v47  ;;  %v5029_v42 = vmul.f32 -1.442695, %v2309_v53 }
0x147a   :  { %2339 = vrot.lane.b32.xlu0 %v6892_v31, %s5873_s3  ;;  %5396 = vpow2.f32 %v5026_v54 }
0x147b   :  { %5398 = vpow2.f32 %v5027_v0 }
0x147c   :  { %5400 = vpow2.f32 %v5029_v42 }
0x1482   :  { %v5395_v33 = vpop.eup %5394 }
0x1483   :  { %v2257_v44 = vadd.f32 1.0, %v5395_v33  ;;  %v4935_v33 = vsel %vm83_vm14, 1.0, %v8293_v57 }
0x1484   :  { %v5397_v1 = vpop.eup %5396  ;;  %180 = vst.msk [vmem:[#allocation4 + $0x60] sm:$0xff] %vm167_vm3, %v4935_v33  ;;  %v2246_v33 = vld [vmem:[#allocation2 + $0x128] sm:$0xff] }
0x1485   :  { %v5399_v13 = vpop.eup %5398  ;;  %v2258_v39 = vadd.f32 1.0, %v5397_v1  ;;  %5402 = vrcp.f32 %v2257_v44 }
0x1486   :  { %v5401_v28 = vpop.eup %5400  ;;  %v2323_v20 = vadd.f32 1.0, %v5399_v13 }
0x1487   :  { %5404 = vrcp.f32 %v2258_v39  ;;  %v2325_v56 = vadd.f32 1.0, %v5401_v28  ;;  %v4936_v39 = vsel %vm84_vm15, 1.0, %v8293_v57 }
0x1488   :  { %5406 = vrcp.f32 %v2323_v20  ;;  %181 = vst.msk [vmem:[#allocation4 + $0x68] sm:$0xff] %vm167_vm3, %v4936_v39 }
0x1489   :  { %5408 = vrcp.f32 %v2325_v56 }
0x148f   :  { %v6910_v26 = vpop.eup %5402 }
0x1491   :  { %v6914_v42 = vpop.eup %5404 }
0x1492   :  { %v5407_v28 = vpop.eup %5406 }
0x1493   :  { %v5409_v0 = vpop.eup %5408 }
0x14e6   :  { %v2266_v47 = vpop.permute.xlu1 %2265 }
0x14e7   :  { %v2271_v54 = vmul.f32 %v6910_v26, %v2266_v47  ;;  %v4941_v47 = vsel %vm89_vm2, 1.0, %v8293_v57 }
0x14e8   :  { %v2268_v53 = vpop.permute.xlu0 %2267  ;;  %186 = vst.msk [vmem:[#allocation4 + $0x90] sm:$0xff] %vm167_vm3, %v4941_v47  ;;  %v6945_v47 = vld [vmem:[#allocation4 + $0x68] sm:$0xff] }
0x14e9   :  { %v2272_v1 = vmul.f32 %v6914_v42, %v2268_v53  ;;  %2275 = vrot.lane.b32.xlu1 %v2271_v54, %s5873_s3  ;;  %v6934_v53 = vld [vmem:[%s8194_s1 + $0x8] sm:$0xff] }
0x14ea   :  { %v2338_v13 = vpop.permute.xlu1 %2337  ;;  %vm90_vm4 = vcmp.gt.s32.totalorder %v6934_v53, 9  ;;  %vm86_vm6 = vcmp.gt.s32.totalorder %v6934_v53, 7  ;;  %vm88_vm8 = vcmp.gt.s32.totalorder %v6934_v53, 8 }
0x14eb   :  { %v2343_v44 = vmul.f32 %v5407_v28, %v2338_v13  ;;  %2277 = vrot.lane.b32.xlu0 %v2272_v1, %s5873_s3  ;;  %v4942_v28 = vsel %vm90_vm4, 1.0, %v8293_v57  ;;  %v2248_v13 = vld [vmem:[#allocation2 + $0x138] sm:$0xff] }
0x14ec   :  { %v2340_v32 = vpop.permute.xlu0 %2339  ;;  %187 = vst.msk [vmem:[#allocation4 + $0x98] sm:$0xff] %vm167_vm3, %v4942_v28 }
0x14ed   :  { %v2344_v7 = vmul.f32 %v5409_v0, %v2340_v32  ;;  %2347 = vrot.lane.b32.xlu1 %v2343_v44, %s5873_s3 }
0x14ef   :  { %2349 = vrot.lane.b32.xlu0 %v2344_v7, %s5873_s3  ;;  %v6958_v11 = vld [vmem:[#allocation4 + $0x90] sm:$0xff] }
0x155b   :  { %v2276_v20 = vpop.permute.xlu1 %2275 }
0x155c   :  { %v2281_v56 = vadd.f32 %v2276_v20, %v6898_v55 }
0x155d   :  { %v2278_v36 = vpop.permute.xlu0 %2277 }
0x155e   :  { %5410 = vtanh.f32 %v2281_v56  ;;  %v2282_v54 = vadd.f32 %v2278_v36, %v6901_v50  ;;  %v6942_v56 = vld [vmem:[#allocation4 + $0x60] sm:$0xff] }
0x155f   :  { %v2348_v1 = vpop.permute.xlu1 %2347 }
0x1560   :  { %5412 = vtanh.f32 %v2282_v54  ;;  %v2353_v59 = vadd.f32 %v2348_v1, %v2246_v33 }
0x1561   :  { %v2350_v39 = vpop.permute.xlu0 %2349 }
0x1562   :  { %v2354_v44 = vadd.f32 %v2350_v39, %v2248_v13  ;;  %5414 = vtanh.f32 %v2353_v59  ;;  %v2308_v59 = vadd.f32 %v2246_v33, %v6888_v37  ;;  %v2310_v39 = vadd.f32 %v2248_v13, %v6892_v31  ;;  %v6961_v33 = vld [vmem:[#allocation4 + $0x98] sm:$0xff] }
0x1564   :  { %5416 = vtanh.f32 %v2354_v44  ;;  %v5028_v44 = vmul.f32 -1.442695, %v2308_v59 }
0x1566   :  { %5418 = vpow2.f32 %v5028_v44 }
0x1568   :  { %v5411_v0 = vpop.eup %5410 }
0x1569   :  { %v2285_v32 = vsub.f32 %v6826_v51, %v5411_v0 }
0x156a   :  { %v5413_v7 = vpop.eup %5412 }
0x156b   :  { %2289 = vrot.lane.b32.xlu1 %v2285_v32, %s5875_s22  ;;  %v2286_v20 = vsub.f32 %v6829_v4, %v5413_v7  ;;  %v5030_v32 = vmul.f32 -1.442695, %v2310_v39 }
0x156c   :  { %v5415_v36 = vpop.eup %5414 }
0x156d   :  { %2291 = vrot.lane.b32.xlu0 %v2286_v20, %s5875_s22  ;;  %v2357_v1 = vsub.f32 %v6849_v21, %v5415_v36  ;;  %5420 = vpow2.f32 %v5030_v32 }
0x156e   :  { %v5417_v54 = vpop.eup %5416 }
0x156f   :  { %2387 = vperm.xlu1 %5108, %v6942_v56   ;;  %v2358_v28 = vsub.f32 %v6852_v14, %v5417_v54 }
0x1571   :  { %2392 = vperm.xlu0 %5107, %v6945_v47  }
0x1573   :  { %2361 = vrot.lane.b32.xlu1 %v2357_v1, %s5875_s22  ;;  %v5419_v1 = vpop.eup %5418 }
0x1574   :  { %v2324_v31 = vadd.f32 1.0, %v5419_v1 }
0x1575   :  { %2363 = vrot.lane.b32.xlu0 %v2358_v28, %s5875_s22 }
0x1576   :  { %5422 = vrcp.f32 %v2324_v31 }
0x1577   :  { %v5421_v37 = vpop.eup %5420 }
0x1578   :  { %v2326_v13 = vadd.f32 1.0, %v5421_v37 }
0x157a   :  { %5424 = vrcp.f32 %v2326_v13 }
0x15dd   :  { %v2290_v20 = vpop.permute.xlu1 %2289 }
0x15de   :  { %v2295_v2 = vmul.f32 %v6910_v26, %v2290_v20 }
0x15df   :  { %v2292_v60 = vpop.permute.xlu0 %2291 }
0x15e0   :  { %v2296_v10 = vmul.f32 %v6914_v42, %v2292_v60  ;;  %2299 = vrot.lane.b32.xlu1 %v2295_v2, %s5876_s23  ;;  %v5423_v2 = vpop.eup %5422 }
0x15e1   :  { %v5425_v59 = vpop.eup %5424 }
0x15e2   :  { %2301 = vrot.lane.b32.xlu0 %v2296_v10, %s5876_s23 }
0x15e4   :  { %2410 = vperm.xlu1 %5108, %v6958_v11  }
0x15e6   :  { %2415 = vperm.xlu0 %5107, %v6961_v33  }
0x15ee   :  { %v6965_v26 = vpop.permute.xlu1 %2387 }
0x15ef   :  { %8311 = vst [vmem:[#allocation48_spill] sm:$0xff] %v6965_v26 }
0x15f0   :  { %v6967_v60 = vpop.permute.xlu0 %2392 }
0x15f1   :  { %8312 = vst [vmem:[#allocation49_spill] sm:$0xff] %v6967_v60 }
0x15f2   :  { %v2362_v42 = vpop.permute.xlu1 %2361 }
0x15f3   :  { %v2367_v28 = vmul.f32 %v5423_v2, %v2362_v42 }
0x15f4   :  { %v2364_v10 = vpop.permute.xlu0 %2363 }
0x15f5   :  { %v2368_v39 = vmul.f32 %v5425_v59, %v2364_v10  ;;  %2371 = vrot.lane.b32.xlu1 %v2367_v28, %s5876_s23 }
0x15f7   :  { %2373 = vrot.lane.b32.xlu0 %v2368_v39, %s5876_s23 }
0x1652   :  { %v2300_v44 = vpop.permute.xlu1 %2299 }
0x1653   :  { %v6971_v32 = vadd.f32 %v5411_v0, %v2300_v44 }
0x1654   :  { %v2302_v20 = vpop.permute.xlu0 %2301 }
0x1655   :  { %8313 = vst [vmem:[#allocation50_spill] sm:$0xff] %v6971_v32  ;;  %v2431_v1 = vsub.f32 %v6971_v32, %v6826_v51  ;;  %v6975_v37 = vadd.f32 %v5413_v7, %v2302_v20 }
0x1657   :  { %8314 = vst [vmem:[#allocation51_spill] sm:$0xff] %v6975_v37  ;;  %v2433_v31 = vmul.f32 %v2431_v1, %v6965_v26  ;;  %v2432_v13 = vsub.f32 %v6975_v37, %v6829_v4 }
0x1659   :  { %v2434_v2 = vmul.f32 %v2432_v13, %v6967_v60  ;;  %v6982_v42 = vadd.f32 %v2433_v31, %v6826_v51 }
0x165b   :  { %v6985_v28 = vadd.f32 %v2434_v2, %v6829_v4 }
0x165d   :  { %v5139_v0 = vpack.i.bf16 %v6985_v28, %v6982_v42 }
0x165f   :  { %5140 = vrot.lane.b32.xlu1 %v5139_v0, %s5873_s3 }
0x1663   :  { %v6990_v7 = vpop.permute.xlu1 %2410 }
0x1664   :  { %8315 = vst [vmem:[#allocation52_spill] sm:$0xff] %v6990_v7 }
0x1665   :  { %v6992_v59 = vpop.permute.xlu0 %2415 }
0x1666   :  { %8316 = vst [vmem:[#allocation53_spill] sm:$0xff] %v6992_v59 }
0x1667   :  { %v2372_v10 = vpop.permute.xlu1 %2371 }
0x1668   :  { %v6994_v44 = vadd.f32 %v5415_v36, %v2372_v10 }
0x1669   :  { %v2374_v39 = vpop.permute.xlu0 %2373 }
0x166a   :  { %8317 = vst [vmem:[#allocation54_spill] sm:$0xff] %v6994_v44  ;;  %v6996_v20 = vadd.f32 %v5417_v54, %v2374_v39  ;;  %v2437_v51 = vsub.f32 %v6994_v44, %v6849_v21 }
0x166c   :  { %8318 = vst [vmem:[#allocation55_spill] sm:$0xff] %v6996_v20  ;;  %v2438_v4 = vsub.f32 %v6996_v20, %v6852_v14  ;;  %v2439_v1 = vmul.f32 %v2437_v51, %v6990_v7 }
0x166e   :  { %v2440_v31 = vmul.f32 %v2438_v4, %v6992_v59  ;;  %v7005_v2 = vadd.f32 %v2439_v1, %v6849_v21 }
0x1670   :  { %v7008_v0 = vadd.f32 %v2440_v31, %v6852_v14 }
0x16d1   :  { %v5141_v13 = vpop.permute.xlu1 %5140 }
0x16d2   :  { %v5143_v36 = vunpack.i.h.bf16 %v5141_v13  ;;  %v5142_v54 = vunpack.i.l.bf16 %v5141_v13 }
0x16d4   :  { %v2452_v10 = vsel %vm284_vm0, %v5143_v36, %v7008_v0  ;;  %v2451_v39 = vsel %vm284_vm0, %v5142_v54, %v7005_v2  ;;  %v7038_v36 = vld [vmem:[#allocation2 + $0xe0] sm:$0xff] }
0x16d5   :  { %v2453_v20 = vpack.c.bf16 %v2452_v10, %v2451_v39  ;;  %v7041_v10 = vld [vmem:[#allocation2 + $0xf0] sm:$0xff] }
0x16d7   :  { %5031 = vmatmul.mubr.msk.bf16.vlgmr.msra.gmra.mrb[28].mxu1 %vm527_vm1, %v2453_v20 }
0x16d8   :  { %2972 = vmatpush1.bf16.msra.mxu1 %v6859_v58  ;;  %3003 = vmatprep.mubr.bf16.mxu1 %v8302_v48 }
0x16d9   :  { %2973 = vmatprep.subr.bf16.mxu1 %v6863_v6 }
0x16dc   :  { %2974 = vmatpush1.bf16.msra.mxu1 %v6866_v61 }
0x16dd   :  { %2975 = vmatprep.subr.bf16.mxu1 %v6869_v49 }
0x16e0   :  { %2976 = vmatpush1.bf16.msra.mxu1 %v6872_v25 }
0x16e1   :  { %2977 = vmatprep.subr.bf16.mxu1 %v6875_v45 }
0x16e4   :  { %2978 = vmatpush1.bf16.msra.mxu1 %v6878_v9 }
0x16e5   :  { %3481 = vmatprep.subr.bf16.mxu1 %v6881_v40 }
0x17aa   :  { %v2491_v21 = vpop.f32.mrb[28].mxu1 }
0x17ab   :  { %v2492_v14 = vadd.f32 %v2491_v21, %v6071_v23  ;;  %v2493_v20 = vpop.f32.mrb[29].mxu1  ;;  %v7044_v21 = vld [vmem:[#allocation2 + $0x100] sm:$0xff] }
0x17ac   :  { %v2495_v51 = vpop.f32.mrb[30].mxu1  ;;  %v7028_v31 = vadd.f32 %v2493_v20, %v6073_v24 }
0x17ad   :  { %v2496_v4 = vadd.f32 %v2495_v51, %v6071_v23  ;;  %v2497_v1 = vpop.f32.mrb[31].mxu1  ;;  %2524 = vrot.lane.b32.xlu0 %v2492_v14, %s5873_s3  ;;  %v2508_v54 = vadd.f32 %v7038_v36, %v2492_v14  ;;  %v2566_v51 = vadd.f32 %v7044_v21, %v2492_v14 }
0x17ae   :  { %v7032_v13 = vadd.f32 %v2497_v1, %v6073_v24  ;;  %v7047_v1 = vld [vmem:[#allocation2 + $0x110] sm:$0xff] }
0x17af   :  { %2526 = vrot.lane.b32.xlu1 %v2496_v4, %s5873_s3  ;;  %v2509_v39 = vadd.f32 %v7041_v10, %v2496_v4  ;;  %v5032_v20 = vmul.f32 -1.442695, %v2508_v54  ;;  %v2568_v7 = vadd.f32 %v7047_v1, %v2496_v4  ;;  %v5034_v44 = vmul.f32 -1.442695, %v2566_v51 }
0x17b1   :  { %2596 = vrot.lane.b32.xlu0 %v7028_v31, %s5873_s3  ;;  %v5033_v59 = vmul.f32 -1.442695, %v2509_v39  ;;  %5426 = vpow2.f32 %v5032_v20  ;;  %v5036_v60 = vmul.f32 -1.442695, %v2568_v7  ;;  %v4938_v7 = vsel %vm86_vm6, 1.0, %v8293_v57 }
0x17b2   :  { %183 = vst.msk [vmem:[#allocation4 + $0x78] sm:$0xff] %vm167_vm3, %v4938_v7 }
0x17b3   :  { %2598 = vrot.lane.b32.xlu1 %v7032_v13, %s5873_s3  ;;  %5428 = vpow2.f32 %v5033_v59 }
0x17b4   :  { %5430 = vpow2.f32 %v5034_v44 }
0x17b5   :  { %5432 = vpow2.f32 %v5036_v60  ;;  %v5737_v60 = vld [vmem:[%s8194_s1] sm:$0xff]  ;;  %s5877_s1 = smov [#allocation11]  }
0x17b6   :  { %vm85_vm5 = vcmp.gt.s32.totalorder %v5737_v60, 7  ;;  %vm87_vm7 = vcmp.gt.s32.totalorder %v5737_v60, 8  ;;  %s4894_s9 = sshll.u32 %s5877_s1, 4  ;;  %s4895_s9 = int_to_ptr.vmem [resolvable:$true] %s4894_s9 }
0x17b7   :  { %s5814_s10 = scalar_lea.vmem %s4895_s9, 4096  ;;  %p5819_p11 = scmp.lt.s32.totalorder %s4895_s9, %s4895_s9 }
0x17b8   :  { %p5815_p10 = scmp.ne.s32.totalorder %s4895_s9, %s5814_s10  ;;  %p5820_p12 = scmp.lt.s32.totalorder %s5814_s10, %s5814_s10 }
0x17ba   :  { %p5821_p13 = por %p5820_p12, %p5819_p11 }
0x17bb   :  { %v5427_v37 = vpop.eup %5426 }
0x17bc   :  { %v2516_v32 = vadd.f32 1.0, %v5427_v37  ;;  %p5822_p0 = pnand %p5821_p13, %p5815_p10 }
0x17bd   :  { %v5429_v26 = vpop.eup %5428 }
0x17be   :  { %v5431_v15 = vpop.eup %5430  ;;  %v2517_v8 = vadd.f32 1.0, %v5429_v26  ;;  %5434 = vrcp.f32 %v2516_v32  ;;  %v4937_v32 = vsel %vm85_vm5, 1.0, %v8293_v57 }
0x17bf   :  { %v5433_v46 = vpop.eup %5432  ;;  %v2582_v54 = vadd.f32 1.0, %v5431_v15  ;;  %182 = vst.msk [vmem:[#allocation4 + $0x70] sm:$0xff] %vm167_vm3, %v4937_v32 }
0x17c0   :  { %5436 = vrcp.f32 %v2517_v8  ;;  %v2584_v14 = vadd.f32 1.0, %v5433_v46 }
0x17c1   :  { %5438 = vrcp.f32 %v2582_v54 }
0x17c2   :  { %5440 = vrcp.f32 %v2584_v14 }
0x17c8   :  { %v7050_v39 = vpop.eup %5434 }
0x17ca   :  { %v7056_v37 = vpop.eup %5436 }
0x17cb   :  { %v5439_v46 = vpop.eup %5438 }
0x17cc   :  { %v5441_v20 = vpop.eup %5440 }
0x181f   :  { %v2525_v4 = vpop.permute.xlu0 %2524 }
0x1820   :  { %v2530_v59 = vmul.f32 %v7050_v39, %v2525_v4 }
0x1821   :  { %v2527_v26 = vpop.permute.xlu1 %2526 }
0x1822   :  { %v2531_v15 = vmul.f32 %v7056_v37, %v2527_v26  ;;  %2534 = vrot.lane.b32.xlu0 %v2530_v59, %s5873_s3  ;;  %v4939_v26 = vsel %vm87_vm7, 1.0, %v8293_v57 }
0x1823   :  { %v2597_v8 = vpop.permute.xlu0 %2596  ;;  %184 = vst.msk [vmem:[#allocation4 + $0x80] sm:$0xff] %vm167_vm3, %v4939_v26 }
0x1824   :  { %v2602_v44 = vmul.f32 %v5439_v46, %v2597_v8  ;;  %2536 = vrot.lane.b32.xlu1 %v2531_v15, %s5873_s3  ;;  %v2505_v15 = vld [vmem:[#allocation2 + $0x108] sm:$0xff]  ;;  %v4940_v8 = vsel %vm88_vm8, 1.0, %v8293_v57 }
0x1825   :  { %v2599_v51 = vpop.permute.xlu1 %2598  ;;  %185 = vst.msk [vmem:[#allocation4 + $0x88] sm:$0xff] %vm167_vm3, %v4940_v8  ;;  %v2567_v8 = vadd.f32 %v2505_v15, %v7028_v31 }
0x1826   :  { %v2603_v54 = vmul.f32 %v5441_v20, %v2599_v51  ;;  %2606 = vrot.lane.b32.xlu0 %v2602_v44, %s5873_s3  ;;  %v2507_v44 = vld [vmem:[#allocation2 + $0x118] sm:$0xff] }
0x1828   :  { %2608 = vrot.lane.b32.xlu1 %v2603_v54, %s5873_s3 }
0x182a   :  { %v7094_v27 = vld [vmem:[#allocation4 + $0x80] sm:$0xff] }
0x1894   :  { %v2535_v14 = vpop.permute.xlu0 %2534 }
0x1895   :  { %v2540_v4 = vadd.f32 %v2535_v14, %v7038_v36 }
0x1896   :  { %v2537_v59 = vpop.permute.xlu1 %2536 }
0x1897   :  { %5442 = vtanh.f32 %v2540_v4  ;;  %v2541_v32 = vadd.f32 %v2537_v59, %v7041_v10  ;;  %v7078_v4 = vld [vmem:[#allocation4 + $0x70] sm:$0xff]  ;;  %v7081_v59 = vld [vmem:[#allocation4 + $0x78] sm:$0xff] }
0x1898   :  { %v2607_v46 = vpop.permute.xlu0 %2606 }
0x1899   :  { %5444 = vtanh.f32 %v2541_v32  ;;  %v2612_v7 = vadd.f32 %v2607_v46, %v2505_v15  ;;  %v7097_v15 = vld [vmem:[#allocation4 + $0x88] sm:$0xff] }
0x189a   :  { %v2609_v60 = vpop.permute.xlu1 %2608 }
0x189b   :  { %v2613_v20 = vadd.f32 %v2609_v60, %v2507_v44  ;;  %5446 = vtanh.f32 %v2612_v7  ;;  %v2569_v7 = vadd.f32 %v2507_v44, %v7032_v13  ;;  %v5035_v60 = vmul.f32 -1.442695, %v2567_v8 }
0x189d   :  { %5448 = vtanh.f32 %v2613_v20  ;;  %v5037_v20 = vmul.f32 -1.442695, %v2569_v7 }
0x189e   :  { %5450 = vpow2.f32 %v5035_v60 }
0x189f   :  { %5452 = vpow2.f32 %v5037_v20 }
0x18a1   :  { %v5443_v51 = vpop.eup %5442 }
0x18a2   :  { %v2544_v54 = vsub.f32 %v6982_v42, %v5443_v51 }
0x18a3   :  { %v5445_v14 = vpop.eup %5444 }
0x18a4   :  { %2548 = vrot.lane.b32.xlu0 %v2544_v54, %s5875_s22  ;;  %v2545_v53 = vsub.f32 %v6985_v28, %v5445_v14 }
0x18a5   :  { %v5447_v57 = vpop.eup %5446 }
0x18a6   :  { %2550 = vrot.lane.b32.xlu1 %v2545_v53, %s5875_s22  ;;  %v2616_v32 = vsub.f32 %v7005_v2, %v5447_v57 }
0x18a7   :  { %v5449_v26 = vpop.eup %5448 }
0x18a8   :  { %2646 = vperm.xlu0 %5107, %v7078_v4   ;;  %v2617_v46 = vsub.f32 %v7008_v0, %v5449_v26 }
0x18aa   :  { %2651 = vperm.xlu1 %5108, %v7081_v59  }
0x18ac   :  { %2620 = vrot.lane.b32.xlu0 %v2616_v32, %s5875_s22  ;;  %v5451_v32 = vpop.eup %5450 }
0x18ad   :  { %v5453_v31 = vpop.eup %5452  ;;  %v2583_v13 = vadd.f32 1.0, %v5451_v32 }
0x18ae   :  { %2622 = vrot.lane.b32.xlu1 %v2617_v46, %s5875_s22  ;;  %v2585_v44 = vadd.f32 1.0, %v5453_v31 }
0x18af   :  { %5454 = vrcp.f32 %v2583_v13 }
0x18b0   :  { %5456 = vrcp.f32 %v2585_v44 }
0x1916   :  { %v2549_v54 = vpop.permute.xlu0 %2548 }
0x1917   :  { %v2554_v53 = vmul.f32 %v7050_v39, %v2549_v54 }
0x1918   :  { %v2551_v34 = vpop.permute.xlu1 %2550 }
0x1919   :  { %v2555_v52 = vmul.f32 %v7056_v37, %v2551_v34  ;;  %2558 = vrot.lane.b32.xlu0 %v2554_v53, %s5876_s23  ;;  %v5455_v37 = vpop.eup %5454 }
0x191a   :  { %v5457_v7 = vpop.eup %5456 }
0x191b   :  { %2560 = vrot.lane.b32.xlu1 %v2555_v52, %s5876_s23 }
0x191d   :  { %2669 = vperm.xlu0 %5107, %v7094_v27  }
0x191f   :  { %2674 = vperm.xlu1 %5108, %v7097_v15  }
0x1927   :  { %v7101_v39 = vpop.permute.xlu0 %2646 }
0x1928   :  { %8319 = vst [vmem:[#allocation56_spill] sm:$0xff] %v7101_v39 }
0x1929   :  { %v7103_v34 = vpop.permute.xlu1 %2651 }
0x192a   :  { %8320 = vst [vmem:[#allocation57_spill] sm:$0xff] %v7103_v34 }
0x192b   :  { %v2621_v46 = vpop.permute.xlu0 %2620 }
0x192c   :  { %v2626_v8 = vmul.f32 %v5455_v37, %v2621_v46 }
0x192d   :  { %v2623_v52 = vpop.permute.xlu1 %2622 }
0x192e   :  { %v2627_v60 = vmul.f32 %v5457_v7, %v2623_v52  ;;  %2630 = vrot.lane.b32.xlu0 %v2626_v8, %s5876_s23 }
0x1930   :  { %2632 = vrot.lane.b32.xlu1 %v2627_v60, %s5876_s23 }
0x198b   :  { %v2559_v20 = vpop.permute.xlu0 %2558 }
0x198c   :  { %v7107_v54 = vadd.f32 %v5443_v51, %v2559_v20 }
0x198d   :  { %v2561_v53 = vpop.permute.xlu1 %2560 }
0x198e   :  { %8321 = vst [vmem:[#allocation58_spill] sm:$0xff] %v7107_v54  ;;  %v2690_v32 = vsub.f32 %v7107_v54, %v6982_v42  ;;  %v7111_v31 = vadd.f32 %v5445_v14, %v2561_v53 }
0x1990   :  { %8322 = vst [vmem:[#allocation59_spill] sm:$0xff] %v7111_v31  ;;  %v2692_v13 = vmul.f32 %v2690_v32, %v7101_v39  ;;  %v2691_v44 = vsub.f32 %v7111_v31, %v6985_v28 }
0x1992   :  { %v2693_v37 = vmul.f32 %v2691_v44, %v7103_v34  ;;  %v7118_v46 = vadd.f32 %v2692_v13, %v6982_v42 }
0x1994   :  { %v7121_v8 = vadd.f32 %v2693_v37, %v6985_v28 }
0x1996   :  { %v5144_v51 = vpack.i.bf16 %v7121_v8, %v7118_v46 }
0x1998   :  { %5145 = vrot.lane.b32.xlu0 %v5144_v51, %s5873_s3 }
0x199c   :  { %v7126_v14 = vpop.permute.xlu0 %2669 }
0x199d   :  { %8323 = vst [vmem:[#allocation60_spill] sm:$0xff] %v7126_v14 }
0x199e   :  { %v7128_v7 = vpop.permute.xlu1 %2674 }
0x199f   :  { %8324 = vst [vmem:[#allocation61_spill] sm:$0xff] %v7128_v7 }
0x19a0   :  { %v2631_v52 = vpop.permute.xlu0 %2630 }
0x19a1   :  { %v7130_v20 = vadd.f32 %v5447_v57, %v2631_v52 }
0x19a2   :  { %v2633_v60 = vpop.permute.xlu1 %2632 }
0x19a3   :  { %8325 = vst [vmem:[#allocation62_spill] sm:$0xff] %v7130_v20  ;;  %v7132_v53 = vadd.f32 %v5449_v26, %v2633_v60  ;;  %v2696_v42 = vsub.f32 %v7130_v20, %v7005_v2 }
0x19a5   :  { %8326 = vst [vmem:[#allocation63_spill] sm:$0xff] %v7132_v53  ;;  %v2697_v28 = vsub.f32 %v7132_v53, %v7008_v0  ;;  %v2698_v32 = vmul.f32 %v2696_v42, %v7126_v14 }
0x19a7   :  { %v2699_v13 = vmul.f32 %v2697_v28, %v7128_v7  ;;  %v7141_v37 = vadd.f32 %v2698_v32, %v7005_v2 }
0x19a9   :  { %v7144_v51 = vadd.f32 %v2699_v13, %v7008_v0 }
0x1a0a   :  { %v5146_v44 = vpop.permute.xlu0 %5145 }
0x1a0b   :  { %v5148_v57 = vunpack.i.h.bf16 %v5146_v44  ;;  %v5147_v26 = vunpack.i.l.bf16 %v5146_v44 }
0x1a0d   :  { %v2711_v52 = vsel %vm284_vm0, %v5148_v57, %v7144_v51  ;;  %v2710_v60 = vsel %vm284_vm0, %v5147_v26, %v7141_v37 }
0x1a0e   :  { %v2712_v53 = vpack.c.bf16 %v2711_v52, %v2710_v60 }
0x1a10   :  { %5038 = vmatmul.mubr.msk.bf16.vlgmr.msra.gmra.mrb[64].mxu0 %vm527_vm1, %v2712_v53 }
0x1a11   :  { %3227 = vmatpush1.bf16.msra.mxu0 %v6859_v58  ;;  %3258 = vmatprep.mubr.bf16.mxu0 %v8302_v48 }
0x1a12   :  { %3228 = vmatprep.subr.bf16.mxu0 %v6863_v6 }
0x1a15   :  { %3229 = vmatpush1.bf16.msra.mxu0 %v6866_v61 }
0x1a16   :  { %3230 = vmatprep.subr.bf16.mxu0 %v6869_v49 }
0x1a19   :  { %3231 = vmatpush1.bf16.msra.mxu0 %v6872_v25 }
0x1a1a   :  { %3232 = vmatprep.subr.bf16.mxu0 %v6875_v45 }
0x1a1d   :  { %3233 = vmatpush1.bf16.msra.mxu0 %v6878_v9 }
0x1a1e   :  { %3736 = vmatprep.subr.bf16.mxu0 %v6881_v40 }
0x1ae3   :  { %v2750_v2 = vpop.f32.mrb[64].mxu0 }
0x1ae4   :  { %v2751_v0 = vadd.f32 %v2750_v2, %v6071_v23  ;;  %v2752_v53 = vpop.f32.mrb[65].mxu0 }
0x1ae5   :  { %v2754_v42 = vpop.f32.mrb[66].mxu0  ;;  %v7164_v13 = vadd.f32 %v2752_v53, %v6073_v24 }
0x1ae6   :  { %v2755_v28 = vadd.f32 %v2754_v42, %v6071_v23  ;;  %v2756_v32 = vpop.f32.mrb[67].mxu0  ;;  %2781 = vrot.lane.b32.xlu1 %v2751_v0, %s5873_s3  ;;  %v2765_v57 = vadd.f32 %v2751_v0, %v7044_v21  ;;  %v2823_v60 = vadd.f32 %v2751_v0, %v7038_v36 }
0x1ae7   :  { %v7168_v44 = vadd.f32 %v2756_v32, %v6073_v24 }
0x1ae8   :  { %2783 = vrot.lane.b32.xlu0 %v2755_v28, %s5873_s3  ;;  %v2766_v26 = vadd.f32 %v2755_v28, %v7047_v1  ;;  %v5039_v52 = vmul.f32 -1.442695, %v2765_v57  ;;  %v2825_v53 = vadd.f32 %v2755_v28, %v7041_v10  ;;  %v5041_v42 = vmul.f32 -1.442695, %v2823_v60 }
0x1aea   :  { %2853 = vrot.lane.b32.xlu1 %v7164_v13, %s5873_s3  ;;  %v5040_v2 = vmul.f32 -1.442695, %v2766_v26  ;;  %5458 = vpow2.f32 %v5039_v52  ;;  %v5043_v32 = vmul.f32 -1.442695, %v2825_v53 }
0x1aec   :  { %2855 = vrot.lane.b32.xlu0 %v7168_v44, %s5873_s3  ;;  %5460 = vpow2.f32 %v5040_v2 }
0x1aed   :  { %5462 = vpow2.f32 %v5041_v42  ;;  %v2762_v42 = vld [vmem:[#allocation2 + $0xe8] sm:$0xff] }
0x1aee   :  { %5464 = vpow2.f32 %v5043_v32 }
0x1af4   :  { %v5459_v7 = vpop.eup %5458 }
0x1af5   :  { %v2773_v20 = vadd.f32 1.0, %v5459_v7 }
0x1af6   :  { %v5461_v14 = vpop.eup %5460 }
0x1af7   :  { %v5463_v34 = vpop.eup %5462  ;;  %v2774_v31 = vadd.f32 1.0, %v5461_v14  ;;  %5466 = vrcp.f32 %v2773_v20 }
0x1af8   :  { %v5465_v39 = vpop.eup %5464  ;;  %v2839_v54 = vadd.f32 1.0, %v5463_v34 }
0x1af9   :  { %5468 = vrcp.f32 %v2774_v31  ;;  %v2841_v57 = vadd.f32 1.0, %v5465_v39 }
0x1afa   :  { %5470 = vrcp.f32 %v2839_v54 }
0x1afb   :  { %5472 = vrcp.f32 %v2841_v57 }
0x1b01   :  { %v5467_v36 = vpop.eup %5466 }
0x1b03   :  { %v5469_v28 = vpop.eup %5468 }
0x1b04   :  { %v5471_v60 = vpop.eup %5470 }
0x1b05   :  { %v5473_v14 = vpop.eup %5472 }
0x1b58   :  { %v2782_v10 = vpop.permute.xlu1 %2781 }
0x1b59   :  { %v2787_v0 = vmul.f32 %v5467_v36, %v2782_v10  ;;  %v2764_v10 = vld [vmem:[#allocation2 + $0xf8] sm:$0xff] }
0x1b5a   :  { %v2784_v26 = vpop.permute.xlu0 %2783 }
0x1b5b   :  { %v2788_v52 = vmul.f32 %v5469_v28, %v2784_v26  ;;  %2791 = vrot.lane.b32.xlu1 %v2787_v0, %s5873_s3 }
0x1b5c   :  { %v2854_v2 = vpop.permute.xlu1 %2853 }
0x1b5d   :  { %v2859_v7 = vmul.f32 %v5471_v60, %v2854_v2  ;;  %2793 = vrot.lane.b32.xlu0 %v2788_v52, %s5873_s3 }
0x1b5e   :  { %v2856_v20 = vpop.permute.xlu0 %2855 }
0x1b5f   :  { %v2860_v34 = vmul.f32 %v5473_v14, %v2856_v20  ;;  %2863 = vrot.lane.b32.xlu1 %v2859_v7, %s5873_s3 }
0x1b61   :  { %2865 = vrot.lane.b32.xlu0 %v2860_v34, %s5873_s3  ;;  %v2824_v34 = vadd.f32 %v2762_v42, %v7164_v13 }
0x1bcd   :  { %v2792_v39 = vpop.permute.xlu1 %2791 }
0x1bce   :  { %v2797_v54 = vadd.f32 %v2792_v39, %v7044_v21  ;;  %v2826_v39 = vadd.f32 %v2764_v10, %v7168_v44 }
0x1bcf   :  { %v2794_v31 = vpop.permute.xlu0 %2793 }
0x1bd0   :  { %5474 = vtanh.f32 %v2797_v54  ;;  %v2798_v53 = vadd.f32 %v2794_v31, %v7047_v1  ;;  %v5042_v54 = vmul.f32 -1.442695, %v2824_v34  ;;  %v5044_v31 = vmul.f32 -1.442695, %v2826_v39 }
0x1bd1   :  { %v2864_v32 = vpop.permute.xlu1 %2863 }
0x1bd2   :  { %5476 = vtanh.f32 %v2798_v53  ;;  %v2869_v57 = vadd.f32 %v2864_v32, %v2762_v42 }
0x1bd3   :  { %v2866_v0 = vpop.permute.xlu0 %2865 }
0x1bd4   :  { %v2870_v26 = vadd.f32 %v2866_v0, %v2764_v10  ;;  %5478 = vtanh.f32 %v2869_v57 }
0x1bd6   :  { %5480 = vtanh.f32 %v2870_v26 }
0x1bd7   :  { %5482 = vpow2.f32 %v5042_v54 }
0x1bd8   :  { %5484 = vpow2.f32 %v5044_v31 }
0x1bda   :  { %v5475_v52 = vpop.eup %5474 }
0x1bdb   :  { %v2801_v60 = vsub.f32 %v7118_v46, %v5475_v52 }
0x1bdc   :  { %v5477_v2 = vpop.eup %5476 }
0x1bdd   :  { %2805 = vrot.lane.b32.xlu1 %v2801_v60, %s5875_s22  ;;  %v2802_v21 = vsub.f32 %v7121_v8, %v5477_v2 }
0x1bde   :  { %v5479_v1 = vpop.eup %5478 }
0x1bdf   :  { %2807 = vrot.lane.b32.xlu0 %v2802_v21, %s5875_s22  ;;  %v2873_v14 = vsub.f32 %v7141_v37, %v5479_v1 }
0x1be0   :  { %v5481_v7 = vpop.eup %5480 }
0x1be1   :  { %2901 = vperm.xlu1 %5108, %v7094_v27   ;;  %v2874_v20 = vsub.f32 %v7144_v51, %v5481_v7  ;;  %v5483_v57 = vpop.eup %5482 }
0x1be2   :  { %v5485_v0 = vpop.eup %5484  ;;  %v2840_v26 = vadd.f32 1.0, %v5483_v57 }
0x1be3   :  { %2906 = vperm.xlu0 %5107, %v7097_v15   ;;  %v2842_v13 = vadd.f32 1.0, %v5485_v0 }
0x1be4   :  { %5486 = vrcp.f32 %v2840_v26 }
0x1be5   :  { %2877 = vrot.lane.b32.xlu1 %v2873_v14, %s5875_s22  ;;  %5488 = vrcp.f32 %v2842_v13 }
0x1be7   :  { %2879 = vrot.lane.b32.xlu0 %v2874_v20, %s5875_s22 }
0x1c4f   :  { %v2806_v27 = vpop.permute.xlu1 %2805 }
0x1c50   :  { %v2811_v53 = vmul.f32 %v5467_v36, %v2806_v27  ;;  %v5487_v36 = vpop.eup %5486 }
0x1c51   :  { %v2808_v32 = vpop.permute.xlu0 %2807  ;;  %v5489_v60 = vpop.eup %5488 }
0x1c52   :  { %v2812_v15 = vmul.f32 %v5469_v28, %v2808_v32  ;;  %2815 = vrot.lane.b32.xlu1 %v2811_v53, %s5876_s23 }
0x1c54   :  { %2817 = vrot.lane.b32.xlu0 %v2812_v15, %s5876_s23 }
0x1c56   :  { %2924 = vperm.xlu1 %5108, %v7078_v4  }
0x1c58   :  { %2929 = vperm.xlu0 %5107, %v7081_v59  }
0x1c60   :  { %v7200_v44 = vpop.permute.xlu1 %2901 }
0x1c62   :  { %v7202_v42 = vpop.permute.xlu0 %2906 }
0x1c64   :  { %v2878_v28 = vpop.permute.xlu1 %2877 }
0x1c65   :  { %v2883_v10 = vmul.f32 %v5487_v36, %v2878_v28 }
0x1c66   :  { %v2880_v21 = vpop.permute.xlu0 %2879 }
0x1c67   :  { %v2884_v14 = vmul.f32 %v5489_v60, %v2880_v21  ;;  %2887 = vrot.lane.b32.xlu1 %v2883_v10, %s5876_s23 }
0x1c69   :  { %2889 = vrot.lane.b32.xlu0 %v2884_v14, %s5876_s23 }
0x1cc4   :  { %v2816_v4 = vpop.permute.xlu1 %2815 }
0x1cc5   :  { %v7206_v20 = vadd.f32 %v5475_v52, %v2816_v4 }
0x1cc6   :  { %v2818_v59 = vpop.permute.xlu0 %2817 }
0x1cc7   :  { %v2945_v34 = vsub.f32 %v7206_v20, %v7118_v46  ;;  %v7210_v39 = vadd.f32 %v5477_v2, %v2818_v59 }
0x1cc9   :  { %v2947_v54 = vmul.f32 %v2945_v34, %v7200_v44  ;;  %v2946_v31 = vsub.f32 %v7210_v39, %v7121_v8 }
0x1ccb   :  { %v2948_v27 = vmul.f32 %v2946_v31, %v7202_v42  ;;  %v7217_v53 = vadd.f32 %v2947_v54, %v7118_v46 }
0x1ccd   :  { %v7220_v32 = vadd.f32 %v2948_v27, %v7121_v8 }
0x1ccf   :  { %v5149_v52 = vpack.i.bf16 %v7220_v32, %v7217_v53 }
0x1cd1   :  { %5150 = vrot.lane.b32.xlu1 %v5149_v52, %s5873_s3 }
0x1cd5   :  { %v7225_v2 = vpop.permute.xlu1 %2924 }
0x1cd7   :  { %v7227_v15 = vpop.permute.xlu0 %2929 }
0x1cd9   :  { %v2888_v57 = vpop.permute.xlu1 %2887 }
0x1cda   :  { %v7229_v26 = vadd.f32 %v5479_v1, %v2888_v57 }
0x1cdb   :  { %v2890_v0 = vpop.permute.xlu0 %2889 }
0x1cdc   :  { %v7231_v13 = vadd.f32 %v5481_v7, %v2890_v0  ;;  %v2951_v46 = vsub.f32 %v7229_v26, %v7141_v37 }
0x1cde   :  { %v2952_v8 = vsub.f32 %v7231_v13, %v7144_v51  ;;  %v2953_v36 = vmul.f32 %v2951_v46, %v7225_v2 }
0x1ce0   :  { %v2954_v28 = vmul.f32 %v2952_v8, %v7227_v15  ;;  %v7240_v60 = vadd.f32 %v2953_v36, %v7141_v37 }
0x1ce2   :  { %v7243_v21 = vadd.f32 %v2954_v28, %v7144_v51 }
0x1d43   :  { %v5151_v10 = vpop.permute.xlu1 %5150 }
0x1d44   :  { %v5153_v1 = vunpack.i.h.bf16 %v5151_v10  ;;  %v5152_v7 = vunpack.i.l.bf16 %v5151_v10 }
0x1d46   :  { %v2966_v14 = vsel %vm284_vm0, %v5153_v1, %v7243_v21  ;;  %v2965_v4 = vsel %vm284_vm0, %v5152_v7, %v7240_v60 }
0x1d47   :  { %v2967_v59 = vpack.c.bf16 %v2966_v14, %v2965_v4 }
0x1d49   :  { %5045 = vmatmul.mubr.msk.bf16.vlgmr.msra.gmra.mrb[32].mxu1 %vm527_vm1, %v2967_v59 }
0x1d4a   :  { %3482 = vmatpush1.bf16.msra.mxu1 %v6859_v58  ;;  %3513 = vmatprep.mubr.bf16.mxu1 %v8302_v48 }
0x1d4b   :  { %3483 = vmatprep.subr.bf16.mxu1 %v6863_v6 }
0x1d4e   :  { %3484 = vmatpush1.bf16.msra.mxu1 %v6866_v61 }
0x1d4f   :  { %3485 = vmatprep.subr.bf16.mxu1 %v6869_v49 }
0x1d52   :  { %3486 = vmatpush1.bf16.msra.mxu1 %v6872_v25 }
0x1d53   :  { %3487 = vmatprep.subr.bf16.mxu1 %v6875_v45 }
0x1d56   :  { %3488 = vmatpush1.bf16.msra.mxu1 %v6878_v9 }
0x1d57   :  { %3991 = vmatprep.subr.bf16.mxu1 %v6881_v40 }
0x1e1c   :  { %v3005_v37 = vpop.f32.mrb[32].mxu1 }
0x1e1d   :  { %v3006_v51 = vadd.f32 %v3005_v37, %v6071_v23  ;;  %v3007_v58 = vpop.f32.mrb[33].mxu1 }
0x1e1e   :  { %v3009_v34 = vpop.f32.mrb[34].mxu1  ;;  %v7263_v61 = vadd.f32 %v3007_v58, %v6073_v24 }
0x1e1f   :  { %v3010_v54 = vadd.f32 %v3009_v34, %v6071_v23  ;;  %v3011_v6 = vpop.f32.mrb[35].mxu1  ;;  %3036 = vrot.lane.b32.xlu0 %v3006_v51, %s5873_s3  ;;  %v3020_v25 = vadd.f32 %v3006_v51, %v6904_v62  ;;  %v3078_v40 = vadd.f32 %v3006_v51, %v6898_v55 }
0x1e20   :  { %v7267_v49 = vadd.f32 %v3011_v6, %v6073_v24 }
0x1e21   :  { %3038 = vrot.lane.b32.xlu1 %v3010_v54, %s5873_s3  ;;  %v3021_v45 = vadd.f32 %v3010_v54, %v6907_v30  ;;  %v5046_v9 = vmul.f32 -1.442695, %v3020_v25  ;;  %v3080_v27 = vadd.f32 %v3010_v54, %v6901_v50  ;;  %v5048_v52 = vmul.f32 -1.442695, %v3078_v40  ;;  %v5738_v25 = vld [vmem:[#allocation2 + $0x120] sm:$0xff]  ;;  %v5739_v40 = vld [vmem:[#allocation2 + $0x130] sm:$0xff] }
0x1e23   :  { %3108 = vrot.lane.b32.xlu0 %v7263_v61, %s5873_s3  ;;  %v5047_v31 = vmul.f32 -1.442695, %v3021_v45  ;;  %5490 = vpow2.f32 %v5046_v9  ;;  %v5050_v57 = vmul.f32 -1.442695, %v3080_v27  ;;  %v3017_v27 = vld [vmem:[#allocation2 + $0xc8] sm:$0xff] }
0x1e25   :  { %3110 = vrot.lane.b32.xlu1 %v7267_v49, %s5873_s3  ;;  %5492 = vpow2.f32 %v5047_v31 }
0x1e26   :  { %5494 = vpow2.f32 %v5048_v52 }
0x1e27   :  { %5496 = vpow2.f32 %v5050_v57 }
0x1e2d   :  { %v5491_v0 = vpop.eup %5490 }
0x1e2e   :  { %v3028_v8 = vadd.f32 1.0, %v5491_v0  ;;  %v3019_v0 = vld [vmem:[#allocation2 + $0xd8] sm:$0xff] }
0x1e2f   :  { %v5493_v46 = vpop.eup %5492 }
0x1e30   :  { %v5495_v36 = vpop.eup %5494  ;;  %v3029_v28 = vadd.f32 1.0, %v5493_v46  ;;  %5498 = vrcp.f32 %v3028_v8 }
0x1e31   :  { %v5497_v62 = vpop.eup %5496  ;;  %v3094_v30 = vadd.f32 1.0, %v5495_v36 }
0x1e32   :  { %5500 = vrcp.f32 %v3029_v28  ;;  %v3096_v10 = vadd.f32 1.0, %v5497_v62 }
0x1e33   :  { %5502 = vrcp.f32 %v3094_v30 }
0x1e34   :  { %5504 = vrcp.f32 %v3096_v10 }
0x1e3a   :  { %v5499_v55 = vpop.eup %5498 }
0x1e3c   :  { %v5501_v7 = vpop.eup %5500 }
0x1e3d   :  { %v5503_v59 = vpop.eup %5502 }
0x1e3e   :  { %v5505_v58 = vpop.eup %5504 }
0x1e91   :  { %v3037_v50 = vpop.permute.xlu0 %3036 }
0x1e92   :  { %v3042_v1 = vmul.f32 %v5499_v55, %v3037_v50 }
0x1e93   :  { %v3039_v14 = vpop.permute.xlu1 %3038 }
0x1e94   :  { %v3043_v4 = vmul.f32 %v5501_v7, %v3039_v14  ;;  %3046 = vrot.lane.b32.xlu0 %v3042_v1, %s5873_s3 }
0x1e95   :  { %v3109_v37 = vpop.permute.xlu0 %3108 }
0x1e96   :  { %v3114_v51 = vmul.f32 %v5503_v59, %v3109_v37  ;;  %3048 = vrot.lane.b32.xlu1 %v3043_v4, %s5873_s3  ;;  %v3079_v4 = vadd.f32 %v3017_v27, %v7263_v61  ;;  %v3081_v59 = vadd.f32 %v3019_v0, %v7267_v49 }
0x1e97   :  { %v3111_v34 = vpop.permute.xlu1 %3110 }
0x1e98   :  { %v3115_v54 = vmul.f32 %v5505_v58, %v3111_v34  ;;  %3118 = vrot.lane.b32.xlu0 %v3114_v51, %s5873_s3  ;;  %v5049_v37 = vmul.f32 -1.442695, %v3079_v4  ;;  %v5051_v51 = vmul.f32 -1.442695, %v3081_v59 }
0x1e9a   :  { %3120 = vrot.lane.b32.xlu1 %v3115_v54, %s5873_s3 }
0x1f06   :  { %v3047_v6 = vpop.permute.xlu0 %3046 }
0x1f07   :  { %v3052_v45 = vadd.f32 %v5738_v25, %v3047_v6 }
0x1f08   :  { %v3049_v9 = vpop.permute.xlu1 %3048 }
0x1f09   :  { %5506 = vtanh.f32 %v3052_v45  ;;  %v3053_v31 = vadd.f32 %v5739_v40, %v3049_v9 }
0x1f0a   :  { %v3119_v52 = vpop.permute.xlu0 %3118 }
0x1f0b   :  { %5508 = vtanh.f32 %v3053_v31  ;;  %v3124_v57 = vadd.f32 %v3119_v52, %v3017_v27 }
0x1f0c   :  { %v3121_v46 = vpop.permute.xlu1 %3120 }
0x1f0d   :  { %v3125_v8 = vadd.f32 %v3121_v46, %v3019_v0  ;;  %5510 = vtanh.f32 %v3124_v57 }
0x1f0f   :  { %5512 = vtanh.f32 %v3125_v8 }
0x1f10   :  { %5514 = vpow2.f32 %v5049_v37 }
0x1f11   :  { %5516 = vpow2.f32 %v5051_v51 }
0x1f13   :  { %v5507_v36 = vpop.eup %5506 }
0x1f14   :  { %v3056_v28 = vsub.f32 %v7217_v53, %v5507_v36 }
0x1f15   :  { %v5509_v62 = vpop.eup %5508 }
0x1f16   :  { %3060 = vrot.lane.b32.xlu0 %v3056_v28, %s5875_s22  ;;  %v3057_v30 = vsub.f32 %v7220_v32, %v5509_v62 }
0x1f17   :  { %v5511_v10 = vpop.eup %5510 }
0x1f18   :  { %3062 = vrot.lane.b32.xlu1 %v3057_v30, %s5875_s22  ;;  %v3128_v1 = vsub.f32 %v7240_v60, %v5511_v10 }
0x1f19   :  { %v5513_v50 = vpop.eup %5512 }
0x1f1a   :  { %3156 = vperm.xlu0 %5107, %v6958_v11   ;;  %v3129_v14 = vsub.f32 %v7243_v21, %v5513_v50  ;;  %v5515_v54 = vpop.eup %5514 }
0x1f1b   :  { %v5517_v6 = vpop.eup %5516  ;;  %v3095_v25 = vadd.f32 1.0, %v5515_v54 }
0x1f1c   :  { %3161 = vperm.xlu1 %5108, %v6961_v33   ;;  %v3097_v61 = vadd.f32 1.0, %v5517_v6 }
0x1f1d   :  { %5518 = vrcp.f32 %v3095_v25 }
0x1f1e   :  { %3132 = vrot.lane.b32.xlu0 %v3128_v1, %s5875_s22  ;;  %5520 = vrcp.f32 %v3097_v61 }
0x1f20   :  { %3134 = vrot.lane.b32.xlu1 %v3129_v14, %s5875_s22 }
0x1f88   :  { %v3061_v11 = vpop.permute.xlu0 %3060 }
0x1f89   :  { %v3066_v58 = vmul.f32 %v5499_v55, %v3061_v11  ;;  %v5519_v55 = vpop.eup %5518 }
0x1f8a   :  { %v3063_v34 = vpop.permute.xlu1 %3062  ;;  %v5521_v40 = vpop.eup %5520 }
0x1f8b   :  { %v3067_v33 = vmul.f32 %v5501_v7, %v3063_v34  ;;  %3070 = vrot.lane.b32.xlu0 %v3066_v58, %s5876_s23 }
0x1f8d   :  { %3072 = vrot.lane.b32.xlu1 %v3067_v33, %s5876_s23 }
0x1f8f   :  { %3179 = vperm.xlu0 %5107, %v6942_v56  }
0x1f91   :  { %3184 = vperm.xlu1 %5108, %v6945_v47  }
0x1f99   :  { %v7297_v49 = vpop.permute.xlu0 %3156 }
0x1f9b   :  { %v7299_v45 = vpop.permute.xlu1 %3161 }
0x1f9d   :  { %v3133_v7 = vpop.permute.xlu0 %3132 }
0x1f9e   :  { %v3138_v9 = vmul.f32 %v5519_v55, %v3133_v7  ;;  %v7347_v55 = vld [vmem:[#allocation10] ss:$8 sps:$4 sm:$0xff]   ;;  %v7357_v7 = vld [vmem:[#allocation10 + $0x24] ss:$8 sps:$4 sm:$0xff]  }
0x1f9f   :  { %v3135_v31 = vpop.permute.xlu1 %3134 }
0x1fa0   :  { %v3139_v27 = vmul.f32 %v5521_v40, %v3135_v31  ;;  %3142 = vrot.lane.b32.xlu0 %v3138_v9, %s5876_s23  ;;  %v7360_v9 = vld [vmem:[#allocation10 + $0x20] ss:$8 sps:$4 sm:$0xff]   ;;  %v7363_v40 = vld [vmem:[#allocation10 + $0x34] ss:$8 sps:$4 sm:$0xff]   ;;  %v7366_v31 = vld [vmem:[#allocation10 + $0x30] ss:$8 sps:$4 sm:$0xff]  }
0x1fa2   :  { %3144 = vrot.lane.b32.xlu1 %v3139_v27, %s5876_s23  ;;  %v7369_v27 = vld [vmem:[#allocation10 + $0x4] ss:$8 sps:$4 sm:$0xff]  }
0x1ffd   :  { %v3071_v56 = vpop.permute.xlu0 %3070 }
0x1ffe   :  { %v7303_v52 = vadd.f32 %v5507_v36, %v3071_v56 }
0x1fff   :  { %v3073_v47 = vpop.permute.xlu1 %3072 }
0x2000   :  { %v3200_v57 = vsub.f32 %v7303_v52, %v7217_v53  ;;  %v7307_v0 = vadd.f32 %v5509_v62, %v3073_v47 }
0x2002   :  { %v3202_v46 = vmul.f32 %v3200_v57, %v7297_v49  ;;  %v3201_v8 = vsub.f32 %v7307_v0, %v7220_v32 }
0x2004   :  { %v3203_v28 = vmul.f32 %v3201_v8, %v7299_v45  ;;  %v7314_v30 = vadd.f32 %v3202_v46, %v7217_v53 }
0x2006   :  { %v7317_v1 = vadd.f32 %v3203_v28, %v7220_v32 }
0x2008   :  { %v5154_v36 = vpack.i.bf16 %v7317_v1, %v7314_v30 }
0x200a   :  { %5155 = vrot.lane.b32.xlu0 %v5154_v36, %s5873_s3 }
0x200e   :  { %v7322_v62 = vpop.permute.xlu0 %3179 }
0x200f   :  { %8327 = vst [vmem:[#allocation64_spill] sm:$0xff] %v7322_v62 }
0x2010   :  { %v7324_v14 = vpop.permute.xlu1 %3184 }
0x2011   :  { %8328 = vst [vmem:[#allocation65_spill] sm:$0xff] %v7324_v14 }
0x2012   :  { %v3143_v4 = vpop.permute.xlu0 %3142 }
0x2013   :  { %v7326_v37 = vadd.f32 %v5511_v10, %v3143_v4 }
0x2014   :  { %v3145_v59 = vpop.permute.xlu1 %3144 }
0x2015   :  { %8329 = vst [vmem:[#allocation66_spill] sm:$0xff] %v7326_v37  ;;  %v7328_v51 = vadd.f32 %v5513_v50, %v3145_v59  ;;  %v3206_v53 = vsub.f32 %v7326_v37, %v7240_v60  ;;  %v3269_v59 = vld [vmem:[#allocation2 + $0x140] sm:$0xff] }
0x2017   :  { %8330 = vst [vmem:[#allocation67_spill] sm:$0xff] %v7328_v51  ;;  %v3207_v32 = vsub.f32 %v7328_v51, %v7243_v21  ;;  %v3208_v11 = vmul.f32 %v3206_v53, %v7322_v62 }
0x2019   :  { %v3209_v58 = vmul.f32 %v3207_v32, %v7324_v14  ;;  %v7337_v33 = vadd.f32 %v3208_v11, %v7240_v60  ;;  %v7351_v60 = vld [vmem:[#allocation10 + $0x14] ss:$8 sps:$4 sm:$0xff]  }
0x201a   :  { %v3270_v32 = vld [vmem:[#allocation2 + $0x150] sm:$0xff] }
0x201b   :  { %v7340_v54 = vadd.f32 %v3209_v58, %v7243_v21  ;;  %v7354_v21 = vld [vmem:[#allocation10 + $0x10] ss:$8 sps:$4 sm:$0xff]   ;;  %v3271_v58 = vld [vmem:[#allocation2 + $0xa0] sm:$0xff] }
0x207c   :  { %v5156_v34 = vpop.permute.xlu0 %5155 }
0x207d   :  { %v5158_v10 = vunpack.i.h.bf16 %v5156_v34  ;;  %v5157_v50 = vunpack.i.l.bf16 %v5156_v34 }
0x207f   :  { %v3221_v6 = vsel %vm284_vm0, %v5158_v10, %v7340_v54  ;;  %v3220_v25 = vsel %vm284_vm0, %v5157_v50, %v7337_v33  ;;  %v3273_v50 = vld [vmem:[#allocation2 + $0xb0] sm:$0xff] }
0x2080   :  { %v3222_v61 = vpack.c.bf16 %v3221_v6, %v3220_v25 }
0x2082   :  { %5052 = vmatmul.mubr.msk.bf16.vlgmr.msra.gmra.mrb[68].mxu0 %vm527_vm1, %v3222_v61 }
0x2083   :  { %3737 = vmatpush1.bf16.msra.mxu0 %v7347_v55  ;;  %3768 = vmatprep.mubr.bf16.mxu0 %v8302_v48 }
0x2084   :  { %3738 = vmatprep.subr.bf16.mxu0 %v7351_v60 }
0x2087   :  { %3739 = vmatpush1.bf16.msra.mxu0 %v7354_v21 }
0x2088   :  { %3740 = vmatprep.subr.bf16.mxu0 %v7357_v7 }
0x208b   :  { %3741 = vmatpush1.bf16.msra.mxu0 %v7360_v9 }
0x208c   :  { %3742 = vmatprep.subr.bf16.mxu0 %v7363_v40 }
0x208f   :  { %3743 = vmatpush1.bf16.msra.mxu0 %v7366_v31 }
0x2090   :  { %4246 = vmatprep.subr.bf16.mxu0 %v7369_v27 }
0x2155   :  { %v3260_v56 = vpop.f32.mrb[68].mxu0 }
0x2156   :  { %v3261_v47 = vadd.f32 %v3260_v56, %v6071_v23  ;;  %v3262_v57 = vpop.f32.mrb[69].mxu0 }
0x2157   :  { %v3264_v46 = vpop.f32.mrb[70].mxu0  ;;  %v7376_v36 = vadd.f32 %v3262_v57, %v6073_v24 }
0x2158   :  { %v3265_v8 = vadd.f32 %v3264_v46, %v6071_v23  ;;  %v3266_v28 = vpop.f32.mrb[71].mxu0  ;;  %3291 = vrot.lane.b32.xlu1 %v3261_v47, %s5873_s3  ;;  %v3275_v53 = vadd.f32 %v3269_v59, %v3261_v47  ;;  %v3333_v10 = vadd.f32 %v3271_v58, %v3261_v47 }
0x2159   :  { %v7380_v4 = vadd.f32 %v3266_v28, %v6073_v24 }
0x215a   :  { %3293 = vrot.lane.b32.xlu0 %v3265_v8, %s5873_s3  ;;  %v3276_v11 = vadd.f32 %v3270_v32, %v3265_v8  ;;  %v5053_v34 = vmul.f32 -1.442695, %v3275_v53  ;;  %v3335_v25 = vadd.f32 %v3273_v50, %v3265_v8  ;;  %v5055_v61 = vmul.f32 -1.442695, %v3333_v10 }
0x215c   :  { %3363 = vrot.lane.b32.xlu1 %v7376_v36, %s5873_s3  ;;  %v5054_v6 = vmul.f32 -1.442695, %v3276_v11  ;;  %5522 = vpow2.f32 %v5053_v34  ;;  %v5057_v56 = vmul.f32 -1.442695, %v3335_v25 }
0x215e   :  { %3365 = vrot.lane.b32.xlu0 %v7380_v4, %s5873_s3  ;;  %5524 = vpow2.f32 %v5054_v6 }
0x215f   :  { %5526 = vpow2.f32 %v5055_v61 }
0x2160   :  { %5528 = vpow2.f32 %v5057_v56 }
0x2166   :  { %v5523_v57 = vpop.eup %5522 }
0x2167   :  { %v3283_v28 = vadd.f32 1.0, %v5523_v57 }
0x2168   :  { %v5525_v46 = vpop.eup %5524 }
0x2169   :  { %v5527_v62 = vpop.eup %5526  ;;  %v3284_v37 = vadd.f32 1.0, %v5525_v46  ;;  %5530 = vrcp.f32 %v3283_v28  ;;  %v3272_v46 = vld [vmem:[#allocation2 + $0xa8] sm:$0xff] }
0x216a   :  { %v5529_v14 = vpop.eup %5528  ;;  %v3349_v51 = vadd.f32 1.0, %v5527_v62 }
0x216b   :  { %5532 = vrcp.f32 %v3284_v37  ;;  %v3351_v53 = vadd.f32 1.0, %v5529_v14 }
0x216c   :  { %5534 = vrcp.f32 %v3349_v51 }
0x216d   :  { %5536 = vrcp.f32 %v3351_v53 }
0x2173   :  { %v5531_v47 = vpop.eup %5530 }
0x2175   :  { %v5533_v58 = vpop.eup %5532 }
0x2176   :  { %v5535_v50 = vpop.eup %5534 }
0x2177   :  { %v5537_v61 = vpop.eup %5536 }
0x21ca   :  { %v3292_v8 = vpop.permute.xlu1 %3291 }
0x21cb   :  { %v3297_v11 = vmul.f32 %v5531_v47, %v3292_v8  ;;  %v3274_v8 = vld [vmem:[#allocation2 + $0xb8] sm:$0xff] }
0x21cc   :  { %v3294_v34 = vpop.permute.xlu0 %3293 }
0x21cd   :  { %v3298_v10 = vmul.f32 %v5533_v58, %v3294_v34  ;;  %3301 = vrot.lane.b32.xlu1 %v3297_v11, %s5873_s3 }
0x21ce   :  { %v3364_v6 = vpop.permute.xlu1 %3363 }
0x21cf   :  { %v3369_v25 = vmul.f32 %v5535_v50, %v3364_v6  ;;  %3303 = vrot.lane.b32.xlu0 %v3298_v10, %s5873_s3 }
0x21d0   :  { %v3366_v56 = vpop.permute.xlu0 %3365 }
0x21d1   :  { %v3370_v62 = vmul.f32 %v5537_v61, %v3366_v56  ;;  %3373 = vrot.lane.b32.xlu1 %v3369_v25, %s5873_s3  ;;  %v3405_v25 = vld [vmem:[#allocation4 + $0xa0] sm:$0xff]  ;;  %v3406_v61 = vld [vmem:[#allocation4 + $0xa8] sm:$0xff] }
0x21d3   :  { %3375 = vrot.lane.b32.xlu0 %v3370_v62, %s5873_s3 }
0x223f   :  { %v3302_v14 = vpop.permute.xlu1 %3301 }
0x2240   :  { %v3307_v37 = vadd.f32 %v3302_v14, %v3269_v59 }
0x2241   :  { %v3304_v51 = vpop.permute.xlu0 %3303 }
0x2242   :  { %5538 = vtanh.f32 %v3307_v37  ;;  %v3308_v57 = vadd.f32 %v3304_v51, %v3270_v32  ;;  %v3334_v37 = vadd.f32 %v3272_v46, %v7376_v36  ;;  %v3336_v51 = vadd.f32 %v3274_v8, %v7380_v4 }
0x2243   :  { %v3374_v28 = vpop.permute.xlu1 %3373 }
0x2244   :  { %5540 = vtanh.f32 %v3308_v57  ;;  %v3379_v53 = vadd.f32 %v3374_v28, %v3272_v46  ;;  %v5056_v57 = vmul.f32 -1.442695, %v3334_v37  ;;  %v5058_v28 = vmul.f32 -1.442695, %v3336_v51 }
0x2245   :  { %v3376_v11 = vpop.permute.xlu0 %3375 }
0x2246   :  { %v3380_v34 = vadd.f32 %v3376_v11, %v3274_v8  ;;  %5542 = vtanh.f32 %v3379_v53 }
0x2248   :  { %5544 = vtanh.f32 %v3380_v34 }
0x2249   :  { %5546 = vpow2.f32 %v5056_v57 }
0x224a   :  { %5548 = vpow2.f32 %v5058_v28 }
0x224c   :  { %v5539_v10 = vpop.eup %5538 }
0x224d   :  { %v3311_v50 = vsub.f32 %v7314_v30, %v5539_v10 }
0x224e   :  { %v5541_v6 = vpop.eup %5540 }
0x224f   :  { %3315 = vrot.lane.b32.xlu1 %v3311_v50, %s5875_s22  ;;  %v3312_v59 = vsub.f32 %v7317_v1, %v5541_v6 }
0x2250   :  { %v5543_v32 = vpop.eup %5542 }
0x2251   :  { %3317 = vrot.lane.b32.xlu0 %v3312_v59, %s5875_s22  ;;  %v3383_v62 = vsub.f32 %v7337_v33, %v5543_v32 }
0x2252   :  { %v5545_v56 = vpop.eup %5544 }
0x2253   :  { %3411 = vperm.xlu1 %5108, %v3405_v25   ;;  %v3384_v14 = vsub.f32 %v7340_v54, %v5545_v56  ;;  %v5547_v59 = vpop.eup %5546  ;;  %v3407_v25 = vld [vmem:[#allocation4 + $0x50] sm:$0xff] }
0x2255   :  { %3416 = vperm.xlu0 %5107, %v3406_v61   ;;  %v5549_v61 = vpop.eup %5548 }
0x2256   :  { %v3352_v36 = vadd.f32 1.0, %v5549_v61 }
0x2257   :  { %3387 = vrot.lane.b32.xlu1 %v3383_v62, %s5875_s22  ;;  %v3408_v62 = vld [vmem:[#allocation4 + $0x58] sm:$0xff] }
0x2259   :  { %3389 = vrot.lane.b32.xlu0 %v3384_v14, %s5875_s22  ;;  %v3350_v14 = vadd.f32 1.0, %v5547_v59 }
0x225b   :  { %5550 = vrcp.f32 %v3350_v14 }
0x225c   :  { %5552 = vrcp.f32 %v3352_v36 }
0x22c1   :  { %v3316_v53 = vpop.permute.xlu1 %3315 }
0x22c2   :  { %v3321_v11 = vmul.f32 %v5531_v47, %v3316_v53  ;;  %v5551_v47 = vpop.eup %5550 }
0x22c3   :  { %v3318_v34 = vpop.permute.xlu0 %3317  ;;  %v5553_v37 = vpop.eup %5552 }
0x22c4   :  { %v3322_v50 = vmul.f32 %v5533_v58, %v3318_v34  ;;  %3325 = vrot.lane.b32.xlu1 %v3321_v11, %s5876_s23 }
0x22c6   :  { %3327 = vrot.lane.b32.xlu0 %v3322_v50, %s5876_s23 }
0x22c8   :  { %3434 = vperm.xlu1 %5108, %v3407_v25  }
0x22ca   :  { %3439 = vperm.xlu0 %5107, %v3408_v62  }
0x22d2   :  { %v7402_v4 = vpop.permute.xlu1 %3411 }
0x22d3   :  { %8331 = vst [vmem:[#allocation68_spill] sm:$0xff] %v7402_v4 }
0x22d4   :  { %v7404_v46 = vpop.permute.xlu0 %3416 }
0x22d5   :  { %8332 = vst [vmem:[#allocation69_spill] sm:$0xff] %v7404_v46 }
0x22d6   :  { %v3388_v58 = vpop.permute.xlu1 %3387 }
0x22d7   :  { %v3393_v8 = vmul.f32 %v5551_v47, %v3388_v58 }
0x22d8   :  { %v3390_v51 = vpop.permute.xlu0 %3389 }
0x22d9   :  { %v3394_v57 = vmul.f32 %v5553_v37, %v3390_v51  ;;  %3397 = vrot.lane.b32.xlu1 %v3393_v8, %s5876_s23 }
0x22db   :  { %3399 = vrot.lane.b32.xlu0 %v3394_v57, %s5876_s23 }
0x2336   :  { %v3326_v28 = vpop.permute.xlu1 %3325 }
0x2337   :  { %v7408_v53 = vadd.f32 %v5539_v10, %v3326_v28 }
0x2338   :  { %v3328_v11 = vpop.permute.xlu0 %3327 }
0x2339   :  { %8333 = vst [vmem:[#allocation70_spill] sm:$0xff] %v7408_v53  ;;  %v3455_v34 = vsub.f32 %v7408_v53, %v7314_v30  ;;  %v7412_v50 = vadd.f32 %v5541_v6, %v3328_v11 }
0x233b   :  { %v3457_v59 = vmul.f32 %v3455_v34, %v7402_v4  ;;  %v3456_v25 = vsub.f32 %v7412_v50, %v7317_v1 }
0x233d   :  { %v3458_v61 = vmul.f32 %v3456_v25, %v7404_v46  ;;  %v7419_v62 = vadd.f32 %v3457_v59, %v7314_v30 }
0x233f   :  { %v7422_v14 = vadd.f32 %v3458_v61, %v7317_v1 }
0x2341   :  { %v5159_v10 = vpack.i.bf16 %v7422_v14, %v7419_v62 }
0x2343   :  { %5160 = vrot.lane.b32.xlu1 %v5159_v10, %s5873_s3 }
0x2347   :  { %v7427_v6 = vpop.permute.xlu1 %3434 }
0x2348   :  { %8334 = vst [vmem:[#allocation71_spill] sm:$0xff] %v7427_v6 }
0x2349   :  { %v7429_v36 = vpop.permute.xlu0 %3439 }
0x234a   :  { %8335 = vst [vmem:[#allocation72_spill] sm:$0xff] %v7429_v36 }
0x234b   :  { %v3398_v47 = vpop.permute.xlu1 %3397 }
0x234c   :  { %v7431_v8 = vadd.f32 %v5543_v32, %v3398_v47 }
0x234d   :  { %v3400_v58 = vpop.permute.xlu0 %3399 }
0x234e   :  { %8336 = vst [vmem:[#allocation73_spill] sm:$0xff] %v7431_v8  ;;  %v7433_v37 = vadd.f32 %v5545_v56, %v3400_v58  ;;  %v3461_v30 = vsub.f32 %v7431_v8, %v7337_v33 }
0x2350   :  { %8337 = vst [vmem:[#allocation74_spill] sm:$0xff] %v7433_v37  ;;  %v3462_v1 = vsub.f32 %v7433_v37, %v7340_v54  ;;  %v3463_v51 = vmul.f32 %v3461_v30, %v7427_v6 }
0x2352   :  { %v3464_v57 = vmul.f32 %v3462_v1, %v7429_v36  ;;  %v7442_v11 = vadd.f32 %v3463_v51, %v7337_v33 }
0x2354   :  { %v7445_v34 = vadd.f32 %v3464_v57, %v7340_v54 }
0x23b5   :  { %v5161_v28 = vpop.permute.xlu1 %5160 }
0x23b6   :  { %v5163_v32 = vunpack.i.h.bf16 %v5161_v28  ;;  %v5162_v56 = vunpack.i.l.bf16 %v5161_v28  ;;  %v3525_v28 = vld [vmem:[#allocation2 + $0x170] sm:$0xff] }
0x23b8   :  { %v3476_v59 = vsel %vm284_vm0, %v5163_v32, %v7445_v34  ;;  %v3475_v25 = vsel %vm284_vm0, %v5162_v56, %v7442_v11  ;;  %v3526_v56 = vld [vmem:[#allocation2 + $0x80] sm:$0xff] }
0x23b9   :  { %v3477_v61 = vpack.c.bf16 %v3476_v59, %v3475_v25 }
0x23bb   :  { %5059 = vmatmul.mubr.msk.bf16.vlgmr.msra.gmra.mrb[36].mxu1 %vm527_vm1, %v3477_v61  ;;  %v3528_v61 = vld [vmem:[#allocation2 + $0x90] sm:$0xff] }
0x23bc   :  { %3992 = vmatpush1.bf16.msra.mxu1 %v7347_v55  ;;  %4023 = vmatprep.mubr.bf16.mxu1 %v8302_v48 }
0x23bd   :  { %3993 = vmatprep.subr.bf16.mxu1 %v7351_v60 }
0x23c0   :  { %3994 = vmatpush1.bf16.msra.mxu1 %v7354_v21 }
0x23c1   :  { %3995 = vmatprep.subr.bf16.mxu1 %v7357_v7 }
0x23c4   :  { %3996 = vmatpush1.bf16.msra.mxu1 %v7360_v9 }
0x23c5   :  { %3997 = vmatprep.subr.bf16.mxu1 %v7363_v40 }
0x23c8   :  { %3998 = vmatpush1.bf16.msra.mxu1 %v7366_v31 }
0x23c9   :  { %4501 = vmatprep.subr.bf16.mxu1 %v7369_v27  ;;  %v3524_v27 = vld [vmem:[#allocation2 + $0x160] sm:$0xff] }
0x248e   :  { %v3515_v33 = vpop.f32.mrb[36].mxu1 }
0x248f   :  { %v3516_v54 = vadd.f32 %v3515_v33, %v6071_v23  ;;  %v3517_v10 = vpop.f32.mrb[37].mxu1 }
0x2490   :  { %v3519_v47 = vpop.f32.mrb[38].mxu1  ;;  %v7465_v1 = vadd.f32 %v3517_v10, %v6073_v24 }
0x2491   :  { %v3520_v58 = vadd.f32 %v3519_v47, %v6071_v23  ;;  %v3521_v30 = vpop.f32.mrb[39].mxu1  ;;  %3546 = vrot.lane.b32.xlu0 %v3516_v54, %s5873_s3  ;;  %v3530_v57 = vadd.f32 %v3524_v27, %v3516_v54  ;;  %v3588_v25 = vadd.f32 %v3526_v56, %v3516_v54 }
0x2492   :  { %v7469_v51 = vadd.f32 %v3521_v30, %v6073_v24 }
0x2493   :  { %3548 = vrot.lane.b32.xlu1 %v3520_v58, %s5873_s3  ;;  %v3531_v32 = vadd.f32 %v3525_v28, %v3520_v58  ;;  %v5060_v59 = vmul.f32 -1.442695, %v3530_v57  ;;  %v3590_v10 = vadd.f32 %v3528_v61, %v3520_v58  ;;  %v5062_v47 = vmul.f32 -1.442695, %v3588_v25 }
0x2495   :  { %3618 = vrot.lane.b32.xlu0 %v7465_v1, %s5873_s3  ;;  %v5061_v33 = vmul.f32 -1.442695, %v3531_v32  ;;  %5554 = vpow2.f32 %v5060_v59  ;;  %v5064_v30 = vmul.f32 -1.442695, %v3590_v10 }
0x2497   :  { %3620 = vrot.lane.b32.xlu1 %v7469_v51, %s5873_s3  ;;  %5556 = vpow2.f32 %v5061_v33 }
0x2498   :  { %5558 = vpow2.f32 %v5062_v47  ;;  %v3527_v47 = vld [vmem:[#allocation2 + $0x88] sm:$0xff] }
0x2499   :  { %5560 = vpow2.f32 %v5064_v30 }
0x249f   :  { %v5555_v6 = vpop.eup %5554 }
0x24a0   :  { %v3538_v36 = vadd.f32 1.0, %v5555_v6 }
0x24a1   :  { %v5557_v8 = vpop.eup %5556 }
0x24a2   :  { %v5559_v37 = vpop.eup %5558  ;;  %v3539_v4 = vadd.f32 1.0, %v5557_v8  ;;  %5562 = vrcp.f32 %v3538_v36 }
0x24a3   :  { %v5561_v53 = vpop.eup %5560  ;;  %v3604_v46 = vadd.f32 1.0, %v5559_v37 }
0x24a4   :  { %5564 = vrcp.f32 %v3539_v4  ;;  %v3606_v57 = vadd.f32 1.0, %v5561_v53 }
0x24a5   :  { %5566 = vrcp.f32 %v3604_v46 }
0x24a6   :  { %5568 = vrcp.f32 %v3606_v57 }
0x24ac   :  { %v5563_v54 = vpop.eup %5562 }
0x24ae   :  { %v5565_v56 = vpop.eup %5564 }
0x24af   :  { %v5567_v61 = vpop.eup %5566 }
0x24b0   :  { %v5569_v8 = vpop.eup %5568 }
0x2503   :  { %v3547_v58 = vpop.permute.xlu0 %3546 }
0x2504   :  { %v3552_v32 = vmul.f32 %v5563_v54, %v3547_v58  ;;  %v3529_v58 = vld [vmem:[#allocation2 + $0x98] sm:$0xff] }
0x2505   :  { %v3549_v59 = vpop.permute.xlu1 %3548 }
0x2506   :  { %v3553_v25 = vmul.f32 %v5565_v56, %v3549_v59  ;;  %3556 = vrot.lane.b32.xlu0 %v3552_v32, %s5873_s3 }
0x2507   :  { %v3619_v33 = vpop.permute.xlu0 %3618 }
0x2508   :  { %v3624_v6 = vmul.f32 %v5567_v61, %v3619_v33  ;;  %3558 = vrot.lane.b32.xlu1 %v3553_v25, %s5873_s3 }
0x2509   :  { %v3621_v36 = vpop.permute.xlu1 %3620 }
0x250a   :  { %v3625_v37 = vmul.f32 %v5569_v8, %v3621_v36  ;;  %3628 = vrot.lane.b32.xlu0 %v3624_v6, %s5873_s3  ;;  %v3660_v6 = vld [vmem:[#allocation4 + $0xb0] sm:$0xff]  ;;  %v3661_v8 = vld [vmem:[#allocation4 + $0xb8] sm:$0xff] }
0x250c   :  { %3630 = vrot.lane.b32.xlu1 %v3625_v37, %s5873_s3 }
0x2578   :  { %v3557_v4 = vpop.permute.xlu0 %3556 }
0x2579   :  { %v3562_v46 = vadd.f32 %v3557_v4, %v3524_v27 }
0x257a   :  { %v3559_v53 = vpop.permute.xlu1 %3558 }
0x257b   :  { %5570 = vtanh.f32 %v3562_v46  ;;  %v3563_v10 = vadd.f32 %v3559_v53, %v3525_v28  ;;  %v3589_v46 = vadd.f32 %v3527_v47, %v7465_v1  ;;  %v3591_v53 = vadd.f32 %v3529_v58, %v7469_v51 }
0x257c   :  { %v3629_v30 = vpop.permute.xlu0 %3628 }
0x257d   :  { %5572 = vtanh.f32 %v3563_v10  ;;  %v3634_v57 = vadd.f32 %v3629_v30, %v3527_v47  ;;  %v5063_v10 = vmul.f32 -1.442695, %v3589_v46  ;;  %v5065_v30 = vmul.f32 -1.442695, %v3591_v53 }
0x257e   :  { %v3631_v32 = vpop.permute.xlu1 %3630 }
0x257f   :  { %v3635_v59 = vadd.f32 %v3631_v32, %v3529_v58  ;;  %5574 = vtanh.f32 %v3634_v57 }
0x2581   :  { %5576 = vtanh.f32 %v3635_v59 }
0x2582   :  { %5578 = vpow2.f32 %v5063_v10 }
0x2583   :  { %5580 = vpow2.f32 %v5065_v30 }
0x2585   :  { %v5571_v25 = vpop.eup %5570 }
0x2586   :  { %v3566_v61 = vsub.f32 %v7419_v62, %v5571_v25 }
0x2587   :  { %v5573_v33 = vpop.eup %5572 }
0x2588   :  { %3570 = vrot.lane.b32.xlu0 %v3566_v61, %s5875_s22  ;;  %v3567_v27 = vsub.f32 %v7422_v14, %v5573_v33 }
0x2589   :  { %v5575_v28 = vpop.eup %5574 }
0x258a   :  { %3572 = vrot.lane.b32.xlu1 %v3567_v27, %s5875_s22  ;;  %v3638_v37 = vsub.f32 %v7442_v11, %v5575_v28 }
0x258b   :  { %v5577_v36 = vpop.eup %5576 }
0x258c   :  { %3666 = vperm.xlu0 %5107, %v3660_v6   ;;  %v3639_v4 = vsub.f32 %v7445_v34, %v5577_v36  ;;  %v5579_v27 = vpop.eup %5578  ;;  %v3662_v6 = vld [vmem:[#allocation4 + $0x40] sm:$0xff] }
0x258e   :  { %3671 = vperm.xlu1 %5108, %v3661_v8   ;;  %v5581_v8 = vpop.eup %5580 }
0x258f   :  { %v3607_v1 = vadd.f32 1.0, %v5581_v8 }
0x2590   :  { %3642 = vrot.lane.b32.xlu0 %v3638_v37, %s5875_s22  ;;  %v3663_v37 = vld [vmem:[#allocation4 + $0x48] sm:$0xff] }
0x2592   :  { %3644 = vrot.lane.b32.xlu1 %v3639_v4, %s5875_s22  ;;  %v3605_v4 = vadd.f32 1.0, %v5579_v27 }
0x2594   :  { %5582 = vrcp.f32 %v3605_v4 }
0x2595   :  { %5584 = vrcp.f32 %v3607_v1 }
0x25fa   :  { %v3571_v57 = vpop.permute.xlu0 %3570 }
0x25fb   :  { %v3576_v32 = vmul.f32 %v5563_v54, %v3571_v57  ;;  %v5583_v54 = vpop.eup %5582 }
0x25fc   :  { %v3573_v59 = vpop.permute.xlu1 %3572  ;;  %v5585_v46 = vpop.eup %5584 }
0x25fd   :  { %v3577_v61 = vmul.f32 %v5565_v56, %v3573_v59  ;;  %3580 = vrot.lane.b32.xlu0 %v3576_v32, %s5876_s23 }
0x25ff   :  { %3582 = vrot.lane.b32.xlu1 %v3577_v61, %s5876_s23 }
0x2601   :  { %3689 = vperm.xlu0 %5107, %v3662_v6  }
0x2603   :  { %3694 = vperm.xlu1 %5108, %v3663_v37  }
0x260b   :  { %v7491_v51 = vpop.permute.xlu0 %3666 }
0x260c   :  { %8338 = vst [vmem:[#allocation75_spill] sm:$0xff] %v7491_v51 }
0x260d   :  { %v7493_v47 = vpop.permute.xlu1 %3671 }
0x260e   :  { %8339 = vst [vmem:[#allocation76_spill] sm:$0xff] %v7493_v47 }
0x260f   :  { %v3643_v56 = vpop.permute.xlu0 %3642 }
0x2610   :  { %v3648_v58 = vmul.f32 %v5583_v54, %v3643_v56 }
0x2611   :  { %v3645_v53 = vpop.permute.xlu1 %3644 }
0x2612   :  { %v3649_v10 = vmul.f32 %v5585_v46, %v3645_v53  ;;  %3652 = vrot.lane.b32.xlu0 %v3648_v58, %s5876_s23 }
0x2614   :  { %3654 = vrot.lane.b32.xlu1 %v3649_v10, %s5876_s23 }
0x266f   :  { %v3581_v30 = vpop.permute.xlu0 %3580 }
0x2670   :  { %v7497_v57 = vadd.f32 %v5571_v25, %v3581_v30 }
0x2671   :  { %v3583_v32 = vpop.permute.xlu1 %3582 }
0x2672   :  { %8340 = vst [vmem:[#allocation77_spill] sm:$0xff] %v7497_v57  ;;  %v3710_v59 = vsub.f32 %v7497_v57, %v7419_v62  ;;  %v7501_v61 = vadd.f32 %v5573_v33, %v3583_v32 }
0x2674   :  { %8341 = vst [vmem:[#allocation78_spill] sm:$0xff] %v7501_v61  ;;  %v3712_v27 = vmul.f32 %v3710_v59, %v7491_v51  ;;  %v3711_v6 = vsub.f32 %v7501_v61, %v7422_v14 }
0x2676   :  { %v3713_v8 = vmul.f32 %v3711_v6, %v7493_v47  ;;  %v7508_v37 = vadd.f32 %v3712_v27, %v7419_v62 }
0x2678   :  { %v7511_v4 = vadd.f32 %v3713_v8, %v7422_v14 }
0x267a   :  { %v5164_v25 = vpack.i.bf16 %v7511_v4, %v7508_v37 }
0x267c   :  { %5165 = vrot.lane.b32.xlu0 %v5164_v25, %s5873_s3 }
0x2680   :  { %v7516_v33 = vpop.permute.xlu0 %3689 }
0x2681   :  { %8342 = vst [vmem:[#allocation79_spill] sm:$0xff] %v7516_v33 }
0x2682   :  { %v7518_v1 = vpop.permute.xlu1 %3694 }
0x2683   :  { %8343 = vst [vmem:[#allocation80_spill] sm:$0xff] %v7518_v1 }
0x2684   :  { %v3653_v54 = vpop.permute.xlu0 %3652 }
0x2685   :  { %v7520_v58 = vadd.f32 %v5575_v28, %v3653_v54 }
0x2686   :  { %v3655_v56 = vpop.permute.xlu1 %3654 }
0x2687   :  { %8344 = vst [vmem:[#allocation81_spill] sm:$0xff] %v7520_v58  ;;  %v7522_v46 = vadd.f32 %v5577_v36, %v3655_v56  ;;  %v3716_v62 = vsub.f32 %v7520_v58, %v7442_v11 }
0x2689   :  { %8345 = vst [vmem:[#allocation82_spill] sm:$0xff] %v7522_v46  ;;  %v3717_v14 = vsub.f32 %v7522_v46, %v7445_v34  ;;  %v3718_v53 = vmul.f32 %v3716_v62, %v7516_v33 }
0x268b   :  { %v3719_v10 = vmul.f32 %v3717_v14, %v7518_v1  ;;  %v7531_v32 = vadd.f32 %v3718_v53, %v7442_v11 }
0x268d   :  { %v7534_v59 = vadd.f32 %v3719_v10, %v7445_v34  ;;  %v3779_v10 = vld [vmem:[#allocation2 + $0x180] sm:$0xff] }
0x26ee   :  { %v5166_v30 = vpop.permute.xlu0 %5165 }
0x26ef   :  { %v5168_v28 = vunpack.i.h.bf16 %v5166_v30  ;;  %v5167_v36 = vunpack.i.l.bf16 %v5166_v30 }
0x26f1   :  { %v3731_v27 = vsel %vm284_vm0, %v5168_v28, %v7534_v59  ;;  %v3730_v6 = vsel %vm284_vm0, %v5167_v36, %v7531_v32  ;;  %v3780_v28 = vld [vmem:[#allocation2 + $0x190] sm:$0xff] }
0x26f2   :  { %v3732_v8 = vpack.c.bf16 %v3731_v27, %v3730_v6  ;;  %v3781_v27 = vld [vmem:[#allocation2 + $0x60] sm:$0xff] }
0x26f4   :  { %5066 = vmatmul.mubr.msk.bf16.vlgmr.msra.gmra.mrb[72].mxu0 %vm527_vm1, %v3732_v8 }
0x26f5   :  { %4247 = vmatpush1.bf16.msra.mxu0 %v7347_v55  ;;  %4278 = vmatprep.mubr.bf16.mxu0 %v8302_v48 }
0x26f6   :  { %4248 = vmatprep.subr.bf16.mxu0 %v7351_v60 }
0x26f9   :  { %4249 = vmatpush1.bf16.msra.mxu0 %v7354_v21 }
0x26fa   :  { %4250 = vmatprep.subr.bf16.mxu0 %v7357_v7 }
0x26fd   :  { %4251 = vmatpush1.bf16.msra.mxu0 %v7360_v9 }
0x26fe   :  { %4252 = vmatprep.subr.bf16.mxu0 %v7363_v40 }
0x2701   :  { %4253 = vmatpush1.bf16.msra.mxu0 %v7366_v31 }
0x27c7   :  { %v3770_v11 = vpop.f32.mrb[72].mxu0 }
0x27c8   :  { %v3771_v34 = vadd.f32 %v3770_v11, %v6071_v23  ;;  %v3772_v25 = vpop.f32.mrb[73].mxu0  ;;  %v3783_v11 = vld [vmem:[#allocation2 + $0x70] sm:$0xff] }
0x27c9   :  { %v3774_v54 = vpop.f32.mrb[74].mxu0  ;;  %v7553_v14 = vadd.f32 %v3772_v25, %v6073_v24 }
0x27ca   :  { %v3775_v56 = vadd.f32 %v3774_v54, %v6071_v23  ;;  %v3776_v62 = vpop.f32.mrb[75].mxu0  ;;  %3801 = vrot.lane.b32.xlu1 %v3771_v34, %s5873_s3  ;;  %v3785_v30 = vadd.f32 %v3779_v10, %v3771_v34  ;;  %v3843_v8 = vadd.f32 %v3781_v27, %v3771_v34 }
0x27cb   :  { %v7557_v53 = vadd.f32 %v3776_v62, %v6073_v24 }
0x27cc   :  { %3803 = vrot.lane.b32.xlu0 %v3775_v56, %s5873_s3  ;;  %v3786_v36 = vadd.f32 %v3780_v28, %v3775_v56  ;;  %v5067_v6 = vmul.f32 -1.442695, %v3785_v30  ;;  %v3845_v54 = vadd.f32 %v3783_v11, %v3775_v56  ;;  %v5069_v33 = vmul.f32 -1.442695, %v3843_v8 }
0x27ce   :  { %3873 = vrot.lane.b32.xlu1 %v7553_v14, %s5873_s3  ;;  %v5068_v25 = vmul.f32 -1.442695, %v3786_v36  ;;  %5586 = vpow2.f32 %v5067_v6  ;;  %v5071_v62 = vmul.f32 -1.442695, %v3845_v54  ;;  %v3782_v54 = vld [vmem:[#allocation2 + $0x68] sm:$0xff] }
0x27d0   :  { %3875 = vrot.lane.b32.xlu0 %v7557_v53, %s5873_s3  ;;  %5588 = vpow2.f32 %v5068_v25 }
0x27d1   :  { %5590 = vpow2.f32 %v5069_v33 }
0x27d2   :  { %5592 = vpow2.f32 %v5071_v62 }
0x27d8   :  { %v5587_v58 = vpop.eup %5586 }
0x27d9   :  { %v3793_v46 = vadd.f32 1.0, %v5587_v58 }
0x27da   :  { %v5589_v1 = vpop.eup %5588 }
0x27db   :  { %v5591_v51 = vpop.eup %5590  ;;  %v3794_v57 = vadd.f32 1.0, %v5589_v1  ;;  %5594 = vrcp.f32 %v3793_v46 }
0x27dc   :  { %v5593_v47 = vpop.eup %5592  ;;  %v3859_v61 = vadd.f32 1.0, %v5591_v51 }
0x27dd   :  { %5596 = vrcp.f32 %v3794_v57  ;;  %v3861_v30 = vadd.f32 1.0, %v5593_v47 }
0x27de   :  { %5598 = vrcp.f32 %v3859_v61 }
0x27df   :  { %5600 = vrcp.f32 %v3861_v30 }
0x27e5   :  { %v5595_v34 = vpop.eup %5594 }
0x27e7   :  { %v5597_v27 = vpop.eup %5596 }
0x27e8   :  { %v5599_v33 = vpop.eup %5598 }
0x27e9   :  { %v5601_v1 = vpop.eup %5600 }
0x283c   :  { %v3802_v56 = vpop.permute.xlu1 %3801 }
0x283d   :  { %v3807_v36 = vmul.f32 %v5595_v34, %v3802_v56  ;;  %v3784_v56 = vld [vmem:[#allocation2 + $0x78] sm:$0xff] }
0x283e   :  { %v3804_v6 = vpop.permute.xlu0 %3803 }
0x283f   :  { %v3808_v8 = vmul.f32 %v5597_v27, %v3804_v6  ;;  %3811 = vrot.lane.b32.xlu1 %v3807_v36, %s5873_s3 }
0x2840   :  { %v3874_v11 = vpop.permute.xlu1 %3873 }
0x2841   :  { %v3879_v58 = vmul.f32 %v5599_v33, %v3874_v11  ;;  %3813 = vrot.lane.b32.xlu0 %v3808_v8, %s5873_s3 }
0x2842   :  { %v3876_v46 = vpop.permute.xlu0 %3875 }
0x2843   :  { %v3880_v51 = vmul.f32 %v5601_v1, %v3876_v46  ;;  %3883 = vrot.lane.b32.xlu1 %v3879_v58, %s5873_s3  ;;  %v3915_v58 = vld [vmem:[#allocation4 + $0xc0] sm:$0xff]  ;;  %v3916_v1 = vld [vmem:[#allocation4 + $0xc8] sm:$0xff] }
0x2845   :  { %3885 = vrot.lane.b32.xlu0 %v3880_v51, %s5873_s3 }
0x28b1   :  { %v3812_v47 = vpop.permute.xlu1 %3811 }
0x28b2   :  { %v3817_v57 = vadd.f32 %v3812_v47, %v3779_v10 }
0x28b3   :  { %v3814_v61 = vpop.permute.xlu0 %3813 }
0x28b4   :  { %5602 = vtanh.f32 %v3817_v57  ;;  %v3818_v25 = vadd.f32 %v3814_v61, %v3780_v28  ;;  %v3844_v57 = vadd.f32 %v3782_v54, %v7553_v14  ;;  %v3846_v61 = vadd.f32 %v3784_v56, %v7557_v53 }
0x28b5   :  { %v3884_v62 = vpop.permute.xlu1 %3883 }
0x28b6   :  { %5604 = vtanh.f32 %v3818_v25  ;;  %v3889_v30 = vadd.f32 %v3884_v62, %v3782_v54  ;;  %v5070_v25 = vmul.f32 -1.442695, %v3844_v57  ;;  %v5072_v62 = vmul.f32 -1.442695, %v3846_v61 }
0x28b7   :  { %v3886_v36 = vpop.permute.xlu0 %3885 }
0x28b8   :  { %v3890_v6 = vadd.f32 %v3886_v36, %v3784_v56  ;;  %5606 = vtanh.f32 %v3889_v30 }
0x28ba   :  { %5608 = vtanh.f32 %v3890_v6 }
0x28bb   :  { %5610 = vpow2.f32 %v5070_v25 }
0x28bc   :  { %5612 = vpow2.f32 %v5072_v62 }
0x28be   :  { %v5603_v8 = vpop.eup %5602 }
0x28bf   :  { %v3821_v33 = vsub.f32 %v7508_v37, %v5603_v8 }
0x28c0   :  { %v5605_v11 = vpop.eup %5604 }
0x28c1   :  { %3825 = vrot.lane.b32.xlu1 %v3821_v33, %s5875_s22  ;;  %v3822_v10 = vsub.f32 %v7511_v4, %v5605_v11 }
0x28c2   :  { %v5607_v28 = vpop.eup %5606 }
0x28c3   :  { %3827 = vrot.lane.b32.xlu0 %v3822_v10, %s5875_s22  ;;  %v3893_v51 = vsub.f32 %v7531_v32, %v5607_v28 }
0x28c4   :  { %v5609_v46 = vpop.eup %5608 }
0x28c5   :  { %3921 = vperm.xlu1 %5108, %v3915_v58   ;;  %v3894_v47 = vsub.f32 %v7534_v59, %v5609_v46  ;;  %v5611_v10 = vpop.eup %5610  ;;  %v3917_v58 = vld [vmem:[#allocation4 + $0x30] sm:$0xff] }
0x28c7   :  { %3926 = vperm.xlu0 %5107, %v3916_v1   ;;  %v5613_v1 = vpop.eup %5612 }
0x28c8   :  { %v3862_v14 = vadd.f32 1.0, %v5613_v1 }
0x28c9   :  { %3897 = vrot.lane.b32.xlu1 %v3893_v51, %s5875_s22  ;;  %v3918_v51 = vld [vmem:[#allocation4 + $0x38] sm:$0xff] }
0x28cb   :  { %3899 = vrot.lane.b32.xlu0 %v3894_v47, %s5875_s22  ;;  %v3860_v47 = vadd.f32 1.0, %v5611_v10 }
0x28cd   :  { %5614 = vrcp.f32 %v3860_v47 }
0x28ce   :  { %5616 = vrcp.f32 %v3862_v14 }
0x2933   :  { %v3826_v30 = vpop.permute.xlu1 %3825 }
0x2934   :  { %v3831_v36 = vmul.f32 %v5595_v34, %v3826_v30  ;;  %v5615_v34 = vpop.eup %5614 }
0x2935   :  { %v3828_v6 = vpop.permute.xlu0 %3827  ;;  %v5617_v57 = vpop.eup %5616 }
0x2936   :  { %v3832_v33 = vmul.f32 %v5597_v27, %v3828_v6  ;;  %3835 = vrot.lane.b32.xlu1 %v3831_v36, %s5876_s23 }
0x2938   :  { %3837 = vrot.lane.b32.xlu0 %v3832_v33, %s5876_s23 }
0x293a   :  { %3944 = vperm.xlu1 %5108, %v3917_v58  }
0x293c   :  { %3949 = vperm.xlu0 %5107, %v3918_v51  }
0x2944   :  { %v7579_v53 = vpop.permute.xlu1 %3921 }
0x2946   :  { %v7581_v54 = vpop.permute.xlu0 %3926 }
0x2948   :  { %v3898_v27 = vpop.permute.xlu1 %3897 }
0x2949   :  { %v3903_v56 = vmul.f32 %v5615_v34, %v3898_v27 }
0x294a   :  { %v3900_v61 = vpop.permute.xlu0 %3899 }
0x294b   :  { %v3904_v25 = vmul.f32 %v5617_v57, %v3900_v61  ;;  %3907 = vrot.lane.b32.xlu1 %v3903_v56, %s5876_s23 }
0x294d   :  { %3909 = vrot.lane.b32.xlu0 %v3904_v25, %s5876_s23 }
0x29a8   :  { %v3836_v62 = vpop.permute.xlu1 %3835 }
0x29a9   :  { %v7585_v30 = vadd.f32 %v5603_v8, %v3836_v62 }
0x29aa   :  { %v3838_v36 = vpop.permute.xlu0 %3837 }
0x29ab   :  { %v3965_v6 = vsub.f32 %v7585_v30, %v7508_v37  ;;  %v7589_v33 = vadd.f32 %v5605_v11, %v3838_v36 }
0x29ad   :  { %v3967_v10 = vmul.f32 %v3965_v6, %v7579_v53  ;;  %v3966_v58 = vsub.f32 %v7589_v33, %v7511_v4 }
0x29af   :  { %v3968_v1 = vmul.f32 %v3966_v58, %v7581_v54  ;;  %v7596_v51 = vadd.f32 %v3967_v10, %v7508_v37 }
0x29b1   :  { %v7599_v47 = vadd.f32 %v3968_v1, %v7511_v4 }
0x29b3   :  { %v5169_v8 = vpack.i.bf16 %v7599_v47, %v7596_v51 }
0x29b5   :  { %5170 = vrot.lane.b32.xlu1 %v5169_v8, %s5873_s3 }
0x29b9   :  { %v7604_v11 = vpop.permute.xlu1 %3944 }
0x29bb   :  { %v7606_v14 = vpop.permute.xlu0 %3949 }
0x29bd   :  { %v3908_v34 = vpop.permute.xlu1 %3907 }
0x29be   :  { %v7608_v56 = vadd.f32 %v5607_v28, %v3908_v34 }
0x29bf   :  { %v3910_v27 = vpop.permute.xlu0 %3909 }
0x29c0   :  { %v7610_v57 = vadd.f32 %v5609_v46, %v3910_v27  ;;  %v3971_v37 = vsub.f32 %v7608_v56, %v7531_v32  ;;  %v4036_v27 = vld [vmem:[#allocation2 + $0x40] sm:$0xff] }
0x29c2   :  { %v3972_v4 = vsub.f32 %v7610_v57, %v7534_v59  ;;  %v3973_v61 = vmul.f32 %v3971_v37, %v7604_v11 }
0x29c4   :  { %v3974_v25 = vmul.f32 %v3972_v4, %v7606_v14  ;;  %v7619_v36 = vadd.f32 %v3973_v61, %v7531_v32  ;;  %v4038_v61 = vld [vmem:[#allocation2 + $0x50] sm:$0xff] }
0x29c6   :  { %v7622_v6 = vadd.f32 %v3974_v25, %v7534_v59 }
0x2a27   :  { %v5171_v62 = vpop.permute.xlu1 %5170 }
0x2a28   :  { %v5173_v28 = vunpack.i.h.bf16 %v5171_v62  ;;  %v5172_v46 = vunpack.i.l.bf16 %v5171_v62 }
0x2a2a   :  { %v3986_v10 = vsel %vm284_vm0, %v5173_v28, %v7622_v6  ;;  %v3985_v58 = vsel %vm284_vm0, %v5172_v46, %v7619_v36 }
0x2a2b   :  { %v3987_v1 = vpack.c.bf16 %v3986_v10, %v3985_v58 }
0x2a2d   :  { %5073 = vmatmul.mubr.msk.bf16.vlgmr.msra.gmra.mrb[40].mxu1 %vm527_vm1, %v3987_v1 }
0x2a2e   :  { %4502 = vmatpush1.bf16.msra.mxu1 %v7347_v55  ;;  %4533 = vmatprep.mubr.bf16.mxu1 %v8302_v48 }
0x2a2f   :  { %4503 = vmatprep.subr.bf16.mxu1 %v7351_v60 }
0x2a32   :  { %4504 = vmatpush1.bf16.msra.mxu1 %v7354_v21 }
0x2a33   :  { %4505 = vmatprep.subr.bf16.mxu1 %v7357_v7  ;;  %v4034_v7 = vld [vmem:[#allocation2 + $0x1a0] sm:$0xff] }
0x2a36   :  { %4506 = vmatpush1.bf16.msra.mxu1 %v7360_v9 }
0x2a37   :  { %4507 = vmatprep.subr.bf16.mxu1 %v7363_v40  ;;  %v4035_v40 = vld [vmem:[#allocation2 + $0x1b0] sm:$0xff] }
0x2a3a   :  { %4508 = vmatpush1.bf16.msra.mxu1 %v7366_v31 }
0x2b00   :  { %v4025_v32 = vpop.f32.mrb[40].mxu1 }
0x2b01   :  { %v4026_v59 = vadd.f32 %v4025_v32, %v6071_v23  ;;  %v4027_v8 = vpop.f32.mrb[41].mxu1 }
0x2b02   :  { %v4029_v34 = vpop.f32.mrb[42].mxu1  ;;  %v7641_v60 = vadd.f32 %v4027_v8, %v6073_v24 }
0x2b03   :  { %v4030_v55 = vadd.f32 %v4029_v34, %v6071_v23  ;;  %v4031_v48 = vpop.f32.mrb[43].mxu1  ;;  %4056 = vrot.lane.b32.xlu0 %v4026_v59, %s5873_s3  ;;  %v4040_v9 = vadd.f32 %v4034_v7, %v4026_v59  ;;  %v4098_v4 = vadd.f32 %v4036_v27, %v4026_v59 }
0x2b04   :  { %v7645_v21 = vadd.f32 %v4031_v48, %v6073_v24 }
0x2b05   :  { %4058 = vrot.lane.b32.xlu1 %v4030_v55, %s5873_s3  ;;  %v4041_v31 = vadd.f32 %v4035_v40, %v4030_v55  ;;  %v5074_v37 = vmul.f32 -1.442695, %v4040_v9  ;;  %v4100_v62 = vadd.f32 %v4038_v61, %v4030_v55  ;;  %v5076_v28 = vmul.f32 -1.442695, %v4098_v4 }
0x2b07   :  { %4128 = vrot.lane.b32.xlu0 %v7641_v60, %s5873_s3  ;;  %v5075_v25 = vmul.f32 -1.442695, %v4041_v31  ;;  %5618 = vpow2.f32 %v5074_v37  ;;  %v5078_v46 = vmul.f32 -1.442695, %v4100_v62 }
0x2b09   :  { %4130 = vrot.lane.b32.xlu1 %v7645_v21, %s5873_s3  ;;  %5620 = vpow2.f32 %v5075_v25 }
0x2b0a   :  { %5622 = vpow2.f32 %v5076_v28 }
0x2b0b   :  { %5624 = vpow2.f32 %v5078_v46 }
0x2b11   :  { %v5619_v10 = vpop.eup %5618 }
0x2b12   :  { %v4048_v1 = vadd.f32 1.0, %v5619_v10 }
0x2b13   :  { %v5621_v58 = vpop.eup %5620 }
0x2b14   :  { %v5623_v32 = vpop.eup %5622  ;;  %v4049_v8 = vadd.f32 1.0, %v5621_v58  ;;  %5626 = vrcp.f32 %v4048_v1 }
0x2b15   :  { %v5625_v34 = vpop.eup %5624  ;;  %v4114_v48 = vadd.f32 1.0, %v5623_v32 }
0x2b16   :  { %5628 = vrcp.f32 %v4049_v8  ;;  %v4116_v9 = vadd.f32 1.0, %v5625_v34  ;;  %v4037_v34 = vld [vmem:[#allocation2 + $0x48] sm:$0xff] }
0x2b17   :  { %5630 = vrcp.f32 %v4114_v48 }
0x2b18   :  { %5632 = vrcp.f32 %v4116_v9 }
0x2b1e   :  { %v5627_v59 = vpop.eup %5626 }
0x2b20   :  { %v5629_v27 = vpop.eup %5628 }
0x2b21   :  { %v5631_v61 = vpop.eup %5630 }
0x2b22   :  { %v5633_v28 = vpop.eup %5632 }
0x2b75   :  { %v4057_v55 = vpop.permute.xlu0 %4056 }
0x2b76   :  { %v4062_v31 = vmul.f32 %v5627_v59, %v4057_v55  ;;  %v4039_v55 = vld [vmem:[#allocation2 + $0x58] sm:$0xff] }
0x2b77   :  { %v4059_v37 = vpop.permute.xlu1 %4058 }
0x2b78   :  { %v4063_v4 = vmul.f32 %v5629_v27, %v4059_v37  ;;  %4066 = vrot.lane.b32.xlu0 %v4062_v31, %s5873_s3 }
0x2b79   :  { %v4129_v25 = vpop.permute.xlu0 %4128 }
0x2b7a   :  { %v4134_v62 = vmul.f32 %v5631_v61, %v4129_v25  ;;  %4068 = vrot.lane.b32.xlu1 %v4063_v4, %s5873_s3 }
0x2b7b   :  { %v4131_v46 = vpop.permute.xlu1 %4130 }
0x2b7c   :  { %v4135_v10 = vmul.f32 %v5633_v28, %v4131_v46  ;;  %4138 = vrot.lane.b32.xlu0 %v4134_v62, %s5873_s3  ;;  %v4170_v62 = vld [vmem:[#allocation4 + $0xd0] sm:$0xff]  ;;  %v4171_v28 = vld [vmem:[#allocation4 + $0xd8] sm:$0xff] }
0x2b7e   :  { %4140 = vrot.lane.b32.xlu1 %v4135_v10, %s5873_s3 }
0x2bea   :  { %v4067_v58 = vpop.permute.xlu0 %4066 }
0x2beb   :  { %v4072_v1 = vadd.f32 %v4067_v58, %v4034_v7 }
0x2bec   :  { %v4069_v32 = vpop.permute.xlu1 %4068 }
0x2bed   :  { %5634 = vtanh.f32 %v4072_v1  ;;  %v4073_v8 = vadd.f32 %v4069_v32, %v4035_v40  ;;  %v4099_v1 = vadd.f32 %v4037_v34, %v7641_v60  ;;  %v4101_v32 = vadd.f32 %v4039_v55, %v7645_v21 }
0x2bee   :  { %v4139_v48 = vpop.permute.xlu0 %4138 }
0x2bef   :  { %5636 = vtanh.f32 %v4073_v8  ;;  %v4144_v9 = vadd.f32 %v4139_v48, %v4037_v34  ;;  %v5077_v8 = vmul.f32 -1.442695, %v4099_v1  ;;  %v5079_v48 = vmul.f32 -1.442695, %v4101_v32 }
0x2bf0   :  { %v4141_v31 = vpop.permute.xlu1 %4140 }
0x2bf1   :  { %v4145_v37 = vadd.f32 %v4141_v31, %v4039_v55  ;;  %5638 = vtanh.f32 %v4144_v9 }
0x2bf3   :  { %5640 = vtanh.f32 %v4145_v37 }
0x2bf4   :  { %5642 = vpow2.f32 %v5077_v8 }
0x2bf5   :  { %5644 = vpow2.f32 %v5079_v48 }
0x2bf7   :  { %v5635_v4 = vpop.eup %5634 }
0x2bf8   :  { %v4076_v61 = vsub.f32 %v7596_v51, %v5635_v4 }
0x2bf9   :  { %v5637_v25 = vpop.eup %5636 }
0x2bfa   :  { %4080 = vrot.lane.b32.xlu0 %v4076_v61, %s5875_s22  ;;  %v4077_v7 = vsub.f32 %v7599_v47, %v5637_v25 }
0x2bfb   :  { %v5639_v40 = vpop.eup %5638 }
0x2bfc   :  { %4082 = vrot.lane.b32.xlu1 %v4077_v7, %s5875_s22  ;;  %v4148_v10 = vsub.f32 %v7619_v36, %v5639_v40 }
0x2bfd   :  { %v5641_v46 = vpop.eup %5640 }
0x2bfe   :  { %4176 = vperm.xlu0 %5107, %v4170_v62   ;;  %v4149_v58 = vsub.f32 %v7622_v6, %v5641_v46  ;;  %v5643_v7 = vpop.eup %5642  ;;  %v4172_v62 = vld [vmem:[#allocation4 + $0x20] sm:$0xff] }
0x2c00   :  { %4181 = vperm.xlu1 %5108, %v4171_v28   ;;  %v5645_v28 = vpop.eup %5644 }
0x2c01   :  { %v4117_v60 = vadd.f32 1.0, %v5645_v28 }
0x2c02   :  { %4152 = vrot.lane.b32.xlu0 %v4148_v10, %s5875_s22  ;;  %v4173_v10 = vld [vmem:[#allocation4 + $0x28] sm:$0xff] }
0x2c04   :  { %4154 = vrot.lane.b32.xlu1 %v4149_v58, %s5875_s22  ;;  %v4115_v58 = vadd.f32 1.0, %v5643_v7 }
0x2c06   :  { %5646 = vrcp.f32 %v4115_v58 }
0x2c07   :  { %5648 = vrcp.f32 %v4117_v60 }
0x2c6c   :  { %v4081_v9 = vpop.permute.xlu0 %4080 }
0x2c6d   :  { %v4086_v31 = vmul.f32 %v5627_v59, %v4081_v9  ;;  %v5647_v59 = vpop.eup %5646 }
0x2c6e   :  { %v4083_v37 = vpop.permute.xlu1 %4082  ;;  %v5649_v1 = vpop.eup %5648 }
0x2c6f   :  { %v4087_v61 = vmul.f32 %v5629_v27, %v4083_v37  ;;  %4090 = vrot.lane.b32.xlu0 %v4086_v31, %s5876_s23 }
0x2c71   :  { %4092 = vrot.lane.b32.xlu1 %v4087_v61, %s5876_s23 }
0x2c73   :  { %4199 = vperm.xlu0 %5107, %v4172_v62  }
0x2c75   :  { %4204 = vperm.xlu1 %5108, %v4173_v10  }
0x2c7d   :  { %v7667_v21 = vpop.permute.xlu0 %4176 }
0x2c7e   :  { %8346 = vst [vmem:[#allocation83_spill] sm:$0xff] %v7667_v21 }
0x2c7f   :  { %v7669_v34 = vpop.permute.xlu1 %4181 }
0x2c80   :  { %8347 = vst [vmem:[#allocation84_spill] sm:$0xff] %v7669_v34 }
0x2c81   :  { %v4153_v27 = vpop.permute.xlu0 %4152 }
0x2c82   :  { %v4158_v55 = vmul.f32 %v5647_v59, %v4153_v27 }
0x2c83   :  { %v4155_v32 = vpop.permute.xlu1 %4154 }
0x2c84   :  { %v4159_v8 = vmul.f32 %v5649_v1, %v4155_v32  ;;  %4162 = vrot.lane.b32.xlu0 %v4158_v55, %s5876_s23 }
0x2c86   :  { %4164 = vrot.lane.b32.xlu1 %v4159_v8, %s5876_s23 }
0x2ce1   :  { %v4091_v48 = vpop.permute.xlu0 %4090 }
0x2ce2   :  { %v7673_v9 = vadd.f32 %v5635_v4, %v4091_v48 }
0x2ce3   :  { %v4093_v31 = vpop.permute.xlu1 %4092 }
0x2ce4   :  { %8348 = vst [vmem:[#allocation85_spill] sm:$0xff] %v7673_v9  ;;  %v4220_v37 = vsub.f32 %v7673_v9, %v7596_v51  ;;  %v7677_v61 = vadd.f32 %v5637_v25, %v4093_v31 }
0x2ce6   :  { %8349 = vst [vmem:[#allocation86_spill] sm:$0xff] %v7677_v61  ;;  %v4222_v7 = vmul.f32 %v4220_v37, %v7667_v21  ;;  %v4221_v62 = vsub.f32 %v7677_v61, %v7599_v47 }
0x2ce8   :  { %v4223_v28 = vmul.f32 %v4221_v62, %v7669_v34  ;;  %v7684_v10 = vadd.f32 %v4222_v7, %v7596_v51 }
0x2cea   :  { %v7687_v58 = vadd.f32 %v4223_v28, %v7599_v47 }
0x2cec   :  { %v5174_v4 = vpack.i.bf16 %v7687_v58, %v7684_v10 }
0x2cee   :  { %5175 = vrot.lane.b32.xlu0 %v5174_v4, %s5873_s3 }
0x2cf2   :  { %v7692_v25 = vpop.permute.xlu0 %4199 }
0x2cf3   :  { %8350 = vst [vmem:[#allocation87_spill] sm:$0xff] %v7692_v25 }
0x2cf4   :  { %v7694_v60 = vpop.permute.xlu1 %4204 }
0x2cf5   :  { %8351 = vst [vmem:[#allocation88_spill] sm:$0xff] %v7694_v60 }
0x2cf6   :  { %v4163_v59 = vpop.permute.xlu0 %4162 }
0x2cf7   :  { %v7696_v55 = vadd.f32 %v5639_v40, %v4163_v59 }
0x2cf8   :  { %v4165_v27 = vpop.permute.xlu1 %4164 }
0x2cf9   :  { %8352 = vst [vmem:[#allocation89_spill] sm:$0xff] %v7696_v55  ;;  %v7698_v1 = vadd.f32 %v5641_v46, %v4165_v27  ;;  %v4226_v51 = vsub.f32 %v7696_v55, %v7619_v36 }
0x2cfb   :  { %8353 = vst [vmem:[#allocation90_spill] sm:$0xff] %v7698_v1  ;;  %v4227_v47 = vsub.f32 %v7698_v1, %v7622_v6  ;;  %v4228_v32 = vmul.f32 %v4226_v51, %v7692_v25 }
0x2cfd   :  { %v4229_v8 = vmul.f32 %v4227_v47, %v7694_v60  ;;  %v7707_v31 = vadd.f32 %v4228_v32, %v7619_v36 }
0x2cff   :  { %v7710_v37 = vadd.f32 %v4229_v8, %v7622_v6  ;;  %v4289_v8 = vld [vmem:[#allocation2 + $0x1c0] sm:$0xff] }
0x2d60   :  { %v5176_v48 = vpop.permute.xlu0 %5175 }
0x2d61   :  { %v5178_v40 = vunpack.i.h.bf16 %v5176_v48  ;;  %v5177_v46 = vunpack.i.l.bf16 %v5176_v48 }
0x2d63   :  { %v4241_v7 = vsel %vm284_vm0, %v5178_v40, %v7710_v37  ;;  %v4240_v62 = vsel %vm284_vm0, %v5177_v46, %v7707_v31  ;;  %v4290_v40 = vld [vmem:[#allocation2 + $0x1d0] sm:$0xff] }
0x2d64   :  { %v4242_v28 = vpack.c.bf16 %v4241_v7, %v4240_v62  ;;  %v4291_v7 = vld [vmem:[#allocation2 + $0x20] sm:$0xff] }
0x2d66   :  { %5080 = vmatmul.mubr.msk.bf16.vlgmr.msra.gmra.mrb[76].mxu0 %vm527_vm1, %v4242_v28 }
0x2e39   :  { %v4280_v4 = vpop.f32.mrb[76].mxu0 }
0x2e3a   :  { %v4281_v59 = vadd.f32 %v4280_v4, %v6071_v23  ;;  %v4282_v27 = vpop.f32.mrb[77].mxu0  ;;  %v4293_v4 = vld [vmem:[#allocation2 + $0x30] sm:$0xff] }
0x2e3b   :  { %v4284_v36 = vpop.f32.mrb[78].mxu0  ;;  %v7721_v47 = vadd.f32 %v4282_v27, %v6073_v24 }
0x2e3c   :  { %v4285_v51 = vadd.f32 %v4284_v36, %v6071_v23  ;;  %v4286_v6 = vpop.f32.mrb[79].mxu0  ;;  %4311 = vrot.lane.b32.xlu1 %v4281_v59, %s5873_s3  ;;  %v4295_v48 = vadd.f32 %v4289_v8, %v4281_v59  ;;  %v4353_v28 = vadd.f32 %v4291_v7, %v4281_v59 }
0x2e3d   :  { %v7725_v32 = vadd.f32 %v4286_v6, %v6073_v24 }
0x2e3e   :  { %4313 = vrot.lane.b32.xlu0 %v4285_v51, %s5873_s3  ;;  %v4296_v46 = vadd.f32 %v4290_v40, %v4285_v51  ;;  %v5081_v62 = vmul.f32 -1.442695, %v4295_v48  ;;  %v4355_v36 = vadd.f32 %v4293_v4, %v4285_v51  ;;  %v5083_v25 = vmul.f32 -1.442695, %v4353_v28 }
0x2e40   :  { %4383 = vrot.lane.b32.xlu1 %v7721_v47, %s5873_s3  ;;  %v5082_v27 = vmul.f32 -1.442695, %v4296_v46  ;;  %5650 = vpow2.f32 %v5081_v62  ;;  %v5085_v6 = vmul.f32 -1.442695, %v4355_v36  ;;  %v4292_v36 = vld [vmem:[#allocation2 + $0x28] sm:$0xff] }
0x2e42   :  { %4385 = vrot.lane.b32.xlu0 %v7725_v32, %s5873_s3  ;;  %5652 = vpow2.f32 %v5082_v27 }
0x2e43   :  { %5654 = vpow2.f32 %v5083_v25 }
0x2e44   :  { %5656 = vpow2.f32 %v5085_v6 }
0x2e4a   :  { %v5651_v55 = vpop.eup %5650 }
0x2e4b   :  { %v4303_v1 = vadd.f32 1.0, %v5651_v55 }
0x2e4c   :  { %v5653_v60 = vpop.eup %5652 }
0x2e4d   :  { %v5655_v21 = vpop.eup %5654  ;;  %v4304_v9 = vadd.f32 1.0, %v5653_v60  ;;  %5658 = vrcp.f32 %v4303_v1 }
0x2e4e   :  { %v5657_v34 = vpop.eup %5656  ;;  %v4369_v61 = vadd.f32 1.0, %v5655_v21 }
0x2e4f   :  { %5660 = vrcp.f32 %v4304_v9  ;;  %v4371_v48 = vadd.f32 1.0, %v5657_v34 }
0x2e50   :  { %5662 = vrcp.f32 %v4369_v61 }
0x2e51   :  { %5664 = vrcp.f32 %v4371_v48 }
0x2e57   :  { %v5659_v59 = vpop.eup %5658 }
0x2e59   :  { %v5661_v7 = vpop.eup %5660 }
0x2e5a   :  { %v5663_v25 = vpop.eup %5662 }
0x2e5b   :  { %v5665_v60 = vpop.eup %5664 }
0x2eae   :  { %v4312_v51 = vpop.permute.xlu1 %4311 }
0x2eaf   :  { %v4317_v46 = vmul.f32 %v5659_v59, %v4312_v51  ;;  %v4294_v51 = vld [vmem:[#allocation2 + $0x38] sm:$0xff] }
0x2eb0   :  { %v4314_v62 = vpop.permute.xlu0 %4313 }
0x2eb1   :  { %v4318_v28 = vmul.f32 %v5661_v7, %v4314_v62  ;;  %4321 = vrot.lane.b32.xlu1 %v4317_v46, %s5873_s3 }
0x2eb2   :  { %v4384_v4 = vpop.permute.xlu1 %4383 }
0x2eb3   :  { %v4389_v55 = vmul.f32 %v5663_v25, %v4384_v4  ;;  %4323 = vrot.lane.b32.xlu0 %v4318_v28, %s5873_s3 }
0x2eb4   :  { %v4386_v1 = vpop.permute.xlu0 %4385 }
0x2eb5   :  { %v4390_v21 = vmul.f32 %v5665_v60, %v4386_v1  ;;  %4393 = vrot.lane.b32.xlu1 %v4389_v55, %s5873_s3  ;;  %v4425_v55 = vld [vmem:[#allocation4 + $0xe0] sm:$0xff]  ;;  %v4426_v60 = vld [vmem:[#allocation4 + $0xe8] sm:$0xff] }
0x2eb7   :  { %4395 = vrot.lane.b32.xlu0 %v4390_v21, %s5873_s3 }
0x2f23   :  { %v4322_v34 = vpop.permute.xlu1 %4321 }
0x2f24   :  { %v4327_v9 = vadd.f32 %v4322_v34, %v4289_v8 }
0x2f25   :  { %v4324_v61 = vpop.permute.xlu0 %4323 }
0x2f26   :  { %5666 = vtanh.f32 %v4327_v9  ;;  %v4328_v27 = vadd.f32 %v4324_v61, %v4290_v40  ;;  %v4354_v9 = vadd.f32 %v4292_v36, %v7721_v47  ;;  %v4356_v61 = vadd.f32 %v4294_v51, %v7725_v32 }
0x2f27   :  { %v4394_v6 = vpop.permute.xlu1 %4393 }
0x2f28   :  { %5668 = vtanh.f32 %v4328_v27  ;;  %v4399_v48 = vadd.f32 %v4394_v6, %v4292_v36  ;;  %v5084_v27 = vmul.f32 -1.442695, %v4354_v9  ;;  %v5086_v6 = vmul.f32 -1.442695, %v4356_v61 }
0x2f29   :  { %v4396_v46 = vpop.permute.xlu0 %4395 }
0x2f2a   :  { %v4400_v62 = vadd.f32 %v4396_v46, %v4294_v51  ;;  %5670 = vtanh.f32 %v4399_v48 }
0x2f2c   :  { %5672 = vtanh.f32 %v4400_v62 }
0x2f2d   :  { %5674 = vpow2.f32 %v5084_v27 }
0x2f2e   :  { %5676 = vpow2.f32 %v5086_v6 }
0x2f30   :  { %v5667_v28 = vpop.eup %5666 }
0x2f31   :  { %v4331_v25 = vsub.f32 %v7684_v10, %v5667_v28 }
0x2f32   :  { %v5669_v4 = vpop.eup %5668 }
0x2f33   :  { %4335 = vrot.lane.b32.xlu1 %v4331_v25, %s5875_s22  ;;  %v4332_v8 = vsub.f32 %v7687_v58, %v5669_v4 }
0x2f34   :  { %v5671_v40 = vpop.eup %5670 }
0x2f35   :  { %4337 = vrot.lane.b32.xlu0 %v4332_v8, %s5875_s22  ;;  %v4403_v21 = vsub.f32 %v7707_v31, %v5671_v40 }
0x2f36   :  { %v5673_v1 = vpop.eup %5672 }
0x2f37   :  { %4431 = vperm.xlu1 %5108, %v4425_v55   ;;  %v4404_v34 = vsub.f32 %v7710_v37, %v5673_v1  ;;  %v5675_v8 = vpop.eup %5674  ;;  %v4427_v55 = vld [vmem:[#allocation4 + $0x10] sm:$0xff] }
0x2f39   :  { %4436 = vperm.xlu0 %5107, %v4426_v60   ;;  %v5677_v60 = vpop.eup %5676 }
0x2f3a   :  { %v4372_v47 = vadd.f32 1.0, %v5677_v60 }
0x2f3b   :  { %4407 = vrot.lane.b32.xlu1 %v4403_v21, %s5875_s22  ;;  %v4428_v21 = vld [vmem:[#allocation4 + $0x18] sm:$0xff] }
0x2f3d   :  { %4409 = vrot.lane.b32.xlu0 %v4404_v34, %s5875_s22  ;;  %v4370_v34 = vadd.f32 1.0, %v5675_v8 }
0x2f3f   :  { %5678 = vrcp.f32 %v4370_v34 }
0x2f40   :  { %5680 = vrcp.f32 %v4372_v47 }
0x2fa5   :  { %v4336_v48 = vpop.permute.xlu1 %4335 }
0x2fa6   :  { %v4341_v46 = vmul.f32 %v5659_v59, %v4336_v48  ;;  %v5679_v59 = vpop.eup %5678 }
0x2fa7   :  { %v4338_v62 = vpop.permute.xlu0 %4337  ;;  %v5681_v9 = vpop.eup %5680 }
0x2fa8   :  { %v4342_v25 = vmul.f32 %v5661_v7, %v4338_v62  ;;  %4345 = vrot.lane.b32.xlu1 %v4341_v46, %s5876_s23 }
0x2faa   :  { %4347 = vrot.lane.b32.xlu0 %v4342_v25, %s5876_s23 }
0x2fac   :  { %4454 = vperm.xlu1 %5108, %v4427_v55  }
0x2fae   :  { %4459 = vperm.xlu0 %5107, %v4428_v21  }
0x2fb6   :  { %v7747_v32 = vpop.permute.xlu1 %4431 }
0x2fb7   :  { %8354 = vst [vmem:[#allocation91_spill] sm:$0xff] %v7747_v32 }
0x2fb8   :  { %v7749_v36 = vpop.permute.xlu0 %4436 }
0x2fba   :  { %v4408_v7 = vpop.permute.xlu1 %4407 }
0x2fbb   :  { %v4413_v51 = vmul.f32 %v5679_v59, %v4408_v7 }
0x2fbc   :  { %v4410_v61 = vpop.permute.xlu0 %4409 }
0x2fbd   :  { %v4414_v27 = vmul.f32 %v5681_v9, %v4410_v61  ;;  %4417 = vrot.lane.b32.xlu1 %v4413_v51, %s5876_s23 }
0x2fbf   :  { %4419 = vrot.lane.b32.xlu0 %v4414_v27, %s5876_s23 }
0x301a   :  { %v4346_v6 = vpop.permute.xlu1 %4345 }
0x301b   :  { %v7753_v48 = vadd.f32 %v5667_v28, %v4346_v6 }
0x301c   :  { %v4348_v46 = vpop.permute.xlu0 %4347 }
0x301d   :  { %v4475_v62 = vsub.f32 %v7753_v48, %v7684_v10  ;;  %v7757_v25 = vadd.f32 %v5669_v4, %v4348_v46 }
0x301f   :  { %v4477_v8 = vmul.f32 %v4475_v62, %v7747_v32  ;;  %v4476_v55 = vsub.f32 %v7757_v25, %v7687_v58 }
0x3021   :  { %v4478_v60 = vmul.f32 %v4476_v55, %v7749_v36  ;;  %v7764_v21 = vadd.f32 %v4477_v8, %v7684_v10 }
0x3023   :  { %v7767_v34 = vadd.f32 %v4478_v60, %v7687_v58 }
0x3025   :  { %v5179_v28 = vpack.i.bf16 %v7767_v34, %v7764_v21 }
0x3027   :  { %5180 = vrot.lane.b32.xlu1 %v5179_v28, %s5873_s3 }
0x302b   :  { %v4455_v4 = vpop.permute.xlu1 %4454 }
0x302d   :  { %v4460_v47 = vpop.permute.xlu0 %4459 }
0x302f   :  { %v4418_v59 = vpop.permute.xlu1 %4417 }
0x3030   :  { %v4423_v7 = vadd.f32 %v5671_v40, %v4418_v59 }
0x3031   :  { %v4420_v51 = vpop.permute.xlu0 %4419 }
0x3032   :  { %v7772_v9 = vmul.f32 %v4455_v4, %v4423_v7  ;;  %v4424_v61 = vadd.f32 %v5673_v1, %v4420_v51  ;;  %v4481_v10 = vsub.f32 %v4423_v7, %v7707_v31 }
0x3034   :  { %8355 = vst [vmem:[#allocation92_spill] sm:$0xff] %v7772_v9  ;;  %v7774_v27 = vmul.f32 %v4460_v47, %v4424_v61  ;;  %v4482_v58 = vsub.f32 %v4424_v61, %v7710_v37  ;;  %v4483_v6 = vmul.f32 %v4481_v10, %v4455_v4 }
0x3036   :  { %8356 = vst [vmem:[#allocation93_spill] sm:$0xff] %v7774_v27  ;;  %v4484_v46 = vmul.f32 %v4482_v58, %v4460_v47  ;;  %v7779_v8 = vadd.f32 %v4483_v6, %v7707_v31  ;;  %v4546_v58 = vld [vmem:[#allocation2] sm:$0xff] }
0x3038   :  { %v7782_v55 = vadd.f32 %v4484_v46, %v7710_v37  ;;  %v4548_v46 = vld [vmem:[#allocation2 + $0x10] sm:$0xff] }
0x3099   :  { %v5181_v62 = vpop.permute.xlu1 %5180 }
0x309a   :  { %v5183_v40 = vunpack.i.h.bf16 %v5181_v62  ;;  %v5182_v60 = vunpack.i.l.bf16 %v5181_v62 }
0x309c   :  { %v4496_v1 = vsel %vm284_vm0, %v5183_v40, %v7782_v55  ;;  %v4495_v28 = vsel %vm284_vm0, %v5182_v60, %v7779_v8 }
0x309d   :  { %v4497_v59 = vpack.c.bf16 %v4496_v1, %v4495_v28  ;;  %v4545_v1 = vld [vmem:[#allocation2 + $0x1f0] sm:$0xff] }
0x309f   :  { %5087 = vmatmul.mubr.msk.bf16.vlgmr.msra.gmra.mrb[44].mxu1 %vm527_vm1, %v4497_v59 }
0x3172   :  { %v4535_v4 = vpop.f32.mrb[44].mxu1 }
0x3173   :  { %v4537_v47 = vpop.f32.mrb[45].mxu1  ;;  %v4536_v61 = vadd.f32 %v4535_v4, %v6071_v23 }
0x3174   :  { %v7790_v7 = vadd.f32 %v4537_v47, %v6073_v24  ;;  %v4539_v31 = vpop.f32.mrb[46].mxu1 }
0x3175   :  { %v4541_v51 = vpop.f32.mrb[47].mxu1  ;;  %v4540_v10 = vadd.f32 %v4539_v31, %v6071_v23  ;;  %v4608_v6 = vadd.f32 %v4546_v58, %v4536_v61 }
0x3176   :  { %v7793_v37 = vadd.f32 %v4541_v51, %v6073_v24  ;;  %4638 = vrot.lane.b32.xlu0 %v7790_v7, %s5873_s3  ;;  %v4544_v24 = vld [vmem:[#allocation2 + $0x1e0] sm:$0xff] }
0x3177   :  { %v4610_v62 = vadd.f32 %v4548_v46, %v4540_v10  ;;  %v4550_v40 = vadd.f32 %v4544_v24, %v4536_v61  ;;  %v5090_v60 = vmul.f32 -1.442695, %v4608_v6  ;;  %v4551_v28 = vadd.f32 %v4545_v1, %v4540_v10 }
0x3178   :  { %4640 = vrot.lane.b32.xlu1 %v7793_v37, %s5873_s3 }
0x3179   :  { %v5092_v59 = vmul.f32 -1.442695, %v4610_v62  ;;  %v5088_v4 = vmul.f32 -1.442695, %v4550_v40  ;;  %5682 = vpow2.f32 %v5090_v60  ;;  %v5089_v47 = vmul.f32 -1.442695, %v4551_v28 }
0x317a   :  { %4566 = vrot.lane.b32.xlu0 %v4536_v61, %s5873_s3 }
0x317b   :  { %5684 = vpow2.f32 %v5092_v59 }
0x317c   :  { %4568 = vrot.lane.b32.xlu1 %v4540_v10, %s5873_s3  ;;  %5686 = vpow2.f32 %v5088_v4 }
0x317d   :  { %5688 = vpow2.f32 %v5089_v47  ;;  %v4547_v47 = vld [vmem:[#allocation2 + $0x8] sm:$0xff] }
0x3183   :  { %v5683_v23 = vpop.eup %5682 }
0x3184   :  { %v4624_v51 = vadd.f32 1.0, %v5683_v23 }
0x3185   :  { %v5685_v31 = vpop.eup %5684 }
0x3186   :  { %v5687_v9 = vpop.eup %5686  ;;  %v4626_v27 = vadd.f32 1.0, %v5685_v31  ;;  %5690 = vrcp.f32 %v4624_v51  ;;  %v4549_v51 = vld [vmem:[#allocation2 + $0x18] sm:$0xff] }
0x3187   :  { %v5689_v58 = vpop.eup %5688  ;;  %v4558_v32 = vadd.f32 1.0, %v5687_v9 }
0x3188   :  { %v4559_v46 = vadd.f32 1.0, %v5689_v58  ;;  %5692 = vrcp.f32 %v4626_v27 }
0x3189   :  { %5694 = vrcp.f32 %v4558_v32 }
0x318a   :  { %5696 = vrcp.f32 %v4559_v46 }
0x3190   :  { %v5691_v61 = vpop.eup %5690 }
0x3192   :  { %v5693_v62 = vpop.eup %5692 }
0x3193   :  { %v7804_v28 = vpop.eup %5694 }
0x3194   :  { %v7808_v9 = vpop.eup %5696 }
0x31e8   :  { %v4639_v10 = vpop.permute.xlu0 %4638 }
0x31e9   :  { %v4644_v6 = vmul.f32 %v5691_v61, %v4639_v10 }
0x31ea   :  { %v4641_v40 = vpop.permute.xlu1 %4640 }
0x31eb   :  { %v4645_v60 = vmul.f32 %v5693_v62, %v4641_v40  ;;  %4648 = vrot.lane.b32.xlu0 %v4644_v6, %s5873_s3 }
0x31ec   :  { %v4567_v59 = vpop.permute.xlu0 %4566 }
0x31ed   :  { %v4572_v4 = vmul.f32 %v7804_v28, %v4567_v59  ;;  %4650 = vrot.lane.b32.xlu1 %v4645_v60, %s5873_s3 }
0x31ee   :  { %v4569_v27 = vpop.permute.xlu1 %4568 }
0x31ef   :  { %v4573_v32 = vmul.f32 %v7808_v9, %v4569_v27  ;;  %4576 = vrot.lane.b32.xlu0 %v4572_v4, %s5873_s3 }
0x31f1   :  { %4578 = vrot.lane.b32.xlu1 %v4573_v32, %s5873_s3 }
0x325d   :  { %v4649_v23 = vpop.permute.xlu0 %4648 }
0x325e   :  { %v4654_v31 = vadd.f32 %v4649_v23, %v4547_v47  ;;  %v4682_v23 = vld [vmem:[#allocation4] sm:$0xff] }
0x325f   :  { %v4651_v58 = vpop.permute.xlu1 %4650 }
0x3260   :  { %5698 = vtanh.f32 %v4654_v31  ;;  %v4655_v46 = vadd.f32 %v4651_v58, %v4549_v51  ;;  %v4683_v31 = vld [vmem:[#allocation4 + $0x8] sm:$0xff]  ;;  %v1100_v58 = vmul.f32 %v6343_v16, %v6349_v5  ;;  %v4611_v16 = vadd.f32 %v4549_v51, %v7793_v37 }
0x3261   :  { %v4577_v61 = vpop.permute.xlu0 %4576 }
0x3262   :  { %5700 = vtanh.f32 %v4655_v46  ;;  %v4582_v10 = vadd.f32 %v4577_v61, %v4544_v24  ;;  %v1101_v46 = vmul.f32 %v6345_v63, %v6353_v22  ;;  %v4680_v61 = vld [vmem:[#allocation4 + $0xf0] sm:$0xff]  ;;  %v5093_v5 = vmul.f32 -1.442695, %v4611_v16  ;;  %v8366_v16 = vld [vmem:[#allocation25_spill] sm:$0xff] }
0x3263   :  { %v4579_v6 = vpop.permute.xlu1 %4578 }
0x3264   :  { %5702 = vtanh.f32 %v4582_v10  ;;  %v4583_v62 = vadd.f32 %v4579_v6, %v4545_v1 }
0x3266   :  { %5704 = vtanh.f32 %v4583_v62 }
0x326a   :  { %v7813_v40 = vpop.eup %5698 }
0x326b   :  { %v4658_v60 = vsub.f32 %v7779_v8, %v7813_v40 }
0x326c   :  { %v7817_v59 = vpop.eup %5700 }
0x326d   :  { %4662 = vrot.lane.b32.xlu0 %v4658_v60, %s5875_s22  ;;  %v4659_v4 = vsub.f32 %v7782_v55, %v7817_v59 }
0x326e   :  { %v7822_v27 = vpop.eup %5702 }
0x326f   :  { %4664 = vrot.lane.b32.xlu1 %v4659_v4, %s5875_s22  ;;  %v4586_v24 = vsub.f32 %v7764_v21, %v7822_v27 }
0x3270   :  { %v7827_v1 = vpop.eup %5704 }
0x3271   :  { %4590 = vrot.lane.b32.xlu0 %v4586_v24, %s5875_s22  ;;  %v4587_v32 = vsub.f32 %v7767_v34, %v7827_v1  ;;  %v1359_v24 = vmul.f32 %v6472_v3, %v6478_v41 }
0x3273   :  { %4592 = vrot.lane.b32.xlu1 %v4587_v32, %s5875_s22  ;;  %v8357_v32 = vld [vmem:[#allocation19_spill] sm:$0xff] }
0x3275   :  { %4709 = vperm.xlu0 %5107, %v4682_v23  }
0x3277   :  { %4714 = vperm.xlu1 %5108, %v4683_v31   ;;  %v8360_v31 = vld [vmem:[#allocation20_spill] sm:$0xff] }
0x3279   :  { %854 = vrot.lane.b32.xlu0 %v6262_v18, %s5873_s3  ;;  %v4681_v18 = vld [vmem:[#allocation4 + $0xf8] sm:$0xff] }
0x327b   :  { %856 = vrot.lane.b32.xlu1 %v6264_v12, %s5873_s3  ;;  %v1123_v12 = vmul.f32 %v6368_v19, %v6372_v29 }
0x327d   :  { %876 = vrot.lane.b32.xlu0 %v6269_v35, %s5875_s22  ;;  %v1124_v35 = vmul.f32 %v6370_v38, %v6374_v43 }
0x327f   :  { %878 = vrot.lane.b32.xlu1 %v6271_v17, %s5875_s22  ;;  %v4609_v17 = vadd.f32 %v4547_v47, %v7790_v7 }
0x3281   :  { %1104 = vrot.lane.b32.xlu0 %v1100_v58, %s5873_s3  ;;  %v5091_v63 = vmul.f32 -1.442695, %v4609_v17  ;;  %v8365_v17 = vld [vmem:[#allocation27_spill] sm:$0xff] }
0x3283   :  { %1106 = vrot.lane.b32.xlu1 %v1101_v46, %s5873_s3  ;;  %5706 = vpow2.f32 %v5091_v63  ;;  %v8361_v46 = vld [vmem:[#allocation23_spill] sm:$0xff]  ;;  %v1619_v63 = vmul.f32 %v8366_v16, %v8365_v17 }
0x3284   :  { %5708 = vpow2.f32 %v5093_v5  ;;  %v8381_v16 = vld [vmem:[#allocation43_spill] sm:$0xff] }
0x3285   :  { %4686 = vperm.xlu0 %5107, %v4680_v61   ;;  %v8362_v61 = vld [vmem:[#allocation21_spill] sm:$0xff] }
0x3287   :  { %4691 = vperm.xlu1 %5108, %v4681_v18   ;;  %v1383_v18 = vmul.f32 %v8362_v61, %v8361_v46  ;;  %v8378_v46 = vld [vmem:[#allocation37_spill] sm:$0xff] }
0x3289   :  { %1127 = vrot.lane.b32.xlu0 %v1123_v12, %s5875_s22  ;;  %v8363_v12 = vld [vmem:[#allocation26_spill] sm:$0xff] }
0x328b   :  { %1129 = vrot.lane.b32.xlu1 %v1124_v35, %s5875_s22  ;;  %v8364_v35 = vld [vmem:[#allocation24_spill] sm:$0xff] }
0x328c   :  { %v1618_v3 = vmul.f32 %v8364_v35, %v8363_v12  ;;  %v8379_v12 = vld [vmem:[#allocation42_spill] sm:$0xff]  ;;  %v8380_v35 = vld [vmem:[#allocation40_spill] sm:$0xff] }
0x328d   :  { %v5707_v22 = vpop.eup %5706 }
0x328e   :  { %v5709_v10 = vpop.eup %5708  ;;  %v4625_v6 = vadd.f32 1.0, %v5707_v22  ;;  %v8367_v22 = vld [vmem:[#allocation30_spill] sm:$0xff] }
0x328f   :  { %v4627_v19 = vadd.f32 1.0, %v5709_v10  ;;  %v8368_v10 = vld [vmem:[#allocation28_spill] sm:$0xff] }
0x3290   :  { %5710 = vrcp.f32 %v4625_v6  ;;  %v1641_v6 = vmul.f32 %v8368_v10, %v8367_v22 }
0x3291   :  { %5712 = vrcp.f32 %v4627_v19 }
0x329a   :  { %v5711_v37 = vpop.eup %5710 }
0x329b   :  { %v5713_v51 = vpop.eup %5712 }
0x32df   :  { %v4663_v29 = vpop.permute.xlu0 %4662 }
0x32e0   :  { %v4668_v47 = vmul.f32 %v5711_v37, %v4663_v29  ;;  %v8369_v29 = vld [vmem:[#allocation31_spill] sm:$0xff] }
0x32e1   :  { %v4665_v38 = vpop.permute.xlu1 %4664 }
0x32e2   :  { %v4669_v4 = vmul.f32 %v5713_v51, %v4665_v38  ;;  %v8370_v38 = vld [vmem:[#allocation29_spill] sm:$0xff]  ;;  %v8373_v51 = vld [vmem:[#allocation35_spill] sm:$0xff] }
0x32e3   :  { %v4591_v43 = vpop.permute.xlu0 %4590 }
0x32e4   :  { %v4596_v62 = vmul.f32 %v7804_v28, %v4591_v43  ;;  %v8358_v28 = vld [vmem:[#allocation18_spill] sm:$0xff]  ;;  %v1642_v43 = vmul.f32 %v8370_v38, %v8369_v29 }
0x32e5   :  { %v4593_v60 = vpop.permute.xlu1 %4592  ;;  %v1360_v23 = vmul.f32 %v8358_v28, %v8357_v32  ;;  %v8375_v28 = vld [vmem:[#allocation38_spill] sm:$0xff] }
0x32e6   :  { %v4597_v7 = vmul.f32 %v7808_v9, %v4593_v60  ;;  %4600 = vrot.lane.b32.xlu0 %v4596_v62, %s5876_s23  ;;  %v8359_v9 = vld [vmem:[#allocation22_spill] sm:$0xff] }
0x32e7   :  { %v1382_v58 = vmul.f32 %v8360_v31, %v8359_v9  ;;  %v8371_v60 = vld [vmem:[#allocation34_spill] sm:$0xff] }
0x32e8   :  { %4602 = vrot.lane.b32.xlu1 %v4597_v7, %s5876_s23  ;;  %v8372_v7 = vld [vmem:[#allocation32_spill] sm:$0xff] }
0x32e9   :  { %v1877_v37 = vmul.f32 %v8372_v7, %v8371_v60 }
0x32ea   :  { %4672 = vrot.lane.b32.xlu0 %v4668_v47, %s5876_s23 }
0x32ec   :  { %4674 = vrot.lane.b32.xlu1 %v4669_v4, %s5876_s23  ;;  %v8374_v4 = vld [vmem:[#allocation33_spill] sm:$0xff] }
0x32ee   :  { %1363 = vrot.lane.b32.xlu0 %v1359_v24, %s5873_s3  ;;  %v1878_v24 = vmul.f32 %v8374_v4, %v8373_v51  ;;  %v8389_v4 = vld [vmem:[#allocation51_spill] sm:$0xff] }
0x32f0   :  { %1365 = vrot.lane.b32.xlu1 %v1360_v23, %s5873_s3  ;;  %v8376_v23 = vld [vmem:[#allocation36_spill] sm:$0xff] }
0x32f1   :  { %v1900_v9 = vmul.f32 %v8376_v23, %v8375_v28  ;;  %v8391_v28 = vld [vmem:[#allocation54_spill] sm:$0xff]  ;;  %v8392_v23 = vld [vmem:[#allocation52_spill] sm:$0xff] }
0x32f2   :  { %1386 = vrot.lane.b32.xlu0 %v1382_v58, %s5875_s22  ;;  %v8377_v58 = vld [vmem:[#allocation39_spill] sm:$0xff] }
0x32f3   :  { %v1901_v61 = vmul.f32 %v8378_v46, %v8377_v58  ;;  %v8394_v58 = vld [vmem:[#allocation53_spill] sm:$0xff] }
0x32f4   :  { %1388 = vrot.lane.b32.xlu1 %v1383_v18, %s5875_s22  ;;  %v7875_v41 = vpop.permute.xlu0 %4709 }
0x32f6   :  { %v7879_v5 = vpop.permute.xlu1 %4714  ;;  %1622 = vrot.lane.b32.xlu0 %v1618_v3, %s5873_s3  ;;  %v2136_v3 = vmul.f32 %v8380_v35, %v8379_v12  ;;  %v8397_v35 = vld [vmem:[#allocation59_spill] sm:$0xff] }
0x32f8   :  { %1624 = vrot.lane.b32.xlu1 %v1619_v63, %s5873_s3  ;;  %v855_v19 = vpop.permute.xlu0 %854  ;;  %v8382_v63 = vld [vmem:[#allocation41_spill] sm:$0xff] }
0x32f9   :  { %860 = vst.msk [vmem:[#allocation11] sm:$0xff] %vm284_vm0, %v855_v19  ;;  %v2137_v22 = vmul.f32 %v8382_v63, %v8381_v16  ;;  %v8384_v19 = vld [vmem:[#allocation44_spill] sm:$0xff]  ;;  %v8399_v63 = vld [vmem:[#allocation62_spill] sm:$0xff] }
0x32fa   :  { %v857_v62 = vpop.permute.xlu1 %856  ;;  %1645 = vrot.lane.b32.xlu0 %v1641_v6, %s5875_s22  ;;  %v8383_v6 = vld [vmem:[#allocation46_spill] sm:$0xff] }
0x32fb   :  { %861 = vst.msk [vmem:[#allocation11 + $0x8] sm:$0xff] %vm284_vm0, %v857_v62  ;;  %v2159_v29 = vmul.f32 %v8384_v19, %v8383_v6  ;;  %v8386_v62 = vld [vmem:[#allocation45_spill] sm:$0xff]  ;;  %v8401_v19 = vld [vmem:[#allocation63_spill] sm:$0xff] }
0x32fc   :  { %1647 = vrot.lane.b32.xlu1 %v1642_v43, %s5875_s22  ;;  %v877_v47 = vpop.permute.xlu0 %876  ;;  %v8385_v43 = vld [vmem:[#allocation47_spill] sm:$0xff] }
0x32fd   :  { %883 = vst.msk [vmem:[#allocation3 + $0xf0] sm:$0xff] %vm284_vm0, %v877_v47  ;;  %v2160_v60 = vmul.f32 %v8386_v62, %v8385_v43  ;;  %v8388_v47 = vld [vmem:[#allocation48_spill] sm:$0xff]  ;;  %v2909_v43 = vmul.f32 %v7200_v44, %v7206_v20  ;;  %v2910_v62 = vmul.f32 %v7202_v42, %v7210_v39  ;;  %v3164_v44 = vmul.f32 %v7297_v49, %v7303_v52 }
0x32fe   :  { %v879_v32 = vpop.permute.xlu1 %878  ;;  %1881 = vrot.lane.b32.xlu0 %v1877_v37, %s5873_s3  ;;  %v8387_v37 = vld [vmem:[#allocation50_spill] sm:$0xff]  ;;  %v3165_v42 = vmul.f32 %v7299_v45, %v7307_v0 }
0x32ff   :  { %884 = vst.msk [vmem:[#allocation3 + $0xf8] sm:$0xff] %vm284_vm0, %v879_v32  ;;  %v2395_v51 = vmul.f32 %v8388_v47, %v8387_v37 }
0x3300   :  { %1883 = vrot.lane.b32.xlu1 %v1878_v24, %s5873_s3  ;;  %v1105_v31 = vpop.permute.xlu0 %1104  ;;  %v8390_v24 = vld [vmem:[#allocation49_spill] sm:$0xff] }
0x3301   :  { %1111 = vst.msk [vmem:[#allocation11 + $0x10] sm:$0xff] %vm284_vm0, %v1105_v31  ;;  %v2396_v32 = vmul.f32 %v8390_v24, %v8389_v4  ;;  %v8393_v31 = vld [vmem:[#allocation55_spill] sm:$0xff] }
0x3302   :  { %v1107_v18 = vpop.permute.xlu1 %1106  ;;  %1904 = vrot.lane.b32.xlu0 %v1900_v9, %s5875_s22  ;;  %v2418_v9 = vmul.f32 %v8392_v23, %v8391_v28  ;;  %v2419_v46 = vmul.f32 %v8394_v58, %v8393_v31  ;;  %v8403_v24 = vld [vmem:[#allocation67_spill] sm:$0xff]  ;;  %v8405_v23 = vld [vmem:[#allocation66_spill] sm:$0xff]  ;;  %v8407_v58 = vld [vmem:[#allocation69_spill] sm:$0xff] }
0x3303   :  { %1112 = vst.msk [vmem:[#allocation11 + $0x18] sm:$0xff] %vm284_vm0, %v1107_v18  ;;  %v8396_v18 = vld [vmem:[#allocation56_spill] sm:$0xff] }
0x3304   :  { %1906 = vrot.lane.b32.xlu1 %v1901_v61, %s5875_s22  ;;  %v7909_v17 = vpop.permute.xlu0 %4686  ;;  %v8395_v61 = vld [vmem:[#allocation58_spill] sm:$0xff] }
0x3305   :  { %v2654_v12 = vmul.f32 %v8396_v18, %v8395_v61  ;;  %v8408_v18 = vld [vmem:[#allocation70_spill] sm:$0xff] }
0x3306   :  { %v7913_v10 = vpop.permute.xlu1 %4691  ;;  %2140 = vrot.lane.b32.xlu0 %v2136_v3, %s5873_s3  ;;  %v8398_v3 = vld [vmem:[#allocation57_spill] sm:$0xff] }
0x3307   :  { %v2655_v16 = vmul.f32 %v8398_v3, %v8397_v35 }
0x3308   :  { %2142 = vrot.lane.b32.xlu1 %v2137_v22, %s5873_s3  ;;  %v1128_v38 = vpop.permute.xlu0 %1127  ;;  %v8400_v22 = vld [vmem:[#allocation60_spill] sm:$0xff] }
0x3309   :  { %1134 = vst.msk [vmem:[#allocation3 + $0xe0] sm:$0xff] %vm284_vm0, %v1128_v38  ;;  %v2677_v6 = vmul.f32 %v8400_v22, %v8399_v63  ;;  %v8411_v63 = vld [vmem:[#allocation72_spill] sm:$0xff] }
0x330a   :  { %v1130_v7 = vpop.permute.xlu1 %1129  ;;  %2163 = vrot.lane.b32.xlu0 %v2159_v29, %s5875_s22  ;;  %v8402_v29 = vld [vmem:[#allocation61_spill] sm:$0xff] }
0x330b   :  { %1135 = vst.msk [vmem:[#allocation3 + $0xe8] sm:$0xff] %vm284_vm0, %v1130_v7  ;;  %v2678_v38 = vmul.f32 %v8402_v29, %v8401_v19  ;;  %v2933_v7 = vmul.f32 %v7227_v15, %v7231_v13  ;;  %v8413_v19 = vld [vmem:[#allocation71_spill] sm:$0xff] }
0x330c   :  { %2165 = vrot.lane.b32.xlu1 %v2160_v60, %s5875_s22  ;;  %v2932_v60 = vmul.f32 %v7225_v2, %v7229_v26 }
0x330e   :  { %2399 = vrot.lane.b32.xlu0 %v2395_v51, %s5873_s3 }
0x3310   :  { %2401 = vrot.lane.b32.xlu1 %v2396_v32, %s5873_s3  ;;  %v8404_v32 = vld [vmem:[#allocation65_spill] sm:$0xff] }
0x3311   :  { %v3188_v28 = vmul.f32 %v8404_v32, %v8403_v24  ;;  %v3929_v24 = vmul.f32 %v7579_v53, %v7585_v30  ;;  %v8422_v30 = vld [vmem:[#allocation86_spill] sm:$0xff] }
0x3312   :  { %2422 = vrot.lane.b32.xlu0 %v2418_v9, %s5875_s22  ;;  %v8406_v9 = vld [vmem:[#allocation64_spill] sm:$0xff] }
0x3313   :  { %v3187_v31 = vmul.f32 %v8406_v9, %v8405_v23  ;;  %v8425_v9 = vld [vmem:[#allocation83_spill] sm:$0xff] }
0x3314   :  { %2424 = vrot.lane.b32.xlu1 %v2419_v46, %s5875_s22  ;;  %v3420_v46 = vmul.f32 %v8407_v58, %v7412_v50 }
0x3316   :  { %2658 = vrot.lane.b32.xlu0 %v2654_v12, %s5873_s3  ;;  %v8409_v12 = vld [vmem:[#allocation68_spill] sm:$0xff] }
0x3317   :  { %v3419_v35 = vmul.f32 %v8409_v12, %v8408_v18  ;;  %v8429_v18 = vld [vmem:[#allocation87_spill] sm:$0xff] }
0x3318   :  { %2660 = vrot.lane.b32.xlu1 %v2655_v16, %s5873_s3  ;;  %v8410_v16 = vld [vmem:[#allocation74_spill] sm:$0xff] }
0x3319   :  { %v3443_v22 = vmul.f32 %v8411_v63, %v8410_v16  ;;  %v8430_v63 = vld [vmem:[#allocation91_spill] sm:$0xff] }
0x331a   :  { %2681 = vrot.lane.b32.xlu0 %v2677_v6, %s5875_s22  ;;  %v8412_v6 = vld [vmem:[#allocation73_spill] sm:$0xff] }
0x331b   :  { %v3442_v29 = vmul.f32 %v8413_v19, %v8412_v6 }
0x331c   :  { %2683 = vrot.lane.b32.xlu1 %v2678_v38, %s5875_s22 }
0x331e   :  { %2913 = vrot.lane.b32.xlu0 %v2909_v43, %s5873_s3  ;;  %v8414_v43 = vld [vmem:[#allocation78_spill] sm:$0xff] }
0x3320   :  { %2915 = vrot.lane.b32.xlu1 %v2910_v62, %s5873_s3  ;;  %v8415_v62 = vld [vmem:[#allocation76_spill] sm:$0xff] }
0x3322   :  { %2936 = vrot.lane.b32.xlu0 %v2932_v60, %s5875_s22  ;;  %v3675_v60 = vmul.f32 %v8415_v62, %v8414_v43 }
0x3324   :  { %2938 = vrot.lane.b32.xlu1 %v2933_v7, %s5875_s22 }
0x3326   :  { %3168 = vrot.lane.b32.xlu0 %v3164_v44, %s5873_s3  ;;  %v8416_v44 = vld [vmem:[#allocation77_spill] sm:$0xff] }
0x3328   :  { %3170 = vrot.lane.b32.xlu1 %v3165_v42, %s5873_s3  ;;  %v8417_v42 = vld [vmem:[#allocation75_spill] sm:$0xff] }
0x3358   :  { %v7967_v20 = vpop.permute.xlu0 %4600 }
0x335a   :  { %v7969_v39 = vpop.permute.xlu1 %4602 }
0x335b   :  { %v4607_v6 = vadd.f32 %v7827_v1, %v7969_v39  ;;  %v8432_v1 = vld [vmem:[#allocation92_spill] sm:$0xff] }
0x335c   :  { %v4673_v2 = vpop.permute.xlu0 %4672 }
0x335d   :  { %v7972_v15 = vadd.f32 %v7813_v40, %v4673_v2  ;;  %v3674_v2 = vmul.f32 %v8417_v42, %v8416_v44 }
0x335e   :  { %v4675_v26 = vpop.permute.xlu1 %4674 }
0x335f   :  { %v4735_v13 = vsub.f32 %v7972_v15, %v7779_v8  ;;  %v7977_v49 = vadd.f32 %v7817_v59, %v4675_v26 }
0x3360   :  { %v1364_v45 = vpop.permute.xlu0 %1363 }
0x3361   :  { %v4737_v52 = vmul.f32 %v4735_v13, %v7875_v41  ;;  %v4736_v0 = vsub.f32 %v7977_v49, %v7782_v55  ;;  %1370 = vst.msk [vmem:[#allocation11 + $0x20] sm:$0xff] %vm284_vm0, %v1364_v45  ;;  %v8418_v13 = vld [vmem:[#allocation82_spill] sm:$0xff]  ;;  %v8419_v45 = vld [vmem:[#allocation80_spill] sm:$0xff] }
0x3362   :  { %v1366_v37 = vpop.permute.xlu1 %1365 }
0x3363   :  { %v4739_v47 = vadd.f32 %v4737_v52, %v7779_v8  ;;  %v4738_v40 = vmul.f32 %v4736_v0, %v7879_v5  ;;  %1371 = vst.msk [vmem:[#allocation11 + $0x28] sm:$0xff] %vm284_vm0, %v1366_v37  ;;  %v3698_v52 = vmul.f32 %v8419_v45, %v8418_v13  ;;  %v8420_v37 = vld [vmem:[#allocation81_spill] sm:$0xff] }
0x3364   :  { %v1387_v51 = vpop.permute.xlu0 %1386 }
0x3365   :  { %v4740_v4 = vadd.f32 %v4738_v40, %v7782_v55  ;;  %1393 = vst.msk [vmem:[#allocation3 + $0xd0] sm:$0xff] %vm284_vm0, %v1387_v51  ;;  %4871 = vrot.lane.b32.xlu1 %v4739_v47, %s5876_s23  ;;  %v8421_v47 = vld [vmem:[#allocation79_spill] sm:$0xff] }
0x3366   :  { %v1389_v59 = vpop.permute.xlu1 %1388  ;;  %v3697_v40 = vmul.f32 %v8421_v47, %v8420_v37 }
0x3367   :  { %1394 = vst.msk [vmem:[#allocation3 + $0xd8] sm:$0xff] %vm284_vm0, %v1389_v59  ;;  %4873 = vrot.lane.b32.xlu0 %v4740_v4, %s5876_s23  ;;  %v3930_v4 = vmul.f32 %v7581_v54, %v7589_v33  ;;  %v3952_v33 = vmul.f32 %v7604_v11, %v7608_v56  ;;  %v8426_v56 = vld [vmem:[#allocation90_spill] sm:$0xff] }
0x3368   :  { %v1623_v8 = vpop.permute.xlu0 %1622 }
0x3369   :  { %1629 = vst.msk [vmem:[#allocation11 + $0x30] sm:$0xff] %vm284_vm0, %v1623_v8  ;;  %3193 = vrot.lane.b32.xlu1 %v3188_v28, %s5875_s22  ;;  %v3953_v28 = vmul.f32 %v7606_v14, %v7610_v57  ;;  %v8423_v8 = vld [vmem:[#allocation84_spill] sm:$0xff]  ;;  %v8424_v57 = vld [vmem:[#allocation85_spill] sm:$0xff] }
0x336a   :  { %v1625_v55 = vpop.permute.xlu1 %1624  ;;  %v4185_v23 = vmul.f32 %v8423_v8, %v8422_v30 }
0x336b   :  { %1630 = vst.msk [vmem:[#allocation11 + $0x38] sm:$0xff] %vm284_vm0, %v1625_v55  ;;  %3191 = vrot.lane.b32.xlu0 %v3187_v31, %s5875_s22  ;;  %v4184_v31 = vmul.f32 %v8425_v9, %v8424_v57  ;;  %v8427_v55 = vld [vmem:[#allocation88_spill] sm:$0xff] }
0x336c   :  { %v1646_v61 = vpop.permute.xlu0 %1645  ;;  %v4208_v58 = vmul.f32 %v8427_v55, %v8426_v56 }
0x336d   :  { %1652 = vst.msk [vmem:[#allocation3 + $0xc0] sm:$0xff] %vm284_vm0, %v1646_v61  ;;  %3425 = vrot.lane.b32.xlu1 %v3420_v46, %s5873_s3  ;;  %v8428_v61 = vld [vmem:[#allocation89_spill] sm:$0xff] }
0x336e   :  { %v1648_v3 = vpop.permute.xlu1 %1647  ;;  %v4207_v12 = vmul.f32 %v8429_v18, %v8428_v61 }
0x336f   :  { %1653 = vst.msk [vmem:[#allocation3 + $0xc8] sm:$0xff] %vm284_vm0, %v1648_v3  ;;  %3423 = vrot.lane.b32.xlu0 %v3419_v35, %s5873_s3  ;;  %v4440_v3 = vmul.f32 %v7749_v36, %v7757_v25  ;;  %v4606_v25 = vadd.f32 %v7822_v27, %v7967_v20  ;;  %v4718_v20 = vmul.f32 %v7879_v5, %v7977_v49 }
0x3370   :  { %v1882_v50 = vpop.permute.xlu0 %1881 }
0x3371   :  { %1888 = vst.msk [vmem:[#allocation11 + $0x40] sm:$0xff] %vm284_vm0, %v1882_v50  ;;  %3448 = vrot.lane.b32.xlu1 %v3443_v22, %s5875_s22  ;;  %v4439_v22 = vmul.f32 %v8430_v63, %v7753_v48  ;;  %v8431_v48 = vld [vmem:[#allocation93_spill] sm:$0xff] }
0x3372   :  { %v1884_v38 = vpop.permute.xlu1 %1883 }
0x3373   :  { %1889 = vst.msk [vmem:[#allocation11 + $0x48] sm:$0xff] %vm284_vm0, %v1884_v38  ;;  %3446 = vrot.lane.b32.xlu0 %v3442_v29, %s5875_s22  ;;  %v4695_v29 = vmul.f32 %v7913_v10, %v4607_v6  ;;  %v4694_v38 = vmul.f32 %v7909_v17, %v4606_v25 }
0x3374   :  { %v1905_v7 = vpop.permute.xlu0 %1904 }
0x3375   :  { %1911 = vst.msk [vmem:[#allocation3 + $0xb0] sm:$0xff] %vm284_vm0, %v1905_v7  ;;  %3680 = vrot.lane.b32.xlu1 %v3675_v60, %s5873_s3  ;;  %v4717_v7 = vmul.f32 %v7875_v41, %v7972_v15 }
0x3376   :  { %v1907_v26 = vpop.permute.xlu1 %1906 }
0x3377   :  { %1912 = vst.msk [vmem:[#allocation3 + $0xb8] sm:$0xff] %vm284_vm0, %v1907_v26  ;;  %3678 = vrot.lane.b32.xlu0 %v3674_v2, %s5873_s3 }
0x3378   :  { %v2141_v0 = vpop.permute.xlu0 %2140 }
0x3379   :  { %2147 = vst.msk [vmem:[#allocation11 + $0x50] sm:$0xff] %vm284_vm0, %v2141_v0  ;;  %3703 = vrot.lane.b32.xlu1 %v3698_v52, %s5875_s22 }
0x337a   :  { %v2143_v51 = vpop.permute.xlu1 %2142 }
0x337b   :  { %2148 = vst.msk [vmem:[#allocation11 + $0x58] sm:$0xff] %vm284_vm0, %v2143_v51  ;;  %3701 = vrot.lane.b32.xlu0 %v3697_v40, %s5875_s22 }
0x337c   :  { %v2164_v59 = vpop.permute.xlu0 %2163 }
0x337d   :  { %2170 = vst.msk [vmem:[#allocation3 + $0xa0] sm:$0xff] %vm284_vm0, %v2164_v59  ;;  %3935 = vrot.lane.b32.xlu1 %v3930_v4, %s5873_s3  ;;  %v4729_v59 = vsub.f32 %v4606_v25, %v7764_v21 }
0x337e   :  { %v2166_v32 = vpop.permute.xlu1 %2165 }
0x337f   :  { %2171 = vst.msk [vmem:[#allocation3 + $0xa8] sm:$0xff] %vm284_vm0, %v2166_v32  ;;  %3933 = vrot.lane.b32.xlu0 %v3929_v24, %s5873_s3  ;;  %v4730_v24 = vsub.f32 %v4607_v6, %v7767_v34  ;;  %v4731_v32 = vmul.f32 %v4729_v59, %v7909_v17 }
0x3380   :  { %v2400_v54 = vpop.permute.xlu0 %2399  ;;  %v4751_v25 = vld [vmem:[#allocation11 + $0x50] sm:$0xff] }
0x3381   :  { %2406 = vst.msk [vmem:[#allocation11 + $0x60] sm:$0xff] %vm284_vm0, %v2400_v54  ;;  %3958 = vrot.lane.b32.xlu1 %v3953_v28, %s5875_s22  ;;  %v4732_v28 = vmul.f32 %v4730_v24, %v7913_v10  ;;  %v4733_v54 = vadd.f32 %v4731_v32, %v7764_v21  ;;  %v4747_v32 = vld [vmem:[#allocation11 + $0x30] sm:$0xff] }
0x3382   :  { %v2402_v53 = vpop.permute.xlu1 %2401 }
0x3383   :  { %2407 = vst.msk [vmem:[#allocation11 + $0x68] sm:$0xff] %vm284_vm0, %v2402_v53  ;;  %3956 = vrot.lane.b32.xlu0 %v3952_v33, %s5875_s22  ;;  %v4734_v30 = vadd.f32 %v4732_v28, %v7767_v34 }
0x3384   :  { %v2423_v14 = vpop.permute.xlu0 %2422 }
0x3385   :  { %2429 = vst.msk [vmem:[#allocation3 + $0x90] sm:$0xff] %vm284_vm0, %v2423_v14  ;;  %4190 = vrot.lane.b32.xlu1 %v4185_v23, %s5873_s3 }
0x3386   :  { %v2425_v11 = vpop.permute.xlu1 %2424 }
0x3387   :  { %2430 = vst.msk [vmem:[#allocation3 + $0x98] sm:$0xff] %vm284_vm0, %v2425_v11  ;;  %4188 = vrot.lane.b32.xlu0 %v4184_v31, %s5873_s3 }
0x3388   :  { %v2659_v46 = vpop.permute.xlu0 %2658  ;;  %v4753_v11 = vld [vmem:[#allocation11 + $0x60] sm:$0xff] }
0x3389   :  { %2665 = vst.msk [vmem:[#allocation11 + $0x70] sm:$0xff] %vm284_vm0, %v2659_v46  ;;  %4213 = vrot.lane.b32.xlu1 %v4208_v58, %s5875_s22  ;;  %v4794_v46 = vld [vmem:[#allocation3 + $0xa8] sm:$0xff] }
0x338a   :  { %v2661_v35 = vpop.permute.xlu1 %2660  ;;  %v4754_v10 = vld [vmem:[#allocation11 + $0x68] sm:$0xff] }
0x338b   :  { %2666 = vst.msk [vmem:[#allocation11 + $0x78] sm:$0xff] %vm284_vm0, %v2661_v35  ;;  %4211 = vrot.lane.b32.xlu0 %v4207_v12, %s5875_s22  ;;  %v4793_v35 = vld [vmem:[#allocation3 + $0xa0] sm:$0xff] }
0x338c   :  { %v2682_v16 = vpop.permute.xlu0 %2681  ;;  %v4791_v0 = vld [vmem:[#allocation3 + $0x90] sm:$0xff] }
0x338d   :  { %2688 = vst.msk [vmem:[#allocation3 + $0x80] sm:$0xff] %vm284_vm0, %v2682_v16  ;;  %4445 = vrot.lane.b32.xlu1 %v4440_v3, %s5873_s3 }
0x338e   :  { %v2684_v50 = vpop.permute.xlu1 %2683  ;;  %v4792_v40 = vld [vmem:[#allocation3 + $0x98] sm:$0xff] }
0x338f   :  { %2689 = vst.msk [vmem:[#allocation3 + $0x88] sm:$0xff] %vm284_vm0, %v2684_v50  ;;  %4443 = vrot.lane.b32.xlu0 %v4439_v22, %s5873_s3  ;;  %v4752_v22 = vld [vmem:[#allocation11 + $0x58] sm:$0xff] }
0x3390   :  { %v2914_v36 = vpop.permute.xlu0 %2913  ;;  %v4755_v49 = vld [vmem:[#allocation11 + $0x70] sm:$0xff] }
0x3391   :  { %2920 = vst.msk [vmem:[#allocation11 + $0x80] sm:$0xff] %vm284_vm0, %v2914_v36  ;;  %4468 = vrot.lane.b32.xlu1 %v8431_v48, %s5875_s22 }
0x3392   :  { %v2916_v19 = vpop.permute.xlu1 %2915  ;;  %v4756_v15 = vld [vmem:[#allocation11 + $0x78] sm:$0xff] }
0x3393   :  { %2921 = vst.msk [vmem:[#allocation11 + $0x88] sm:$0xff] %vm284_vm0, %v2916_v19  ;;  %4466 = vrot.lane.b32.xlu0 %v8432_v1, %s5875_s22  ;;  %v4796_v1 = vld [vmem:[#allocation3 + $0xb8] sm:$0xff] }
0x3394   :  { %v2937_v39 = vpop.permute.xlu0 %2936  ;;  %v4789_v43 = vld [vmem:[#allocation3 + $0x80] sm:$0xff] }
0x3395   :  { %2943 = vst.msk [vmem:[#allocation3 + $0x70] sm:$0xff] %vm284_vm0, %v2937_v39  ;;  %4700 = vrot.lane.b32.xlu1 %v4695_v29, %s5873_s3 }
0x3396   :  { %v2939_v27 = vpop.permute.xlu1 %2938  ;;  %v4790_v42 = vld [vmem:[#allocation3 + $0x88] sm:$0xff] }
0x3397   :  { %2944 = vst.msk [vmem:[#allocation3 + $0x78] sm:$0xff] %vm284_vm0, %v2939_v27  ;;  %4698 = vrot.lane.b32.xlu0 %v4694_v38, %s5873_s3 }
0x3398   :  { %v4757_v62 = vld [vmem:[#allocation11 + $0x80] sm:$0xff]  ;;  %v3169_v60 = vpop.permute.xlu0 %3168 }
0x3399   :  { %v4821_v44 = vadd.f32 %v4789_v43, %v4757_v62  ;;  %3175 = vst.msk [vmem:[#allocation11 + $0x90] sm:$0xff] %vm284_vm0, %v3169_v60  ;;  %4723 = vrot.lane.b32.xlu1 %v4718_v20, %s5875_s22  ;;  %v4795_v20 = vld [vmem:[#allocation3 + $0xb0] sm:$0xff] }
0x339a   :  { %v4758_v2 = vld [vmem:[#allocation11 + $0x88] sm:$0xff]  ;;  %v3171_v26 = vpop.permute.xlu1 %3170 }
0x339b   :  { %4853 = vst.msk [vmem:[#allocation11 + $0x80] sm:$0xff] %vm284_vm0, %v4821_v44  ;;  %v4822_v5 = vadd.f32 %v4790_v42, %v4758_v2  ;;  %3176 = vst.msk [vmem:[#allocation11 + $0x98] sm:$0xff] %vm284_vm0, %v3171_v26  ;;  %4721 = vrot.lane.b32.xlu0 %v4717_v7, %s5875_s22  ;;  %v4750_v7 = vld [vmem:[#allocation11 + $0x48] sm:$0xff]  ;;  %v4749_v26 = vld [vmem:[#allocation11 + $0x40] sm:$0xff] }
0x339c   :  { %v4787_v13 = vld [vmem:[#allocation3 + $0x70] sm:$0xff] }
0x339d   :  { %4854 = vst.msk [vmem:[#allocation11 + $0x88] sm:$0xff] %vm284_vm0, %v4822_v5  ;;  %v4819_v41 = vadd.f32 %v4787_v13, %v4755_v49 }
0x339e   :  { %v4788_v45 = vld [vmem:[#allocation3 + $0x78] sm:$0xff] }
0x339f   :  { %4851 = vst.msk [vmem:[#allocation11 + $0x70] sm:$0xff] %vm284_vm0, %v4819_v41  ;;  %v4820_v52 = vadd.f32 %v4788_v45, %v4756_v15  ;;  %v4798_v41 = vld [vmem:[#allocation3 + $0xc8] sm:$0xff] }
0x33a0   :  { %v4759_v37 = vld [vmem:[#allocation11 + $0x90] sm:$0xff] }
0x33a1   :  { %4852 = vst.msk [vmem:[#allocation11 + $0x78] sm:$0xff] %vm284_vm0, %v4820_v52  ;;  %v4823_v47 = vadd.f32 %v4791_v0, %v4759_v37  ;;  %v4797_v0 = vld [vmem:[#allocation3 + $0xc0] sm:$0xff] }
0x33a2   :  { %v4760_v51 = vld [vmem:[#allocation11 + $0x98] sm:$0xff] }
0x33a3   :  { %4855 = vst.msk [vmem:[#allocation11 + $0x90] sm:$0xff] %vm284_vm0, %v4823_v47  ;;  %v4824_v4 = vadd.f32 %v4792_v40, %v4760_v51  ;;  %v4748_v51 = vld [vmem:[#allocation11 + $0x38] sm:$0xff] }
0x33a5   :  { %4856 = vst.msk [vmem:[#allocation11 + $0x98] sm:$0xff] %vm284_vm0, %v4824_v4 }
0x33d7   :  { %v4872_v33 = vpop.permute.xlu1 %4871 }
0x33d8   :  { %v4877_v53 = vadd.f32 %v4872_v33, %v4733_v54 }
0x33d9   :  { %v4874_v8 = vpop.permute.xlu0 %4873 }
0x33da   :  { %v4878_v23 = vadd.f32 %v4874_v8, %v4734_v30  ;;  %4881 = vrot.lane.b32.xlu0 %v4877_v53, %s5873_s3  ;;  %v4800_v53 = vld [vmem:[#allocation3 + $0xd8] sm:$0xff] }
0x33db   :  { %v3194_v14 = vpop.permute.xlu1 %3193 }
0x33dc   :  { %3199 = vst.msk [vmem:[#allocation3 + $0x68] sm:$0xff] %vm284_vm0, %v3194_v14  ;;  %4883 = vrot.lane.b32.xlu1 %v4878_v23, %s5873_s3  ;;  %v4799_v14 = vld [vmem:[#allocation3 + $0xd0] sm:$0xff] }
0x33dd   :  { %v3192_v57 = vpop.permute.xlu0 %3191 }
0x33de   :  { %3198 = vst.msk [vmem:[#allocation3 + $0x60] sm:$0xff] %vm284_vm0, %v3192_v57 }
0x33df   :  { %v3426_v17 = vpop.permute.xlu1 %3425 }
0x33e0   :  { %3431 = vst.msk [vmem:[#allocation11 + $0xa8] sm:$0xff] %vm284_vm0, %v3426_v17 }
0x33e1   :  { %v3424_v21 = vpop.permute.xlu0 %3423 }
0x33e2   :  { %3430 = vst.msk [vmem:[#allocation11 + $0xa0] sm:$0xff] %vm284_vm0, %v3424_v21 }
0x33e3   :  { %v4786_v34 = vld [vmem:[#allocation3 + $0x68] sm:$0xff]  ;;  %v3449_v9 = vpop.permute.xlu1 %3448 }
0x33e4   :  { %v4818_v31 = vadd.f32 %v4786_v34, %v4754_v10  ;;  %3454 = vst.msk [vmem:[#allocation3 + $0x58] sm:$0xff] %vm284_vm0, %v3449_v9  ;;  %v4746_v10 = vld [vmem:[#allocation11 + $0x28] sm:$0xff] }
0x33e5   :  { %v4785_v56 = vld [vmem:[#allocation3 + $0x60] sm:$0xff]  ;;  %v3447_v55 = vpop.permute.xlu0 %3446 }
0x33e6   :  { %4850 = vst.msk [vmem:[#allocation11 + $0x68] sm:$0xff] %vm284_vm0, %v4818_v31  ;;  %v4817_v58 = vadd.f32 %v4785_v56, %v4753_v11  ;;  %3453 = vst.msk [vmem:[#allocation3 + $0x50] sm:$0xff] %vm284_vm0, %v3447_v55  ;;  %v4745_v11 = vld [vmem:[#allocation11 + $0x20] sm:$0xff] }
0x33e7   :  { %v4762_v61 = vld [vmem:[#allocation11 + $0xa8] sm:$0xff]  ;;  %v3681_v18 = vpop.permute.xlu1 %3680 }
0x33e8   :  { %4849 = vst.msk [vmem:[#allocation11 + $0x60] sm:$0xff] %vm284_vm0, %v4817_v58  ;;  %v4826_v12 = vadd.f32 %v4794_v46, %v4762_v61  ;;  %3686 = vst.msk [vmem:[#allocation11 + $0xb8] sm:$0xff] %vm284_vm0, %v3681_v18  ;;  %v4802_v46 = vld [vmem:[#allocation3 + $0xe8] sm:$0xff] }
0x33e9   :  { %v4761_v3 = vld [vmem:[#allocation11 + $0xa0] sm:$0xff]  ;;  %v3679_v16 = vpop.permute.xlu0 %3678 }
0x33ea   :  { %4858 = vst.msk [vmem:[#allocation11 + $0xa8] sm:$0xff] %vm284_vm0, %v4826_v12  ;;  %v4825_v63 = vadd.f32 %v4793_v35, %v4761_v3  ;;  %3685 = vst.msk [vmem:[#allocation11 + $0xb0] sm:$0xff] %vm284_vm0, %v3679_v16  ;;  %v4801_v35 = vld [vmem:[#allocation3 + $0xe0] sm:$0xff] }
0x33eb   :  { %v4784_v50 = vld [vmem:[#allocation3 + $0x58] sm:$0xff]  ;;  %v3704_v6 = vpop.permute.xlu1 %3703 }
0x33ec   :  { %4857 = vst.msk [vmem:[#allocation11 + $0xa0] sm:$0xff] %vm284_vm0, %v4825_v63  ;;  %v4816_v36 = vadd.f32 %v4784_v50, %v4752_v22  ;;  %3709 = vst.msk [vmem:[#allocation3 + $0x48] sm:$0xff] %vm284_vm0, %v3704_v6  ;;  %v4744_v22 = vld [vmem:[#allocation11 + $0x18] sm:$0xff] }
0x33ed   :  { %v4783_v48 = vld [vmem:[#allocation3 + $0x50] sm:$0xff]  ;;  %v3702_v19 = vpop.permute.xlu0 %3701 }
0x33ee   :  { %4848 = vst.msk [vmem:[#allocation11 + $0x58] sm:$0xff] %vm284_vm0, %v4816_v36  ;;  %v4815_v29 = vadd.f32 %v4783_v48, %v4751_v25  ;;  %3708 = vst.msk [vmem:[#allocation3 + $0x40] sm:$0xff] %vm284_vm0, %v3702_v19  ;;  %v4743_v25 = vld [vmem:[#allocation11 + $0x10] sm:$0xff] }
0x33ef   :  { %v4764_v39 = vld [vmem:[#allocation11 + $0xb8] sm:$0xff]  ;;  %v3936_v38 = vpop.permute.xlu1 %3935 }
0x33f0   :  { %4847 = vst.msk [vmem:[#allocation11 + $0x50] sm:$0xff] %vm284_vm0, %v4815_v29  ;;  %v4828_v27 = vadd.f32 %v4796_v1, %v4764_v39  ;;  %3941 = vst.msk [vmem:[#allocation11 + $0xc8] sm:$0xff] %vm284_vm0, %v3936_v38  ;;  %v4804_v1 = vld [vmem:[#allocation3 + $0xf8] sm:$0xff] }
0x33f1   :  { %v4763_v43 = vld [vmem:[#allocation11 + $0xb0] sm:$0xff]  ;;  %v3934_v62 = vpop.permute.xlu0 %3933 }
0x33f2   :  { %4860 = vst.msk [vmem:[#allocation11 + $0xb8] sm:$0xff] %vm284_vm0, %v4828_v27  ;;  %v4827_v60 = vadd.f32 %v4795_v20, %v4763_v43  ;;  %3940 = vst.msk [vmem:[#allocation11 + $0xc0] sm:$0xff] %vm284_vm0, %v3934_v62  ;;  %v4803_v27 = vld [vmem:[#allocation3 + $0xf0] sm:$0xff]  ;;  %v4742_v62 = vld [vmem:[#allocation11 + $0x8] sm:$0xff] }
0x33f3   :  { %v4782_v44 = vld [vmem:[#allocation3 + $0x48] sm:$0xff]  ;;  %v3959_v42 = vpop.permute.xlu1 %3958 }
0x33f4   :  { %4859 = vst.msk [vmem:[#allocation11 + $0xb0] sm:$0xff] %vm284_vm0, %v4827_v60  ;;  %v4814_v2 = vadd.f32 %v4782_v44, %v4750_v7  ;;  %3964 = vst.msk [vmem:[#allocation3 + $0x38] sm:$0xff] %vm284_vm0, %v3959_v42  ;;  %v4741_v44 = vld [vmem:[#allocation11] sm:$0xff] }
0x33f5   :  { %v4781_v5 = vld [vmem:[#allocation3 + $0x40] sm:$0xff]  ;;  %v3957_v49 = vpop.permute.xlu0 %3956 }
0x33f6   :  { %4846 = vst.msk [vmem:[#allocation11 + $0x48] sm:$0xff] %vm284_vm0, %v4814_v2  ;;  %v4813_v13 = vadd.f32 %v4781_v5, %v4749_v26  ;;  %3963 = vst.msk [vmem:[#allocation3 + $0x30] sm:$0xff] %vm284_vm0, %v3957_v49 }
0x33f7   :  { %v4766_v15 = vld [vmem:[#allocation11 + $0xc8] sm:$0xff]  ;;  %v4191_v45 = vpop.permute.xlu1 %4190 }
0x33f8   :  { %4845 = vst.msk [vmem:[#allocation11 + $0x40] sm:$0xff] %vm284_vm0, %v4813_v13  ;;  %v4830_v52 = vadd.f32 %v4798_v41, %v4766_v15  ;;  %4196 = vst.msk [vmem:[#allocation11 + $0xd8] sm:$0xff] %vm284_vm0, %v4191_v45 }
0x33f9   :  { %v4765_v37 = vld [vmem:[#allocation11 + $0xc0] sm:$0xff]  ;;  %v4189_v47 = vpop.permute.xlu0 %4188 }
0x33fa   :  { %4862 = vst.msk [vmem:[#allocation11 + $0xc8] sm:$0xff] %vm284_vm0, %v4830_v52  ;;  %v4829_v40 = vadd.f32 %v4797_v0, %v4765_v37  ;;  %4195 = vst.msk [vmem:[#allocation11 + $0xd0] sm:$0xff] %vm284_vm0, %v4189_v47 }
0x33fb   :  { %v4780_v4 = vld [vmem:[#allocation3 + $0x38] sm:$0xff]  ;;  %v4214_v59 = vpop.permute.xlu1 %4213 }
0x33fc   :  { %4861 = vst.msk [vmem:[#allocation11 + $0xc0] sm:$0xff] %vm284_vm0, %v4829_v40  ;;  %v4812_v24 = vadd.f32 %v4780_v4, %v4748_v51  ;;  %4219 = vst.msk [vmem:[#allocation3 + $0x28] sm:$0xff] %vm284_vm0, %v4214_v59 }
0x33fd   :  { %v4779_v28 = vld [vmem:[#allocation3 + $0x30] sm:$0xff]  ;;  %v4212_v54 = vpop.permute.xlu0 %4211 }
0x33fe   :  { %4844 = vst.msk [vmem:[#allocation11 + $0x38] sm:$0xff] %vm284_vm0, %v4812_v24  ;;  %v4811_v33 = vadd.f32 %v4779_v28, %v4747_v32  ;;  %4218 = vst.msk [vmem:[#allocation3 + $0x20] sm:$0xff] %vm284_vm0, %v4212_v54 }
0x33ff   :  { %v4768_v30 = vld [vmem:[#allocation11 + $0xd8] sm:$0xff]  ;;  %v4446_v8 = vpop.permute.xlu1 %4445 }
0x3400   :  { %4843 = vst.msk [vmem:[#allocation11 + $0x30] sm:$0xff] %vm284_vm0, %v4811_v33  ;;  %v4832_v23 = vadd.f32 %v4800_v53, %v4768_v30  ;;  %4451 = vst.msk [vmem:[#allocation11 + $0xe8] sm:$0xff] %vm284_vm0, %v4446_v8 }
0x3401   :  { %v4767_v57 = vld [vmem:[#allocation11 + $0xd0] sm:$0xff]  ;;  %v4444_v17 = vpop.permute.xlu0 %4443 }
0x3402   :  { %4864 = vst.msk [vmem:[#allocation11 + $0xd8] sm:$0xff] %vm284_vm0, %v4832_v23  ;;  %v4831_v21 = vadd.f32 %v4799_v14, %v4767_v57  ;;  %4450 = vst.msk [vmem:[#allocation11 + $0xe0] sm:$0xff] %vm284_vm0, %v4444_v17 }
0x3403   :  { %v4778_v34 = vld [vmem:[#allocation3 + $0x28] sm:$0xff]  ;;  %v4469_v9 = vpop.permute.xlu1 %4468 }
0x3404   :  { %4863 = vst.msk [vmem:[#allocation11 + $0xd0] sm:$0xff] %vm284_vm0, %v4831_v21  ;;  %v4810_v31 = vadd.f32 %v4778_v34, %v4746_v10  ;;  %4474 = vst.msk [vmem:[#allocation3 + $0x18] sm:$0xff] %vm284_vm0, %v4469_v9 }
0x3405   :  { %v4777_v56 = vld [vmem:[#allocation3 + $0x20] sm:$0xff]  ;;  %v4467_v55 = vpop.permute.xlu0 %4466 }
0x3406   :  { %4842 = vst.msk [vmem:[#allocation11 + $0x28] sm:$0xff] %vm284_vm0, %v4810_v31  ;;  %v4809_v58 = vadd.f32 %v4777_v56, %v4745_v11  ;;  %4473 = vst.msk [vmem:[#allocation3 + $0x10] sm:$0xff] %vm284_vm0, %v4467_v55 }
0x3407   :  { %v4770_v61 = vld [vmem:[#allocation11 + $0xe8] sm:$0xff]  ;;  %v4701_v18 = vpop.permute.xlu1 %4700 }
0x3408   :  { %4841 = vst.msk [vmem:[#allocation11 + $0x20] sm:$0xff] %vm284_vm0, %v4809_v58  ;;  %v4834_v12 = vadd.f32 %v4802_v46, %v4770_v61  ;;  %4706 = vst.msk [vmem:[#allocation11 + $0xf8] sm:$0xff] %vm284_vm0, %v4701_v18 }
0x3409   :  { %v4769_v3 = vld [vmem:[#allocation11 + $0xe0] sm:$0xff]  ;;  %v4699_v16 = vpop.permute.xlu0 %4698 }
0x340a   :  { %4866 = vst.msk [vmem:[#allocation11 + $0xe8] sm:$0xff] %vm284_vm0, %v4834_v12  ;;  %v4833_v63 = vadd.f32 %v4801_v35, %v4769_v3  ;;  %4705 = vst.msk [vmem:[#allocation11 + $0xf0] sm:$0xff] %vm284_vm0, %v4699_v16 }
0x340b   :  { %v4776_v50 = vld [vmem:[#allocation3 + $0x18] sm:$0xff]  ;;  %v4724_v6 = vpop.permute.xlu1 %4723 }
0x340c   :  { %4865 = vst.msk [vmem:[#allocation11 + $0xe0] sm:$0xff] %vm284_vm0, %v4833_v63  ;;  %v4808_v36 = vadd.f32 %v4776_v50, %v4744_v22  ;;  %4728 = vst.msk [vmem:[#allocation3 + $0x8] sm:$0xff] %vm284_vm0, %v4724_v6 }
0x340d   :  { %v4775_v48 = vld [vmem:[#allocation3 + $0x10] sm:$0xff]  ;;  %v4722_v19 = vpop.permute.xlu0 %4721 }
0x340e   :  { %4840 = vst.msk [vmem:[#allocation11 + $0x18] sm:$0xff] %vm284_vm0, %v4808_v36  ;;  %v4807_v29 = vadd.f32 %v4775_v48, %v4743_v25  ;;  %4727 = vst.msk [vmem:[#allocation3] sm:$0xff] %vm284_vm0, %v4722_v19 }
0x340f   :  { %v4772_v39 = vld [vmem:[#allocation11 + $0xf8] sm:$0xff] }
0x3410   :  { %4839 = vst.msk [vmem:[#allocation11 + $0x10] sm:$0xff] %vm284_vm0, %v4807_v29  ;;  %v4836_v38 = vadd.f32 %v4804_v1, %v4772_v39 }
0x3411   :  { %v4771_v20 = vld [vmem:[#allocation11 + $0xf0] sm:$0xff] }
0x3412   :  { %4868 = vst.msk [vmem:[#allocation11 + $0xf8] sm:$0xff] %vm284_vm0, %v4836_v38  ;;  %v4835_v43 = vadd.f32 %v4803_v27, %v4771_v20 }
0x3413   :  { %v4774_v60 = vld [vmem:[#allocation3 + $0x8] sm:$0xff] }
0x3414   :  { %4867 = vst.msk [vmem:[#allocation11 + $0xf0] sm:$0xff] %vm284_vm0, %v4835_v43  ;;  %v4806_v7 = vadd.f32 %v4774_v60, %v4742_v62 }
0x3415   :  { %v4773_v42 = vld [vmem:[#allocation3] sm:$0xff] }
0x3416   :  { %4838 = vst.msk [vmem:[#allocation11 + $0x8] sm:$0xff] %vm284_vm0, %v4806_v7  ;;  %v4805_v2 = vadd.f32 %v4773_v42, %v4741_v44 }
0x3418   :  { %4837 = vst.msk [vmem:[#allocation11] sm:$0xff] %vm284_vm0, %v4805_v2 }
0x3419   :  { %5825 = shalt.err (!%p5822_p0)
}
0x341a   :  { %s5826_s15 = scalar_lea.hbm %s8199_s6, 4096 }
0x341b   :  { %p5827_p1 = scmp.ne.s32.totalorder %s8199_s6, %s5826_s15  ;;  %p5830_p2 = scmp.lt.u32.totalorder %s5826_s15, %s8199_s6 }
0x341d   :  { %p5832_p3 = pnand %p5830_p2, %p5827_p1 }
0x341f   :  { %5835 = shalt.err (!%p5832_p3)
}
0x3420   :  { %4900 = dma.vmem_to_hbm [thread:$0]  %s4895_s9, 4096, %s8199_s6, [#allocation7], %s5868_s13, %s5868_s13, %s5869_s14  }
0x3421   :  { %s5878_s3 = smov [#allocation12]  }
0x3422   :  { %s4906_s5 = sshll.u32 %s5878_s3, 4  ;;  %s4907_s5 = int_to_ptr.vmem [resolvable:$true] %s4906_s5 }
0x3423   :  { %s5836_s19 = scalar_lea.vmem %s4907_s5, 256  ;;  %p5841_p5 = scmp.lt.s32.totalorder %s4907_s5, %s4907_s5 }
0x3424   :  { %p5837_p4 = scmp.ne.s32.totalorder %s4907_s5, %s5836_s19  ;;  %p5842_p6 = scmp.lt.s32.totalorder %s5836_s19, %s5836_s19 }
0x3426   :  { %p5843_p7 = por %p5842_p6, %p5841_p5 }
0x3428   :  { %p5844_p8 = pnand %p5843_p7, %p5837_p4 }
0x344c   :  { %v4882_v26 = vpop.permute.xlu0 %4881 }
0x344d   :  { %4887 = vst.msk [vmem:[#allocation12] sm:$0xff] %vm284_vm0, %v4882_v26 }
0x344e   :  { %v4884_v5 = vpop.permute.xlu1 %4883 }
0x344f   :  { %4888 = vst.msk [vmem:[#allocation12 + $0x8] sm:$0xff] %vm284_vm0, %v4884_v5 }
0x3450   :  { %5847 = shalt.err (!%p5844_p8)
}
0x3451   :  { %s5848_s6 = scalar_lea.hbm %s8200_s7, 256 }
0x3452   :  { %p5849_p9 = scmp.ne.s32.totalorder %s8200_s7, %s5848_s6  ;;  %p5852_p10 = scmp.lt.u32.totalorder %s5848_s6, %s8200_s7 }
0x3454   :  { %p5854_p11 = pnand %p5852_p10, %p5849_p9 }
0x3456   :  { %5857 = shalt.err (!%p5854_p11)
}
0x3457   :  { %4912 = dma.vmem_to_hbm [thread:$0]  %s4907_s5, 256, %s8200_s7, [#allocation13], %s5868_s13, %s5868_s13, %s5869_s14  }
0x3458   :  { %5862 = dma.done.wait [#allocation7], 4096  }
0x3459   :  { %5863 = vsyncadd [#allocation7], 4294963200 }
0x345a   :  { %5864 = dma.done.wait [#allocation13], 256  }
0x345b   :  { %5865 = vsyncadd [#allocation13], 4294967040 }
0x345c   :  { %4919 = vsyncpa [#allocation6], 1 }
0x345d   :  { %4920 = vsyncpa [#allocation9], 1 }
0x345e   :  { %4921 = vsyncpa [#allocation7], 1 }
0x345f   :  { %4922 = vsyncpa [#allocation13], 1 }

</bundles_post_ra>
